<compile_context>
chip_gen: v5e
topology: v5e:2x2
jax: 0.10.0
libtpu: 0.0.40
codegen_flags: <defaults>
</compile_context>

<pallas_src>
import jax
import jax.numpy as jnp
from jax import lax
from jax.experimental import pallas as pl
from jax.experimental.pallas import tpu as pltpu


def resblock_sqex_kernel(x_ref, w1_ref, w2_ref, wl1_ref, bl1_ref, wl2_ref, bl2_ref,
                         out_ref, pad_ref, patch_ref):
    # x_ref:   (Bt, H, W, C) f32
    # w1_ref, w2_ref: (9*C, C) bf16, row index = (ky*3+kx)*C + ci  (im2col order)
    # wl1_ref: (C, Cr) f32   bl1_ref: (1, Cr) f32
    # wl2_ref: (Cr, C) f32   bl2_ref: (1, C) f32
    # pad_ref   (scratch): (Bt, H+2, W+2, C) bf16
    # patch_ref (scratch): (Bt*H*W, 9*C)     bf16
    Bt, H, W, C = x_ref.shape
    M = Bt * H * W
    cdt = pad_ref.dtype  # bf16

    # --- zero only the 1-pixel halo ring (interior is fully overwritten below).
    # Re-done every grid step so "parallel" batch sharding across cores is safe.
    zrow = jnp.zeros((Bt, 1, W + 2, C), cdt)
    pad_ref[:, 0:1, :, :] = zrow
    pad_ref[:, H + 1:H + 2, :, :] = zrow
    zcol = jnp.zeros((Bt, H, 1, C), cdt)            # rows 0 / H+1 already zeroed
    pad_ref[:, 1:H + 1, 0:1, :] = zcol
    pad_ref[:, 1:H + 1, W + 1:W + 2, :] = zcol

    def conv3x3_im2col(inp_f32, w_ref):
        # ReLU (f32) fused into the pad-interior store; cast to bf16 on store.
        pad_ref[:, 1:H + 1, 1:W + 1, :] = jnp.maximum(inp_f32, 0.0).astype(cdt)
        # Build the im2col patch matrix.  dx (the sublane shift) is hoisted to
        # the outer loop: one sublane-offset slab load per dx, then the three
        # dy taps are plain address offsets into that slab.
        for dx in range(3):
            slab = pad_ref[:, :, dx:dx + W, :]            # (Bt, H+2, W, C) bf16
            for dy in range(3):
                k = dy * 3 + dx
                patch_ref[:, k * C:(k + 1) * C] = (
                    slab[:, dy:dy + H, :, :].reshape(M, C))
        # One native-bf16 MXU matmul with K = 9*C, f32 accumulation.
        return jnp.dot(patch_ref[...], w_ref[...],
                       preferred_element_type=jnp.float32)        # (M, C) f32

    x = x_ref[...]                                                # (Bt, H, W, C) f32
    y1 = conv3x3_im2col(x, w1_ref)                                # conv1(relu(x))
    y2 = conv3x3_im2col(y1.reshape(Bt, H, W, C), w2_ref)          # conv2(relu(y1))

    # --- squeeze-excitation (kept in f32): avgpool -> linear -> relu -> linear -> sigmoid
    y2b = y2.reshape(Bt, H * W, C)
    pool = jnp.mean(y2b, axis=1)                                  # (Bt, C)
    s = jnp.dot(pool, wl1_ref[...], preferred_element_type=jnp.float32) + bl1_ref[...]
    s = jnp.maximum(s, 0.0)                                       # (Bt, Cr)
    g = jnp.dot(s, wl2_ref[...], preferred_element_type=jnp.float32) + bl2_ref[...]
    g = jax.nn.sigmoid(g)                                         # (Bt, C)

    # gate + residual add
    out_ref[...] = x + (y2b * g.reshape(Bt, 1, C)).reshape(Bt, H, W, C)


def _vmem_bytes(Bt, H, W, C, Cr):
    """Per-step VMEM footprint estimate (bytes)."""
    f32, bf16 = 4, 2
    io = 2 * (Bt * H * W * C * f32) * 2                       # x + out, double-buffered
    conv_w = 2 * (9 * C * C) * bf16                            # w1 + w2, single-buffered
    se_w = (C * Cr + Cr + Cr * C + C) * f32                    # SE weights, single-buffered
    pad = Bt * (H + 2) * (W + 2) * C * bf16                    # scratch
    patch = Bt * H * W * 9 * C * bf16                          # scratch
    return io + conv_w + se_w + pad + patch


def _pick_block_n(N, H, W, C, Cr, budget=40 * 1024 * 1024):
    """Largest Bt that fits the VMEM budget while keeping >=4 grid steps when
    possible (>=2 steps per TensorCore on v7x -> pipeline actually overlaps)."""
    divs = [d for d in range(1, N + 1) if N % d == 0]
    fit = [d for d in divs if _vmem_bytes(d, H, W, C, Cr) <= budget]
    if not fit:
        return 1
    piped = [d for d in fit if N // d >= 4]
    return max(piped) if piped else max(fit)


def resblock_sqex_nhwc(x_nhwc, params, block_n=None, single_buffer_weights=True):
    """x_nhwc: (N, H, W, C) float32.  Returns (N, H, W, C). No layout transposes."""
    N, H, W, C = x_nhwc.shape
    Cr = params["wl1"].shape[1]
    if block_n is None:
        block_n = _pick_block_n(N, H, W, C, Cr)
    assert N % block_n == 0, "batch must be divisible by block_n"
    Bt = block_n

    # Explicit, shape-derived scoped-VMEM budget (v5e default is only 16 MiB);
    # capped under v7x's 64 MiB physical so the same number is safe on all gens.
    vmem_limit = int(min(max(2 * _vmem_bytes(Bt, H, W, C, Cr), 16 << 20), 56 << 20))

    def const_spec(shape):
        idx = lambda n: (0, 0)
        if single_buffer_weights:
            # Constant-index blocks: fetch once, keep one buffer.
            return pl.BlockSpec(shape, idx, pipeline_mode=pl.Buffered(1))
        return pl.BlockSpec(shape, idx)

    return pl.pallas_call(
        resblock_sqex_kernel,
        out_shape=jax.ShapeDtypeStruct((N, H, W, C), jnp.float32),
        grid_spec=pltpu.PrefetchScalarGridSpec(
            num_scalar_prefetch=0,
            grid=(N // Bt,),
            in_specs=[
                pl.BlockSpec((Bt, H, W, C), lambda n: (n, 0, 0, 0)),
                const_spec((9 * C, C)),          # w1 (bf16)
                const_spec((9 * C, C)),          # w2 (bf16)
                const_spec((C, Cr)),             # wl1
                const_spec((1, Cr)),             # bl1
                const_spec((Cr, C)),             # wl2
                const_spec((1, C)),              # bl2
            ],
            out_specs=pl.BlockSpec((Bt, H, W, C), lambda n: (n, 0, 0, 0)),
            scratch_shapes=[
                pltpu.VMEM((Bt, H + 2, W + 2, C), jnp.bfloat16),  # padded activations
                pltpu.VMEM((Bt * H * W, 9 * C), jnp.bfloat16),    # im2col patch matrix
            ],
        ),
        compiler_params=pltpu.CompilerParams(
            # Batch blocks are fully independent -> shard across TensorCores (v7x).
            dimension_semantics=("parallel",),
            vmem_limit_bytes=vmem_limit,
        ),
    )(x_nhwc, params["w1"], params["w2"],
      params["wl1"], params["bl1"], params["wl2"], params["bl2"])


def resblock_sqex(x_nchw, params, block_n=None):
    """PyTorch-layout (NCHW) convenience wrapper. Prefer the NHWC entry point."""
    x_nhwc = jnp.transpose(x_nchw, (0, 2, 3, 1))
    out = resblock_sqex_nhwc(x_nhwc, params, block_n)
    return jnp.transpose(out, (0, 3, 1, 2))


def reference_nhwc(x, params):
    """Pure-JAX NHWC reference of the PyTorch forward, mirroring the kernel's
    bf16 operand / f32 accumulation quantization so tolerances stay tight."""
    C = x.shape[-1]
    w1 = params["w1"].astype(jnp.bfloat16).reshape(3, 3, C, C)   # HWIO
    w2 = params["w2"].astype(jnp.bfloat16).reshape(3, 3, C, C)

    def conv(inp, w):
        return lax.conv_general_dilated(
            jax.nn.relu(inp).astype(jnp.bfloat16), w,
            window_strides=(1, 1), padding="SAME",
            dimension_numbers=("NHWC", "HWIO", "NHWC"),
            preferred_element_type=jnp.float32)

    y = conv(x, w1)
    y = conv(y, w2)
    pool = jnp.mean(y, axis=(1, 2), keepdims=True)               # (N,1,1,C)
    s = jax.nn.relu(pool @ params["wl1"] + params["bl1"])        # (N,1,1,Cr)
    g = jax.nn.sigmoid(s @ params["wl2"] + params["bl2"])        # (N,1,1,C)
    return x + y * g


def init_params(key, C, reduction=16):
    assert C % reduction == 0
    Cr = C // reduction
    k1, k2, k3, k4, k5, k6 = jax.random.split(key, 6)
    return {
        # conv weights pre-flattened for im2col: (9*Cin, Cout) bf16,
        # row index = (ky*3+kx)*Cin + ci  [= torch (Cout,Cin,3,3) -> HWIO -> flatten]
        "w1": (0.1 * jax.random.normal(k1, (9 * C, C), jnp.float32)).astype(jnp.bfloat16),
        "w2": (0.1 * jax.random.normal(k2, (9 * C, C), jnp.float32)).astype(jnp.bfloat16),
        # SE linear weights already transposed: y = x @ W + b  (kept in f32)
        "wl1": 0.1 * jax.random.normal(k3, (C, Cr), jnp.float32),
        "bl1": 0.1 * jax.random.normal(k4, (1, Cr), jnp.float32),
        "wl2": 0.1 * jax.random.normal(k5, (Cr, C), jnp.float32),
        "bl2": 0.1 * jax.random.normal(k6, (1, C), jnp.float32),
    }


if __name__ == "__main__":
    # n_features must be divisible by 16 (SqEx reduction); use C=128 so the
    # kernel's lane dimension is dense.  Small spatial / batch.
    N, H, W, C = 4, 8, 8, 128
    key = jax.random.PRNGKey(0)
    kx, kp = jax.random.split(key)
    x = jax.random.normal(kx, (N, H, W, C), jnp.float32)   # NHWC end-to-end
    params = init_params(kp, C)

    try:
        out = jax.block_until_ready(resblock_sqex_nhwc(x, params))
    except Exception:
        # Graceful fallback if pl.Buffered(1) single-buffering is unavailable
        # in this JAX build; everything else is unchanged.
        out = jax.block_until_ready(
            resblock_sqex_nhwc(x, params, single_buffer_weights=False))
    ref = jax.block_until_ready(reference_nhwc(x, params))

    assert out.shape == x.shape and out.dtype == jnp.float32
    # bf16 operands / f32 accumulation in both kernel and reference; tolerance
    # covers accumulation-order and bf16 rounding-boundary differences.
    err = jnp.max(jnp.abs(out - ref))
    assert jnp.allclose(out, ref, atol=2e-2, rtol=2e-2), f"max abs err {err}"
    print("KERNEL_OK")
</pallas_src>

<mosaic_0001>
module attributes {stable_mosaic.version = 11 : i64} {
  func.func @resblock_sqex_kernel(%arg0: i32, %arg1: memref<1x8x8x128xf32, #tpu.memory_space<vmem>>, %arg2: memref<1152x128xbf16, #tpu.memory_space<vmem>>, %arg3: memref<1152x128xbf16, #tpu.memory_space<vmem>>, %arg4: memref<128x8xf32, #tpu.memory_space<vmem>>, %arg5: memref<1x8xf32, #tpu.memory_space<vmem>>, %arg6: memref<8x128xf32, #tpu.memory_space<vmem>>, %arg7: memref<1x128xf32, #tpu.memory_space<vmem>>, %arg8: memref<1x8x8x128xf32, #tpu.memory_space<vmem>>, %arg9: memref<1x10x10x128xbf16, #tpu.memory_space<vmem>>, %arg10: memref<64x1152xbf16, #tpu.memory_space<vmem>>) attributes {dimension_semantics = [#tpu.dimension_semantics<parallel>], iteration_bounds = array<i64: 4>, scalar_prefetch = 0 : i64, scratch_operands = 2 : i64, tpu.core_type = #tpu.core_type<tc>, window_params = [{transform_indices = @transform_0, window_bounds = array<i64: 1, 8, 8, 128>}, {pipeline_mode = #tpu.pipeline_mode<synchronous>, transform_indices = @transform_1, window_bounds = array<i64: 1152, 128>}, {pipeline_mode = #tpu.pipeline_mode<synchronous>, transform_indices = @transform_2, window_bounds = array<i64: 1152, 128>}, {pipeline_mode = #tpu.pipeline_mode<synchronous>, transform_indices = @transform_3, window_bounds = array<i64: 128, 8>}, {pipeline_mode = #tpu.pipeline_mode<synchronous>, transform_indices = @transform_4, window_bounds = array<i64: 1, 8>}, {pipeline_mode = #tpu.pipeline_mode<synchronous>, transform_indices = @transform_5, window_bounds = array<i64: 8, 128>}, {pipeline_mode = #tpu.pipeline_mode<synchronous>, transform_indices = @transform_6, window_bounds = array<i64: 1, 128>}, {transform_indices = @transform_7, window_bounds = array<i64: 1, 8, 8, 128>}]} {
    %cst = arith.constant 0.000000e+00 : bf16
    %0 = vector.broadcast %cst : bf16 to vector<1x1x10x128xbf16>
    %c0 = arith.constant 0 : index
    %c0_0 = arith.constant 0 : index
    %c0_1 = arith.constant 0 : index
    %c0_2 = arith.constant 0 : index
    %1 = vector.load %arg9[%c0, %c0_0, %c0_1, %c0_2] : memref<1x10x10x128xbf16, #tpu.memory_space<vmem>>, vector<1x1x10x128xbf16>
    tpu.vector_store %arg9[%c0, %c0_0, %c0_1, %c0_2], %0 {strides = array<i32>} : memref<1x10x10x128xbf16, #tpu.memory_space<vmem>>, vector<1x1x10x128xbf16>,
    %c0_3 = arith.constant 0 : index
    %c9 = arith.constant 9 : index
    %c0_4 = arith.constant 0 : index
    %c0_5 = arith.constant 0 : index
    %2 = vector.load %arg9[%c0_3, %c9, %c0_4, %c0_5] : memref<1x10x10x128xbf16, #tpu.memory_space<vmem>>, vector<1x1x10x128xbf16>
    tpu.vector_store %arg9[%c0_3, %c9, %c0_4, %c0_5], %0 {strides = array<i32>} : memref<1x10x10x128xbf16, #tpu.memory_space<vmem>>, vector<1x1x10x128xbf16>,
    %cst_6 = arith.constant 0.000000e+00 : bf16
    %3 = vector.broadcast %cst_6 : bf16 to vector<1x8x1x128xbf16>
    %c0_7 = arith.constant 0 : index
    %c1 = arith.constant 1 : index
    %c0_8 = arith.constant 0 : index
    %c0_9 = arith.constant 0 : index
    %4 = vector.load %arg9[%c0_7, %c1, %c0_8, %c0_9] : memref<1x10x10x128xbf16, #tpu.memory_space<vmem>>, vector<1x8x1x128xbf16>
    tpu.vector_store %arg9[%c0_7, %c1, %c0_8, %c0_9], %3 {strides = array<i32>} : memref<1x10x10x128xbf16, #tpu.memory_space<vmem>>, vector<1x8x1x128xbf16>,
    %c0_10 = arith.constant 0 : index
    %c1_11 = arith.constant 1 : index
    %c9_12 = arith.constant 9 : index
    %c0_13 = arith.constant 0 : index
    %5 = vector.load %arg9[%c0_10, %c1_11, %c9_12, %c0_13] : memref<1x10x10x128xbf16, #tpu.memory_space<vmem>>, vector<1x8x1x128xbf16>
    tpu.vector_store %arg9[%c0_10, %c1_11, %c9_12, %c0_13], %3 {strides = array<i32>} : memref<1x10x10x128xbf16, #tpu.memory_space<vmem>>, vector<1x8x1x128xbf16>,
    %c0_14 = arith.constant 0 : index
    %c0_15 = arith.constant 0 : index
    %c0_16 = arith.constant 0 : index
    %c0_17 = arith.constant 0 : index
    %6 = vector.load %arg1[%c0_14, %c0_15, %c0_16, %c0_17] : memref<1x8x8x128xf32, #tpu.memory_space<vmem>>, vector<1x8x8x128xf32>
    %cst_18 = arith.constant 0.000000e+00 : f32
    %7 = vector.broadcast %cst_18 : f32 to vector<1x8x8x128xf32>
    %8 = arith.maximumf %6, %7 : vector<1x8x8x128xf32>
    %9 = arith.truncf %8 : vector<1x8x8x128xf32> to vector<1x8x8x128xbf16>
    %c0_19 = arith.constant 0 : index
    %c1_20 = arith.constant 1 : index
    %c1_21 = arith.constant 1 : index
    %c0_22 = arith.constant 0 : index
    %10 = vector.load %arg9[%c0_19, %c1_20, %c1_21, %c0_22] : memref<1x10x10x128xbf16, #tpu.memory_space<vmem>>, vector<1x8x8x128xbf16>
    tpu.vector_store %arg9[%c0_19, %c1_20, %c1_21, %c0_22], %9 {strides = array<i32>} : memref<1x10x10x128xbf16, #tpu.memory_space<vmem>>, vector<1x8x8x128xbf16>,
    %c0_23 = arith.constant 0 : index
    %c0_24 = arith.constant 0 : index
    %c0_25 = arith.constant 0 : index
    %c0_26 = arith.constant 0 : index
    %11 = vector.load %arg9[%c0_23, %c0_24, %c0_25, %c0_26] : memref<1x10x10x128xbf16, #tpu.memory_space<vmem>>, vector<1x10x8x128xbf16>
    %12 = vector.extract_strided_slice %11 {offsets = [0, 0, 0, 0], sizes = [1, 8, 8, 128], strides = [1, 1, 1, 1]} : vector<1x10x8x128xbf16> to vector<1x8x8x128xbf16>
    %13 = vector.shape_cast %12 : vector<1x8x8x128xbf16> to vector<64x128xbf16>
    %c0_27 = arith.constant 0 : index
    %c0_28 = arith.constant 0 : index
    %14 = vector.load %arg10[%c0_27, %c0_28] : memref<64x1152xbf16, #tpu.memory_space<vmem>>, vector<64x128xbf16>
    tpu.vector_store %arg10[%c0_27, %c0_28], %13 {strides = array<i32>} : memref<64x1152xbf16, #tpu.memory_space<vmem>>, vector<64x128xbf16>,
    %15 = vector.extract_strided_slice %11 {offsets = [0, 1, 0, 0], sizes = [1, 8, 8, 128], strides = [1, 1, 1, 1]} : vector<1x10x8x128xbf16> to vector<1x8x8x128xbf16>
    %16 = vector.shape_cast %15 : vector<1x8x8x128xbf16> to vector<64x128xbf16>
    %c0_29 = arith.constant 0 : index
    %c384 = arith.constant 384 : index
    %17 = vector.load %arg10[%c0_29, %c384] : memref<64x1152xbf16, #tpu.memory_space<vmem>>, vector<64x128xbf16>
    tpu.vector_store %arg10[%c0_29, %c384], %16 {strides = array<i32>} : memref<64x1152xbf16, #tpu.memory_space<vmem>>, vector<64x128xbf16>,
    %18 = vector.extract_strided_slice %11 {offsets = [0, 2, 0, 0], sizes = [1, 8, 8, 128], strides = [1, 1, 1, 1]} : vector<1x10x8x128xbf16> to vector<1x8x8x128xbf16>
    %19 = vector.shape_cast %18 : vector<1x8x8x128xbf16> to vector<64x128xbf16>
    %c0_30 = arith.constant 0 : index
    %c768 = arith.constant 768 : index
    %20 = vector.load %arg10[%c0_30, %c768] : memref<64x1152xbf16, #tpu.memory_space<vmem>>, vector<64x128xbf16>
    tpu.vector_store %arg10[%c0_30, %c768], %19 {strides = array<i32>} : memref<64x1152xbf16, #tpu.memory_space<vmem>>, vector<64x128xbf16>,
    %c0_31 = arith.constant 0 : index
    %c0_32 = arith.constant 0 : index
    %c1_33 = arith.constant 1 : index
    %c0_34 = arith.constant 0 : index
    %21 = vector.load %arg9[%c0_31, %c0_32, %c1_33, %c0_34] : memref<1x10x10x128xbf16, #tpu.memory_space<vmem>>, vector<1x10x8x128xbf16>
    %22 = vector.extract_strided_slice %21 {offsets = [0, 0, 0, 0], sizes = [1, 8, 8, 128], strides = [1, 1, 1, 1]} : vector<1x10x8x128xbf16> to vector<1x8x8x128xbf16>
    %23 = vector.shape_cast %22 : vector<1x8x8x128xbf16> to vector<64x128xbf16>
    %c0_35 = arith.constant 0 : index
    %c128 = arith.constant 128 : index
    %24 = vector.load %arg10[%c0_35, %c128] : memref<64x1152xbf16, #tpu.memory_space<vmem>>, vector<64x128xbf16>
    tpu.vector_store %arg10[%c0_35, %c128], %23 {strides = array<i32>} : memref<64x1152xbf16, #tpu.memory_space<vmem>>, vector<64x128xbf16>,
    %25 = vector.extract_strided_slice %21 {offsets = [0, 1, 0, 0], sizes = [1, 8, 8, 128], strides = [1, 1, 1, 1]} : vector<1x10x8x128xbf16> to vector<1x8x8x128xbf16>
    %26 = vector.shape_cast %25 : vector<1x8x8x128xbf16> to vector<64x128xbf16>
    %c0_36 = arith.constant 0 : index
    %c512 = arith.constant 512 : index
    %27 = vector.load %arg10[%c0_36, %c512] : memref<64x1152xbf16, #tpu.memory_space<vmem>>, vector<64x128xbf16>
    tpu.vector_store %arg10[%c0_36, %c512], %26 {strides = array<i32>} : memref<64x1152xbf16, #tpu.memory_space<vmem>>, vector<64x128xbf16>,
    %28 = vector.extract_strided_slice %21 {offsets = [0, 2, 0, 0], sizes = [1, 8, 8, 128], strides = [1, 1, 1, 1]} : vector<1x10x8x128xbf16> to vector<1x8x8x128xbf16>
    %29 = vector.shape_cast %28 : vector<1x8x8x128xbf16> to vector<64x128xbf16>
    %c0_37 = arith.constant 0 : index
    %c896 = arith.constant 896 : index
    %30 = vector.load %arg10[%c0_37, %c896] : memref<64x1152xbf16, #tpu.memory_space<vmem>>, vector<64x128xbf16>
    tpu.vector_store %arg10[%c0_37, %c896], %29 {strides = array<i32>} : memref<64x1152xbf16, #tpu.memory_space<vmem>>, vector<64x128xbf16>,
    %c0_38 = arith.constant 0 : index
    %c0_39 = arith.constant 0 : index
    %c2 = arith.constant 2 : index
    %c0_40 = arith.constant 0 : index
    %31 = vector.load %arg9[%c0_38, %c0_39, %c2, %c0_40] : memref<1x10x10x128xbf16, #tpu.memory_space<vmem>>, vector<1x10x8x128xbf16>
    %32 = vector.extract_strided_slice %31 {offsets = [0, 0, 0, 0], sizes = [1, 8, 8, 128], strides = [1, 1, 1, 1]} : vector<1x10x8x128xbf16> to vector<1x8x8x128xbf16>
    %33 = vector.shape_cast %32 : vector<1x8x8x128xbf16> to vector<64x128xbf16>
    %c0_41 = arith.constant 0 : index
    %c256 = arith.constant 256 : index
    %34 = vector.load %arg10[%c0_41, %c256] : memref<64x1152xbf16, #tpu.memory_space<vmem>>, vector<64x128xbf16>
    tpu.vector_store %arg10[%c0_41, %c256], %33 {strides = array<i32>} : memref<64x1152xbf16, #tpu.memory_space<vmem>>, vector<64x128xbf16>,
    %35 = vector.extract_strided_slice %31 {offsets = [0, 1, 0, 0], sizes = [1, 8, 8, 128], strides = [1, 1, 1, 1]} : vector<1x10x8x128xbf16> to vector<1x8x8x128xbf16>
    %36 = vector.shape_cast %35 : vector<1x8x8x128xbf16> to vector<64x128xbf16>
    %c0_42 = arith.constant 0 : index
    %c640 = arith.constant 640 : index
    %37 = vector.load %arg10[%c0_42, %c640] : memref<64x1152xbf16, #tpu.memory_space<vmem>>, vector<64x128xbf16>
    tpu.vector_store %arg10[%c0_42, %c640], %36 {strides = array<i32>} : memref<64x1152xbf16, #tpu.memory_space<vmem>>, vector<64x128xbf16>,
    %38 = vector.extract_strided_slice %31 {offsets = [0, 2, 0, 0], sizes = [1, 8, 8, 128], strides = [1, 1, 1, 1]} : vector<1x10x8x128xbf16> to vector<1x8x8x128xbf16>
    %39 = vector.shape_cast %38 : vector<1x8x8x128xbf16> to vector<64x128xbf16>
    %c0_43 = arith.constant 0 : index
    %c1024 = arith.constant 1024 : index
    %40 = vector.load %arg10[%c0_43, %c1024] : memref<64x1152xbf16, #tpu.memory_space<vmem>>, vector<64x128xbf16>
    tpu.vector_store %arg10[%c0_43, %c1024], %39 {strides = array<i32>} : memref<64x1152xbf16, #tpu.memory_space<vmem>>, vector<64x128xbf16>,
    %c0_44 = arith.constant 0 : index
    %c0_45 = arith.constant 0 : index
    %41 = vector.load %arg10[%c0_44, %c0_45] : memref<64x1152xbf16, #tpu.memory_space<vmem>>, vector<64x1152xbf16>
    %c0_46 = arith.constant 0 : index
    %c0_47 = arith.constant 0 : index
    %42 = vector.load %arg2[%c0_46, %c0_47] : memref<1152x128xbf16, #tpu.memory_space<vmem>>, vector<1152x128xbf16>
    %cst_48 = arith.constant dense<0.000000e+00> : vector<64x128xf32>
    %43 = tpu.matmul %41, %42, %cst_48 {dimension_numbers = #tpu.dot_dimension_numbers<[1], [0], [0], [1], [0, 0, 1, 1], [], []>} : vector<64x1152xbf16>, vector<1152x128xbf16>, vector<64x128xf32> -> vector<64x128xf32>
    %44 = vector.shape_cast %43 : vector<64x128xf32> to vector<1x8x8x128xf32>
    %cst_49 = arith.constant 0.000000e+00 : f32
    %45 = vector.broadcast %cst_49 : f32 to vector<1x8x8x128xf32>
    %46 = arith.maximumf %44, %45 : vector<1x8x8x128xf32>
    %47 = arith.truncf %46 : vector<1x8x8x128xf32> to vector<1x8x8x128xbf16>
    %c0_50 = arith.constant 0 : index
    %c1_51 = arith.constant 1 : index
    %c1_52 = arith.constant 1 : index
    %c0_53 = arith.constant 0 : index
    %48 = vector.load %arg9[%c0_50, %c1_51, %c1_52, %c0_53] : memref<1x10x10x128xbf16, #tpu.memory_space<vmem>>, vector<1x8x8x128xbf16>
    tpu.vector_store %arg9[%c0_50, %c1_51, %c1_52, %c0_53], %47 {strides = array<i32>} : memref<1x10x10x128xbf16, #tpu.memory_space<vmem>>, vector<1x8x8x128xbf16>,
    %c0_54 = arith.constant 0 : index
    %c0_55 = arith.constant 0 : index
    %c0_56 = arith.constant 0 : index
    %c0_57 = arith.constant 0 : index
    %49 = vector.load %arg9[%c0_54, %c0_55, %c0_56, %c0_57] : memref<1x10x10x128xbf16, #tpu.memory_space<vmem>>, vector<1x10x8x128xbf16>
    %50 = vector.extract_strided_slice %49 {offsets = [0, 0, 0, 0], sizes = [1, 8, 8, 128], strides = [1, 1, 1, 1]} : vector<1x10x8x128xbf16> to vector<1x8x8x128xbf16>
    %51 = vector.shape_cast %50 : vector<1x8x8x128xbf16> to vector<64x128xbf16>
    %c0_58 = arith.constant 0 : index
    %c0_59 = arith.constant 0 : index
    %52 = vector.load %arg10[%c0_58, %c0_59] : memref<64x1152xbf16, #tpu.memory_space<vmem>>, vector<64x128xbf16>
    tpu.vector_store %arg10[%c0_58, %c0_59], %51 {strides = array<i32>} : memref<64x1152xbf16, #tpu.memory_space<vmem>>, vector<64x128xbf16>,
    %53 = vector.extract_strided_slice %49 {offsets = [0, 1, 0, 0], sizes = [1, 8, 8, 128], strides = [1, 1, 1, 1]} : vector<1x10x8x128xbf16> to vector<1x8x8x128xbf16>
    %54 = vector.shape_cast %53 : vector<1x8x8x128xbf16> to vector<64x128xbf16>
    %c0_60 = arith.constant 0 : index
    %c384_61 = arith.constant 384 : index
    %55 = vector.load %arg10[%c0_60, %c384_61] : memref<64x1152xbf16, #tpu.memory_space<vmem>>, vector<64x128xbf16>
    tpu.vector_store %arg10[%c0_60, %c384_61], %54 {strides = array<i32>} : memref<64x1152xbf16, #tpu.memory_space<vmem>>, vector<64x128xbf16>,
    %56 = vector.extract_strided_slice %49 {offsets = [0, 2, 0, 0], sizes = [1, 8, 8, 128], strides = [1, 1, 1, 1]} : vector<1x10x8x128xbf16> to vector<1x8x8x128xbf16>
    %57 = vector.shape_cast %56 : vector<1x8x8x128xbf16> to vector<64x128xbf16>
    %c0_62 = arith.constant 0 : index
    %c768_63 = arith.constant 768 : index
    %58 = vector.load %arg10[%c0_62, %c768_63] : memref<64x1152xbf16, #tpu.memory_space<vmem>>, vector<64x128xbf16>
    tpu.vector_store %arg10[%c0_62, %c768_63], %57 {strides = array<i32>} : memref<64x1152xbf16, #tpu.memory_space<vmem>>, vector<64x128xbf16>,
    %c0_64 = arith.constant 0 : index
    %c0_65 = arith.constant 0 : index
    %c1_66 = arith.constant 1 : index
    %c0_67 = arith.constant 0 : index
    %59 = vector.load %arg9[%c0_64, %c0_65, %c1_66, %c0_67] : memref<1x10x10x128xbf16, #tpu.memory_space<vmem>>, vector<1x10x8x128xbf16>
    %60 = vector.extract_strided_slice %59 {offsets = [0, 0, 0, 0], sizes = [1, 8, 8, 128], strides = [1, 1, 1, 1]} : vector<1x10x8x128xbf16> to vector<1x8x8x128xbf16>
    %61 = vector.shape_cast %60 : vector<1x8x8x128xbf16> to vector<64x128xbf16>
    %c0_68 = arith.constant 0 : index
    %c128_69 = arith.constant 128 : index
    %62 = vector.load %arg10[%c0_68, %c128_69] : memref<64x1152xbf16, #tpu.memory_space<vmem>>, vector<64x128xbf16>
    tpu.vector_store %arg10[%c0_68, %c128_69], %61 {strides = array<i32>} : memref<64x1152xbf16, #tpu.memory_space<vmem>>, vector<64x128xbf16>,
    %63 = vector.extract_strided_slice %59 {offsets = [0, 1, 0, 0], sizes = [1, 8, 8, 128], strides = [1, 1, 1, 1]} : vector<1x10x8x128xbf16> to vector<1x8x8x128xbf16>
    %64 = vector.shape_cast %63 : vector<1x8x8x128xbf16> to vector<64x128xbf16>
    %c0_70 = arith.constant 0 : index
    %c512_71 = arith.constant 512 : index
    %65 = vector.load %arg10[%c0_70, %c512_71] : memref<64x1152xbf16, #tpu.memory_space<vmem>>, vector<64x128xbf16>
    tpu.vector_store %arg10[%c0_70, %c512_71], %64 {strides = array<i32>} : memref<64x1152xbf16, #tpu.memory_space<vmem>>, vector<64x128xbf16>,
    %66 = vector.extract_strided_slice %59 {offsets = [0, 2, 0, 0], sizes = [1, 8, 8, 128], strides = [1, 1, 1, 1]} : vector<1x10x8x128xbf16> to vector<1x8x8x128xbf16>
    %67 = vector.shape_cast %66 : vector<1x8x8x128xbf16> to vector<64x128xbf16>
    %c0_72 = arith.constant 0 : index
    %c896_73 = arith.constant 896 : index
    %68 = vector.load %arg10[%c0_72, %c896_73] : memref<64x1152xbf16, #tpu.memory_space<vmem>>, vector<64x128xbf16>
    tpu.vector_store %arg10[%c0_72, %c896_73], %67 {strides = array<i32>} : memref<64x1152xbf16, #tpu.memory_space<vmem>>, vector<64x128xbf16>,
    %c0_74 = arith.constant 0 : index
    %c0_75 = arith.constant 0 : index
    %c2_76 = arith.constant 2 : index
    %c0_77 = arith.constant 0 : index
    %69 = vector.load %arg9[%c0_74, %c0_75, %c2_76, %c0_77] : memref<1x10x10x128xbf16, #tpu.memory_space<vmem>>, vector<1x10x8x128xbf16>
    %70 = vector.extract_strided_slice %69 {offsets = [0, 0, 0, 0], sizes = [1, 8, 8, 128], strides = [1, 1, 1, 1]} : vector<1x10x8x128xbf16> to vector<1x8x8x128xbf16>
    %71 = vector.shape_cast %70 : vector<1x8x8x128xbf16> to vector<64x128xbf16>
    %c0_78 = arith.constant 0 : index
    %c256_79 = arith.constant 256 : index
    %72 = vector.load %arg10[%c0_78, %c256_79] : memref<64x1152xbf16, #tpu.memory_space<vmem>>, vector<64x128xbf16>
    tpu.vector_store %arg10[%c0_78, %c256_79], %71 {strides = array<i32>} : memref<64x1152xbf16, #tpu.memory_space<vmem>>, vector<64x128xbf16>,
    %73 = vector.extract_strided_slice %69 {offsets = [0, 1, 0, 0], sizes = [1, 8, 8, 128], strides = [1, 1, 1, 1]} : vector<1x10x8x128xbf16> to vector<1x8x8x128xbf16>
    %74 = vector.shape_cast %73 : vector<1x8x8x128xbf16> to vector<64x128xbf16>
    %c0_80 = arith.constant 0 : index
    %c640_81 = arith.constant 640 : index
    %75 = vector.load %arg10[%c0_80, %c640_81] : memref<64x1152xbf16, #tpu.memory_space<vmem>>, vector<64x128xbf16>
    tpu.vector_store %arg10[%c0_80, %c640_81], %74 {strides = array<i32>} : memref<64x1152xbf16, #tpu.memory_space<vmem>>, vector<64x128xbf16>,
    %76 = vector.extract_strided_slice %69 {offsets = [0, 2, 0, 0], sizes = [1, 8, 8, 128], strides = [1, 1, 1, 1]} : vector<1x10x8x128xbf16> to vector<1x8x8x128xbf16>
    %77 = vector.shape_cast %76 : vector<1x8x8x128xbf16> to vector<64x128xbf16>
    %c0_82 = arith.constant 0 : index
    %c1024_83 = arith.constant 1024 : index
    %78 = vector.load %arg10[%c0_82, %c1024_83] : memref<64x1152xbf16, #tpu.memory_space<vmem>>, vector<64x128xbf16>
    tpu.vector_store %arg10[%c0_82, %c1024_83], %77 {strides = array<i32>} : memref<64x1152xbf16, #tpu.memory_space<vmem>>, vector<64x128xbf16>,
    %c0_84 = arith.constant 0 : index
    %c0_85 = arith.constant 0 : index
    %79 = vector.load %arg10[%c0_84, %c0_85] : memref<64x1152xbf16, #tpu.memory_space<vmem>>, vector<64x1152xbf16>
    %c0_86 = arith.constant 0 : index
    %c0_87 = arith.constant 0 : index
    %80 = vector.load %arg3[%c0_86, %c0_87] : memref<1152x128xbf16, #tpu.memory_space<vmem>>, vector<1152x128xbf16>
    %cst_88 = arith.constant dense<0.000000e+00> : vector<64x128xf32>
    %81 = tpu.matmul %79, %80, %cst_88 {dimension_numbers = #tpu.dot_dimension_numbers<[1], [0], [0], [1], [0, 0, 1, 1], [], []>} : vector<64x1152xbf16>, vector<1152x128xbf16>, vector<64x128xf32> -> vector<64x128xf32>
    %82 = vector.shape_cast %81 : vector<64x128xf32> to vector<1x64x128xf32>
    %cst_89 = arith.constant dense<0.000000e+00> : vector<1x128xf32>
    %83 = vector.multi_reduction <add>, %82, %cst_89 [1] : vector<1x64x128xf32> to vector<1x128xf32>
    %cst_90 = arith.constant 6.400000e+01 : f32
    %84 = vector.broadcast %cst_90 : f32 to vector<1x128xf32>
    %85 = arith.divf %83, %84 : vector<1x128xf32>
    %c0_91 = arith.constant 0 : index
    %c0_92 = arith.constant 0 : index
    %86 = vector.load %arg4[%c0_91, %c0_92] : memref<128x8xf32, #tpu.memory_space<vmem>>, vector<128x8xf32>
    %cst_93 = arith.constant dense<0.000000e+00> : vector<1x8xf32>
    %87 = tpu.matmul %85, %86, %cst_93 {dimension_numbers = #tpu.dot_dimension_numbers<[1], [0], [0], [1], [0, 0, 1, 1], [], []>} : vector<1x128xf32>, vector<128x8xf32>, vector<1x8xf32> -> vector<1x8xf32>
    %c0_94 = arith.constant 0 : index
    %c0_95 = arith.constant 0 : index
    %88 = vector.load %arg5[%c0_94, %c0_95] : memref<1x8xf32, #tpu.memory_space<vmem>>, vector<1x8xf32>
    %89 = arith.addf %87, %88 : vector<1x8xf32>
    %cst_96 = arith.constant 0.000000e+00 : f32
    %90 = vector.broadcast %cst_96 : f32 to vector<1x8xf32>
    %91 = arith.maximumf %89, %90 : vector<1x8xf32>
    %c0_97 = arith.constant 0 : index
    %c0_98 = arith.constant 0 : index
    %92 = vector.load %arg6[%c0_97, %c0_98] : memref<8x128xf32, #tpu.memory_space<vmem>>, vector<8x128xf32>
    %cst_99 = arith.constant dense<0.000000e+00> : vector<1x128xf32>
    %93 = tpu.matmul %91, %92, %cst_99 {dimension_numbers = #tpu.dot_dimension_numbers<[1], [0], [0], [1], [0, 0, 1, 1], [], []>} : vector<1x8xf32>, vector<8x128xf32>, vector<1x128xf32> -> vector<1x128xf32>
    %c0_100 = arith.constant 0 : index
    %c0_101 = arith.constant 0 : index
    %94 = vector.load %arg7[%c0_100, %c0_101] : memref<1x128xf32, #tpu.memory_space<vmem>>, vector<1x128xf32>
    %95 = arith.addf %93, %94 : vector<1x128xf32>
    %96 = arith.negf %95 : vector<1x128xf32>
    %97 = math.exp %96 : vector<1x128xf32>
    %cst_102 = arith.constant 1.000000e+00 : f32
    %98 = vector.broadcast %cst_102 : f32 to vector<1x128xf32>
    %99 = arith.addf %98, %97 : vector<1x128xf32>
    %100 = arith.divf %98, %99 : vector<1x128xf32>
    %101 = vector.shape_cast %100 : vector<1x128xf32> to vector<1x1x128xf32>
    %102 = vector.broadcast %101 : vector<1x1x128xf32> to vector<1x64x128xf32>
    %103 = arith.mulf %82, %102 : vector<1x64x128xf32>
    %104 = vector.shape_cast %103 : vector<1x64x128xf32> to vector<1x8x8x128xf32>
    %105 = arith.addf %6, %104 : vector<1x8x8x128xf32>
    %c0_103 = arith.constant 0 : index
    %c0_104 = arith.constant 0 : index
    %c0_105 = arith.constant 0 : index
    %c0_106 = arith.constant 0 : index
    %106 = vector.load %arg8[%c0_103, %c0_104, %c0_105, %c0_106] : memref<1x8x8x128xf32, #tpu.memory_space<vmem>>, vector<1x8x8x128xf32>
    tpu.vector_store %arg8[%c0_103, %c0_104, %c0_105, %c0_106], %105 {strides = array<i32>} : memref<1x8x8x128xf32, #tpu.memory_space<vmem>>, vector<1x8x8x128xf32>,
    return
  }
  func.func @transform_0(%arg0: i32) -> (i32, i32, i32, i32) {
    %c0_i32 = arith.constant 0 : i32
    %c0_i32_0 = arith.constant 0 : i32
    %c0_i32_1 = arith.constant 0 : i32
    %c0_i32_2 = arith.constant 0 : i32
    return %arg0, %c0_i32, %c0_i32_0, %c0_i32_1 : i32, i32, i32, i32
  }
  func.func @transform_1(%arg0: i32) -> (i32, i32) {
    %c0_i32 = arith.constant 0 : i32
    %c0_i32_0 = arith.constant 0 : i32
    %c0_i32_1 = arith.constant 0 : i32
    return %c0_i32, %c0_i32_0 : i32, i32
  }
  func.func @transform_2(%arg0: i32) -> (i32, i32) {
    %c0_i32 = arith.constant 0 : i32
    %c0_i32_0 = arith.constant 0 : i32
    %c0_i32_1 = arith.constant 0 : i32
    return %c0_i32, %c0_i32_0 : i32, i32
  }
  func.func @transform_3(%arg0: i32) -> (i32, i32) {
    %c0_i32 = arith.constant 0 : i32
    %c0_i32_0 = arith.constant 0 : i32
    %c0_i32_1 = arith.constant 0 : i32
    return %c0_i32, %c0_i32_0 : i32, i32
  }
  func.func @transform_4(%arg0: i32) -> (i32, i32) {
    %c0_i32 = arith.constant 0 : i32
    %c0_i32_0 = arith.constant 0 : i32
    %c0_i32_1 = arith.constant 0 : i32
    return %c0_i32, %c0_i32_0 : i32, i32
  }
  func.func @transform_5(%arg0: i32) -> (i32, i32) {
    %c0_i32 = arith.constant 0 : i32
    %c0_i32_0 = arith.constant 0 : i32
    %c0_i32_1 = arith.constant 0 : i32
    return %c0_i32, %c0_i32_0 : i32, i32
  }
  func.func @transform_6(%arg0: i32) -> (i32, i32) {
    %c0_i32 = arith.constant 0 : i32
    %c0_i32_0 = arith.constant 0 : i32
    %c0_i32_1 = arith.constant 0 : i32
    return %c0_i32, %c0_i32_0 : i32, i32
  }
  func.func @transform_7(%arg0: i32) -> (i32, i32, i32, i32) {
    %c0_i32 = arith.constant 0 : i32
    %c0_i32_0 = arith.constant 0 : i32
    %c0_i32_1 = arith.constant 0 : i32
    %c0_i32_2 = arith.constant 0 : i32
    return %arg0, %c0_i32, %c0_i32_0, %c0_i32_1 : i32, i32, i32, i32
  }
}

module attributes {stable_mosaic.version = 11 : i64} {
  func.func @resblock_sqex_kernel(%arg0: i32, %arg1: memref<1x8x8x128xf32, #tpu.memory_space<vmem>>, %arg2: memref<1152x128xbf16, #tpu.memory_space<vmem>>, %arg3: memref<1152x128xbf16, #tpu.memory_space<vmem>>, %arg4: memref<128x8xf32, #tpu.memory_space<vmem>>, %arg5: memref<1x8xf32, #tpu.memory_space<vmem>>, %arg6: memref<8x128xf32, #tpu.memory_space<vmem>>, %arg7: memref<1x128xf32, #tpu.memory_space<vmem>>, %arg8: memref<1x8x8x128xf32, #tpu.memory_space<vmem>>, %arg9: memref<1x10x10x128xbf16, #tpu.memory_space<vmem>>, %arg10: memref<64x1152xbf16, #tpu.memory_space<vmem>>) attributes {dimension_semantics = [#tpu.dimension_semantics<parallel>], iteration_bounds = array<i64: 4>, scalar_prefetch = 0 : i64, scratch_operands = 2 : i64, tpu.core_type = #tpu.core_type<tc>, window_params = [{transform_indices = @transform_0, window_bounds = array<i64: 1, 8, 8, 128>}, {pipeline_mode = #tpu.pipeline_mode<synchronous>, transform_indices = @transform_1, window_bounds = array<i64: 1152, 128>}, {pipeline_mode = #tpu.pipeline_mode<synchronous>, transform_indices = @transform_2, window_bounds = array<i64: 1152, 128>}, {pipeline_mode = #tpu.pipeline_mode<synchronous>, transform_indices = @transform_3, window_bounds = array<i64: 128, 8>}, {pipeline_mode = #tpu.pipeline_mode<synchronous>, transform_indices = @transform_4, window_bounds = array<i64: 1, 8>}, {pipeline_mode = #tpu.pipeline_mode<synchronous>, transform_indices = @transform_5, window_bounds = array<i64: 8, 128>}, {pipeline_mode = #tpu.pipeline_mode<synchronous>, transform_indices = @transform_6, window_bounds = array<i64: 1, 128>}, {transform_indices = @transform_7, window_bounds = array<i64: 1, 8, 8, 128>}]} {
    %cst = arith.constant 0.000000e+00 : bf16
    %0 = vector.broadcast %cst : bf16 to vector<1x1x10x128xbf16>
    %c0 = arith.constant 0 : index
    %c0_0 = arith.constant 0 : index
    %c0_1 = arith.constant 0 : index
    %c0_2 = arith.constant 0 : index
    %1 = vector.load %arg9[%c0, %c0_0, %c0_1, %c0_2] : memref<1x10x10x128xbf16, #tpu.memory_space<vmem>>, vector<1x1x10x128xbf16>
    tpu.vector_store %arg9[%c0, %c0_0, %c0_1, %c0_2], %0 {strides = array<i32>} : memref<1x10x10x128xbf16, #tpu.memory_space<vmem>>, vector<1x1x10x128xbf16>,
    %c0_3 = arith.constant 0 : index
    %c9 = arith.constant 9 : index
    %c0_4 = arith.constant 0 : index
    %c0_5 = arith.constant 0 : index
    %2 = vector.load %arg9[%c0_3, %c9, %c0_4, %c0_5] : memref<1x10x10x128xbf16, #tpu.memory_space<vmem>>, vector<1x1x10x128xbf16>
    tpu.vector_store %arg9[%c0_3, %c9, %c0_4, %c0_5], %0 {strides = array<i32>} : memref<1x10x10x128xbf16, #tpu.memory_space<vmem>>, vector<1x1x10x128xbf16>,
    %cst_6 = arith.constant 0.000000e+00 : bf16
    %3 = vector.broadcast %cst_6 : bf16 to vector<1x8x1x128xbf16>
    %c0_7 = arith.constant 0 : index
    %c1 = arith.constant 1 : index
    %c0_8 = arith.constant 0 : index
    %c0_9 = arith.constant 0 : index
    %4 = vector.load %arg9[%c0_7, %c1, %c0_8, %c0_9] : memref<1x10x10x128xbf16, #tpu.memory_space<vmem>>, vector<1x8x1x128xbf16>
    tpu.vector_store %arg9[%c0_7, %c1, %c0_8, %c0_9], %3 {strides = array<i32>} : memref<1x10x10x128xbf16, #tpu.memory_space<vmem>>, vector<1x8x1x128xbf16>,
    %c0_10 = arith.constant 0 : index
    %c1_11 = arith.constant 1 : index
    %c9_12 = arith.constant 9 : index
    %c0_13 = arith.constant 0 : index
    %5 = vector.load %arg9[%c0_10, %c1_11, %c9_12, %c0_13] : memref<1x10x10x128xbf16, #tpu.memory_space<vmem>>, vector<1x8x1x128xbf16>
    tpu.vector_store %arg9[%c0_10, %c1_11, %c9_12, %c0_13], %3 {strides = array<i32>} : memref<1x10x10x128xbf16, #tpu.memory_space<vmem>>, vector<1x8x1x128xbf16>,
    %c0_14 = arith.constant 0 : index
    %c0_15 = arith.constant 0 : index
    %c0_16 = arith.constant 0 : index
    %c0_17 = arith.constant 0 : index
    %6 = vector.load %arg1[%c0_14, %c0_15, %c0_16, %c0_17] : memref<1x8x8x128xf32, #tpu.memory_space<vmem>>, vector<1x8x8x128xf32>
    %cst_18 = arith.constant 0.000000e+00 : f32
    %7 = vector.broadcast %cst_18 : f32 to vector<1x8x8x128xf32>
    %8 = arith.maximumf %6, %7 : vector<1x8x8x128xf32>
    %9 = arith.truncf %8 : vector<1x8x8x128xf32> to vector<1x8x8x128xbf16>
    %c0_19 = arith.constant 0 : index
    %c1_20 = arith.constant 1 : index
    %c1_21 = arith.constant 1 : index
    %c0_22 = arith.constant 0 : index
    %10 = vector.load %arg9[%c0_19, %c1_20, %c1_21, %c0_22] : memref<1x10x10x128xbf16, #tpu.memory_space<vmem>>, vector<1x8x8x128xbf16>
    tpu.vector_store %arg9[%c0_19, %c1_20, %c1_21, %c0_22], %9 {strides = array<i32>} : memref<1x10x10x128xbf16, #tpu.memory_space<vmem>>, vector<1x8x8x128xbf16>,
    %c0_23 = arith.constant 0 : index
    %c0_24 = arith.constant 0 : index
    %c0_25 = arith.constant 0 : index
    %c0_26 = arith.constant 0 : index
    %11 = vector.load %arg9[%c0_23, %c0_24, %c0_25, %c0_26] : memref<1x10x10x128xbf16, #tpu.memory_space<vmem>>, vector<1x10x8x128xbf16>
    %12 = vector.extract_strided_slice %11 {offsets = [0, 0, 0, 0], sizes = [1, 8, 8, 128], strides = [1, 1, 1, 1]} : vector<1x10x8x128xbf16> to vector<1x8x8x128xbf16>
    %13 = vector.shape_cast %12 : vector<1x8x8x128xbf16> to vector<64x128xbf16>
    %c0_27 = arith.constant 0 : index
    %c0_28 = arith.constant 0 : index
    %14 = vector.load %arg10[%c0_27, %c0_28] : memref<64x1152xbf16, #tpu.memory_space<vmem>>, vector<64x128xbf16>
    tpu.vector_store %arg10[%c0_27, %c0_28], %13 {strides = array<i32>} : memref<64x1152xbf16, #tpu.memory_space<vmem>>, vector<64x128xbf16>,
    %15 = vector.extract_strided_slice %11 {offsets = [0, 1, 0, 0], sizes = [1, 8, 8, 128], strides = [1, 1, 1, 1]} : vector<1x10x8x128xbf16> to vector<1x8x8x128xbf16>
    %16 = vector.shape_cast %15 : vector<1x8x8x128xbf16> to vector<64x128xbf16>
    %c0_29 = arith.constant 0 : index
    %c384 = arith.constant 384 : index
    %17 = vector.load %arg10[%c0_29, %c384] : memref<64x1152xbf16, #tpu.memory_space<vmem>>, vector<64x128xbf16>
    tpu.vector_store %arg10[%c0_29, %c384], %16 {strides = array<i32>} : memref<64x1152xbf16, #tpu.memory_space<vmem>>, vector<64x128xbf16>,
    %18 = vector.extract_strided_slice %11 {offsets = [0, 2, 0, 0], sizes = [1, 8, 8, 128], strides = [1, 1, 1, 1]} : vector<1x10x8x128xbf16> to vector<1x8x8x128xbf16>
    %19 = vector.shape_cast %18 : vector<1x8x8x128xbf16> to vector<64x128xbf16>
    %c0_30 = arith.constant 0 : index
    %c768 = arith.constant 768 : index
    %20 = vector.load %arg10[%c0_30, %c768] : memref<64x1152xbf16, #tpu.memory_space<vmem>>, vector<64x128xbf16>
    tpu.vector_store %arg10[%c0_30, %c768], %19 {strides = array<i32>} : memref<64x1152xbf16, #tpu.memory_space<vmem>>, vector<64x128xbf16>,
    %c0_31 = arith.constant 0 : index
    %c0_32 = arith.constant 0 : index
    %c1_33 = arith.constant 1 : index
    %c0_34 = arith.constant 0 : index
    %21 = vector.load %arg9[%c0_31, %c0_32, %c1_33, %c0_34] : memref<1x10x10x128xbf16, #tpu.memory_space<vmem>>, vector<1x10x8x128xbf16>
    %22 = vector.extract_strided_slice %21 {offsets = [0, 0, 0, 0], sizes = [1, 8, 8, 128], strides = [1, 1, 1, 1]} : vector<1x10x8x128xbf16> to vector<1x8x8x128xbf16>
    %23 = vector.shape_cast %22 : vector<1x8x8x128xbf16> to vector<64x128xbf16>
    %c0_35 = arith.constant 0 : index
    %c128 = arith.constant 128 : index
    %24 = vector.load %arg10[%c0_35, %c128] : memref<64x1152xbf16, #tpu.memory_space<vmem>>, vector<64x128xbf16>
    tpu.vector_store %arg10[%c0_35, %c128], %23 {strides = array<i32>} : memref<64x1152xbf16, #tpu.memory_space<vmem>>, vector<64x128xbf16>,
    %25 = vector.extract_strided_slice %21 {offsets = [0, 1, 0, 0], sizes = [1, 8, 8, 128], strides = [1, 1, 1, 1]} : vector<1x10x8x128xbf16> to vector<1x8x8x128xbf16>
    %26 = vector.shape_cast %25 : vector<1x8x8x128xbf16> to vector<64x128xbf16>
    %c0_36 = arith.constant 0 : index
    %c512 = arith.constant 512 : index
    %27 = vector.load %arg10[%c0_36, %c512] : memref<64x1152xbf16, #tpu.memory_space<vmem>>, vector<64x128xbf16>
    tpu.vector_store %arg10[%c0_36, %c512], %26 {strides = array<i32>} : memref<64x1152xbf16, #tpu.memory_space<vmem>>, vector<64x128xbf16>,
    %28 = vector.extract_strided_slice %21 {offsets = [0, 2, 0, 0], sizes = [1, 8, 8, 128], strides = [1, 1, 1, 1]} : vector<1x10x8x128xbf16> to vector<1x8x8x128xbf16>
    %29 = vector.shape_cast %28 : vector<1x8x8x128xbf16> to vector<64x128xbf16>
    %c0_37 = arith.constant 0 : index
    %c896 = arith.constant 896 : index
    %30 = vector.load %arg10[%c0_37, %c896] : memref<64x1152xbf16, #tpu.memory_space<vmem>>, vector<64x128xbf16>
    tpu.vector_store %arg10[%c0_37, %c896], %29 {strides = array<i32>} : memref<64x1152xbf16, #tpu.memory_space<vmem>>, vector<64x128xbf16>,
    %c0_38 = arith.constant 0 : index
    %c0_39 = arith.constant 0 : index
    %c2 = arith.constant 2 : index
    %c0_40 = arith.constant 0 : index
    %31 = vector.load %arg9[%c0_38, %c0_39, %c2, %c0_40] : memref<1x10x10x128xbf16, #tpu.memory_space<vmem>>, vector<1x10x8x128xbf16>
    %32 = vector.extract_strided_slice %31 {offsets = [0, 0, 0, 0], sizes = [1, 8, 8, 128], strides = [1, 1, 1, 1]} : vector<1x10x8x128xbf16> to vector<1x8x8x128xbf16>
    %33 = vector.shape_cast %32 : vector<1x8x8x128xbf16> to vector<64x128xbf16>
    %c0_41 = arith.constant 0 : index
    %c256 = arith.constant 256 : index
    %34 = vector.load %arg10[%c0_41, %c256] : memref<64x1152xbf16, #tpu.memory_space<vmem>>, vector<64x128xbf16>
    tpu.vector_store %arg10[%c0_41, %c256], %33 {strides = array<i32>} : memref<64x1152xbf16, #tpu.memory_space<vmem>>, vector<64x128xbf16>,
    %35 = vector.extract_strided_slice %31 {offsets = [0, 1, 0, 0], sizes = [1, 8, 8, 128], strides = [1, 1, 1, 1]} : vector<1x10x8x128xbf16> to vector<1x8x8x128xbf16>
    %36 = vector.shape_cast %35 : vector<1x8x8x128xbf16> to vector<64x128xbf16>
    %c0_42 = arith.constant 0 : index
    %c640 = arith.constant 640 : index
    %37 = vector.load %arg10[%c0_42, %c640] : memref<64x1152xbf16, #tpu.memory_space<vmem>>, vector<64x128xbf16>
    tpu.vector_store %arg10[%c0_42, %c640], %36 {strides = array<i32>} : memref<64x1152xbf16, #tpu.memory_space<vmem>>, vector<64x128xbf16>,
    %38 = vector.extract_strided_slice %31 {offsets = [0, 2, 0, 0], sizes = [1, 8, 8, 128], strides = [1, 1, 1, 1]} : vector<1x10x8x128xbf16> to vector<1x8x8x128xbf16>
    %39 = vector.shape_cast %38 : vector<1x8x8x128xbf16> to vector<64x128xbf16>
    %c0_43 = arith.constant 0 : index
    %c1024 = arith.constant 1024 : index
    %40 = vector.load %arg10[%c0_43, %c1024] : memref<64x1152xbf16, #tpu.memory_space<vmem>>, vector<64x128xbf16>
    tpu.vector_store %arg10[%c0_43, %c1024], %39 {strides = array<i32>} : memref<64x1152xbf16, #tpu.memory_space<vmem>>, vector<64x128xbf16>,
    %c0_44 = arith.constant 0 : index
    %c0_45 = arith.constant 0 : index
    %41 = vector.load %arg10[%c0_44, %c0_45] : memref<64x1152xbf16, #tpu.memory_space<vmem>>, vector<64x1152xbf16>
    %c0_46 = arith.constant 0 : index
    %c0_47 = arith.constant 0 : index
    %42 = vector.load %arg2[%c0_46, %c0_47] : memref<1152x128xbf16, #tpu.memory_space<vmem>>, vector<1152x128xbf16>
    %cst_48 = arith.constant dense<0.000000e+00> : vector<64x128xf32>
    %43 = tpu.matmul %41, %42, %cst_48 {dimension_numbers = #tpu.dot_dimension_numbers<[1], [0], [0], [1], [0, 0, 1, 1], [], []>} : vector<64x1152xbf16>, vector<1152x128xbf16>, vector<64x128xf32> -> vector<64x128xf32>
    %44 = vector.shape_cast %43 : vector<64x128xf32> to vector<1x8x8x128xf32>
    %cst_49 = arith.constant 0.000000e+00 : f32
    %45 = vector.broadcast %cst_49 : f32 to vector<1x8x8x128xf32>
    %46 = arith.maximumf %44, %45 : vector<1x8x8x128xf32>
    %47 = arith.truncf %46 : vector<1x8x8x128xf32> to vector<1x8x8x128xbf16>
    %c0_50 = arith.constant 0 : index
    %c1_51 = arith.constant 1 : index
    %c1_52 = arith.constant 1 : index
    %c0_53 = arith.constant 0 : index
    %48 = vector.load %arg9[%c0_50, %c1_51, %c1_52, %c0_53] : memref<1x10x10x128xbf16, #tpu.memory_space<vmem>>, vector<1x8x8x128xbf16>
    tpu.vector_store %arg9[%c0_50, %c1_51, %c1_52, %c0_53], %47 {strides = array<i32>} : memref<1x10x10x128xbf16, #tpu.memory_space<vmem>>, vector<1x8x8x128xbf16>,
    %c0_54 = arith.constant 0 : index
    %c0_55 = arith.constant 0 : index
    %c0_56 = arith.constant 0 : index
    %c0_57 = arith.constant 0 : index
    %49 = vector.load %arg9[%c0_54, %c0_55, %c0_56, %c0_57] : memref<1x10x10x128xbf16, #tpu.memory_space<vmem>>, vector<1x10x8x128xbf16>
    %50 = vector.extract_strided_slice %49 {offsets = [0, 0, 0, 0], sizes = [1, 8, 8, 128], strides = [1, 1, 1, 1]} : vector<1x10x8x128xbf16> to vector<1x8x8x128xbf16>
    %51 = vector.shape_cast %50 : vector<1x8x8x128xbf16> to vector<64x128xbf16>
    %c0_58 = arith.constant 0 : index
    %c0_59 = arith.constant 0 : index
    %52 = vector.load %arg10[%c0_58, %c0_59] : memref<64x1152xbf16, #tpu.memory_space<vmem>>, vector<64x128xbf16>
    tpu.vector_store %arg10[%c0_58, %c0_59], %51 {strides = array<i32>} : memref<64x1152xbf16, #tpu.memory_space<vmem>>, vector<64x128xbf16>,
    %53 = vector.extract_strided_slice %49 {offsets = [0, 1, 0, 0], sizes = [1, 8, 8, 128], strides = [1, 1, 1, 1]} : vector<1x10x8x128xbf16> to vector<1x8x8x128xbf16>
    %54 = vector.shape_cast %53 : vector<1x8x8x128xbf16> to vector<64x128xbf16>
    %c0_60 = arith.constant 0 : index
    %c384_61 = arith.constant 384 : index
    %55 = vector.load %arg10[%c0_60, %c384_61] : memref<64x1152xbf16, #tpu.memory_space<vmem>>, vector<64x128xbf16>
    tpu.vector_store %arg10[%c0_60, %c384_61], %54 {strides = array<i32>} : memref<64x1152xbf16, #tpu.memory_space<vmem>>, vector<64x128xbf16>,
    %56 = vector.extract_strided_slice %49 {offsets = [0, 2, 0, 0], sizes = [1, 8, 8, 128], strides = [1, 1, 1, 1]} : vector<1x10x8x128xbf16> to vector<1x8x8x128xbf16>
    %57 = vector.shape_cast %56 : vector<1x8x8x128xbf16> to vector<64x128xbf16>
    %c0_62 = arith.constant 0 : index
    %c768_63 = arith.constant 768 : index
    %58 = vector.load %arg10[%c0_62, %c768_63] : memref<64x1152xbf16, #tpu.memory_space<vmem>>, vector<64x128xbf16>
    tpu.vector_store %arg10[%c0_62, %c768_63], %57 {strides = array<i32>} : memref<64x1152xbf16, #tpu.memory_space<vmem>>, vector<64x128xbf16>,
    %c0_64 = arith.constant 0 : index
    %c0_65 = arith.constant 0 : index
    %c1_66 = arith.constant 1 : index
    %c0_67 = arith.constant 0 : index
    %59 = vector.load %arg9[%c0_64, %c0_65, %c1_66, %c0_67] : memref<1x10x10x128xbf16, #tpu.memory_space<vmem>>, vector<1x10x8x128xbf16>
    %60 = vector.extract_strided_slice %59 {offsets = [0, 0, 0, 0], sizes = [1, 8, 8, 128], strides = [1, 1, 1, 1]} : vector<1x10x8x128xbf16> to vector<1x8x8x128xbf16>
    %61 = vector.shape_cast %60 : vector<1x8x8x128xbf16> to vector<64x128xbf16>
    %c0_68 = arith.constant 0 : index
    %c128_69 = arith.constant 128 : index
    %62 = vector.load %arg10[%c0_68, %c128_69] : memref<64x1152xbf16, #tpu.memory_space<vmem>>, vector<64x128xbf16>
    tpu.vector_store %arg10[%c0_68, %c128_69], %61 {strides = array<i32>} : memref<64x1152xbf16, #tpu.memory_space<vmem>>, vector<64x128xbf16>,
    %63 = vector.extract_strided_slice %59 {offsets = [0, 1, 0, 0], sizes = [1, 8, 8, 128], strides = [1, 1, 1, 1]} : vector<1x10x8x128xbf16> to vector<1x8x8x128xbf16>
    %64 = vector.shape_cast %63 : vector<1x8x8x128xbf16> to vector<64x128xbf16>
    %c0_70 = arith.constant 0 : index
    %c512_71 = arith.constant 512 : index
    %65 = vector.load %arg10[%c0_70, %c512_71] : memref<64x1152xbf16, #tpu.memory_space<vmem>>, vector<64x128xbf16>
    tpu.vector_store %arg10[%c0_70, %c512_71], %64 {strides = array<i32>} : memref<64x1152xbf16, #tpu.memory_space<vmem>>, vector<64x128xbf16>,
    %66 = vector.extract_strided_slice %59 {offsets = [0, 2, 0, 0], sizes = [1, 8, 8, 128], strides = [1, 1, 1, 1]} : vector<1x10x8x128xbf16> to vector<1x8x8x128xbf16>
    %67 = vector.shape_cast %66 : vector<1x8x8x128xbf16> to vector<64x128xbf16>
    %c0_72 = arith.constant 0 : index
    %c896_73 = arith.constant 896 : index
    %68 = vector.load %arg10[%c0_72, %c896_73] : memref<64x1152xbf16, #tpu.memory_space<vmem>>, vector<64x128xbf16>
    tpu.vector_store %arg10[%c0_72, %c896_73], %67 {strides = array<i32>} : memref<64x1152xbf16, #tpu.memory_space<vmem>>, vector<64x128xbf16>,
    %c0_74 = arith.constant 0 : index
    %c0_75 = arith.constant 0 : index
    %c2_76 = arith.constant 2 : index
    %c0_77 = arith.constant 0 : index
    %69 = vector.load %arg9[%c0_74, %c0_75, %c2_76, %c0_77] : memref<1x10x10x128xbf16, #tpu.memory_space<vmem>>, vector<1x10x8x128xbf16>
    %70 = vector.extract_strided_slice %69 {offsets = [0, 0, 0, 0], sizes = [1, 8, 8, 128], strides = [1, 1, 1, 1]} : vector<1x10x8x128xbf16> to vector<1x8x8x128xbf16>
    %71 = vector.shape_cast %70 : vector<1x8x8x128xbf16> to vector<64x128xbf16>
    %c0_78 = arith.constant 0 : index
    %c256_79 = arith.constant 256 : index
    %72 = vector.load %arg10[%c0_78, %c256_79] : memref<64x1152xbf16, #tpu.memory_space<vmem>>, vector<64x128xbf16>
    tpu.vector_store %arg10[%c0_78, %c256_79], %71 {strides = array<i32>} : memref<64x1152xbf16, #tpu.memory_space<vmem>>, vector<64x128xbf16>,
    %73 = vector.extract_strided_slice %69 {offsets = [0, 1, 0, 0], sizes = [1, 8, 8, 128], strides = [1, 1, 1, 1]} : vector<1x10x8x128xbf16> to vector<1x8x8x128xbf16>
    %74 = vector.shape_cast %73 : vector<1x8x8x128xbf16> to vector<64x128xbf16>
    %c0_80 = arith.constant 0 : index
    %c640_81 = arith.constant 640 : index
    %75 = vector.load %arg10[%c0_80, %c640_81] : memref<64x1152xbf16, #tpu.memory_space<vmem>>, vector<64x128xbf16>
    tpu.vector_store %arg10[%c0_80, %c640_81], %74 {strides = array<i32>} : memref<64x1152xbf16, #tpu.memory_space<vmem>>, vector<64x128xbf16>,
    %76 = vector.extract_strided_slice %69 {offsets = [0, 2, 0, 0], sizes = [1, 8, 8, 128], strides = [1, 1, 1, 1]} : vector<1x10x8x128xbf16> to vector<1x8x8x128xbf16>
    %77 = vector.shape_cast %76 : vector<1x8x8x128xbf16> to vector<64x128xbf16>
    %c0_82 = arith.constant 0 : index
    %c1024_83 = arith.constant 1024 : index
    %78 = vector.load %arg10[%c0_82, %c1024_83] : memref<64x1152xbf16, #tpu.memory_space<vmem>>, vector<64x128xbf16>
    tpu.vector_store %arg10[%c0_82, %c1024_83], %77 {strides = array<i32>} : memref<64x1152xbf16, #tpu.memory_space<vmem>>, vector<64x128xbf16>,
    %c0_84 = arith.constant 0 : index
    %c0_85 = arith.constant 0 : index
    %79 = vector.load %arg10[%c0_84, %c0_85] : memref<64x1152xbf16, #tpu.memory_space<vmem>>, vector<64x1152xbf16>
    %c0_86 = arith.constant 0 : index
    %c0_87 = arith.constant 0 : index
    %80 = vector.load %arg3[%c0_86, %c0_87] : memref<1152x128xbf16, #tpu.memory_space<vmem>>, vector<1152x128xbf16>
    %cst_88 = arith.constant dense<0.000000e+00> : vector<64x128xf32>
    %81 = tpu.matmul %79, %80, %cst_88 {dimension_numbers = #tpu.dot_dimension_numbers<[1], [0], [0], [1], [0, 0, 1, 1], [], []>} : vector<64x1152xbf16>, vector<1152x128xbf16>, vector<64x128xf32> -> vector<64x128xf32>
    %82 = vector.shape_cast %81 : vector<64x128xf32> to vector<1x64x128xf32>
    %cst_89 = arith.constant dense<0.000000e+00> : vector<1x128xf32>
    %83 = vector.multi_reduction <add>, %82, %cst_89 [1] : vector<1x64x128xf32> to vector<1x128xf32>
    %cst_90 = arith.constant 6.400000e+01 : f32
    %84 = vector.broadcast %cst_90 : f32 to vector<1x128xf32>
    %85 = arith.divf %83, %84 : vector<1x128xf32>
    %c0_91 = arith.constant 0 : index
    %c0_92 = arith.constant 0 : index
    %86 = vector.load %arg4[%c0_91, %c0_92] : memref<128x8xf32, #tpu.memory_space<vmem>>, vector<128x8xf32>
    %cst_93 = arith.constant dense<0.000000e+00> : vector<1x8xf32>
    %87 = tpu.matmul %85, %86, %cst_93 {dimension_numbers = #tpu.dot_dimension_numbers<[1], [0], [0], [1], [0, 0, 1, 1], [], []>} : vector<1x128xf32>, vector<128x8xf32>, vector<1x8xf32> -> vector<1x8xf32>
    %c0_94 = arith.constant 0 : index
    %c0_95 = arith.constant 0 : index
    %88 = vector.load %arg5[%c0_94, %c0_95] : memref<1x8xf32, #tpu.memory_space<vmem>>, vector<1x8xf32>
    %89 = arith.addf %87, %88 : vector<1x8xf32>
    %cst_96 = arith.constant 0.000000e+00 : f32
    %90 = vector.broadcast %cst_96 : f32 to vector<1x8xf32>
    %91 = arith.maximumf %89, %90 : vector<1x8xf32>
    %c0_97 = arith.constant 0 : index
    %c0_98 = arith.constant 0 : index
    %92 = vector.load %arg6[%c0_97, %c0_98] : memref<8x128xf32, #tpu.memory_space<vmem>>, vector<8x128xf32>
    %cst_99 = arith.constant dense<0.000000e+00> : vector<1x128xf32>
    %93 = tpu.matmul %91, %92, %cst_99 {dimension_numbers = #tpu.dot_dimension_numbers<[1], [0], [0], [1], [0, 0, 1, 1], [], []>} : vector<1x8xf32>, vector<8x128xf32>, vector<1x128xf32> -> vector<1x128xf32>
    %c0_100 = arith.constant 0 : index
    %c0_101 = arith.constant 0 : index
    %94 = vector.load %arg7[%c0_100, %c0_101] : memref<1x128xf32, #tpu.memory_space<vmem>>, vector<1x128xf32>
    %95 = arith.addf %93, %94 : vector<1x128xf32>
    %96 = arith.negf %95 : vector<1x128xf32>
    %97 = math.exp %96 : vector<1x128xf32>
    %cst_102 = arith.constant 1.000000e+00 : f32
    %98 = vector.broadcast %cst_102 : f32 to vector<1x128xf32>
    %99 = arith.addf %98, %97 : vector<1x128xf32>
    %100 = arith.divf %98, %99 : vector<1x128xf32>
    %101 = vector.shape_cast %100 : vector<1x128xf32> to vector<1x1x128xf32>
    %102 = vector.broadcast %101 : vector<1x1x128xf32> to vector<1x64x128xf32>
    %103 = arith.mulf %82, %102 : vector<1x64x128xf32>
    %104 = vector.shape_cast %103 : vector<1x64x128xf32> to vector<1x8x8x128xf32>
    %105 = arith.addf %6, %104 : vector<1x8x8x128xf32>
    %c0_103 = arith.constant 0 : index
    %c0_104 = arith.constant 0 : index
    %c0_105 = arith.constant 0 : index
    %c0_106 = arith.constant 0 : index
    %106 = vector.load %arg8[%c0_103, %c0_104, %c0_105, %c0_106] : memref<1x8x8x128xf32, #tpu.memory_space<vmem>>, vector<1x8x8x128xf32>
    tpu.vector_store %arg8[%c0_103, %c0_104, %c0_105, %c0_106], %105 {strides = array<i32>} : memref<1x8x8x128xf32, #tpu.memory_space<vmem>>, vector<1x8x8x128xf32>,
    return
  }
  func.func @transform_0(%arg0: i32) -> (i32, i32, i32, i32) {
    %c0_i32 = arith.constant 0 : i32
    %c0_i32_0 = arith.constant 0 : i32
    %c0_i32_1 = arith.constant 0 : i32
    %c0_i32_2 = arith.constant 0 : i32
    return %arg0, %c0_i32, %c0_i32_0, %c0_i32_1 : i32, i32, i32, i32
  }
  func.func @transform_1(%arg0: i32) -> (i32, i32) {
    %c0_i32 = arith.constant 0 : i32
    %c0_i32_0 = arith.constant 0 : i32
    %c0_i32_1 = arith.constant 0 : i32
    return %c0_i32, %c0_i32_0 : i32, i32
  }
  func.func @transform_2(%arg0: i32) -> (i32, i32) {
    %c0_i32 = arith.constant 0 : i32
    %c0_i32_0 = arith.constant 0 : i32
    %c0_i32_1 = arith.constant 0 : i32
    return %c0_i32, %c0_i32_0 : i32, i32
  }
  func.func @transform_3(%arg0: i32) -> (i32, i32) {
    %c0_i32 = arith.constant 0 : i32
    %c0_i32_0 = arith.constant 0 : i32
    %c0_i32_1 = arith.constant 0 : i32
    return %c0_i32, %c0_i32_0 : i32, i32
  }
  func.func @transform_4(%arg0: i32) -> (i32, i32) {
    %c0_i32 = arith.constant 0 : i32
    %c0_i32_0 = arith.constant 0 : i32
    %c0_i32_1 = arith.constant 0 : i32
    return %c0_i32, %c0_i32_0 : i32, i32
  }
  func.func @transform_5(%arg0: i32) -> (i32, i32) {
    %c0_i32 = arith.constant 0 : i32
    %c0_i32_0 = arith.constant 0 : i32
    %c0_i32_1 = arith.constant 0 : i32
    return %c0_i32, %c0_i32_0 : i32, i32
  }
  func.func @transform_6(%arg0: i32) -> (i32, i32) {
    %c0_i32 = arith.constant 0 : i32
    %c0_i32_0 = arith.constant 0 : i32
    %c0_i32_1 = arith.constant 0 : i32
    return %c0_i32, %c0_i32_0 : i32, i32
  }
  func.func @transform_7(%arg0: i32) -> (i32, i32, i32, i32) {
    %c0_i32 = arith.constant 0 : i32
    %c0_i32_0 = arith.constant 0 : i32
    %c0_i32_1 = arith.constant 0 : i32
    %c0_i32_2 = arith.constant 0 : i32
    return %arg0, %c0_i32, %c0_i32_0, %c0_i32_1 : i32, i32, i32, i32
  }
}

</mosaic_0001>

<bundles_post_ra>
// kernel: tpu_custom_call.1
= control target key start
LH: loop header
LB: loop body
LE: loop exit
PB: predicated region body
PF: predicated region fallthrough
CT: control target
= control target key end

     0   :  { %s5836_s0 = inlined_call_operand.hbm [shape: f32[4,8,8,128], index: 0, kind: input, shape index: {}]   ;;  %s5837_s1 = inlined_call_operand.hbm [shape: bf16[1152,128], index: 1, kind: input, shape index: {}]   ;;  %s5838_s2 = inlined_call_operand.hbm [shape: bf16[1152,128], index: 2, kind: input, shape index: {}]   ;;  %s5839_s3 = inlined_call_operand.vmem [shape: f32[128,8], index: 3, kind: input, shape index: {}]   ;;  %s5840_s4 = inlined_call_operand.vmem [shape: f32[1,8], index: 4, kind: input, shape index: {}]   ;;  %s5841_s5 = inlined_call_operand.vmem [shape: f32[8,128], index: 5, kind: input, shape index: {}]   ;;  %s5842_s6 = inlined_call_operand.vmem [shape: f32[1,128], index: 6, kind: input, shape index: {}]   ;;  %s5843_s7 = inlined_call_operand.hbm [shape: f32[4,8,8,128], index: 7, kind: output, shape index: {}]  }
   0x1   :  { %5844 = sst [smem:[#allocation14_spill]] %s5837_s1 }
   0x2   :  { %12 = vsyncpa [#allocation5], 0 }
   0x3   :  { %14 = vsyncpa [#allocation5 + $0x1], 0 }
   0x4   :  { %15 = vsyncpa [#allocation8], 0 }
   0x5   :  { %16 = vsyncpa [#allocation6], 0 }
   0x6   :  { %18 = vsyncpa [#allocation6 + $0x1], 0  ;;  %s5178_s24 = smov 0   ;;  %s5180_s25 = smov 0  }
   0x7   :  { %s5182_s26 = smov 0   ;;  %s5184_s27 = smov 0  }
   0x8 LB: > { %s5199_s28 = sadd.s32 4294967295, %s5126_s27   ;;  %s3739_s29 = sadd.s32 4294967294, %s5126_s27   ;;  %s5126_s27 = sphi %s5184_s27, %s5864_s27   ;;  %s5122_s26 = sphi %s5182_s26, %s5863_s26   ;;  %s5118_s25 = sphi %s5180_s25, %s5862_s25   ;;  %s5114_s24 = sphi %s5178_s24, %s5861_s24  }
   0x9   : > { %p44_p0 = scmp.ne.s32.totalorder %s5118_s25, %s5114_s24  ;;  %p45_p1 = scmp.eq.s32.totalorder %s5199_s28, 0 }
   0xa   : > { %p194_p2 = scmp.eq.s32.totalorder %s5199_s28, 3  ;;  %p200_p3 = scmp.eq.s32.totalorder %s3739_s29, 3 }
   0xb   : > { %p5208_p4 = por %p45_p1, %p44_p0  ;;  %p3740_p5 = scmp.ge.s32.totalorder %s5126_s27, 1 }
   0xc   : > { %p5213_p6 = por %p200_p3, %p44_p0  ;;  %p207_p7 = scmp.lt.s32.totalorder %s5126_s27, 5 }
   0xd   : > { %s5847_s1 = sld [smem:[#allocation14_spill]]  ;;  %s5128_s13 = smov [#allocation7]  }
   0xe   : > { %p5221_p8 = pnand %p3740_p5, %p207_p7  ;;  %s220_s14 = sshll.u32 %s5128_s13, 4  ;;  %s221_s14 = int_to_ptr.vmem [resolvable:$true] %s220_s14 }
   0xf   : > { %s232_s17 = sshll.u32 %s5838_s2, 4  ;;  %s5129_s18 = smov 64   ;;  %s233_s17 = int_to_ptr.hbm [resolvable:$true] %s232_s17 }
  0x10   : > { %p4889_p9 = pneg %p5221_p8  ;;  %s5130_s19 = smov 4  }
  0x11   : > { %s5131_s20 = smov [#allocation9]   ;;  %s5233_s22 = sadd.s32 1, %s5126_s27  }
  0x12   : > { %p4890_p10 = pnand %p4889_p9, %p45_p1  ;;  %s234_s21 = sshll.u32 %s5131_s20, 4  ;;  %s235_s21 = int_to_ptr.vmem [resolvable:$true] %s234_s21 }
  0x13   : > { %s218_s11 = sshll.u32 %s5847_s1, 4  ;;  %s31_s23 = sadd.s32 1, %s5122_s26  ;;  %s219_s11 = int_to_ptr.hbm [resolvable:$true] %s218_s11 }
  0x14   : > { %4892 = dma.hbm_to_vmem [thread:$0]  (!%p4890_p10), %s219_s11, 9216, %s221_s14, [#allocation8], %s5129_s18, %s5129_s18, %s5130_s19  }
  0x15   : > { %4895 = dma.hbm_to_vmem [thread:$0]  (!%p4890_p10), %s233_s17, 9216, %s235_s21, [#allocation8], %s5129_s18, %s5129_s18, %s5130_s19  }
  0x16   : > { %s28_s29 = ssub.s32 %s5126_s27, %s5233_s22  ;;  %p38_p11 = scmp.ne.s32.totalorder %s5122_s26, %s5118_s25 }
  0x17   : > { %p29_p12 = scmp.eq.s32.totalorder %s28_s29, 0  ;;  %p39_p13 = scmp.eq.s32.totalorder %s5126_s27, 0 }
  0x18   : > { %p5243_p0 = por %p194_p2, %p38_p11  ;;  %p4906_p3 = scmp.lt.s32.totalorder %s5126_s27, 4 }
  0x19   : > { %s5249_s10 = scalar_select %p29_p12, %s5122_s26, %s31_s23  }
  0x1a   : > { %p40_p5 = por %p39_p13, %p38_p11  ;;  %s260_s11 = sand.u32 1, %s5122_s26  }
  0x1b   : > { %s3744_s13 = sshll.u32 %s260_s11, 6  ;;  %s4643_s14 = sshll.u32 %s5126_s27, 6 }
  0x1c   : > { %s269_s17 = scalar_lea.hbm %s5836_s0, %s4643_s14  ;;  %s264_s18 = scalar_lea.vmem [#allocation4], %s3744_s13 }
  0x1d   : > { %s272_s19 = sshll.u32 %s264_s18, 4  ;;  %s270_s20 = sshll.u32 %s269_s17, 4  ;;  %s273_s19 = int_to_ptr.vmem [resolvable:$true] %s272_s19  ;;  %s271_s20 = int_to_ptr.hbm [resolvable:$true] %s270_s20 }
  0x1e   : > { %p5256_p2 = pnand %p4906_p3, %p40_p5  ;;  %s261_s23 = scalar_lea.sflag [#allocation5], %s260_s11 }
  0x1f   : > { %s5026_s29 = sshra.s32 %s271_s20, 4  ;;  %s5033_s15 = scalar_lea.hbm %s5836_s0, 256  ;;  %s5027_s29 = int_to_ptr.hbm [resolvable:$true] %s5026_s29 }
  0x20   : > { %s5028_s1 = scalar_lea.hbm %s5027_s29, 64  ;;  %p5030_p9 = pneg %p5256_p2 }
  0x21   : > { %p5029_p7 = scmp.ne.s32.totalorder %s5027_s29, %s5028_s1  ;;  %p5034_p12 = scmp.lt.s32.totalorder %s5027_s29, %s5836_s0 }
  0x22   : > { %p5035_p13 = scmp.lt.s32.totalorder %s5033_s15, %s5028_s1 }
  0x23   : > { %p5031_p10 = pnand %p5030_p9, %p5029_p7 }
  0x24   : > { %p5036_p3 = por %p5035_p13, %p5034_p12 }
  0x25   : > { %p5032_p11 = pneg %p5031_p10 }
  0x27   : > { %p5037_p5 = pnand %p5036_p3, %p5032_p11 }
  0x29   : > { %5040 = shalt.err (!%p5037_p5)
}
  0x2a   : > { %s5132_s11 = smov 128   ;;  %s5133_s18 = smov 8  }
  0x2b   : > { %4899 = dma.hbm_to_vmem [thread:$0]  (!%p5256_p2), %s271_s20, 1024, %s273_s19, %s261_s23, %s5132_s11, %s5132_s11, %s5133_s18  }
  0x2c   : > { %284 = sbr.rel (%p5221_p8) target bundleno = 1056 (0x420), region = 48  ;;  %s5273_s14 = sand.u32 (!%p5221_p8), 1, %s5118_s25  }
  0x2d   : > { %s3748_s29 = sshll.u32 (!%p5221_p8), %s5273_s14, 6  ;;  %s287_s1 = scalar_lea.sflag (!%p5221_p8), [#allocation5], %s5273_s14 }
  0x2e   : > { %s5279_s13 = scalar_lea.vmem (!%p5221_p8), [#allocation4], %s3748_s29 }
  0x31   : > { %5101 = dma.done.wait (%p5208_p4), %s287_s1, 1024  }
  0x32   : > { %5103 = vsyncadd (%p5208_p4), %s287_s1, 4294966272 }
  0x33   : > { %5105 = dma.done.wait (%p45_p1), [#allocation8], 18432  }
  0x34   : > { %5107 = vsyncadd (%p45_p1), [#allocation8], 4294948864  ;;  %v5134_v0 = vmov 0   ;;  %v4687_v1 = vld [vmem:[#allocation7 + $0x38] sm:$0xff]  ;;  %vm339_vm0 = vcmask 1040384   ;;  %v4686_v3 = vld [vmem:[#allocation7 + $0x30] sm:$0xff] }
  0x35   : > { %333 = vst [vmem:[#allocation2] sm:$0xf] %v5134_v0  ;;  %v4695_v2 = vld [vmem:[#allocation7 + $0x78] sm:$0xff]  ;;  %vm340_vm1 = vsmask.f32 256  ;;  %4861 = vmatpush.bf16.msra.mxu2 %v4687_v1  ;;  %1694 = vmatpush.bf16.msra.mxu0 %v4687_v1  ;;  %v4694_v4 = vld [vmem:[#allocation7 + $0x70] sm:$0xff] }
  0x36   : > { %334 = vst [vmem:[#allocation2 + $0x4] sm:$0x1] %v5134_v0  ;;  %1723 = vmatpush.bf16.msra.mxu1 %v4695_v2  ;;  %4869 = vmatpush.bf16.msra.mxu3 %v4695_v2  ;;  %vm5290_vm2 = vmand %vm339_vm0, %vm340_vm1  ;;  %vm366_vm3 = vsmask.f32 7938  ;;  %v351_v6 = vld [vmem:[#allocation2 + $0x20] sm:$0x1] }
  0x37   : > { %336 = vst [vmem:[#allocation2 + $0x48] sm:$0xf] %v5134_v0  ;;  %v354_v7 = vld [vmem:[#allocation2 + $0x28] sm:$0x1]  ;;  %vm496_vm4 = vcmask 1043456   ;;  %v4685_v9 = vld [vmem:[#allocation7 + $0x28] sm:$0xff]  ;;  %vm5303_vm5 = vmand %vm339_vm0, %vm366_vm3 }
  0x38   : > { %337 = vst [vmem:[#allocation2 + $0x4c] sm:$0x1] %v5134_v0  ;;  %v395_v8 = vld [vmem:[%s5279_s13 + $0x18] sm:$0xff]  ;;  %v4693_v10 = vld [vmem:[#allocation7 + $0x68] sm:$0xff]  ;;  %v352_v11 = vsel %vm5290_vm2, 0, %v351_v6  ;;  %v355_v12 = vsel %vm5290_vm2, 0, %v354_v7  ;;  %vm5317_vm7 = vmand %vm496_vm4, %vm366_vm3 }
  0x39   : > { %4862 = vmatpush.bf16.msra.mxu2 %v4686_v3  ;;  %1695 = vmatpush.bf16.msra.mxu0 %v4686_v3  ;;  %v396_v13 = vld [vmem:[%s5279_s13 + $0x20] sm:$0xff]  ;;  %v403_v14 = vmax.f32 %v395_v8, 0.0  ;;  %353 = vst [vmem:[#allocation2 + $0x20] sm:$0x1] %v352_v11  ;;  %v342_v16 = vld [vmem:[#allocation2 + $0x8] sm:$0x1] }
  0x3a   : > { %1724 = vmatpush.bf16.msra.mxu1 %v4694_v4  ;;  %4870 = vmatpush.bf16.msra.mxu3 %v4694_v4  ;;  %v404_v15 = vmax.f32 %v396_v13, 0.0  ;;  %v392_v17 = vld [vmem:[%s5279_s13] sm:$0xff]  ;;  %356 = vst [vmem:[#allocation2 + $0x28] sm:$0x1] %v355_v12  ;;  %v343_v21 = vsel %vm5290_vm2, 0, %v342_v16  ;;  %v4683_v43 = vld [vmem:[#allocation7 + $0x18] sm:$0xff] }
  0x3b   : > { %v4684_v19 = vld [vmem:[#allocation7 + $0x20] sm:$0xff]  ;;  %v411_v20 = vpack.c.bf16 %v403_v14, %v403_v14  ;;  %v400_v22 = vmax.f32 %v392_v17, 0.0  ;;  %344 = vst [vmem:[#allocation2 + $0x8] sm:$0x1] %v343_v21  ;;  %v368_v25 = vld [vmem:[#allocation2 + $0xc] sm:$0x1] }
  0x3c   : > { %v546_v23 = vld [vmem:[#allocation2] sm:$0xf]  ;;  %v412_v24 = vpack.c.bf16 %v404_v15, %v404_v15  ;;  %vm600_vm6 = vsmask.f32 3328  ;;  %v4692_v26 = vld [vmem:[#allocation7 + $0x60] sm:$0xff]  ;;  %v369_v30 = vsel %vm5303_vm5, 0, %v368_v25 }
  0x3d   : > { %4863 = vmatpush.bf16.msra.mxu2 %v4685_v9  ;;  %1696 = vmatpush.bf16.msra.mxu0 %v4685_v9  ;;  %v441_v27 = vshrl.u32 %v411_v20, 16  ;;  %v444_v28 = vshll.u32 %v411_v20, 16  ;;  %v408_v29 = vpack.c.bf16 %v400_v22, %v400_v22  ;;  %556 = vst [vmem:[#allocation3] sm:$0xf] %v546_v23  ;;  %v580_v33 = vld [vmem:[#allocation2] sm:$0xf] }
  0x3e   : > { %1725 = vmatpush.bf16.msra.mxu1 %v4693_v10  ;;  %4871 = vmatpush.bf16.msra.mxu3 %v4693_v10  ;;  %v449_v31 = vshrl.u32 %v412_v24, 16  ;;  %v452_v32 = vshll.u32 %v412_v24, 16  ;;  %370 = vst [vmem:[#allocation2 + $0xc] sm:$0x1] %v369_v30  ;;  %v581_v37 = vld [vmem:[#allocation2 + $0x4] sm:$0x1] }
  0x3f   : > { %v5311_v34 = vrot.slane %v441_v27, 7  ;;  %v417_v35 = vshrl.u32 %v408_v29, 16  ;;  %v420_v36 = vshll.u32 %v408_v29, 16  ;;  %v604_v38 = vshrl.u32 %v580_v33, 16  ;;  %v4691_v44 = vld [vmem:[#allocation7 + $0x58] sm:$0xff]  ;;  %v397_v54 = vld [vmem:[%s5279_s13 + $0x28] sm:$0xff] }
  0x40   : > { %v5313_v39 = vrot.slane %v449_v31, 7  ;;  %vm601_vm8 = vsmask.f32 7440  ;;  %v607_v41 = vshll.u32 %v580_v33, 16  ;;  %v613_v42 = vshll.u32 %v581_v37, 16  ;;  %v4682_v55 = vld [vmem:[#allocation7 + $0x10] sm:$0xff] }
  0x41   : > { %4864 = vmatpush.bf16.msra.mxu2 %v4684_v19  ;;  %1697 = vmatpush.bf16.msra.mxu0 %v4684_v19  ;;  %v446_v45 = vor.u32 %v444_v28, %v5311_v34  ;;  %v516_v46 = vld [vmem:[#allocation2 + $0x20] sm:$0xf]  ;;  %v419_v47 = vrot.slane %v417_v35, 7  ;;  %v606_v48 = vrot.slane %v604_v38, 4  ;;  %v522_v50 = vld [vmem:[#allocation2 + $0x28] sm:$0xf]  ;;  %vm5334_vm9 = vmor %vm600_vm6, %vm601_vm8 }
  0x42   : > { %1726 = vmatpush.bf16.msra.mxu1 %v4692_v26  ;;  %4872 = vmatpush.bf16.msra.mxu3 %v4692_v26  ;;  %v454_v49 = vor.u32 %v452_v32, %v5313_v39  ;;  %v2099_v51 = vld [vmem:[#allocation2] sm:$0xf]  ;;  %v609_v52 = vrot.slane %v607_v41, 5  ;;  %v377_v53 = vld [vmem:[#allocation2 + $0x24] sm:$0x1]  ;;  %v615_v60 = vrot.slane %v613_v42, 5 }
  0x43   : > { %v517_v56 = vsel %vm5317_vm7, %v446_v45, %v516_v46  ;;  %v422_v57 = vor.u32 %v420_v36, %v419_v47  ;;  %v423_v58 = vrot.slane %v419_v47, 4  ;;  %v498_v59 = vld [vmem:[#allocation2 + $0x8] sm:$0xf]  ;;  %v2133_v61 = vld [vmem:[#allocation2] sm:$0xf]  ;;  %v5342_v10 = vld [vmem:[%s5279_s13 + $0x8] sm:$0xff] }
  0x44   : > { %v4690_v62 = vld [vmem:[#allocation7 + $0x50] sm:$0xff]  ;;  %518 = vst [vmem:[#allocation2 + $0x20] sm:$0xf] %v517_v56  ;;  %v523_v63 = vsel %vm5317_vm7, %v454_v49, %v522_v50  ;;  %v5328_v0 = vld [vmem:[#allocation3] sm:$0xf]  ;;  %v610_v1 = vor.u32 %v609_v52, %v606_v48  ;;  %v2154_v7 = vshrl.u32 %v2133_v61, 16 }
  0x45   : > { %v2134_v2 = vld [vmem:[#allocation2 + $0x4] sm:$0x1]  ;;  %4865 = vmatpush.bf16.msra.mxu2 %v4683_v43  ;;  %1698 = vmatpush.bf16.msra.mxu0 %v4683_v43  ;;  %524 = vst [vmem:[#allocation2 + $0x28] sm:$0xf] %v523_v63  ;;  %v499_v3 = vsel %vm5317_vm7, %v422_v57, %v498_v59  ;;  %v501_v4 = vld [vmem:[#allocation2 + $0xc] sm:$0x1] }
  0x46   : > { %v2157_v8 = vshll.u32 %v2133_v61, 16  ;;  %v5339_v9 = vld [vmem:[%s5279_s13 + $0x30] sm:$0xff]  ;;  %1727 = vmatpush.bf16.msra.mxu1 %v4691_v44  ;;  %4873 = vmatpush.bf16.msra.mxu3 %v4691_v44  ;;  %500 = vst [vmem:[#allocation2 + $0x8] sm:$0xf] %v499_v3  ;;  %v502_v11 = vsel %vm5290_vm2, %v423_v58, %v501_v4  ;;  %v611_v12 = vrot.slane %v610_v1, 4  ;;  %v2163_v13 = vshll.u32 %v2134_v2, 16 }
  0x47   : > { %v380_v14 = vld [vmem:[#allocation2 + $0x2c] sm:$0x1]  ;;  %2109 = vst [vmem:[#allocation3] sm:$0xf] %v2099_v51  ;;  %v2156_v15 = vrot.slane %v2154_v7, 4  ;;  %v378_v17 = vsel %vm5303_vm5, 0, %v377_v53 }
  0x48   : > { %v2159_v16 = vrot.slane %v2157_v8, 5  ;;  %v405_v19 = vmax.f32 %v397_v54, 0.0  ;;  %503 = vst [vmem:[#allocation2 + $0xc] sm:$0x1] %v502_v11  ;;  %v616_v20 = vsel %vm5334_vm9, %v611_v12, %v615_v60  ;;  %v381_v21 = vsel %vm5303_vm5, 0, %v380_v14  ;;  %v4681_v22 = vld [vmem:[#allocation7 + $0x8] sm:$0xff] }
  0x49   : > { %4866 = vmatpush.bf16.msra.mxu2 %v4682_v55  ;;  %1699 = vmatpush.bf16.msra.mxu0 %v4682_v55  ;;  %v4689_v23 = vld [vmem:[#allocation7 + $0x48] sm:$0xff]  ;;  %v447_v24 = vrot.slane %v5311_v34, 4  ;;  %723 = vst [vmem:[#allocation3 + $0x4] sm:$0xf] %v616_v20  ;;  %v455_v27 = vrot.slane %v5313_v39, 4  ;;  %v2165_v28 = vrot.slane %v2163_v13, 5 }
  0x4a   : > { %v2160_v25 = vor.u32 %v2159_v16, %v2156_v15  ;;  %v5353_v26 = vpack.c.bf16 %v405_v19, %v405_v19  ;;  %1728 = vmatpush.bf16.msra.mxu1 %v4690_v62  ;;  %4874 = vmatpush.bf16.msra.mxu3 %v4690_v62  ;;  %379 = vst [vmem:[#allocation2 + $0x24] sm:$0x1] %v378_v17  ;;  %v406_v29 = vmax.f32 %v5339_v9, 0.0  ;;  %v401_v30 = vmax.f32 %v5342_v10, 0.0  ;;  %v4680_v31 = vld [vmem:[#allocation7] sm:$0xff]  ;;  %v4703_v36 = vld [vmem:[#allocation7 + $0xb8] sm:$0xff] }
  0x4b   : > { %v550_v32 = vld [vmem:[#allocation2 + $0x20] sm:$0xf]  ;;  %382 = vst [vmem:[#allocation2 + $0x2c] sm:$0x1] %v381_v21  ;;  %v4688_v37 = vld [vmem:[#allocation7 + $0x40] sm:$0xff]  ;;  %v4711_v12 = vld [vmem:[#allocation7 + $0xf8] sm:$0xff] }
  0x4c   : > { %v2161_v33 = vrot.slane %v2160_v25, 4  ;;  %v457_v34 = vshrl.u32 %v5353_v26, 16  ;;  %v551_v35 = vld [vmem:[#allocation2 + $0x28] sm:$0xf]  ;;  %560 = vst [vmem:[#allocation3 + $0x90] sm:$0xf] %v550_v32  ;;  %v5367_v9 = vpack.c.bf16 %v406_v29, %v406_v29  ;;  %v409_v29 = vpack.c.bf16 %v401_v30, %v401_v30 }
  0x4d   : > { %v588_v38 = vld [vmem:[#allocation2 + $0x20] sm:$0xf]  ;;  %4867 = vmatpush.bf16.msra.mxu2 %v4681_v22  ;;  %1700 = vmatpush.bf16.msra.mxu0 %v4681_v22  ;;  %561 = vst [vmem:[#allocation3 + $0xb4] sm:$0xf] %v551_v35  ;;  %v547_v39 = vld [vmem:[#allocation2 + $0x8] sm:$0xf] }
  0x4e   : > { %v582_v41 = vld [vmem:[#allocation2 + $0x8] sm:$0xf]  ;;  %1729 = vmatpush.bf16.msra.mxu1 %v4689_v23  ;;  %4875 = vmatpush.bf16.msra.mxu3 %v4689_v23  ;;  %567 = vst [vmem:[#allocation3 + $0x78] sm:$0xf] %v550_v32  ;;  %v660_v46 = vshrl.u32 %v588_v38, 16  ;;  %v663_v47 = vshll.u32 %v588_v38, 16  ;;  %v2166_v55 = vsel %vm5334_vm9, %v2161_v33, %v2165_v28 }
  0x4f   : > { %v618_v42 = vshrl.u32 %v582_v41, 16  ;;  %v621_v43 = vshll.u32 %v582_v41, 16  ;;  %v590_v44 = vld [vmem:[#allocation2 + $0x28] sm:$0xf]  ;;  %568 = vst [vmem:[#allocation3 + $0x9c] sm:$0xf] %v551_v35 }
  0x50   : > { %v583_v45 = vld [vmem:[#allocation2 + $0xc] sm:$0x1]  ;;  %574 = vst [vmem:[#allocation3 + $0x60] sm:$0xf] %v550_v32  ;;  %v674_v51 = vshrl.u32 %v590_v44, 16  ;;  %v4702_v52 = vld [vmem:[#allocation7 + $0xb0] sm:$0xff] }
  0x51   : > { %v620_v48 = vrot.slane %v618_v42, 4  ;;  %v623_v49 = vrot.slane %v621_v43, 5  ;;  %v627_v50 = vshll.u32 %v583_v45, 16  ;;  %v357_v53 = vld [vmem:[#allocation2 + $0x30] sm:$0x1]  ;;  %4868 = vmatpush.bf16.msra.mxu2 %v4680_v31  ;;  %1701 = vmatpush.bf16.msra.mxu0 %v4680_v31  ;;  %v662_v61 = vrot.slane %v660_v46, 4 }
  0x52   : > { %575 = vst [vmem:[#allocation3 + $0x84] sm:$0xf] %v551_v35  ;;  %v5359_v54 = vld [vmem:[#allocation3 + $0x4] sm:$0xf]  ;;  %v519_v56 = vld [vmem:[#allocation2 + $0x24] sm:$0x1]  ;;  %1730 = vmatpush.bf16.msra.mxu1 %v4688_v37  ;;  %4876 = vmatpush.bf16.msra.mxu3 %v4688_v37 }
  0x53   : > { %557 = vst [vmem:[#allocation3 + $0x24] sm:$0xf] %v547_v39  ;;  %v624_v57 = vor.u32 %v623_v49, %v620_v48  ;;  %v629_v58 = vrot.slane %v627_v50, 5  ;;  %v520_v59 = vsel %vm5290_vm2, %v447_v24, %v519_v56  ;;  %v525_v60 = vld [vmem:[#allocation2 + $0x2c] sm:$0x1]  ;;  %v665_v2 = vrot.slane %v663_v47, 5 }
  0x54   : > { %v360_v62 = vld [vmem:[#allocation2 + $0x38] sm:$0x1]  ;;  %v3836_v63 = vld [vmem:[#allocation3 + $0x90] sm:$0xf]  ;;  %564 = vst [vmem:[#allocation3 + $0xc] sm:$0xf] %v547_v39  ;;  %v526_v1 = vsel %vm5290_vm2, %v455_v27, %v525_v60 }
  0x55   : > { %1752 = vmatpush.bf16.msrb.mxu2 %v4703_v36  ;;  %v676_v3 = vrot.slane %v674_v51, 4  ;;  %v4666_v4 = vld [vmem:[#allocation3 + $0xb0] sm:$0xf0]  ;;  %v625_v7 = vrot.slane %v624_v57, 4  ;;  %2273 = vst [vmem:[#allocation3 + $0x4] sm:$0xf] %v2166_v55  ;;  %v666_v17 = vor.u32 %v665_v2, %v662_v61 }
  0x56   : > { %v677_v8 = vshll.u32 %v590_v44, 16  ;;  %v3837_v11 = vor.u32 %v4666_v4, %v3836_v63  ;;  %521 = vst [vmem:[#allocation2 + $0x24] sm:$0x1] %v520_v59  ;;  %v4719_v13 = vld [vmem:[#allocation7 + $0x138] sm:$0xff]  ;;  %v358_v14 = vsel %vm5290_vm2, 0, %v357_v53  ;;  %v394_v15 = vld [vmem:[%s5279_s13 + $0x10] sm:$0xff]  ;;  %1781 = vmatpush.bf16.msrb.mxu3 %v4711_v12 }
  0x57   : > { %v630_v16 = vsel %vm5334_vm9, %v625_v7, %v629_v58  ;;  %527 = vst [vmem:[#allocation2 + $0x2c] sm:$0x1] %v526_v1  ;;  %v4701_v20 = vld [vmem:[#allocation7 + $0xa8] sm:$0xff]  ;;  %v345_v21 = vld [vmem:[#allocation2 + $0x10] sm:$0x1]  ;;  %v4710_v22 = vld [vmem:[#allocation7 + $0xf0] sm:$0xff]  ;;  %1810 = vmatpush.bf16.msrb.mxu0 %v4719_v13 }
  0x58   : > { %v679_v19 = vrot.slane %v677_v8, 5  ;;  %1712 = vmatmul.bf16.vlgmr.msra.gmra.mxu2 %v3837_v11  ;;  %724 = vst [vmem:[#allocation3 + $0x28] sm:$0xf] %v630_v16  ;;  %v361_v23 = vsel %vm5290_vm2, 0, %v360_v62  ;;  %v4718_v25 = vld [vmem:[#allocation7 + $0x130] sm:$0xff]  ;;  %v5378_v27 = vrot.slane %v457_v34, 7 }
  0x59   : > { %1753 = vmatpush.bf16.msrb.mxu2 %v4702_v52  ;;  %746 = vst [vmem:[#allocation3 + $0x10] sm:$0xf] %v630_v16  ;;  %v465_v28 = vshrl.u32 %v5367_v9, 16  ;;  %v346_v32 = vsel %vm5290_vm2, 0, %v345_v21  ;;  %v402_v33 = vmax.f32 %v394_v15, 0.0  ;;  %v667_v36 = vrot.slane %v666_v17, 4 }
  0x5a   : > { %v680_v24 = vor.u32 %v679_v19, %v676_v3  ;;  %v4648_v31 = vld [vmem:[#allocation3 + $0x20] sm:$0xf0]  ;;  %359 = vst [vmem:[#allocation2 + $0x30] sm:$0x1] %v358_v14  ;;  %v348_v34 = vld [vmem:[#allocation2 + $0x18] sm:$0x1]  ;;  %1782 = vmatpush.bf16.msrb.mxu3 %v4710_v22 }
  0x5b   : > { %v3765_v35 = vor.u32 %v4648_v31, %v5328_v0  ;;  %v4700_v37 = vld [vmem:[#allocation7 + $0xa0] sm:$0xff]  ;;  %362 = vst [vmem:[#allocation2 + $0x38] sm:$0x1] %v361_v23  ;;  %v4709_v38 = vld [vmem:[#allocation7 + $0xe8] sm:$0xff]  ;;  %v4727_v41 = vld [vmem:[#allocation7 + $0x178] sm:$0xff]  ;;  %v349_v10 = vsel %vm5290_vm2, 0, %v348_v34  ;;  %v410_v30 = vpack.c.bf16 %v402_v33, %v402_v33  ;;  %1811 = vmatpush.bf16.msrb.mxu0 %v4718_v25 }
  0x5c   : > { %v4717_v39 = vld [vmem:[#allocation7 + $0x128] sm:$0xff]  ;;  %347 = vst [vmem:[#allocation2 + $0x10] sm:$0x1] %v346_v32  ;;  %v681_v43 = vrot.slane %v680_v24, 4  ;;  %v460_v44 = vshll.u32 %v5353_v26, 16  ;;  %v468_v0 = vshll.u32 %v5367_v9, 16  ;;  %1839 = vmatpush.bf16.msrb.mxu1 %v4727_v41 }
  0x5d   : > { %1754 = vmatpush.bf16.msrb.mxu2 %v4701_v20  ;;  %1702 = vmatmul.bf16.vlgmr.msra.gmra.mxu0 %v3765_v35  ;;  %v589_v42 = vld [vmem:[#allocation2 + $0x24] sm:$0x1]  ;;  %v425_v45 = vshrl.u32 %v409_v29, 16  ;;  %v5391_v48 = vrot.slane %v465_v28, 7  ;;  %350 = vst [vmem:[#allocation2 + $0x18] sm:$0x1] %v349_v10 }
  0x5e   : > { %v591_v46 = vld [vmem:[#allocation2 + $0x2c] sm:$0x1]  ;;  %v669_v47 = vshll.u32 %v589_v42, 16  ;;  %v4726_v52 = vld [vmem:[#allocation7 + $0x170] sm:$0xff]  ;;  %v433_v53 = vshrl.u32 %v410_v30, 16  ;;  %1783 = vmatpush.bf16.msrb.mxu3 %v4709_v38  ;;  %v4708_v26 = vld [vmem:[#allocation7 + $0xe0] sm:$0xff]  ;;  %v462_v63 = vor.u32 %v460_v44, %v5378_v27 }
  0x5f   : > { %v3766_v49 = vld [vmem:[#allocation3 + $0x24] sm:$0xf0]  ;;  %v683_v50 = vshll.u32 %v591_v46, 16  ;;  %v4699_v51 = vld [vmem:[#allocation7 + $0x98] sm:$0xff]  ;;  %v5394_v57 = vrot.slane %v425_v45, 7  ;;  %v428_v58 = vshll.u32 %v409_v29, 16  ;;  %1812 = vmatpush.bf16.msrb.mxu0 %v4717_v39  ;;  %v470_v2 = vor.u32 %v468_v0, %v5391_v48 }
  0x60   : > { %v3769_v55 = vor.u32 %v5359_v54, %v3766_v49  ;;  %v671_v56 = vrot.slane %v669_v47, 5  ;;  %v5396_v60 = vrot.slane %v433_v53, 7  ;;  %v436_v61 = vshll.u32 %v410_v30, 16  ;;  %v4716_v1 = vld [vmem:[#allocation7 + $0x120] sm:$0xff]  ;;  %1840 = vmatpush.bf16.msrb.mxu1 %v4726_v52  ;;  %v374_v16 = vld [vmem:[#allocation2 + $0x1c] sm:$0x1] }
  0x61   : > { %1755 = vmatpush.bf16.msrb.mxu2 %v4700_v37  ;;  %v685_v59 = vrot.slane %v683_v50, 5  ;;  %v528_v3 = vld [vmem:[#allocation2 + $0x30] sm:$0xf]  ;;  %v430_v7 = vor.u32 %v428_v58, %v5394_v57  ;;  %v371_v13 = vld [vmem:[#allocation2 + $0x14] sm:$0x1]  ;;  %v375_v24 = vsel %vm5303_vm5, 0, %v374_v16 }
  0x62   : > { %1731 = vmatmul.bf16.vlgmr.msra.gmra.mxu1 %v3769_v55  ;;  %v672_v62 = vsel %vm5334_vm9, %v667_v36, %v671_v56  ;;  %v534_v4 = vld [vmem:[#allocation2 + $0x38] sm:$0xf]  ;;  %1784 = vmatpush.bf16.msrb.mxu3 %v4708_v26  ;;  %v438_v8 = vor.u32 %v436_v61, %v5396_v60  ;;  %v529_v11 = vsel %vm5317_vm7, %v462_v63, %v528_v3  ;;  %v372_v19 = vsel %vm5303_vm5, 0, %v371_v13  ;;  %v383_v20 = vld [vmem:[#allocation2 + $0x34] sm:$0x1]  ;;  %s4860_s19 = sshll.u32 %s5199_s28, 6 }
  0x63   : > { %v686_v54 = vsel %vm5334_vm9, %v681_v43, %v685_v59  ;;  %727 = vst [vmem:[#allocation3 + $0x94] sm:$0xf] %v672_v62  ;;  %v504_v9 = vld [vmem:[#allocation2 + $0x10] sm:$0xf]  ;;  %1813 = vmatpush.bf16.msrb.mxu0 %v4716_v1  ;;  %v535_v14 = vsel %vm5317_vm7, %v470_v2, %v534_v4  ;;  %v386_v22 = vld [vmem:[#allocation2 + $0x3c] sm:$0x1]  ;;  %s3643_s21 = scalar_lea.hbm %s5843_s7, %s4860_s19 }
  0x64   : > { %728 = vst [vmem:[#allocation3 + $0xb8] sm:$0xf] %v686_v54  ;;  %v510_v12 = vld [vmem:[#allocation2 + $0x18] sm:$0xf]  ;;  %v505_v15 = vsel %vm5317_vm7, %v430_v7, %v504_v9  ;;  %v384_v28 = vsel %vm5303_vm5, 0, %v383_v20  ;;  %v387_v29 = vsel %vm5303_vm5, 0, %v386_v22 }
  0x65   : > { %1756 = vmatpush.bf16.msrb.mxu2 %v4699_v51  ;;  %749 = vst [vmem:[#allocation3 + $0x7c] sm:$0xf] %v672_v62  ;;  %v511_v17 = vsel %vm5317_vm7, %v438_v8, %v510_v12  ;;  %v463_v32 = vrot.slane %v5378_v27, 4  ;;  %v471_v33 = vrot.slane %v5391_v48, 4  ;;  %v431_v36 = vrot.slane %v5394_v57, 4  ;;  %v4698_v57 = vld [vmem:[#allocation7 + $0x90] sm:$0xff] }
  0x66   : > { %750 = vst [vmem:[#allocation3 + $0xa0] sm:$0xf] %v686_v54  ;;  %v439_v37 = vrot.slane %v5396_v60, 4  ;;  %v4715_v2 = vld [vmem:[#allocation7 + $0x118] sm:$0xff]  ;;  %v4725_v3 = vld [vmem:[#allocation7 + $0x168] sm:$0xff]  ;;  %v4706_v8 = vld [vmem:[#allocation7 + $0xd0] sm:$0xff] }
  0x67   : > { %771 = vst [vmem:[#allocation3 + $0x64] sm:$0xf] %v672_v62  ;;  %v4707_v62 = vld [vmem:[#allocation7 + $0xd8] sm:$0xff]  ;;  %v4697_v7 = vld [vmem:[#allocation7 + $0x88] sm:$0xff]  ;;  %vm813_vm10 = vcmask 1042432   ;;  %vm814_vm11 = vcmask 1046532   ;;  %1814 = vmatpush.bf16.msrb.mxu0 %v4715_v2  ;;  %1841 = vmatpush.bf16.msrb.mxu1 %v4725_v3 }
  0x68   : > { %772 = vst [vmem:[#allocation3 + $0x88] sm:$0xf] %v686_v54  ;;  %1785 = vmatpush.bf16.msrb.mxu3 %v4707_v62  ;;  %v4724_v12 = vld [vmem:[#allocation7 + $0x160] sm:$0xff]  ;;  %v777_v22 = vld [vmem:[#allocation2] sm:$0xe]  ;;  %vm5448_vm12 = vmor %vm813_vm10, %vm814_vm11  ;;  %vm3563_vm14 = vcmask 64512  }
  0x69   : > { %530 = vst [vmem:[#allocation2 + $0x30] sm:$0xf] %v529_v11  ;;  %1757 = vmatpush.bf16.msrb.mxu2 %v4698_v57  ;;  %v4742_v3 = vld [vmem:[#allocation7 + $0x1f0] sm:$0xff]  ;;  %v4820_v5 = vld [vmem:[#allocation9 + $0x100] sm:$0xff]  ;;  %v4853_v6 = vld [vmem:[#allocation9 + $0x208] sm:$0xff]  ;;  %s331_s23 = scalar_lea.vmem [#allocation10], %s3748_s29 }
  0x6a   : > { %v4662_v21 = vld [vmem:[#allocation3 + $0x94] sm:$0xf]  ;;  %536 = vst [vmem:[#allocation2 + $0x38] sm:$0xf] %v535_v14  ;;  %s3644_s15 = sshll.u32 %s331_s23, 4  ;;  %s3646_s16 = sshll.u32 %s3643_s21, 4  ;;  %s3645_s15 = int_to_ptr.vmem [resolvable:$true] %s3644_s15  ;;  %s3647_s16 = int_to_ptr.hbm [resolvable:$true] %s3646_s16 }
  0x6b   : > { %v3838_v23 = vld [vmem:[#allocation3 + $0xb4] sm:$0xf0]  ;;  %506 = vst [vmem:[#allocation2 + $0x10] sm:$0xf] %v505_v15  ;;  %v4714_v14 = vld [vmem:[#allocation7 + $0x110] sm:$0xff]  ;;  %v4696_v15 = vld [vmem:[#allocation7 + $0x80] sm:$0xff]  ;;  %1842 = vmatpush.bf16.msrb.mxu1 %v4724_v12 }
  0x6c   : > { %v3841_v25 = vor.u32 %v4662_v21, %v3838_v23  ;;  %512 = vst [vmem:[#allocation2 + $0x18] sm:$0xf] %v511_v17  ;;  %v4705_v21 = vld [vmem:[#allocation7 + $0xc8] sm:$0xff]  ;;  %1786 = vmatpush.bf16.msrb.mxu3 %v4706_v8  ;;  %1815 = vmatpush.bf16.msrb.mxu0 %v4714_v14  ;;  %v4751_v8 = vld [vmem:[#allocation7 + $0x238] sm:$0xff]  ;;  %s3632_s29 = scalar_lea.sflag [#allocation6], %s5273_s14  ;;  %s5070_s17 = sshra.s32 %s3647_s16, 4  ;;  %s5071_s17 = int_to_ptr.hbm [resolvable:$true] %s5070_s17 }
  0x6d   : > { %373 = vst [vmem:[#allocation2 + $0x14] sm:$0x1] %v372_v19  ;;  %1758 = vmatpush.bf16.msrb.mxu2 %v4697_v7  ;;  %s5072_s11 = scalar_lea.hbm %s5071_s17, 64  ;;  %p5077_p2 = scmp.lt.s32.totalorder %s5071_s17, %s5843_s7 }
  0x6e   : > { %1741 = vmatmul.bf16.vlgmr.msra.gmra.mxu3 %v3841_v25  ;;  %376 = vst [vmem:[#allocation2 + $0x1c] sm:$0x1] %v375_v24  ;;  %v778_v24 = vld [vmem:[#allocation2 + $0x4] sm:$0x1]  ;;  %v779_v25 = vld [vmem:[#allocation2 + $0x8] sm:$0xe]  ;;  %p5073_p1 = scmp.ne.s32.totalorder %s5071_s17, %s5072_s11 }
  0x6f   : > { %385 = vst [vmem:[#allocation2 + $0x34] sm:$0x1] %v384_v28  ;;  %v780_v28 = vld [vmem:[#allocation2 + $0xc] sm:$0x1] }
  0x70   : > { %v552_v31 = vld [vmem:[#allocation2 + $0x30] sm:$0xf]  ;;  %388 = vst [vmem:[#allocation2 + $0x3c] sm:$0x1] %v387_v29  ;;  %v3752_v29 = vrot.slane %v777_v22, 9  ;;  %1787 = vmatpush.bf16.msrb.mxu3 %v4705_v21  ;;  %p5074_p4 = pnand %p5073_p1, %p5243_p0 }
  0x71   : > { %v553_v35 = vld [vmem:[#allocation2 + $0x38] sm:$0xf]  ;;  %562 = vst [vmem:[#allocation3 + $0xd8] sm:$0xf] %v552_v31  ;;  %v592_v39 = vld [vmem:[#allocation2 + $0x30] sm:$0xf]  ;;  %1759 = vmatpush.bf16.msrb.mxu2 %v4696_v15 }
  0x72   : > { %563 = vst [vmem:[#allocation3 + $0xfc] sm:$0xf] %v553_v35  ;;  %v584_v34 = vld [vmem:[#allocation2 + $0x10] sm:$0xf]  ;;  %v594_v27 = vld [vmem:[#allocation2 + $0x38] sm:$0xf]  ;;  %p5075_p8 = pneg %p5074_p4 }
  0x73   : > { %569 = vst [vmem:[#allocation3 + $0xc0] sm:$0xf] %v552_v31  ;;  %v548_v38 = vld [vmem:[#allocation2 + $0x10] sm:$0xf]  ;;  %v586_v41 = vld [vmem:[#allocation2 + $0x18] sm:$0xf] }
  0x74   : > { %570 = vst [vmem:[#allocation3 + $0xe4] sm:$0xf] %v553_v35  ;;  %v632_v10 = vshrl.u32 %v584_v34, 16  ;;  %v635_v30 = vshll.u32 %v584_v34, 16  ;;  %v549_v42 = vld [vmem:[#allocation2 + $0x18] sm:$0xf] }
  0x75   : > { %576 = vst [vmem:[#allocation3 + $0xa8] sm:$0xf] %v552_v31  ;;  %v507_v43 = vld [vmem:[#allocation2 + $0x14] sm:$0x1]  ;;  %v513_v44 = vld [vmem:[#allocation2 + $0x1c] sm:$0x1] }
  0x76   : > { %577 = vst [vmem:[#allocation3 + $0xcc] sm:$0xf] %v553_v35  ;;  %v5426_v0 = vrot.slane %v632_v10, 4  ;;  %v5428_v45 = vrot.slane %v635_v30, 5  ;;  %v646_v46 = vshrl.u32 %v586_v41, 16  ;;  %v649_v47 = vshll.u32 %v586_v41, 16 }
  0x77   : > { %558 = vst [vmem:[#allocation3 + $0x48] sm:$0xf] %v548_v38  ;;  %v688_v49 = vshrl.u32 %v592_v39, 16  ;;  %v691_v50 = vshll.u32 %v592_v39, 16  ;;  %v531_v52 = vld [vmem:[#allocation2 + $0x34] sm:$0x1]  ;;  %v508_v55 = vsel %vm5290_vm2, %v431_v36, %v507_v43  ;;  %v514_v58 = vsel %vm5290_vm2, %v439_v37, %v513_v44 }
  0x78   : > { %v3872_v48 = vld [vmem:[#allocation3 + $0xd8] sm:$0xf]  ;;  %559 = vst [vmem:[#allocation3 + $0x6c] sm:$0xf] %v549_v42  ;;  %v537_v56 = vld [vmem:[#allocation2 + $0x3c] sm:$0x1]  ;;  %v532_v63 = vsel %vm5290_vm2, %v463_v32, %v531_v52  ;;  %v638_v17 = vor.u32 %v5428_v45, %v5426_v0 }
  0x79   : > { %v4675_v51 = vld [vmem:[#allocation3 + $0xf8] sm:$0xf0]  ;;  %565 = vst [vmem:[#allocation3 + $0x30] sm:$0xf] %v548_v38  ;;  %v702_v26 = vshrl.u32 %v594_v27, 16  ;;  %v648_v59 = vrot.slane %v646_v46, 4  ;;  %v538_v4 = vsel %vm5290_vm2, %v471_v33, %v537_v56 }
  0x7a   : > { %v3873_v53 = vor.u32 %v4675_v51, %v3872_v48  ;;  %566 = vst [vmem:[#allocation3 + $0x54] sm:$0xf] %v549_v42  ;;  %v651_v60 = vrot.slane %v649_v47, 5  ;;  %v705_v61 = vshll.u32 %v594_v27, 16  ;;  %v5436_v1 = vrot.slane %v688_v49, 4  ;;  %v4723_v35 = vld [vmem:[#allocation7 + $0x158] sm:$0xff] }
  0x7b   : > { %572 = vst [vmem:[#allocation3 + $0x18] sm:$0xf] %v548_v38  ;;  %v5438_v54 = vrot.slane %v691_v50, 5  ;;  %v5442_v11 = vrot.slane %v702_v26, 4  ;;  %v818_v31 = vrot.slane %v778_v24, 5  ;;  %v3753_v32 = vrot.slane %v779_v25, 9  ;;  %1843 = vmatpush.bf16.msrb.mxu1 %v4723_v35 }
  0x7c   : > { %1717 = vmatmul.bf16.gmra.mxu2 %v3873_v53  ;;  %573 = vst [vmem:[#allocation3 + $0x3c] sm:$0xf] %v549_v42  ;;  %v652_v19 = vor.u32 %v651_v60, %v648_v59  ;;  %v707_v20 = vrot.slane %v705_v61, 5  ;;  %v822_v33 = vrot.slane %v780_v28, 5  ;;  %v4713_v36 = vld [vmem:[#allocation7 + $0x108] sm:$0xff]  ;;  %v639_v34 = vrot.slane %v638_v17, 4 }
  0x7d   : > { %509 = vst [vmem:[#allocation2 + $0x14] sm:$0x1] %v508_v55  ;;  %v819_v39 = vsel %vm5448_vm12, %v3752_v29, %v818_v31  ;;  %v4704_v10 = vld [vmem:[#allocation7 + $0xc0] sm:$0xff]  ;;  %v4735_v30 = vld [vmem:[#allocation7 + $0x1b8] sm:$0xff]  ;;  %v694_v43 = vor.u32 %v5438_v54, %v5436_v1  ;;  %v4722_v47 = vld [vmem:[#allocation7 + $0x150] sm:$0xff]  ;;  %1816 = vmatpush.bf16.msrb.mxu0 %v4713_v36 }
  0x7e   : > { %v3800_v9 = vld [vmem:[#allocation3 + $0x48] sm:$0xf]  ;;  %515 = vst [vmem:[#allocation2 + $0x1c] sm:$0x1] %v514_v58  ;;  %v653_v38 = vrot.slane %v652_v19, 4  ;;  %v823_v41 = vsel %vm5448_vm12, %v3753_v32, %v822_v33  ;;  %v4712_v44 = vld [vmem:[#allocation7 + $0x100] sm:$0xff]  ;;  %v708_v46 = vor.u32 %v707_v20, %v5442_v11  ;;  %1868 = vmatpush.bf16.msra.mxu2 %v4735_v30  ;;  %1788 = vmatpush.bf16.msrb.mxu3 %v4704_v10 }
  0x7f   : > { %v4657_v13 = vld [vmem:[#allocation3 + $0x68] sm:$0xf0]  ;;  %533 = vst [vmem:[#allocation2 + $0x34] sm:$0x1] %v532_v63  ;;  %v695_v55 = vrot.slane %v694_v43, 4  ;;  %1844 = vmatpush.bf16.msrb.mxu1 %v4722_v47  ;;  %v4743_v63 = vld [vmem:[#allocation7 + $0x1f8] sm:$0xff] }
  0x80   : > { %v3801_v16 = vor.u32 %v4657_v13, %v3800_v9  ;;  %539 = vst [vmem:[#allocation2 + $0x3c] sm:$0x1] %v538_v4  ;;  %v709_v57 = vrot.slane %v708_v46, 4  ;;  %v2327_v59 = vld [vmem:[#allocation2] sm:$0xe]  ;;  %v4721_v1 = vld [vmem:[#allocation7 + $0x148] sm:$0xff] }
  0x81   : > { %856 = vst [vmem:[#allocation3 + $0x8] sm:$0xf] %v819_v39  ;;  %v2328_v60 = vld [vmem:[#allocation2 + $0x4] sm:$0x1]  ;;  %v781_v61 = vld [vmem:[#allocation2 + $0x10] sm:$0xe]  ;;  %1817 = vmatpush.bf16.msrb.mxu0 %v4712_v44 }
  0x82   : > { %1707 = vmatmul.bf16.gmra.mxu0 %v3801_v16  ;;  %857 = vst [vmem:[#allocation3 + $0x2c] sm:$0xf] %v823_v41  ;;  %v4734_v54 = vld [vmem:[#allocation7 + $0x1b0] sm:$0xff]  ;;  %1897 = vmatpush.bf16.msra.mxu3 %v4743_v63  ;;  %v4733_v9 = vld [vmem:[#allocation7 + $0x1a8] sm:$0xff]  ;;  %v4720_v13 = vld [vmem:[#allocation7 + $0x140] sm:$0xff]  ;;  %v4194_v14 = vrot.slane %v2327_v59, 9 }
  0x83   : > { %871 = vst [vmem:[#allocation3 + $0x14] sm:$0xf] %v823_v41  ;;  %1869 = vmatpush.bf16.msra.mxu2 %v4734_v54  ;;  %1845 = vmatpush.bf16.msrb.mxu1 %v4721_v1  ;;  %v2365_v15 = vrot.slane %v2328_v60, 5  ;;  %v3754_v16 = vrot.slane %v781_v61, 9  ;;  %v783_v19 = vld [vmem:[#allocation2 + $0x18] sm:$0xe] }
  0x84   : > { %v585_v37 = vld [vmem:[#allocation2 + $0x14] sm:$0x1]  ;;  %v3780_v28 = vld [vmem:[#allocation3 + $0x10] sm:$0xf]  ;;  %v3755_v29 = vrot.slane %v783_v19, 9  ;;  %v399_v36 = vld [vmem:[%s5279_s13 + $0x38] sm:$0xff] }
  0x85   : > { %v587_v42 = vld [vmem:[#allocation2 + $0x1c] sm:$0x1]  ;;  %v641_v27 = vshll.u32 %v585_v37, 16  ;;  %v782_v62 = vld [vmem:[#allocation2 + $0x14] sm:$0x1]  ;;  %1926 = vmatpush.bf16.msra.mxu0 %v4751_v8  ;;  %v2366_v25 = vsel %vm5448_vm12, %v4194_v14, %v2365_v15 }
  0x86   : > { %v655_v0 = vshll.u32 %v587_v42, 16  ;;  %v593_v45 = vld [vmem:[#allocation2 + $0x34] sm:$0x1]  ;;  %v826_v17 = vrot.slane %v782_v62, 5  ;;  %v784_v20 = vld [vmem:[#allocation2 + $0x1c] sm:$0x1]  ;;  %1898 = vmatpush.bf16.msra.mxu3 %v4742_v3 }
  0x87   : > { %v643_v48 = vrot.slane %v641_v27, 5  ;;  %v595_v49 = vld [vmem:[#allocation2 + $0x3c] sm:$0x1]  ;;  %v697_v50 = vshll.u32 %v593_v45, 16  ;;  %1870 = vmatpush.bf16.msra.mxu2 %v4733_v9  ;;  %1846 = vmatpush.bf16.msrb.mxu1 %v4720_v13  ;;  %v830_v31 = vrot.slane %v784_v20, 5  ;;  %v407_v42 = vmax.f32 %v399_v36, 0.0 }
  0x88   : > { %v657_v51 = vrot.slane %v655_v0, 5  ;;  %v711_v52 = vshll.u32 %v595_v49, 16  ;;  %v3772_v2 = vld [vmem:[#allocation3 + $0x8] sm:$0xf]  ;;  %v827_v32 = vsel %vm5448_vm12, %v3754_v16, %v826_v17  ;;  %v786_v10 = vld [vmem:[#allocation2 + $0x24] sm:$0x1] }
  0x89   : > { %v644_v53 = vsel %vm5334_vm9, %v639_v34, %v643_v48  ;;  %v699_v56 = vrot.slane %v697_v50, 5  ;;  %v4649_v7 = vld [vmem:[#allocation3 + $0x28] sm:$0xf0]  ;;  %2403 = vst [vmem:[#allocation3 + $0x8] sm:$0xf] %v2366_v25  ;;  %v831_v34 = vsel %vm5448_vm12, %v3755_v29, %v830_v31  ;;  %v834_v43 = vrot.slane %v786_v10, 5 }
  0x8a   : > { %v658_v26 = vsel %vm5334_vm9, %v653_v38, %v657_v51  ;;  %725 = vst [vmem:[#allocation3 + $0x4c] sm:$0xf] %v644_v53  ;;  %v713_v58 = vrot.slane %v711_v52, 5  ;;  %v3773_v12 = vor.u32 %v4649_v7, %v3772_v2  ;;  %v785_v38 = vld [vmem:[#allocation2 + $0x20] sm:$0xe]  ;;  %v4741_v0 = vld [vmem:[#allocation7 + $0x1e8] sm:$0xff] }
  0x8b   : > { %726 = vst [vmem:[#allocation3 + $0x70] sm:$0xf] %v658_v26  ;;  %v700_v4 = vsel %vm5334_vm9, %v695_v55, %v699_v56  ;;  %v363_v30 = vld [vmem:[#allocation2 + $0x40] sm:$0x1]  ;;  %v3756_v27 = vrot.slane %v785_v38, 9  ;;  %v4732_v46 = vld [vmem:[#allocation7 + $0x1a0] sm:$0xff]  ;;  %1899 = vmatpush.bf16.msra.mxu3 %v4741_v0 }
  0x8c   : > { %769 = vst [vmem:[#allocation3 + $0x1c] sm:$0xf] %v644_v53  ;;  %v714_v11 = vsel %vm5334_vm9, %v709_v57, %v713_v58  ;;  %1760 = vmatmul.bf16.vlgmr.msrb.gmra.mxu2 %v3773_v12  ;;  %v787_v44 = vld [vmem:[#allocation2 + $0x28] sm:$0xe]  ;;  %v4750_v45 = vld [vmem:[#allocation7 + $0x230] sm:$0xff]  ;;  %v4740_v51 = vld [vmem:[#allocation7 + $0x1e0] sm:$0xff]  ;;  %v415_v57 = vpack.c.bf16 %v407_v42, %v407_v42 }
  0x8d   : > { %770 = vst [vmem:[#allocation3 + $0x40] sm:$0xf] %v658_v26  ;;  %v3757_v47 = vrot.slane %v787_v44, 9  ;;  %v4646_v48 = vld [vmem:[#allocation3 + $0x14] sm:$0xf]  ;;  %v835_v49 = vsel %vm5448_vm12, %v3756_v27, %v834_v43  ;;  %1927 = vmatpush.bf16.msra.mxu0 %v4750_v45  ;;  %v4749_v52 = vld [vmem:[#allocation7 + $0x228] sm:$0xff]  ;;  %1871 = vmatpush.bf16.msra.mxu2 %v4732_v46 }
  0x8e   : > { %747 = vst [vmem:[#allocation3 + $0x34] sm:$0xf] %v644_v53  ;;  %v788_v50 = vld [vmem:[#allocation2 + $0x2c] sm:$0x1]  ;;  %v389_v62 = vld [vmem:[#allocation2 + $0x44] sm:$0x1] }
  0x8f   : > { %748 = vst [vmem:[#allocation3 + $0x58] sm:$0xf] %v658_v26  ;;  %v838_v53 = vrot.slane %v788_v50, 5  ;;  %v4731_v56 = vld [vmem:[#allocation7 + $0x198] sm:$0xff]  ;;  %v364_v26 = vsel %vm5290_vm2, 0, %v363_v30  ;;  %1900 = vmatpush.bf16.msra.mxu3 %v4740_v51  ;;  %v390_v54 = vsel %vm5303_vm5, 0, %v389_v62 }
  0x90   : > { %729 = vst [vmem:[#allocation3 + $0xdc] sm:$0xf] %v700_v4  ;;  %v4659_v61 = vld [vmem:[#allocation3 + $0x78] sm:$0xf0]  ;;  %v473_v3 = vshrl.u32 %v415_v57, 16  ;;  %v4730_v29 = vld [vmem:[#allocation7 + $0x190] sm:$0xff] }
  0x91   : > { %v4653_v21 = vld [vmem:[#allocation3 + $0x4c] sm:$0xf]  ;;  %730 = vst [vmem:[#allocation3 + $0x100] sm:$0xf] %v714_v11  ;;  %v839_v60 = vsel %vm5448_vm12, %v3757_v47, %v838_v53  ;;  %1928 = vmatpush.bf16.msra.mxu0 %v4749_v52  ;;  %1872 = vmatpush.bf16.msra.mxu2 %v4731_v56  ;;  %v3774_v7 = vld [vmem:[#allocation3 + $0x2c] sm:$0xf0] }
  0x92   : > { %v3802_v22 = vld [vmem:[#allocation3 + $0x6c] sm:$0xf0]  ;;  %751 = vst [vmem:[#allocation3 + $0xc4] sm:$0xf] %v700_v4  ;;  %v475_v9 = vrot.slane %v473_v3, 7  ;;  %v4739_v25 = vld [vmem:[#allocation7 + $0x1d8] sm:$0xff] }
  0x93   : > { %v3805_v24 = vor.u32 %v4653_v21, %v3802_v22  ;;  %752 = vst [vmem:[#allocation3 + $0xe8] sm:$0xf] %v714_v11  ;;  %v789_v13 = vld [vmem:[#allocation2 + $0x30] sm:$0xe]  ;;  %v790_v14 = vld [vmem:[#allocation2 + $0x34] sm:$0x1]  ;;  %1901 = vmatpush.bf16.msra.mxu3 %v4739_v25 }
  0x94   : > { %773 = vst [vmem:[#allocation3 + $0xac] sm:$0xf] %v700_v4  ;;  %v4645_v4 = vld [vmem:[#allocation3 + $0xc] sm:$0xf]  ;;  %v3758_v15 = vrot.slane %v789_v13, 9  ;;  %v842_v18 = vrot.slane %v790_v14, 5 }
  0x95   : > { %1736 = vmatmul.bf16.gmra.mxu1 %v3805_v24  ;;  %774 = vst [vmem:[#allocation3 + $0xd0] sm:$0xf] %v714_v11  ;;  %v4650_v33 = vld [vmem:[#allocation3 + $0x30] sm:$0xf0]  ;;  %v476_v11 = vshll.u32 %v415_v57, 16  ;;  %v3777_v12 = vor.u32 %v4645_v4, %v3774_v7  ;;  %v479_v31 = vrot.slane %v475_v9, 4  ;;  %1873 = vmatpush.bf16.msra.mxu2 %v4730_v29 }
  0x96   : > { %v3781_v35 = vor.u32 %v4650_v33, %v3780_v28  ;;  %872 = vst [vmem:[#allocation3 + $0x38] sm:$0xf] %v827_v32  ;;  %v3816_v59 = vld [vmem:[#allocation3 + $0x58] sm:$0xf]  ;;  %v791_v16 = vld [vmem:[#allocation2 + $0x38] sm:$0xe]  ;;  %v843_v19 = vsel %vm5448_vm12, %v3758_v15, %v842_v18 }
  0x97   : > { %v4671_v37 = vld [vmem:[#allocation3 + $0xdc] sm:$0xf]  ;;  %858 = vst [vmem:[#allocation3 + $0x50] sm:$0xf] %v827_v32  ;;  %v3817_v8 = vor.u32 %v4659_v61, %v3816_v59  ;;  %v792_v17 = vld [vmem:[#allocation2 + $0x3c] sm:$0x1]  ;;  %v478_v22 = vor.u32 %v476_v11, %v475_v9 }
  0x98   : > { %v3874_v39 = vld [vmem:[#allocation3 + $0xfc] sm:$0xf0]  ;;  %1818 = vmatmul.bf16.vlgmr.msrb.gmra.mxu0 %v3781_v35  ;;  %886 = vst [vmem:[#allocation3 + $0x20] sm:$0xf] %v827_v32  ;;  %v3759_v20 = vrot.slane %v791_v16, 9  ;;  %v846_v21 = vrot.slane %v792_v17, 5 }
  0x99   : > { %v3877_v41 = vor.u32 %v4671_v37, %v3874_v39  ;;  %859 = vst [vmem:[#allocation3 + $0x74] sm:$0xf] %v831_v34  ;;  %v4748_v28 = vld [vmem:[#allocation7 + $0x220] sm:$0xff]  ;;  %v4747_v38 = vld [vmem:[#allocation7 + $0x218] sm:$0xff]  ;;  %v4729_v39 = vld [vmem:[#allocation7 + $0x188] sm:$0xff] }
  0x9a   : > { %887 = vst [vmem:[#allocation3 + $0x44] sm:$0xf] %v831_v34  ;;  %v847_v36 = vsel %vm5448_vm12, %v3759_v20, %v846_v21  ;;  %1929 = vmatpush.bf16.msra.mxu0 %v4748_v28  ;;  %v3852_v43 = vld [vmem:[#allocation3 + $0xa0] sm:$0xf]  ;;  %v4668_v44 = vld [vmem:[#allocation3 + $0xc0] sm:$0xf0]  ;;  %1874 = vmatpush.bf16.msra.mxu2 %v4729_v39 }
  0x9b   : > { %1746 = vmatmul.bf16.gmra.mxu3 %v3877_v41  ;;  %873 = vst [vmem:[#allocation3 + $0x5c] sm:$0xf] %v831_v34  ;;  %v4738_v34 = vld [vmem:[#allocation7 + $0x1d0] sm:$0xff]  ;;  %v3810_v45 = vld [vmem:[#allocation3 + $0x74] sm:$0xf0]  ;;  %v3853_v46 = vor.u32 %v4668_v44, %v3852_v43  ;;  %v4737_v57 = vld [vmem:[#allocation7 + $0x1c8] sm:$0xff] }
  0x9c   : > { %874 = vst [vmem:[#allocation3 + $0x80] sm:$0xf] %v835_v49  ;;  %1902 = vmatpush.bf16.msra.mxu3 %v4738_v34  ;;  %v4654_v0 = vld [vmem:[#allocation3 + $0x54] sm:$0xf]  ;;  %v4728_v59 = vld [vmem:[#allocation7 + $0x180] sm:$0xff]  ;;  %v4745_v3 = vld [vmem:[#allocation7 + $0x208] sm:$0xff] }
  0x9d   : > { %v3782_v55 = vld [vmem:[#allocation3 + $0x34] sm:$0xf0]  ;;  %860 = vst [vmem:[#allocation3 + $0x98] sm:$0xf] %v835_v49  ;;  %v3813_v47 = vor.u32 %v4654_v0, %v3810_v45  ;;  %v4744_v15 = vld [vmem:[#allocation7 + $0x200] sm:$0xff] }
  0x9e   : > { %v3808_v58 = vld [vmem:[#allocation3 + $0x50] sm:$0xf]  ;;  %888 = vst [vmem:[#allocation3 + $0x68] sm:$0xf] %v835_v49  ;;  %v3785_v63 = vor.u32 %v4646_v48, %v3782_v55  ;;  %1930 = vmatpush.bf16.msra.mxu0 %v4747_v38  ;;  %1875 = vmatpush.bf16.msra.mxu2 %v4728_v59  ;;  %v4663_v18 = vld [vmem:[#allocation3 + $0x9c] sm:$0xf] }
  0x9f   : > { %861 = vst [vmem:[#allocation3 + $0xbc] sm:$0xf] %v839_v60  ;;  %v3846_v16 = vld [vmem:[#allocation3 + $0xbc] sm:$0xf0]  ;;  %v4660_v39 = vld [vmem:[#allocation3 + $0x80] sm:$0xf0] }
  0xa0   : > { %v4658_v1 = vld [vmem:[#allocation3 + $0x70] sm:$0xf0]  ;;  %875 = vst [vmem:[#allocation3 + $0xa4] sm:$0xf] %v839_v60  ;;  %1903 = vmatpush.bf16.msra.mxu3 %v4737_v57  ;;  %v3849_v17 = vor.u32 %v4663_v18, %v3846_v16  ;;  %v3824_v38 = vld [vmem:[#allocation3 + $0x60] sm:$0xf] }
  0xa1   : > { %v3809_v2 = vor.u32 %v4658_v1, %v3808_v58  ;;  %889 = vst [vmem:[#allocation3 + $0x8c] sm:$0xf] %v839_v60  ;;  %v4746_v58 = vld [vmem:[#allocation7 + $0x210] sm:$0xff]  ;;  %v598_v44 = vld [vmem:[#allocation2 + $0x48] sm:$0xf] }
  0xa2   : > { %365 = vst [vmem:[#allocation2 + $0x40] sm:$0x1] %v364_v26  ;;  %v4655_v32 = vld [vmem:[#allocation3 + $0x5c] sm:$0xf]  ;;  %1931 = vmatpush.bf16.msra.mxu0 %v4746_v58  ;;  %v755_v45 = vshrl.u32 %v598_v44, 16 }
  0xa3   : > { %1765 = vmatmul.bf16.gmra.mxu2 %v3809_v2  ;;  %391 = vst [vmem:[#allocation2 + $0x44] sm:$0x1] %v390_v54  ;;  %v3818_v33 = vld [vmem:[#allocation3 + $0x7c] sm:$0xf0]  ;;  %v795_v57 = vld [vmem:[#allocation2 + $0x48] sm:$0xe] }
  0xa4   : > { %876 = vst [vmem:[#allocation3 + $0xc8] sm:$0xf] %v843_v19  ;;  %v3844_v35 = vld [vmem:[#allocation3 + $0x98] sm:$0xf]  ;;  %v3821_v27 = vor.u32 %v4655_v32, %v3818_v33  ;;  %v4736_v2 = vld [vmem:[#allocation7 + $0x1c0] sm:$0xff] }
  0xa5   : > { %1847 = vmatmul.bf16.vlgmr.msrb.gmra.mxu1 %v3785_v63  ;;  %862 = vst [vmem:[#allocation3 + $0xe0] sm:$0xf] %v843_v19  ;;  %1904 = vmatpush.bf16.msra.mxu3 %v4736_v2  ;;  %v4672_v32 = vld [vmem:[#allocation3 + $0xe4] sm:$0xf]  ;;  %v796_v58 = vld [vmem:[#allocation2 + $0x4c] sm:$0x1] }
  0xa6   : > { %v4667_v37 = vld [vmem:[#allocation3 + $0xb8] sm:$0xf0]  ;;  %890 = vst [vmem:[#allocation3 + $0xb0] sm:$0xf] %v843_v19  ;;  %1932 = vmatpush.bf16.msra.mxu0 %v4745_v3  ;;  %v3888_v19 = vld [vmem:[#allocation3 + $0xe8] sm:$0xf] }
  0xa7   : > { %863 = vst [vmem:[#allocation3 + $0x104] sm:$0xf] %v847_v36  ;;  %v3845_v42 = vor.u32 %v4667_v37, %v3844_v35  ;;  %v4664_v7 = vld [vmem:[#allocation3 + $0xa4] sm:$0xf]  ;;  %v3796_v35 = vld [vmem:[#allocation3 + $0x20] sm:$0xf] }
  0xa8   : > { %1823 = vmatmul.bf16.gmra.mxu0 %v3817_v8  ;;  %877 = vst [vmem:[#allocation3 + $0xec] sm:$0xf] %v847_v36  ;;  %v2151_v16 = vld [vmem:[#allocation2 + $0x48] sm:$0xf] }
  0xa9   : > { %v540_v24 = vld [vmem:[#allocation2 + $0x40] sm:$0xf]  ;;  %891 = vst [vmem:[#allocation3 + $0xd4] sm:$0xf] %v847_v36  ;;  %v4652_v36 = vld [vmem:[#allocation3 + $0x40] sm:$0xf0] }
  0xaa   : > { %v541_v41 = vsel %vm5317_vm7, %v478_v22, %v540_v24  ;;  %v543_v10 = vld [vmem:[#allocation2 + $0x44] sm:$0x1]  ;;  %1933 = vmatpush.bf16.msra.mxu0 %v4744_v15  ;;  %v3788_v22 = vld [vmem:[#allocation3 + $0x18] sm:$0xf]  ;;  %v4651_v24 = vld [vmem:[#allocation3 + $0x38] sm:$0xf0]  ;;  %v3797_v34 = vor.u32 %v4652_v36, %v3796_v35 }
  0xab   : > { %1789 = vmatmul.bf16.vlgmr.msrb.gmra.mxu3 %v3777_v12  ;;  %v544_v30 = vsel %vm5290_vm2, %v479_v31, %v543_v10  ;;  %542 = vst [vmem:[#allocation2 + $0x40] sm:$0xf] %v541_v41  ;;  %v3854_v8 = vld [vmem:[#allocation3 + $0xc4] sm:$0xf0]  ;;  %v3789_v29 = vor.u32 %v4651_v24, %v3788_v22  ;;  %v3825_v41 = vor.u32 %v4660_v39, %v3824_v38  ;;  %v4647_v10 = vld [vmem:[#allocation3 + $0x1c] sm:$0xf] }
  0xac   : > { %545 = vst [vmem:[#allocation2 + $0x44] sm:$0x1] %v544_v30  ;;  %v3880_v61 = vld [vmem:[#allocation3 + $0xe0] sm:$0xf]  ;;  %v3857_v13 = vor.u32 %v4664_v7, %v3854_v8  ;;  %v4656_v8 = vld [vmem:[#allocation3 + $0x64] sm:$0xf] }
  0xad   : > { %v3790_v30 = vld [vmem:[#allocation3 + $0x3c] sm:$0xf0]  ;;  %v2346_v24 = vld [vmem:[#allocation2 + $0x4c] sm:$0x1] }
  0xae   : > { %v4676_v63 = vld [vmem:[#allocation3 + $0x100] sm:$0xf0]  ;;  %v3793_v43 = vor.u32 %v4647_v10, %v3790_v30  ;;  %v4665_v10 = vld [vmem:[#allocation3 + $0xac] sm:$0xf]  ;;  %v3862_v30 = vld [vmem:[#allocation3 + $0xcc] sm:$0xf0] }
  0xaf   : > { %v3881_v12 = vor.u32 %v4676_v63, %v3880_v61  ;;  %v4673_v25 = vld [vmem:[#allocation3 + $0xec] sm:$0xf]  ;;  %v883_v61 = vrot.slane %v796_v58, 5 }
  0xb2   : > { %v554_v48 = vld [vmem:[#allocation2 + $0x40] sm:$0xf] }
  0xb3   : > { %1770 = vmatmul.bf16.gmra.mxu2 %v3845_v42  ;;  %v596_v49 = vld [vmem:[#allocation2 + $0x40] sm:$0xf]  ;;  %571 = vst [vmem:[#allocation3 + $0x108] sm:$0xf] %v554_v48  ;;  %v597_v50 = vld [vmem:[#allocation2 + $0x44] sm:$0x1] }
  0xb4   : > { %v732_v51 = vshrl.u32 %v596_v49, 16  ;;  %v735_v52 = vshll.u32 %v596_v49, 16  ;;  %578 = vst [vmem:[#allocation3 + $0xf0] sm:$0xf] %v554_v48  ;;  %v741_v53 = vshll.u32 %v597_v50, 16  ;;  %v757_v48 = vrot.slane %v755_v45, 4 }
  0xb5   : > { %1852 = vmatmul.bf16.gmra.mxu1 %v3821_v27  ;;  %v793_v55 = vld [vmem:[#allocation2 + $0x40] sm:$0xe]  ;;  %v794_v62 = vld [vmem:[#allocation2 + $0x44] sm:$0x1]  ;;  %v3832_v42 = vld [vmem:[#allocation3 + $0x68] sm:$0xf] }
  0xb6   : > { %v734_v56 = vrot.slane %v732_v51, 4  ;;  %v737_v26 = vrot.slane %v735_v52, 5  ;;  %v3760_v60 = vrot.slane %v793_v55, 9  ;;  %v743_v54 = vrot.slane %v741_v53, 5  ;;  %v4661_v27 = vld [vmem:[#allocation3 + $0x88] sm:$0xf0] }
  0xb7   : > { %v868_v4 = vrot.slane %v794_v62, 5  ;;  %v3833_v0 = vor.u32 %v4661_v27, %v3832_v42  ;;  %v3860_v51 = vld [vmem:[#allocation3 + $0xa8] sm:$0xf]  ;;  %v4669_v52 = vld [vmem:[#allocation3 + $0xc8] sm:$0xf0] }
  0xb8   : > { %1828 = vmatmul.bf16.gmra.mxu0 %v3853_v46  ;;  %v738_v1 = vor.u32 %v737_v26, %v734_v56  ;;  %v758_v46 = vshll.u32 %v598_v44, 16  ;;  %v599_v53 = vld [vmem:[#allocation2 + $0x4c] sm:$0x1]  ;;  %v3861_v63 = vor.u32 %v4669_v52, %v3860_v51  ;;  %v3865_v44 = vor.u32 %v4665_v10, %v3862_v30 }
  0xb9   : > { %v869_v11 = vsel %vm5448_vm12, %v3760_v60, %v868_v4  ;;  %v764_v26 = vshll.u32 %v599_v53, 16  ;;  %v3761_v60 = vrot.slane %v795_v57, 9  ;;  %v4791_v30 = vld [vmem:[#allocation9 + $0x18] sm:$0xff] }
  0xba   : > { %v739_v9 = vrot.slane %v738_v1, 4  ;;  %878 = vst [vmem:[#allocation3 + $0x110] sm:$0xf] %v869_v11  ;;  %v3882_v33 = vld [vmem:[#allocation3 + $0x104] sm:$0xf0]  ;;  %v760_v49 = vrot.slane %v758_v46, 5 }
  0xbb   : > { %1794 = vmatmul.bf16.gmra.mxu3 %v3813_v47  ;;  %892 = vst [vmem:[#allocation3 + $0xf8] sm:$0xf] %v869_v11  ;;  %v3885_v37 = vor.u32 %v4672_v32, %v3882_v33  ;;  %v555_v47 = vld [vmem:[#allocation2 + $0x48] sm:$0xf]  ;;  %v766_v62 = vrot.slane %v764_v26, 5 }
  0xbc   : > { %v744_v14 = vsel %vm5334_vm9, %v739_v9, %v743_v54  ;;  %579 = vst [vmem:[#allocation3 + $0x114] sm:$0xf] %v555_v47  ;;  %v761_v55 = vor.u32 %v760_v49, %v757_v48  ;;  %v2108_v1 = vld [vmem:[#allocation2 + $0x48] sm:$0xf]  ;;  %v884_v54 = vsel %vm5448_vm12, %v3761_v60, %v883_v61  ;;  %v3826_v9 = vld [vmem:[#allocation3 + $0x84] sm:$0xf0] }
  0xbd   : > { %753 = vst [vmem:[#allocation3 + $0x10c] sm:$0xf] %v744_v14  ;;  %v3868_v11 = vld [vmem:[#allocation3 + $0xb0] sm:$0xf] }
  0xbe   : > { %775 = vst [vmem:[#allocation3 + $0xf4] sm:$0xf] %v744_v14  ;;  %v762_v59 = vrot.slane %v761_v55, 4  ;;  %v3829_v14 = vor.u32 %v4656_v8, %v3826_v9 }
  0xbf   : > { %893 = vst [vmem:[#allocation3 + $0x11c] sm:$0xf] %v884_v54 }
  0xc0   : > { %v767_v3 = vsel %vm5334_vm9, %v762_v59, %v766_v62  ;;  %v4795_v62 = vld [vmem:[#allocation9 + $0x38] sm:$0xff] }
  0xc1   : > { %v3890_v28 = vld [vmem:[#allocation3 + $0x10c] sm:$0xf0]  ;;  %776 = vst [vmem:[#allocation3 + $0x118] sm:$0xf] %v767_v3  ;;  %3241 = vmatpush.bf16.msra.mxu1 %v4795_v62 }
  0xc2   : > { %v3893_v31 = vor.u32 %v4673_v25, %v3890_v28  ;;  %v3896_v28 = vld [vmem:[#allocation3 + $0xf0] sm:$0xf] }
  0xc3   : > { %1775 = vmatmul.bf16.gmra.mxu2 %v3881_v12  ;;  %v4678_v7 = vld [vmem:[#allocation3 + $0x110] sm:$0xf0] }
  0xc4   : > { %v4677_v20 = vld [vmem:[#allocation3 + $0x108] sm:$0xf0]  ;;  %2132 = vst [vmem:[#allocation3 + $0x114] sm:$0xf] %v2108_v1  ;;  %v4670_v12 = vld [vmem:[#allocation3 + $0xd0] sm:$0xf0] }
  0xc5   : > { %1857 = vmatmul.bf16.gmra.mxu1 %v3857_v13  ;;  %v3889_v21 = vor.u32 %v4677_v20, %v3888_v19  ;;  %v3869_v18 = vor.u32 %v4670_v12, %v3868_v11  ;;  %v2345_v19 = vld [vmem:[#allocation2 + $0x48] sm:$0xe]  ;;  %v2305_v20 = vshrl.u32 %v2151_v16, 16  ;;  %v4674_v49 = vld [vmem:[#allocation3 + $0xf4] sm:$0xf]  ;;  %v4793_v12 = vld [vmem:[#allocation9 + $0x28] sm:$0xff] }
  0xc6   : > { %v4203_v25 = vrot.slane %v2345_v19, 9  ;;  %v4679_v35 = vld [vmem:[#allocation3 + $0x118] sm:$0xf0]  ;;  %v4794_v3 = vld [vmem:[#allocation9 + $0x30] sm:$0xff]  ;;  %v4792_v19 = vld [vmem:[#allocation9 + $0x20] sm:$0xff] }
  0xc7   : > { %3242 = vmatpush.bf16.msra.mxu1 %v4794_v3  ;;  %v4790_v62 = vld [vmem:[#allocation9 + $0x10] sm:$0xff]  ;;  %v4816_v3 = vld [vmem:[#allocation9 + $0xe0] sm:$0xff] }
  0xc8   : > { %1833 = vmatmul.bf16.gmra.mxu0 %v3889_v21  ;;  %v2308_v21 = vshll.u32 %v2151_v16, 16  ;;  %v3898_v42 = vld [vmem:[#allocation3 + $0x114] sm:$0xf0] }
  0xc9   : > { %v3901_v51 = vor.u32 %v4674_v49, %v3898_v42  ;;  %v4808_v42 = vld [vmem:[#allocation9 + $0xa0] sm:$0xff] }
  0xca   : > { %v2310_v32 = vrot.slane %v2308_v21, 5 }
  0xcb   : > { %1799 = vmatmul.bf16.gmra.mxu3 %v3849_v17  ;;  %v2152_v17 = vld [vmem:[#allocation2 + $0x4c] sm:$0x1]  ;;  %3243 = vmatpush.bf16.msra.mxu1 %v4793_v12 }
  0xcc   : > { %v2314_v22 = vshll.u32 %v2152_v17, 16 }
  0xce   : > { %v2316_v38 = vrot.slane %v2314_v22, 5 }
  0xcf   : > { %3244 = vmatpush.bf16.msra.mxu1 %v4792_v19  ;;  %v4800_v19 = vld [vmem:[#allocation9 + $0x60] sm:$0xff] }
  0xd3   : > { %1876 = vmatmul.bf16.vlgmr.msra.gmra.mxu2 %v3789_v29  ;;  %v2430_v29 = vrot.slane %v2346_v24, 5  ;;  %3245 = vmatpush.bf16.msra.mxu1 %v4791_v30  ;;  %v4788_v30 = vld [vmem:[#allocation9] sm:$0xff] }
  0xd5   : > { %1862 = vmatmul.bf16.gmra.mxu1 %v3893_v31  ;;  %v2307_v31 = vrot.slane %v2305_v20, 4  ;;  %v2431_v36 = vsel %vm5448_vm12, %v4203_v25, %v2430_v29  ;;  %v4811_v25 = vld [vmem:[#allocation9 + $0xb8] sm:$0xff]  ;;  %v4810_v29 = vld [vmem:[#allocation9 + $0xb0] sm:$0xff] }
  0xd6   : > { %2440 = vst [vmem:[#allocation3 + $0x11c] sm:$0xf] %v2431_v36  ;;  %3299 = vmatpush.bf16.msrb.mxu3 %v4811_v25  ;;  %v4806_v25 = vld [vmem:[#allocation9 + $0x90] sm:$0xff] }
  0xd7   : > { %3246 = vmatpush.bf16.msra.mxu1 %v4790_v62 }
  0xd8   : > { %1934 = vmatmul.bf16.vlgmr.msra.gmra.mxu0 %v3797_v34  ;;  %v2311_v34 = vor.u32 %v2310_v32, %v2307_v31  ;;  %v4819_v32 = vld [vmem:[#allocation9 + $0xf8] sm:$0xff] }
  0xd9   : > { %3328 = vmatpush.bf16.msrb.mxu0 %v4819_v32 }
  0xda   : > { %v5494_v56 = vpop.f32.mrf.mxu0  ;;  %3300 = vmatpush.bf16.msrb.mxu3 %v4810_v29  ;;  %v4789_v29 = vld [vmem:[#allocation9 + $0x8] sm:$0xff] }
  0xdb   : > { %1804 = vmatmul.bf16.gmra.mxu3 %v3885_v37  ;;  %v1713_v50 = vpop.f32.mrf.mxu2  ;;  %v3897_v37 = vor.u32 %v4678_v7, %v3896_v28  ;;  %3247 = vmatpush.bf16.msra.mxu1 %v4789_v29  ;;  %v4812_v29 = vld [vmem:[#allocation9 + $0xc0] sm:$0xff] }
  0xdf   : > { %v1732_v1 = vpop.f32.mrf.mxu1  ;;  %3248 = vmatpush.bf16.msra.mxu1 %v4788_v30  ;;  %v2054_v30 = vld [vmem:[#allocation2 + $0xc] sm:$0x1] }
  0xe0   : > { %v1733_v10 = vadd.f32 %v1732_v1, %v5494_v56 }
  0xe2   : > { %v5504_v15 = vpop.f32.mrf.mxu0 }
  0xe3   : > { %1881 = vmatmul.bf16.gmra.mxu2 %v3825_v41  ;;  %v5502_v13 = vpop.f32.mrf.mxu2  ;;  %v2312_v41 = vrot.slane %v2311_v34, 4  ;;  %v4818_v34 = vld [vmem:[#allocation9 + $0xf0] sm:$0xff] }
  0xe4   : > { %3329 = vmatpush.bf16.msrb.mxu0 %v4818_v34 }
  0xe5   : > { %v2317_v27 = vsel %vm5334_vm9, %v2312_v41, %v2316_v38  ;;  %v4802_v38 = vld [vmem:[#allocation9 + $0x70] sm:$0xff] }
  0xe6   : > { %2326 = vst [vmem:[#allocation3 + $0x118] sm:$0xf] %v2317_v27  ;;  %v4817_v27 = vld [vmem:[#allocation9 + $0xe8] sm:$0xff] }
  0xe7   : > { %v1734_v8 = vpop.f32.mrf.mxu1 }
  0xe8   : > { %1939 = vmatmul.bf16.gmra.mxu0 %v3833_v0 }
  0xe9   : > { %3330 = vmatpush.bf16.msrb.mxu0 %v4817_v27 }
  0xeb   : > { %1905 = vmatmul.bf16.vlgmr.msra.gmra.mxu3 %v3793_v43  ;;  %v3904_v43 = vld [vmem:[#allocation3 + $0xf8] sm:$0xf] }
  0xec   : > { %v3905_v0 = vor.u32 %v4679_v35, %v3904_v43  ;;  %v4803_v35 = vld [vmem:[#allocation9 + $0x78] sm:$0xff] }
  0xed   : > { %3270 = vmatpush.bf16.msrb.mxu2 %v4803_v35  ;;  %3331 = vmatpush.bf16.msrb.mxu0 %v4816_v3  ;;  %v4799_v35 = vld [vmem:[#allocation9 + $0x58] sm:$0xff] }
  0xf1   : > { %v1742_v2 = vpop.f32.mrf.mxu3  ;;  %3271 = vmatpush.bf16.msrb.mxu2 %v4802_v38  ;;  %v4805_v38 = vld [vmem:[#allocation9 + $0x88] sm:$0xff] }
  0xf2   : > { %v5500_v4 = vadd.f32 %v1742_v2, %v1713_v50 }
  0xf3   : > { %1886 = vmatmul.bf16.gmra.mxu2 %v3861_v63 }
  0xf8   : > { %1944 = vmatmul.bf16.gmra.mxu0 %v3869_v18 }
  0xf9   : > { %v5516_v48 = vpop.f32.mrf.mxu3 }
  0xfb   : > { %1910 = vmatmul.bf16.gmra.mxu3 %v3829_v14 }
  0xff   : > { %v1718_v33 = vpop.f32.mrf.mxu2  ;;  %v5508_v39 = vpop.f32.mrf.mxu0 }
 0x103   : > { %1891 = vmatmul.bf16.gmra.mxu2 %v3897_v37  ;;  %v4809_v37 = vld [vmem:[#allocation9 + $0xa8] sm:$0xff] }
 0x104   : > { %3301 = vmatpush.bf16.msrb.mxu3 %v4809_v37 }
 0x107   : > { %v5512_v45 = vpop.f32.mrf.mxu2  ;;  %v5514_v46 = vpop.f32.mrf.mxu0 }
 0x108   : > { %1949 = vmatmul.bf16.gmra.mxu0 %v3905_v0  ;;  %3302 = vmatpush.bf16.msrb.mxu3 %v4808_v42  ;;  %v4798_v42 = vld [vmem:[#allocation9 + $0x50] sm:$0xff] }
 0x10b   : > { %1915 = vmatmul.bf16.gmra.mxu3 %v3865_v44  ;;  %v4801_v44 = vld [vmem:[#allocation9 + $0x68] sm:$0xff] }
 0x10c   : > { %3272 = vmatpush.bf16.msrb.mxu2 %v4801_v44 }
 0x10f   : > { %v1761_v47 = vpop.f32.mrf.mxu2 }
 0x110   : > { %v1762_v43 = vadd.f32 %v1761_v47, %v1733_v10  ;;  %v1735_v47 = vadd.f32 %v1734_v8, %v5504_v15  ;;  %3273 = vmatpush.bf16.msrb.mxu2 %v4800_v19  ;;  %v4814_v15 = vld [vmem:[#allocation9 + $0xd0] sm:$0xff] }
 0x112   : > { %v5550_v16 = vpop.f32.mrf.mxu1 }
 0x113   : > { %v1738_v27 = vadd.f32 %v5550_v16, %v5508_v39 }
 0x114   : > { %3274 = vmatpush.bf16.msrb.mxu2 %v4799_v35 }
 0x115   : > { %v5518_v50 = vpop.f32.mrf.mxu0 }
 0x117   : > { %v5522_v53 = vpop.f32.mrf.mxu2 }
 0x118   : > { %v1764_v32 = vadd.f32 %v5522_v53, %v1735_v47  ;;  %3275 = vmatpush.bf16.msrb.mxu2 %v4798_v42  ;;  %v4797_v47 = vld [vmem:[#allocation9 + $0x48] sm:$0xff] }
 0x11a   : > { %v5558_v22 = vpop.f32.mrf.mxu1 }
 0x11b   : > { %1920 = vmatmul.bf16.gmra.mxu3 %v3901_v51 }
 0x11c   : > { %3276 = vmatpush.bf16.msrb.mxu2 %v4797_v47  ;;  %v2060_v47 = vld [vmem:[#allocation2 + $0x14] sm:$0x1] }
 0x11d   : > { %v5520_v52 = vpop.f32.mrf.mxu0 }
 0x11e   : > { %v1747_v55 = vpop.f32.mrf.mxu3 }
 0x11f   : > { %v5524_v26 = vadd.f32 %v1747_v55, %v1718_v33  ;;  %v4807_v55 = vld [vmem:[#allocation9 + $0x98] sm:$0xff] }
 0x120   : > { %3303 = vmatpush.bf16.msrb.mxu3 %v4807_v55  ;;  %v4804_v55 = vld [vmem:[#allocation9 + $0x80] sm:$0xff] }
 0x122   : > { %v1848_v33 = vpop.f32.mrf.mxu1 }
 0x124   : > { %3304 = vmatpush.bf16.msrb.mxu3 %v4806_v25 }
 0x125   : > { %v5528_v58 = vpop.f32.mrf.mxu0 }
 0x126   : > { %v5526_v57 = vpop.f32.mrf.mxu3  ;;  %v5530_v59 = vpop.f32.mrf.mxu2 }
 0x128   : > { %3305 = vmatpush.bf16.msrb.mxu3 %v4805_v38 }
 0x12a   : > { %v1850_v51 = vpop.f32.mrf.mxu1 }
 0x12c   : > { %3306 = vmatpush.bf16.msrb.mxu3 %v4804_v55 }
 0x12d   : > { %v5534_v63 = vpop.f32.mrf.mxu0 }
 0x12e   : > { %v1790_v60 = vpop.f32.mrf.mxu3  ;;  %v5532_v61 = vpop.f32.mrf.mxu2 }
 0x12f   : > { %v1791_v49 = vadd.f32 %v1790_v60, %v1762_v43  ;;  %v4815_v60 = vld [vmem:[#allocation9 + $0xd8] sm:$0xff] }
 0x130   : > { %3332 = vmatpush.bf16.msrb.mxu0 %v4815_v60 }
 0x131   : > { %v1820_v1 = vadd.f32 %v5518_v50, %v1791_v49 }
 0x132   : > { %v1853_v8 = vpop.f32.mrf.mxu1 }
 0x133   : > { %v1849_v37 = vadd.f32 %v1848_v33, %v1820_v1 }
 0x134   : > { %3333 = vmatpush.bf16.msrb.mxu0 %v4814_v15 }
 0x135   : > { %v5540_v7 = vpop.f32.mrf.mxu0 }
 0x136   : > { %v5536_v54 = vpop.f32.mrf.mxu3  ;;  %v5538_v2 = vpop.f32.mrf.mxu2 }
 0x137   : > { %v1793_v34 = vadd.f32 %v5536_v54, %v1764_v32  ;;  %v1767_v54 = vadd.f32 %v5530_v59, %v1738_v27  ;;  %v1740_v59 = vadd.f32 %v5558_v22, %v5514_v46  ;;  %v4796_v32 = vld [vmem:[#allocation9 + $0x40] sm:$0xff] }
 0x138   : > { %3277 = vmatpush.bf16.msrb.mxu2 %v4796_v32 }
 0x139   : > { %v1822_v43 = vadd.f32 %v5520_v52, %v1793_v34 }
 0x13b   : > { %v1851_v3 = vadd.f32 %v1850_v51, %v1822_v43  ;;  %v1769_v51 = vadd.f32 %v5532_v61, %v1740_v59 }
 0x13d   : > { %v5546_v14 = vpop.f32.mrf.mxu0 }
 0x13e   : > { %v5542_v9 = vpop.f32.mrf.mxu3  ;;  %v5544_v11 = vpop.f32.mrf.mxu2 }
 0x13f   : > { %v1796_v62 = vadd.f32 %v5542_v9, %v1767_v54  ;;  %v4827_v54 = vld [vmem:[#allocation9 + $0x138] sm:$0xff] }
 0x140   : > { %3357 = vmatpush.bf16.msrb.mxu1 %v4827_v54 }
 0x141   : > { %v1825_v52 = vadd.f32 %v5528_v58, %v1796_v62  ;;  %v2051_v58 = vld [vmem:[#allocation2 + $0x8] sm:$0xf] }
 0x143   : > { %v1854_v38 = vadd.f32 %v1853_v8, %v1825_v52 }
 0x145   : > { %v5556_v21 = vpop.f32.mrf.mxu0 }
 0x146   : > { %v5548_v18 = vpop.f32.mrf.mxu3  ;;  %v5552_v17 = vpop.f32.mrf.mxu2 }
 0x147   : > { %v1798_v15 = vadd.f32 %v5548_v18, %v1769_v51  ;;  %v1772_v18 = vadd.f32 %v5538_v2, %v5500_v4  ;;  %v1777_v54 = vadd.f32 %v5552_v17, %v5524_v26 }
 0x149   : > { %v1827_v43 = vadd.f32 %v5534_v63, %v1798_v15  ;;  %v2063_v15 = vld [vmem:[#allocation2 + $0x18] sm:$0xf] }
 0x14d   : > { %v5564_v31 = vpop.f32.mrf.mxu0 }
 0x14e   : > { %v5554_v20 = vpop.f32.mrf.mxu3  ;;  %v5560_v24 = vpop.f32.mrf.mxu2 }
 0x155   : > { %v1935_v0 = vpop.f32.mrf.mxu0 }
 0x156   : > { %v5562_v28 = vpop.f32.mrf.mxu3  ;;  %v1877_v36 = vpop.f32.mrf.mxu2 }
 0x157   : > { %v1878_v50 = vadd.f32 %v1877_v36, %v1849_v37  ;;  %v4813_v36 = vld [vmem:[#allocation9 + $0xc8] sm:$0xff] }
 0x158   : > { %3334 = vmatpush.bf16.msrb.mxu0 %v4813_v36 }
 0x15c   : > { %3335 = vmatpush.bf16.msrb.mxu0 %v4812_v29 }
 0x15d   : > { %v1937_v10 = vpop.f32.mrf.mxu0 }
 0x15e   : > { %v5566_v41 = vpop.f32.mrf.mxu3  ;;  %v1879_v12 = vpop.f32.mrf.mxu2 }
 0x15f   : > { %v1880_v16 = vadd.f32 %v1879_v12, %v1851_v3 }
 0x165   : > { %v1940_v25 = vpop.f32.mrf.mxu0 }
 0x166   : > { %v5569_v56 = vpop.f32.mrf.mxu3  ;;  %v1882_v44 = vpop.f32.mrf.mxu2 }
 0x16e   : > { %v1906_v53 = vpop.f32.mrf.mxu3  ;;  %v1884_v12 = vpop.f32.mrf.mxu2 }
 0x16f   : > { %v1907_v33 = vadd.f32 %v1906_v53, %v1878_v50  ;;  %v1883_v53 = vadd.f32 %v1882_v44, %v1854_v38  ;;  %v2057_v44 = vld [vmem:[#allocation2 + $0x10] sm:$0xf] }
 0x171   : > { %v1936_v49 = vadd.f32 %v1935_v0, %v1907_v33  ;;  %v1855_v0 = vpop.f32.mrf.mxu1 }
 0x173   : > { %v1955_v19 = vmax.f32 %v1936_v49, 0.0  ;;  %v1942_v49 = vpop.f32.mrf.mxu0 }
 0x175   : > { %v1963_v39 = vpack.c.bf16 %v1955_v19, %v1955_v19  ;;  %v1801_v19 = vadd.f32 %v5554_v20, %v1772_v18  ;;  %v1745_v20 = vadd.f32 %v5516_v48, %v5502_v13  ;;  %v4206_v18 = vld [vmem:[#allocation3] sm:$0xf] }
 0x176   : > { %v1908_v1 = vpop.f32.mrf.mxu3 }
 0x177   : > { %v1972_v60 = vshrl.u32 %v1963_v39, 16  ;;  %v1909_v9 = vadd.f32 %v1908_v1, %v1880_v16  ;;  %v1975_v37 = vshll.u32 %v1963_v39, 16  ;;  %v1856_v39 = vadd.f32 %v1855_v0, %v1827_v43  ;;  %v1887_v1 = vpop.f32.mrf.mxu2 }
 0x178   : > { %v1830_v0 = vadd.f32 %v5540_v7, %v1801_v19 }
 0x179   : > { %v1974_v35 = vrot.slane %v1972_v60, 7  ;;  %v1938_v34 = vadd.f32 %v1937_v10, %v1909_v9  ;;  %v1858_v55 = vpop.f32.mrf.mxu1  ;;  %v1885_v59 = vadd.f32 %v1884_v12, %v1856_v39  ;;  %v1774_v12 = vadd.f32 %v5544_v11, %v1745_v20 }
 0x17a   : > { %v1859_v7 = vadd.f32 %v1858_v55, %v1830_v0  ;;  %v4825_v0 = vld [vmem:[#allocation9 + $0x128] sm:$0xff] }
 0x17b   : > { %v1977_v50 = vor.u32 %v1975_v37, %v1974_v35  ;;  %v1978_v42 = vrot.slane %v1974_v35, 4  ;;  %v1956_v46 = vmax.f32 %v1938_v34, 0.0 }
 0x17c   : > { %v1888_v19 = vadd.f32 %v1887_v1, %v1859_v7 }
 0x17d   : > { %v2052_v22 = vsel %vm5317_vm7, %v1977_v50, %v2051_v58  ;;  %v2055_v27 = vsel %vm5290_vm2, %v1978_v42, %v2054_v30  ;;  %v1964_v61 = vpack.c.bf16 %v1956_v46, %v1956_v46  ;;  %v4826_v30 = vld [vmem:[#allocation9 + $0x130] sm:$0xff] }
 0x17e   : > { %2053 = vst [vmem:[#allocation2 + $0x8] sm:$0xf] %v2052_v22  ;;  %v1911_v10 = vpop.f32.mrf.mxu3  ;;  %3358 = vmatpush.bf16.msrb.mxu1 %v4826_v30  ;;  %v2066_v22 = vld [vmem:[#allocation2 + $0x1c] sm:$0x1] }
 0x17f   : > { %2056 = vst [vmem:[#allocation2 + $0xc] sm:$0x1] %v2055_v27  ;;  %v1980_v8 = vshrl.u32 %v1964_v61, 16  ;;  %v1912_v33 = vadd.f32 %v1911_v10, %v1883_v53  ;;  %v1983_v36 = vshll.u32 %v1964_v61, 16  ;;  %v1945_v27 = vpop.f32.mrf.mxu0  ;;  %v1803_v10 = vadd.f32 %v5562_v28, %v1774_v12  ;;  %v1889_v28 = vpop.f32.mrf.mxu2 }
 0x181   : > { %v1982_v62 = vrot.slane %v1980_v8, 7  ;;  %v1941_v3 = vadd.f32 %v1940_v25, %v1912_v33  ;;  %v1860_v11 = vpop.f32.mrf.mxu1  ;;  %v1832_v17 = vadd.f32 %v5546_v14, %v1803_v10 }
 0x182   : > { %3359 = vmatpush.bf16.msrb.mxu1 %v4825_v0 }
 0x183   : > { %v1985_v16 = vor.u32 %v1983_v36, %v1982_v62  ;;  %v1986_v63 = vrot.slane %v1982_v62, 4  ;;  %v1957_v52 = vmax.f32 %v1941_v3, 0.0  ;;  %v1861_v30 = vadd.f32 %v1860_v11, %v1832_v17 }
 0x185   : > { %v2058_v29 = vsel %vm5317_vm7, %v1985_v16, %v2057_v44  ;;  %v2061_v4 = vsel %vm5290_vm2, %v1986_v63, %v2060_v47  ;;  %v1965_v2 = vpack.c.bf16 %v1957_v52, %v1957_v52  ;;  %v2100_v60 = vld [vmem:[#allocation2 + $0x8] sm:$0xf]  ;;  %v4214_v44 = vld [vmem:[#allocation3 + $0x8] sm:$0xf]  ;;  %v1890_v10 = vadd.f32 %v1889_v28, %v1861_v30 }
 0x186   : > { %v2329_v25 = vld [vmem:[#allocation2 + $0x8] sm:$0xe]  ;;  %2059 = vst [vmem:[#allocation2 + $0x10] sm:$0xf] %v2058_v29  ;;  %v1913_v32 = vpop.f32.mrf.mxu3  ;;  %v2330_v51 = vld [vmem:[#allocation2 + $0xc] sm:$0x1]  ;;  %v1806_v29 = vadd.f32 %v5566_v41, %v1777_v54 }
 0x187   : > { %v2135_v9 = vld [vmem:[#allocation2 + $0x8] sm:$0xf]  ;;  %v4195_v35 = vrot.slane %v2329_v25, 9  ;;  %2062 = vst [vmem:[#allocation2 + $0x14] sm:$0x1] %v2061_v4  ;;  %v1988_v34 = vshrl.u32 %v1965_v2, 16  ;;  %v1914_v38 = vadd.f32 %v1913_v32, %v1885_v59 }
 0x188   : > { %v2168_v37 = vshrl.u32 %v2135_v9, 16  ;;  %v2369_v58 = vrot.slane %v2330_v51, 5  ;;  %2110 = vst [vmem:[#allocation3 + $0x24] sm:$0xf] %v2100_v60  ;;  %v1991_v42 = vshll.u32 %v1965_v2, 16  ;;  %v2171_v53 = vshll.u32 %v2135_v9, 16 }
 0x189   : > { %v1990_v50 = vrot.slane %v1988_v34, 7  ;;  %v1943_v46 = vadd.f32 %v1942_v49, %v1914_v38  ;;  %2117 = vst [vmem:[#allocation3 + $0xc] sm:$0xf] %v2100_v60  ;;  %v2136_v48 = vld [vmem:[#allocation2 + $0xc] sm:$0x1] }
 0x18a   : > { %v2370_v13 = vsel %vm5448_vm12, %v4195_v35, %v2369_v58  ;;  %v2170_v61 = vrot.slane %v2168_v37, 4  ;;  %v2173_v49 = vrot.slane %v2171_v53, 5  ;;  %v2177_v62 = vshll.u32 %v2136_v48, 16  ;;  %v2069_v25 = vld [vmem:[#allocation2 + $0x20] sm:$0xf] }
 0x18b   : > { %2404 = vst [vmem:[#allocation3 + $0x2c] sm:$0xf] %v2370_v13  ;;  %v1993_v43 = vor.u32 %v1991_v42, %v1990_v50  ;;  %v1994_v8 = vrot.slane %v1990_v50, 4  ;;  %v1958_v33 = vmax.f32 %v1943_v46, 0.0  ;;  %v2072_v34 = vld [vmem:[#allocation2 + $0x24] sm:$0x1]  ;;  %v1835_v42 = vadd.f32 %v5556_v21, %v1806_v29  ;;  %v1947_v46 = vpop.f32.mrf.mxu0 }
 0x18c   : > { %2418 = vst [vmem:[#allocation3 + $0x14] sm:$0xf] %v2370_v13  ;;  %v2174_v63 = vor.u32 %v2173_v49, %v2170_v61  ;;  %v2179_v20 = vrot.slane %v2177_v62, 5  ;;  %v4752_v54 = vld [vmem:[#allocation3 + $0x4] sm:$0xf] }
 0x18d   : > { %v2064_v55 = vsel %vm5317_vm7, %v1993_v43, %v2063_v15  ;;  %v2067_v36 = vsel %vm5290_vm2, %v1994_v8, %v2066_v22  ;;  %v1966_v3 = vpack.c.bf16 %v1958_v33, %v1958_v33  ;;  %v2101_v47 = vld [vmem:[#allocation2 + $0x10] sm:$0xf]  ;;  %v1863_v22 = vpop.f32.mrf.mxu1  ;;  %v1750_v8 = vadd.f32 %v5526_v57, %v5512_v45 }
 0x18e   : > { %v2331_v39 = vld [vmem:[#allocation2 + $0x10] sm:$0xe]  ;;  %2065 = vst [vmem:[#allocation2 + $0x18] sm:$0xf] %v2064_v55  ;;  %v1916_v16 = vpop.f32.mrf.mxu3  ;;  %v2332_v52 = vld [vmem:[#allocation2 + $0x14] sm:$0x1]  ;;  %v1864_v45 = vadd.f32 %v1863_v22, %v1835_v42 }
 0x18f   : > { %v2137_v26 = vld [vmem:[#allocation2 + $0x10] sm:$0xf]  ;;  %2068 = vst [vmem:[#allocation2 + $0x1c] sm:$0x1] %v2067_v36  ;;  %v1996_v4 = vshrl.u32 %v1966_v3, 16  ;;  %v1917_v2 = vadd.f32 %v1916_v16, %v1888_v19  ;;  %v1999_v60 = vshll.u32 %v1966_v3, 16  ;;  %v1892_v19 = vpop.f32.mrf.mxu2  ;;  %v1779_v28 = vadd.f32 %v5560_v24, %v1750_v8 }
 0x190   : > { %v4756_v59 = vld [vmem:[#allocation3 + $0x20] sm:$0xf0]  ;;  %2118 = vst [vmem:[#allocation3 + $0x30] sm:$0xf] %v2101_v47  ;;  %v2175_v9 = vrot.slane %v2174_v63, 4  ;;  %v4196_v37 = vrot.slane %v2331_v39, 9 }
 0x191   : > { %v4207_v1 = vor.u32 %v4756_v59, %v4206_v18  ;;  %v1998_v32 = vrot.slane %v1996_v4, 7  ;;  %v1946_v51 = vadd.f32 %v1945_v27, %v1917_v2  ;;  %2111 = vst [vmem:[#allocation3 + $0x48] sm:$0xf] %v2101_v47  ;;  %v2373_v38 = vrot.slane %v2332_v52, 5  ;;  %v4753_v11 = vld [vmem:[#allocation3 + $0xc] sm:$0xf] }
 0x192   : > { %v4757_v35 = vld [vmem:[#allocation3 + $0x28] sm:$0xf0]  ;;  %2125 = vst [vmem:[#allocation3 + $0x18] sm:$0xf] %v2101_v47  ;;  %v2180_v41 = vsel %vm5334_vm9, %v2175_v9, %v2179_v20  ;;  %v2182_v58 = vshrl.u32 %v2137_v26, 16  ;;  %v2185_v7 = vshll.u32 %v2137_v26, 16  ;;  %v1808_v29 = vadd.f32 %v5569_v56, %v1779_v28 }
 0x193   : > { %3249 = vmatmul.bf16.vlgmr.msra.gmra.mxu1 %v4207_v1  ;;  %v4215_v14 = vor.u32 %v4757_v35, %v4214_v44  ;;  %v2001_v12 = vor.u32 %v1999_v60, %v1998_v32  ;;  %v2002_v15 = vrot.slane %v1998_v32, 4  ;;  %v1959_v50 = vmax.f32 %v1946_v51, 0.0  ;;  %2274 = vst [vmem:[#allocation3 + $0x28] sm:$0xf] %v2180_v41  ;;  %v2075_v44 = vld [vmem:[#allocation2 + $0x28] sm:$0xf] }
 0x194   : > { %2296 = vst [vmem:[#allocation3 + $0x10] sm:$0xf] %v2180_v41  ;;  %v2374_v13 = vsel %vm5448_vm12, %v4196_v37, %v2373_v38  ;;  %v5617_v48 = vrot.slane %v2182_v58, 4  ;;  %v2187_v62 = vrot.slane %v2185_v7, 5  ;;  %v2078_v47 = vld [vmem:[#allocation2 + $0x2c] sm:$0x1]  ;;  %v1893_v20 = vadd.f32 %v1892_v19, %v1864_v45  ;;  %v1950_v58 = vpop.f32.mrf.mxu0 }
 0x195   : > { %3307 = vmatmul.bf16.vlgmr.msrb.gmra.mxu3 %v4215_v14  ;;  %v2070_v27 = vsel %vm5317_vm7, %v2001_v12, %v2069_v25  ;;  %v2073_v61 = vsel %vm5290_vm2, %v2002_v15, %v2072_v34  ;;  %v1967_v53 = vpack.c.bf16 %v1959_v50, %v1959_v50  ;;  %v2102_v21 = vld [vmem:[#allocation2 + $0x18] sm:$0xf]  ;;  %2405 = vst [vmem:[#allocation3 + $0x50] sm:$0xf] %v2374_v13  ;;  %v4824_v63 = vld [vmem:[#allocation9 + $0x120] sm:$0xff]  ;;  %v4823_v41 = vld [vmem:[#allocation9 + $0x118] sm:$0xff]  ;;  %v1865_v42 = vpop.f32.mrf.mxu1 }
 0x196   : > { %v2333_v43 = vld [vmem:[#allocation2 + $0x18] sm:$0xe]  ;;  %2071 = vst [vmem:[#allocation2 + $0x20] sm:$0xf] %v2070_v27  ;;  %v1918_v33 = vpop.f32.mrf.mxu3  ;;  %v2334_v18 = vld [vmem:[#allocation2 + $0x1c] sm:$0x1]  ;;  %3360 = vmatpush.bf16.msrb.mxu1 %v4824_v63  ;;  %v2188_v59 = vor.u32 %v2187_v62, %v5617_v48  ;;  %v1837_v38 = vadd.f32 %v5564_v31, %v1808_v29 }
 0x197   : > { %v4197_v49 = vrot.slane %v2333_v43, 9  ;;  %2074 = vst [vmem:[#allocation2 + $0x24] sm:$0x1] %v2073_v61  ;;  %v2004_v55 = vshrl.u32 %v1967_v53, 16  ;;  %v1919_v36 = vadd.f32 %v1918_v33, %v1890_v10  ;;  %v4216_v3 = vld [vmem:[#allocation3 + $0x2c] sm:$0xf0]  ;;  %v1894_v43 = vpop.f32.mrf.mxu2 }
 0x198   : > { %v4219_v39 = vor.u32 %v4753_v11, %v4216_v3  ;;  %2112 = vst [vmem:[#allocation3 + $0x6c] sm:$0xf] %v2102_v21  ;;  %v2377_v16 = vrot.slane %v2334_v18, 5  ;;  %v2007_v52 = vshll.u32 %v1967_v53, 16  ;;  %v2138_v17 = vld [vmem:[#allocation2 + $0x14] sm:$0x1]  ;;  %v1866_v33 = vadd.f32 %v1865_v42, %v1837_v38 }
 0x199   : > { %v2006_v57 = vrot.slane %v2004_v55, 7  ;;  %v1948_v26 = vadd.f32 %v1947_v46, %v1919_v36  ;;  %2126 = vst [vmem:[#allocation3 + $0x3c] sm:$0xf] %v2102_v21  ;;  %v2139_v2 = vld [vmem:[#allocation2 + $0x18] sm:$0xf]  ;;  %v2191_v0 = vshll.u32 %v2138_v17, 16 }
 0x19a   : > { %3336 = vmatmul.bf16.vlgmr.msrb.gmra.mxu0 %v4219_v39  ;;  %v4208_v4 = vld [vmem:[#allocation3 + $0x24] sm:$0xf0]  ;;  %2119 = vst [vmem:[#allocation3 + $0x54] sm:$0xf] %v2102_v21  ;;  %v2378_v24 = vsel %vm5448_vm12, %v4197_v49, %v2377_v16  ;;  %v2196_v32 = vshrl.u32 %v2139_v2, 16  ;;  %v2199_v14 = vshll.u32 %v2139_v2, 16  ;;  %3361 = vmatpush.bf16.msrb.mxu1 %v4823_v41 }
 0x19b   : > { %v2009_v60 = vor.u32 %v2007_v52, %v2006_v57  ;;  %v2010_v25 = vrot.slane %v2006_v57, 4  ;;  %v1960_v1 = vmax.f32 %v1948_v26, 0.0  ;;  %v4211_v9 = vor.u32 %v4752_v54, %v4208_v4  ;;  %2406 = vst [vmem:[#allocation3 + $0x74] sm:$0xf] %v2378_v24  ;;  %v4242_v37 = vld [vmem:[#allocation3 + $0x48] sm:$0xf] }
 0x19c   : > { %2419 = vst [vmem:[#allocation3 + $0x38] sm:$0xf] %v2374_v13  ;;  %v2140_v34 = vld [vmem:[#allocation2 + $0x1c] sm:$0x1]  ;;  %v2189_v15 = vrot.slane %v2188_v59, 4  ;;  %v2198_v50 = vrot.slane %v2196_v32, 4 }
 0x19d   : > { %v2076_v56 = vsel %vm5317_vm7, %v2009_v60, %v2075_v44  ;;  %v2079_v51 = vsel %vm5290_vm2, %v2010_v25, %v2078_v47  ;;  %v1968_v35 = vpack.c.bf16 %v1960_v1, %v1960_v1  ;;  %3278 = vmatmul.bf16.vlgmr.msrb.gmra.mxu2 %v4211_v9  ;;  %2433 = vst [vmem:[#allocation3 + $0x20] sm:$0xf] %v2374_v13  ;;  %v2103_v12 = vld [vmem:[#allocation2 + $0x20] sm:$0xf]  ;;  %v2081_v22 = vld [vmem:[#allocation2 + $0x30] sm:$0xf] }
 0x19e   : > { %2077 = vst [vmem:[#allocation2 + $0x28] sm:$0xf] %v2076_v56  ;;  %v1921_v30 = vpop.f32.mrf.mxu3  ;;  %v2084_v27 = vld [vmem:[#allocation2 + $0x34] sm:$0x1]  ;;  %v2193_v61 = vrot.slane %v2191_v0, 5  ;;  %v2201_v53 = vrot.slane %v2199_v14, 5  ;;  %v1895_v44 = vadd.f32 %v1894_v43, %v1866_v33 }
 0x19f   : > { %2080 = vst [vmem:[#allocation2 + $0x2c] sm:$0x1] %v2079_v51  ;;  %v2012_v46 = vshrl.u32 %v1968_v35, 16  ;;  %v1922_v48 = vadd.f32 %v1921_v30, %v1893_v20  ;;  %v4765_v7 = vld [vmem:[#allocation3 + $0x68] sm:$0xf0]  ;;  %v2205_v10 = vshll.u32 %v2140_v34, 16  ;;  %v1952_v20 = vpop.f32.mrf.mxu0 }
 0x1a0   : > { %v4243_v13 = vor.u32 %v4765_v7, %v4242_v37  ;;  %2434 = vst [vmem:[#allocation3 + $0x44] sm:$0xf] %v2378_v24  ;;  %v2015_v11 = vshll.u32 %v1968_v35, 16  ;;  %v4250_v8 = vld [vmem:[#allocation3 + $0x50] sm:$0xf]  ;;  %v2194_v18 = vsel %vm5334_vm9, %v2189_v15, %v2193_v61  ;;  %v2202_v49 = vor.u32 %v2201_v53, %v2198_v50  ;;  %v4843_v62 = vld [vmem:[#allocation9 + $0x1b8] sm:$0xff] }
 0x1a1   : > { %v2014_v31 = vrot.slane %v2012_v46, 7  ;;  %v1951_v21 = vadd.f32 %v1950_v58, %v1922_v48  ;;  %2420 = vst [vmem:[#allocation3 + $0x5c] sm:$0xf] %v2378_v24  ;;  %v5637_v28 = vld [vmem:[#allocation2 + $0x20] sm:$0xf]  ;;  %v2207_v39 = vrot.slane %v2205_v10, 5  ;;  %3415 = vmatpush.bf16.msra.mxu3 %v4843_v62 }
 0x1a2   : > { %v4766_v54 = vld [vmem:[#allocation3 + $0x70] sm:$0xf0]  ;;  %2120 = vst [vmem:[#allocation3 + $0x78] sm:$0xf] %v2103_v12  ;;  %v2203_v47 = vrot.slane %v2202_v49, 4  ;;  %v2210_v25 = vshrl.u32 %v5637_v28, 16 }
 0x1a3   : > { %3254 = vmatmul.bf16.gmra.mxu1 %v4243_v13  ;;  %v2017_v55 = vor.u32 %v2015_v11, %v2014_v31  ;;  %v2018_v36 = vrot.slane %v2014_v31, 4  ;;  %v1961_v3 = vmax.f32 %v1951_v21, 0.0  ;;  %v4251_v19 = vor.u32 %v4766_v54, %v4250_v8  ;;  %2113 = vst [vmem:[#allocation3 + $0x90] sm:$0xf] %v2103_v12  ;;  %v4822_v16 = vld [vmem:[#allocation9 + $0x110] sm:$0xff]  ;;  %v4851_v50 = vld [vmem:[#allocation9 + $0x1f8] sm:$0xff] }
 0x1a4   : > { %2127 = vst [vmem:[#allocation3 + $0x60] sm:$0xf] %v2103_v12  ;;  %v4842_v63 = vld [vmem:[#allocation9 + $0x1b0] sm:$0xff]  ;;  %v2208_v17 = vsel %vm5334_vm9, %v2203_v47, %v2207_v39  ;;  %3362 = vmatpush.bf16.msrb.mxu1 %v4822_v16  ;;  %v2087_v1 = vld [vmem:[#allocation2 + $0x38] sm:$0xf]  ;;  %v2213_v38 = vshll.u32 %v5637_v28, 16  ;;  %3444 = vmatpush.bf16.msra.mxu0 %v4851_v50 }
 0x1a5   : > { %v2082_v45 = vsel %vm5317_vm7, %v2017_v55, %v2081_v22  ;;  %v2085_v57 = vsel %vm5290_vm2, %v2018_v36, %v2084_v27  ;;  %v1969_v52 = vpack.c.bf16 %v1961_v3, %v1961_v3  ;;  %3312 = vmatmul.bf16.gmra.mxu3 %v4251_v19  ;;  %2275 = vst [vmem:[#allocation3 + $0x4c] sm:$0xf] %v2194_v18  ;;  %v2335_v29 = vld [vmem:[#allocation2 + $0x20] sm:$0xe]  ;;  %v2336_v4 = vld [vmem:[#allocation2 + $0x24] sm:$0x1] }
 0x1a6   : > { %2083 = vst [vmem:[#allocation2 + $0x30] sm:$0xf] %v2082_v45  ;;  %v1923_v26 = vpop.f32.mrf.mxu3  ;;  %v4762_v59 = vld [vmem:[#allocation3 + $0x54] sm:$0xf]  ;;  %v2337_v60 = vld [vmem:[#allocation2 + $0x28] sm:$0xe]  ;;  %3416 = vmatpush.bf16.msra.mxu3 %v4842_v63 }
 0x1a7   : > { %2086 = vst [vmem:[#allocation2 + $0x34] sm:$0x1] %v2085_v57  ;;  %v2020_v24 = vshrl.u32 %v1969_v52, 16  ;;  %v1924_v2 = vadd.f32 %v1923_v26, %v1895_v44  ;;  %v2090_v9 = vld [vmem:[#allocation2 + $0x3c] sm:$0x1]  ;;  %v2023_v51 = vshll.u32 %v1969_v52, 16 }
 0x1a8   : > { %2276 = vst [vmem:[#allocation3 + $0x70] sm:$0xf] %v2208_v17  ;;  %v2338_v0 = vld [vmem:[#allocation2 + $0x2c] sm:$0x1]  ;;  %v2143_v32 = vld [vmem:[#allocation2 + $0x28] sm:$0xf] }
 0x1a9   : > { %v2022_v56 = vrot.slane %v2020_v24, 7  ;;  %v1953_v35 = vadd.f32 %v1952_v20, %v1924_v2  ;;  %v4252_v37 = vld [vmem:[#allocation3 + $0x74] sm:$0xf0]  ;;  %2319 = vst [vmem:[#allocation3 + $0x1c] sm:$0xf] %v2194_v18  ;;  %v4198_v41 = vrot.slane %v2335_v29, 9 }
 0x1aa   : > { %v4255_v34 = vor.u32 %v4762_v59, %v4252_v37  ;;  %2320 = vst [vmem:[#allocation3 + $0x40] sm:$0xf] %v2208_v17  ;;  %v2104_v14 = vld [vmem:[#allocation2 + $0x28] sm:$0xf]  ;;  %v2381_v15 = vrot.slane %v2336_v4, 5  ;;  %v4199_v42 = vrot.slane %v2337_v60, 9 }
 0x1ab   : > { %v2025_v58 = vor.u32 %v2023_v51, %v2022_v56  ;;  %v2026_v30 = vrot.slane %v2022_v56, 4  ;;  %v1962_v12 = vmax.f32 %v1953_v35, 0.0  ;;  %2297 = vst [vmem:[#allocation3 + $0x34] sm:$0xf] %v2194_v18  ;;  %v2385_v46 = vrot.slane %v2338_v0, 5  ;;  %v4835_v61 = vld [vmem:[#allocation9 + $0x178] sm:$0xff] }
 0x1ac   : > { %3341 = vmatmul.bf16.gmra.mxu0 %v4255_v34  ;;  %2298 = vst [vmem:[#allocation3 + $0x58] sm:$0xf] %v2208_v17  ;;  %v2224_v48 = vshrl.u32 %v2143_v32, 16  ;;  %v2212_v13 = vrot.slane %v2210_v25, 4  ;;  %v4841_v53 = vld [vmem:[#allocation9 + $0x1a8] sm:$0xff]  ;;  %v2215_v11 = vrot.slane %v2213_v38, 5  ;;  %v2382_v33 = vsel %vm5448_vm12, %v4198_v41, %v2381_v15  ;;  %3386 = vmatpush.bf16.msra.mxu2 %v4835_v61 }
 0x1ad   : > { %v2088_v7 = vsel %vm5317_vm7, %v2025_v58, %v2087_v1  ;;  %v2091_v22 = vsel %vm5290_vm2, %v2026_v30, %v2090_v9  ;;  %v1970_v27 = vpack.c.bf16 %v1962_v12, %v1962_v12  ;;  %2114 = vst [vmem:[#allocation3 + $0xb4] sm:$0xf] %v2104_v14  ;;  %v4761_v10 = vld [vmem:[#allocation3 + $0x4c] sm:$0xf]  ;;  %v2142_v31 = vld [vmem:[#allocation2 + $0x24] sm:$0x1]  ;;  %3417 = vmatpush.bf16.msra.mxu3 %v4841_v53 }
 0x1ae   : > { %2089 = vst [vmem:[#allocation2 + $0x38] sm:$0xf] %v2088_v7  ;;  %v2227_v21 = vshll.u32 %v2143_v32, 16  ;;  %v2144_v54 = vld [vmem:[#allocation2 + $0x2c] sm:$0x1]  ;;  %v2226_v18 = vrot.slane %v2224_v48, 4  ;;  %v2386_v3 = vsel %vm5448_vm12, %v4199_v42, %v2385_v46  ;;  %v2216_v45 = vor.u32 %v2215_v11, %v2212_v13 }
 0x1af   : > { %2092 = vst [vmem:[#allocation2 + $0x3c] sm:$0x1] %v2091_v22  ;;  %v2028_v43 = vshrl.u32 %v1970_v27, 16  ;;  %v4244_v8 = vld [vmem:[#allocation3 + $0x6c] sm:$0xf0]  ;;  %v2031_v49 = vshll.u32 %v1970_v27, 16 }
 0x1b0   : > { %v2093_v62 = vld [vmem:[#allocation2 + $0x40] sm:$0xf]  ;;  %v2096_v55 = vld [vmem:[#allocation2 + $0x44] sm:$0x1]  ;;  %v4247_v36 = vor.u32 %v4761_v10, %v4244_v8  ;;  %2121 = vst [vmem:[#allocation3 + $0x9c] sm:$0xf] %v2104_v14 }
 0x1b1   : > { %v2229_v19 = vrot.slane %v2227_v21, 5  ;;  %v4850_v28 = vld [vmem:[#allocation9 + $0x1f0] sm:$0xff]  ;;  %v2030_v44 = vrot.slane %v2028_v43, 7  ;;  %2128 = vst [vmem:[#allocation3 + $0x84] sm:$0xf] %v2104_v14  ;;  %v4821_v39 = vld [vmem:[#allocation9 + $0x108] sm:$0xff] }
 0x1b2   : > { %v4834_v47 = vld [vmem:[#allocation9 + $0x170] sm:$0xff]  ;;  %v4840_v16 = vld [vmem:[#allocation9 + $0x1a0] sm:$0xff]  ;;  %3283 = vmatmul.bf16.gmra.mxu2 %v4247_v36  ;;  %2407 = vst [vmem:[#allocation3 + $0x98] sm:$0xf] %v2382_v33  ;;  %3445 = vmatpush.bf16.msra.mxu0 %v4850_v28  ;;  %v4849_v57 = vld [vmem:[#allocation9 + $0x1e8] sm:$0xff]  ;;  %v2219_v17 = vshll.u32 %v2142_v31, 16 }
 0x1b3   : > { %v4278_v63 = vld [vmem:[#allocation3 + $0x90] sm:$0xf]  ;;  %v2033_v52 = vor.u32 %v2031_v49, %v2030_v44  ;;  %v2034_v26 = vrot.slane %v2030_v44, 4  ;;  %2408 = vst [vmem:[#allocation3 + $0xbc] sm:$0xf] %v2386_v3  ;;  %v2230_v29 = vor.u32 %v2229_v19, %v2226_v18  ;;  %3387 = vmatpush.bf16.msra.mxu2 %v4834_v47  ;;  %3363 = vmatpush.bf16.msrb.mxu1 %v4821_v39  ;;  %v4833_v4 = vld [vmem:[#allocation9 + $0x168] sm:$0xff] }
 0x1b4   : > { %v4774_v24 = vld [vmem:[#allocation3 + $0xb0] sm:$0xf0]  ;;  %2421 = vst [vmem:[#allocation3 + $0x80] sm:$0xf] %v2382_v33  ;;  %v2233_v2 = vshll.u32 %v2144_v54, 16  ;;  %3418 = vmatpush.bf16.msra.mxu3 %v4840_v16  ;;  %v2217_v9 = vrot.slane %v2216_v45, 4 }
 0x1b5   : > { %v2094_v59 = vsel %vm5317_vm7, %v2033_v52, %v2093_v62  ;;  %v2097_v60 = vsel %vm5290_vm2, %v2034_v26, %v2096_v55  ;;  %v4279_v25 = vor.u32 %v4774_v24, %v4278_v63  ;;  %2422 = vst [vmem:[#allocation3 + $0xa4] sm:$0xf] %v2386_v3  ;;  %v2105_v1 = vld [vmem:[#allocation2 + $0x30] sm:$0xf]  ;;  %v4839_v20 = vld [vmem:[#allocation9 + $0x198] sm:$0xff]  ;;  %v2221_v0 = vrot.slane %v2219_v17, 5 }
 0x1b6   : > { %2095 = vst [vmem:[#allocation2 + $0x40] sm:$0xf] %v2094_v59  ;;  %3446 = vmatpush.bf16.msra.mxu0 %v4849_v57  ;;  %v2231_v32 = vrot.slane %v2230_v29, 4  ;;  %v4848_v56 = vld [vmem:[#allocation9 + $0x1e0] sm:$0xff]  ;;  %v2235_v51 = vrot.slane %v2233_v2, 5  ;;  %v4838_v37 = vld [vmem:[#allocation9 + $0x190] sm:$0xff] }
 0x1b7   : > { %2098 = vst [vmem:[#allocation2 + $0x44] sm:$0x1] %v2097_v60  ;;  %3259 = vmatmul.bf16.gmra.mxu1 %v4279_v25  ;;  %3388 = vmatpush.bf16.msra.mxu2 %v4833_v4  ;;  %v2339_v40 = vld [vmem:[#allocation2 + $0x30] sm:$0xe]  ;;  %v2340_v34 = vld [vmem:[#allocation2 + $0x34] sm:$0x1]  ;;  %v2222_v58 = vsel %vm5334_vm9, %v2217_v9, %v2221_v0 }
 0x1b8   : > { %2435 = vst [vmem:[#allocation3 + $0x68] sm:$0xf] %v2382_v33  ;;  %3419 = vmatpush.bf16.msra.mxu3 %v4839_v20  ;;  %v4832_v35 = vld [vmem:[#allocation9 + $0x160] sm:$0xff]  ;;  %3364 = vmatpush.bf16.msrb.mxu1 %v4820_v5  ;;  %v2236_v12 = vsel %vm5334_vm9, %v2231_v32, %v2235_v51  ;;  %v2341_v15 = vld [vmem:[#allocation2 + $0x38] sm:$0xe]  ;;  %v4200_v22 = vrot.slane %v2339_v40, 9 }
 0x1b9   : > { %2436 = vst [vmem:[#allocation3 + $0x8c] sm:$0xf] %v2386_v3  ;;  %v2145_v14 = vld [vmem:[#allocation2 + $0x30] sm:$0xf]  ;;  %v4286_v41 = vld [vmem:[#allocation3 + $0x98] sm:$0xf] }
 0x1ba   : > { %v4775_v38 = vld [vmem:[#allocation3 + $0xb8] sm:$0xf0]  ;;  %2122 = vst [vmem:[#allocation3 + $0xc0] sm:$0xf] %v2105_v1  ;;  %3447 = vmatpush.bf16.msra.mxu0 %v4848_v56  ;;  %v2147_v50 = vld [vmem:[#allocation2 + $0x38] sm:$0xf] }
 0x1bb   : > { %v4287_v30 = vor.u32 %v4775_v38, %v4286_v41  ;;  %2115 = vst [vmem:[#allocation3 + $0xd8] sm:$0xf] %v2105_v1  ;;  %3389 = vmatpush.bf16.msra.mxu2 %v4832_v35  ;;  %v2238_v42 = vshrl.u32 %v2145_v14, 16  ;;  %v2241_v46 = vshll.u32 %v2145_v14, 16  ;;  %v2252_v48 = vshrl.u32 %v2147_v50, 16  ;;  %v4847_v43 = vld [vmem:[#allocation9 + $0x1d8] sm:$0xff] }
 0x1bc   : > { %2129 = vst [vmem:[#allocation3 + $0xa8] sm:$0xf] %v2105_v1  ;;  %3420 = vmatpush.bf16.msra.mxu3 %v4838_v37  ;;  %v2342_v7 = vld [vmem:[#allocation2 + $0x3c] sm:$0x1]  ;;  %v2255_v27 = vshll.u32 %v2147_v50, 16  ;;  %v2389_v61 = vrot.slane %v2340_v34, 5 }
 0x1bd   : > { %3317 = vmatmul.bf16.gmra.mxu3 %v4287_v30  ;;  %2277 = vst [vmem:[#allocation3 + $0x94] sm:$0xf] %v2222_v58  ;;  %v2106_v13 = vld [vmem:[#allocation2 + $0x38] sm:$0xf]  ;;  %v4201_v53 = vrot.slane %v2341_v15, 9  ;;  %v2240_v11 = vrot.slane %v2238_v42, 4 }
 0x1be   : > { %2278 = vst [vmem:[#allocation3 + $0xb8] sm:$0xf] %v2236_v12  ;;  %v4771_v10 = vld [vmem:[#allocation3 + $0x9c] sm:$0xf]  ;;  %v2146_v31 = vld [vmem:[#allocation2 + $0x34] sm:$0x1]  ;;  %3448 = vmatpush.bf16.msra.mxu0 %v4847_v43  ;;  %v2390_v28 = vsel %vm5448_vm12, %v4200_v22, %v2389_v61 }
 0x1bf   : > { %2299 = vst [vmem:[#allocation3 + $0x7c] sm:$0xf] %v2222_v58  ;;  %v2243_v21 = vrot.slane %v2241_v46, 5  ;;  %v4831_v8 = vld [vmem:[#allocation9 + $0x158] sm:$0xff]  ;;  %v2393_v33 = vrot.slane %v2342_v7, 5  ;;  %v2254_v54 = vrot.slane %v2252_v48, 4 }
 0x1c0   : > { %2300 = vst [vmem:[#allocation3 + $0xa0] sm:$0xf] %v2236_v12  ;;  %v2257_v18 = vrot.slane %v2255_v27, 5  ;;  %v4837_v49 = vld [vmem:[#allocation9 + $0x188] sm:$0xff]  ;;  %3390 = vmatpush.bf16.msra.mxu2 %v4831_v8  ;;  %v4846_v55 = vld [vmem:[#allocation9 + $0x1d0] sm:$0xff]  ;;  %v4836_v19 = vld [vmem:[#allocation9 + $0x180] sm:$0xff] }
 0x1c1   : > { %v4288_v62 = vld [vmem:[#allocation3 + $0xbc] sm:$0xf0]  ;;  %2321 = vst [vmem:[#allocation3 + $0x64] sm:$0xf] %v2222_v58  ;;  %v4830_v36 = vld [vmem:[#allocation9 + $0x150] sm:$0xff]  ;;  %3421 = vmatpush.bf16.msra.mxu3 %v4837_v49  ;;  %v2244_v47 = vor.u32 %v2243_v21, %v2240_v11  ;;  %v4859_v39 = vld [vmem:[#allocation9 + $0x238] sm:$0xff]  ;;  %v2394_v63 = vsel %vm5448_vm12, %v4201_v53, %v2393_v33 }
 0x1c2   : > { %v4291_v3 = vor.u32 %v4771_v10, %v4288_v62  ;;  %2322 = vst [vmem:[#allocation3 + $0x88] sm:$0xf] %v2236_v12  ;;  %v2148_v44 = vld [vmem:[#allocation2 + $0x3c] sm:$0x1]  ;;  %v2247_v45 = vshll.u32 %v2146_v31, 16  ;;  %v2258_v57 = vor.u32 %v2257_v18, %v2254_v54  ;;  %3449 = vmatpush.bf16.msra.mxu0 %v4846_v55  ;;  %3473 = vmatpush.bf16.msra.mxu1 %v4859_v39  ;;  %v4858_v60 = vld [vmem:[#allocation9 + $0x230] sm:$0xff] }
 0x1c3   : > { %2116 = vst [vmem:[#allocation3 + $0xfc] sm:$0xf] %v2106_v13  ;;  %v4845_v26 = vld [vmem:[#allocation9 + $0x1c8] sm:$0xff]  ;;  %v2261_v4 = vshll.u32 %v2148_v44, 16  ;;  %v2245_v24 = vrot.slane %v2244_v47, 4  ;;  %v4844_v9 = vld [vmem:[#allocation9 + $0x1c0] sm:$0xff] }
 0x1c4   : > { %3346 = vmatmul.bf16.gmra.mxu0 %v4291_v3  ;;  %v4770_v16 = vld [vmem:[#allocation3 + $0x94] sm:$0xf]  ;;  %2123 = vst [vmem:[#allocation3 + $0xe4] sm:$0xf] %v2106_v13  ;;  %3391 = vmatpush.bf16.msra.mxu2 %v4830_v36  ;;  %v4829_v17 = vld [vmem:[#allocation9 + $0x148] sm:$0xff]  ;;  %v2259_v59 = vrot.slane %v2258_v57, 4 }
 0x1c5   : > { %v4280_v52 = vld [vmem:[#allocation3 + $0xb4] sm:$0xf0]  ;;  %2130 = vst [vmem:[#allocation3 + $0xcc] sm:$0xf] %v2106_v13  ;;  %3422 = vmatpush.bf16.msra.mxu3 %v4836_v19  ;;  %v2107_v2 = vld [vmem:[#allocation2 + $0x40] sm:$0xf] }
 0x1c6   : > { %v4283_v29 = vor.u32 %v4770_v16, %v4280_v52  ;;  %2409 = vst [vmem:[#allocation3 + $0xe0] sm:$0xf] %v2390_v28  ;;  %v4314_v25 = vld [vmem:[#allocation3 + $0xd8] sm:$0xf]  ;;  %v2249_v1 = vrot.slane %v2247_v45, 5  ;;  %3450 = vmatpush.bf16.msra.mxu0 %v4845_v26  ;;  %v2263_v0 = vrot.slane %v2261_v4, 5  ;;  %3474 = vmatpush.bf16.msra.mxu1 %v4858_v60 }
 0x1c7   : > { %2410 = vst [vmem:[#allocation3 + $0x104] sm:$0xf] %v2394_v63  ;;  %v4828_v32 = vld [vmem:[#allocation9 + $0x140] sm:$0xff]  ;;  %v4857_v35 = vld [vmem:[#allocation9 + $0x228] sm:$0xff]  ;;  %v2149_v30 = vld [vmem:[#allocation2 + $0x40] sm:$0xf] }
 0x1c8   : > { %3288 = vmatmul.bf16.gmra.mxu2 %v4283_v29  ;;  %2423 = vst [vmem:[#allocation3 + $0xc8] sm:$0xf] %v2390_v28  ;;  %v2250_v51 = vsel %vm5334_vm9, %v2245_v24, %v2249_v1  ;;  %v2264_v40 = vsel %vm5334_vm9, %v2259_v59, %v2263_v0  ;;  %v4856_v15 = vld [vmem:[#allocation9 + $0x220] sm:$0xff]  ;;  %v2150_v50 = vld [vmem:[#allocation2 + $0x44] sm:$0x1]  ;;  %v2282_v42 = vshrl.u32 %v2149_v30, 16 }
 0x1c9   : > { %2424 = vst [vmem:[#allocation3 + $0xec] sm:$0xf] %v2394_v63  ;;  %3392 = vmatpush.bf16.msra.mxu2 %v4829_v17  ;;  %v2285_v48 = vshll.u32 %v2149_v30, 16  ;;  %v2343_v7 = vld [vmem:[#allocation2 + $0x40] sm:$0xe]  ;;  %v2291_v10 = vshll.u32 %v2150_v50, 16 }
 0x1ca   : > { %v4783_v20 = vld [vmem:[#allocation3 + $0xf8] sm:$0xf0]  ;;  %2437 = vst [vmem:[#allocation3 + $0xb0] sm:$0xf] %v2390_v28  ;;  %3451 = vmatpush.bf16.msra.mxu0 %v4844_v9  ;;  %3475 = vmatpush.bf16.msra.mxu1 %v4857_v35  ;;  %v4758_v22 = vld [vmem:[#allocation3 + $0x30] sm:$0xf0] }
 0x1cb   : > { %v4315_v56 = vor.u32 %v4783_v20, %v4314_v25  ;;  %2438 = vst [vmem:[#allocation3 + $0xd4] sm:$0xf] %v2394_v63  ;;  %v4780_v14 = vld [vmem:[#allocation3 + $0xe4] sm:$0xf]  ;;  %v2284_v27 = vrot.slane %v2282_v42, 4  ;;  %v4202_v61 = vrot.slane %v2343_v7, 9 }
 0x1cc   : > { %2124 = vst [vmem:[#allocation3 + $0x108] sm:$0xf] %v2107_v2  ;;  %v2344_v13 = vld [vmem:[#allocation2 + $0x44] sm:$0x1]  ;;  %v2287_v53 = vrot.slane %v2285_v48, 5  ;;  %v4855_v54 = vld [vmem:[#allocation9 + $0x218] sm:$0xff] }
 0x1cd   : > { %3264 = vmatmul.bf16.gmra.mxu1 %v4315_v56  ;;  %2131 = vst [vmem:[#allocation3 + $0xf0] sm:$0xf] %v2107_v2  ;;  %v4322_v5 = vld [vmem:[#allocation3 + $0xe0] sm:$0xf]  ;;  %3393 = vmatpush.bf16.msra.mxu2 %v4828_v32  ;;  %v2415_v31 = vrot.slane %v2344_v13, 5  ;;  %v2293_v49 = vrot.slane %v2291_v10, 5 }
 0x1ce   : > { %v4784_v37 = vld [vmem:[#allocation3 + $0x100] sm:$0xf0]  ;;  %2279 = vst [vmem:[#allocation3 + $0xdc] sm:$0xf] %v2250_v51  ;;  %3476 = vmatpush.bf16.msra.mxu1 %v4856_v15  ;;  %v4222_v11 = vld [vmem:[#allocation3 + $0x10] sm:$0xf]  ;;  %v2288_v43 = vor.u32 %v2287_v53, %v2284_v27 }
 0x1cf   : > { %v4323_v34 = vor.u32 %v4784_v37, %v4322_v5  ;;  %2280 = vst [vmem:[#allocation3 + $0x100] sm:$0xf] %v2264_v40  ;;  %v4223_v21 = vor.u32 %v4758_v22, %v4222_v11  ;;  %v2416_v8 = vsel %vm5448_vm12, %v4202_v61, %v2415_v31  ;;  %v4759_v33 = vld [vmem:[#allocation3 + $0x38] sm:$0xf0]  ;;  %v4230_v62 = vld [vmem:[#allocation3 + $0x18] sm:$0xf] }
 0x1d0   : > { %2301 = vst [vmem:[#allocation3 + $0xc4] sm:$0xf] %v2250_v51  ;;  %v2289_v18 = vrot.slane %v2288_v43, 4  ;;  %v4231_v55 = vor.u32 %v4759_v33, %v4230_v62  ;;  %v4232_v3 = vld [vmem:[#allocation3 + $0x3c] sm:$0xf0]  ;;  %v4854_v47 = vld [vmem:[#allocation9 + $0x210] sm:$0xff] }
 0x1d1   : > { %3322 = vmatmul.bf16.gmra.mxu3 %v4323_v34  ;;  %2302 = vst [vmem:[#allocation3 + $0xe8] sm:$0xf] %v2264_v40  ;;  %v4755_v19 = vld [vmem:[#allocation3 + $0x1c] sm:$0xf]  ;;  %v4224_v28 = vld [vmem:[#allocation3 + $0x34] sm:$0xf0] }
 0x1d2   : > { %2323 = vst [vmem:[#allocation3 + $0xac] sm:$0xf] %v2250_v51  ;;  %3477 = vmatpush.bf16.msra.mxu1 %v4855_v54  ;;  %v2294_v36 = vsel %vm5334_vm9, %v2289_v18, %v2293_v49  ;;  %v4235_v23 = vor.u32 %v4755_v19, %v4232_v3  ;;  %v4754_v44 = vld [vmem:[#allocation3 + $0x14] sm:$0xf]  ;;  %v4767_v16 = vld [vmem:[#allocation3 + $0x78] sm:$0xf0] }
 0x1d3   : > { %v4324_v41 = vld [vmem:[#allocation3 + $0x104] sm:$0xf0]  ;;  %2324 = vst [vmem:[#allocation3 + $0xd0] sm:$0xf] %v2264_v40  ;;  %v4227_v39 = vor.u32 %v4754_v44, %v4224_v28  ;;  %v4258_v63 = vld [vmem:[#allocation3 + $0x58] sm:$0xf] }
 0x1d4   : > { %v4327_v38 = vor.u32 %v4780_v14, %v4324_v41  ;;  %2425 = vst [vmem:[#allocation3 + $0x110] sm:$0xf] %v2416_v8  ;;  %v4259_v45 = vor.u32 %v4767_v16, %v4258_v63  ;;  %v4768_v57 = vld [vmem:[#allocation3 + $0x80] sm:$0xf0]  ;;  %v4266_v52 = vld [vmem:[#allocation3 + $0x60] sm:$0xf] }
 0x1d5   : > { %v4779_v58 = vld [vmem:[#allocation3 + $0xdc] sm:$0xf]  ;;  %2439 = vst [vmem:[#allocation3 + $0xf8] sm:$0xf] %v2416_v8  ;;  %v4267_v26 = vor.u32 %v4768_v57, %v4266_v52  ;;  %v4268_v17 = vld [vmem:[#allocation3 + $0x84] sm:$0xf0] }
 0x1d6   : > { %3351 = vmatmul.bf16.gmra.mxu0 %v4327_v38  ;;  %v4316_v12 = vld [vmem:[#allocation3 + $0xfc] sm:$0xf0]  ;;  %2303 = vst [vmem:[#allocation3 + $0x10c] sm:$0xf] %v2294_v36  ;;  %3478 = vmatpush.bf16.msra.mxu1 %v4854_v47  ;;  %v4764_v29 = vld [vmem:[#allocation3 + $0x64] sm:$0xf] }
 0x1d7   : > { %v4319_v46 = vor.u32 %v4779_v58, %v4316_v12  ;;  %2325 = vst [vmem:[#allocation3 + $0xf4] sm:$0xf] %v2294_v36  ;;  %v4271_v4 = vor.u32 %v4764_v29, %v4268_v17  ;;  %v4260_v24 = vld [vmem:[#allocation3 + $0x7c] sm:$0xf0]  ;;  %v4763_v2 = vld [vmem:[#allocation3 + $0x5c] sm:$0xf] }
 0x1d8   : > { %v4852_v59 = vld [vmem:[#allocation9 + $0x200] sm:$0xff]  ;;  %v4263_v60 = vor.u32 %v4763_v2, %v4260_v24  ;;  %v4777_v20 = vld [vmem:[#allocation3 + $0xc8] sm:$0xf0]  ;;  %v4302_v0 = vld [vmem:[#allocation3 + $0xa8] sm:$0xf] }
 0x1d9   : > { %3293 = vmatmul.bf16.gmra.mxu2 %v4319_v46  ;;  %v4776_v25 = vld [vmem:[#allocation3 + $0xc0] sm:$0xf0]  ;;  %v4294_v1 = vld [vmem:[#allocation3 + $0xa0] sm:$0xf]  ;;  %v4303_v32 = vor.u32 %v4777_v20, %v4302_v0  ;;  %v4773_v51 = vld [vmem:[#allocation3 + $0xac] sm:$0xf] }
 0x1da   : > { %3479 = vmatpush.bf16.msra.mxu1 %v4853_v6  ;;  %v4295_v9 = vor.u32 %v4776_v25, %v4294_v1  ;;  %v4304_v56 = vld [vmem:[#allocation3 + $0xcc] sm:$0xf0]  ;;  %v4296_v35 = vld [vmem:[#allocation3 + $0xc4] sm:$0xf0]  ;;  %v4772_v5 = vld [vmem:[#allocation3 + $0xa4] sm:$0xf] }
 0x1db   : > { %v4307_v40 = vor.u32 %v4773_v51, %v4304_v56  ;;  %v4299_v37 = vor.u32 %v4772_v5, %v4296_v35  ;;  %v4330_v14 = vld [vmem:[#allocation3 + $0xe8] sm:$0xf]  ;;  %v4338_v38 = vld [vmem:[#allocation3 + $0xf0] sm:$0xf]  ;;  %v4786_v58 = vld [vmem:[#allocation3 + $0x110] sm:$0xf0] }
 0x1dc   : > { %v4339_v30 = vor.u32 %v4786_v58, %v4338_v38  ;;  %v4340_v50 = vld [vmem:[#allocation3 + $0x114] sm:$0xf0]  ;;  %v4332_v46 = vld [vmem:[#allocation3 + $0x10c] sm:$0xf0]  ;;  %v4781_v48 = vld [vmem:[#allocation3 + $0xec] sm:$0xf] }
 0x1dd   : > { %3365 = vmatmul.bf16.vlgmr.msrb.gmra.mxu1 %v4223_v21  ;;  %v4785_v34 = vld [vmem:[#allocation3 + $0x108] sm:$0xf0]  ;;  %v4335_v7 = vor.u32 %v4781_v48, %v4332_v46  ;;  %v4760_v22 = vld [vmem:[#allocation3 + $0x40] sm:$0xf0]  ;;  %v4238_v13 = vld [vmem:[#allocation3 + $0x20] sm:$0xf] }
 0x1de   : > { %3480 = vmatpush.bf16.msra.mxu1 %v4852_v59  ;;  %v4331_v41 = vor.u32 %v4785_v34, %v4330_v14  ;;  %v4782_v15 = vld [vmem:[#allocation3 + $0xf4] sm:$0xf]  ;;  %v4239_v61 = vor.u32 %v4760_v22, %v4238_v13  ;;  %v4769_v43 = vld [vmem:[#allocation3 + $0x88] sm:$0xf0]  ;;  %v4274_v18 = vld [vmem:[#allocation3 + $0x68] sm:$0xf] }
 0x1df   : > { %v4343_v42 = vor.u32 %v4782_v15, %v4340_v50  ;;  %v4275_v49 = vor.u32 %v4769_v43, %v4274_v18  ;;  %v4778_v47 = vld [vmem:[#allocation3 + $0xd0] sm:$0xf0]  ;;  %v4310_v16 = vld [vmem:[#allocation3 + $0xb0] sm:$0xf]  ;;  %v4346_v24 = vld [vmem:[#allocation3 + $0xf8] sm:$0xf] }
 0x1e0   : > { %v4311_v63 = vor.u32 %v4778_v47, %v4310_v16  ;;  %v4787_v2 = vld [vmem:[#allocation3 + $0x118] sm:$0xf0]  ;;  %v3533_v47 = vld [vmem:[%s5839_s3 + $0x50] sm:$0xff] }
 0x1e1   : > { %3423 = vmatmul.bf16.vlgmr.msra.gmra.mxu3 %v4231_v55  ;;  %v4347_v1 = vor.u32 %v4787_v2, %v4346_v24 }
 0x1e6   : > { %3452 = vmatmul.bf16.vlgmr.msra.gmra.mxu0 %v4235_v23 }
 0x1e9   : > { %3394 = vmatmul.bf16.vlgmr.msra.gmra.mxu2 %v4227_v39 }
 0x1ed   : > { %3370 = vmatmul.bf16.gmra.mxu1 %v4259_v45 }
 0x1f1   : > { %3428 = vmatmul.bf16.gmra.mxu3 %v4267_v26 }
 0x1f6   : > { %3457 = vmatmul.bf16.gmra.mxu0 %v4271_v4 }
 0x1f9   : > { %3399 = vmatmul.bf16.gmra.mxu2 %v4263_v60 }
 0x1fd   : > { %3375 = vmatmul.bf16.gmra.mxu1 %v4295_v9 }
 0x201   : > { %3433 = vmatmul.bf16.gmra.mxu3 %v4303_v32 }
 0x206   : > { %3462 = vmatmul.bf16.gmra.mxu0 %v4307_v40 }
 0x209   : > { %3404 = vmatmul.bf16.gmra.mxu2 %v4299_v37 }
 0x20d   : > { %3380 = vmatmul.bf16.gmra.mxu1 %v4331_v41 }
 0x210   : > { %v3250_v12 = vpop.f32.mrf.mxu1 }
 0x211   : > { %3438 = vmatmul.bf16.gmra.mxu3 %v4339_v30 }
 0x216   : > { %3467 = vmatmul.bf16.gmra.mxu0 %v4343_v42 }
 0x217   : > { %v3337_v36 = vpop.f32.mrf.mxu0 }
 0x218   : > { %v3252_v27 = vpop.f32.mrf.mxu1  ;;  %v3308_v53 = vpop.f32.mrf.mxu3 }
 0x219   : > { %3409 = vmatmul.bf16.gmra.mxu2 %v4335_v7 }
 0x21d   : > { %3481 = vmatmul.bf16.vlgmr.msra.gmra.mxu1 %v4239_v61 }
 0x21f   : > { %v3339_v39 = vpop.f32.mrf.mxu0 }
 0x220   : > { %v3279_v10 = vpop.f32.mrf.mxu2  ;;  %v3255_v11 = vpop.f32.mrf.mxu1 }
 0x221   : > { %v3280_v31 = vadd.f32 %v3279_v10, %v3250_v12  ;;  %v3310_v54 = vpop.f32.mrf.mxu3 }
 0x223   : > { %v3309_v21 = vadd.f32 %v3308_v53, %v3280_v31 }
 0x225   : > { %v3338_v45 = vadd.f32 %v3337_v36, %v3309_v21  ;;  %v3535_v36 = vld [vmem:[%s5839_s3 + $0x60] sm:$0xff] }
 0x228   : > { %v3281_v8 = vpop.f32.mrf.mxu2  ;;  %v3257_v55 = vpop.f32.mrf.mxu1 }
 0x229   : > { %v3282_v33 = vadd.f32 %v3281_v8, %v3252_v27  ;;  %v3313_v3 = vpop.f32.mrf.mxu3  ;;  %v3342_v4 = vpop.f32.mrf.mxu0 }
 0x22b   : > { %v3311_v62 = vadd.f32 %v3310_v54, %v3282_v33  ;;  %v3538_v33 = vld [vmem:[%s5839_s3 + $0x78] sm:$0xff]  ;;  %v3537_v54 = vld [vmem:[%s5839_s3 + $0x70] sm:$0xff] }
 0x22c   : > { %3540 = vmatpush.msrb.mxu2 %v3538_v33 }
 0x22d   : > { %3486 = vmatmul.bf16.gmra.mxu1 %v4275_v49  ;;  %v3340_v29 = vadd.f32 %v3339_v39, %v3311_v62 }
 0x22e   : > { %3541 = vmatpush.msrb.mxu2 %v3537_v54  ;;  %v3561_v54 = vld [vmem:[%s5841_s5] sm:$0xff] }
 0x22f   : > { %3582 = vmatpush.msrb.mxu3 %v3561_v54 }
 0x231   : > { %v3315_v52 = vpop.f32.mrf.mxu3  ;;  %v3344_v0 = vpop.f32.mrf.mxu0 }
 0x234   : > { %v3260_v28 = vpop.f32.mrf.mxu1 }
 0x235   : > { %v3284_v19 = vpop.f32.mrf.mxu2 }
 0x236   : > { %v3285_v23 = vadd.f32 %v3284_v19, %v3255_v11 }
 0x238   : > { %v3314_v44 = vadd.f32 %v3313_v3, %v3285_v23 }
 0x23a   : > { %v3343_v9 = vadd.f32 %v3342_v4, %v3314_v44  ;;  %v3534_v44 = vld [vmem:[%s5839_s3 + $0x58] sm:$0xff] }
 0x23c   : > { %v3262_v17 = vpop.f32.mrf.mxu1 }
 0x23d   : > { %3491 = vmatmul.bf16.gmra.mxu1 %v4311_v63  ;;  %v3286_v57 = vpop.f32.mrf.mxu2 }
 0x23e   : > { %v3287_v6 = vadd.f32 %v3286_v57, %v3257_v55  ;;  %v3536_v55 = vld [vmem:[%s5839_s3 + $0x68] sm:$0xff]  ;;  %v3531_v57 = vld [vmem:[%s5839_s3 + $0x40] sm:$0xff] }
 0x23f   : > { %3542 = vmatpush.msrb.mxu2 %v3536_v55 }
 0x240   : > { %v3316_v26 = vadd.f32 %v3315_v52, %v3287_v6  ;;  %v3318_v60 = vpop.f32.mrf.mxu3 }
 0x241   : > { %v3347_v34 = vpop.f32.mrf.mxu0  ;;  %3543 = vmatpush.msrb.mxu2 %v3535_v36 }
 0x242   : > { %v3345_v40 = vadd.f32 %v3344_v0, %v3316_v26 }
 0x243   : > { %3544 = vmatpush.msrb.mxu2 %v3534_v44 }
 0x245   : > { %3545 = vmatpush.msrb.mxu2 %v3533_v47 }
 0x248   : > { %v3320_v5 = vpop.f32.mrf.mxu3 }
 0x249   : > { %v3349_v58 = vpop.f32.mrf.mxu0 }
 0x24a   : > { %v5675_v59 = vpop.f32.mrf.mxu1 }
 0x24b   : > { %v3289_v25 = vpop.f32.mrf.mxu2 }
 0x24c   : > { %v3290_v20 = vadd.f32 %v3289_v25, %v3260_v28  ;;  %v3527_v25 = vld [vmem:[%s5839_s3 + $0x20] sm:$0xff] }
 0x24d   : > { %3496 = vmatmul.bf16.gmra.mxu1 %v4347_v1 }
 0x24e   : > { %v3319_v32 = vadd.f32 %v3318_v60, %v3290_v20  ;;  %v3528_v60 = vld [vmem:[%s5839_s3 + $0x28] sm:$0xff] }
 0x250   : > { %v3348_v38 = vadd.f32 %v3347_v34, %v3319_v32 }
 0x252   : > { %v5677_v56 = vpop.f32.mrf.mxu1 }
 0x253   : > { %v3291_v51 = vpop.f32.mrf.mxu2  ;;  %v5689_v27 = vpop.f32.mrf.mxu0 }
 0x254   : > { %v3292_v35 = vadd.f32 %v3291_v51, %v3262_v17  ;;  %v5685_v48 = vpop.f32.mrf.mxu3  ;;  %v3530_v17 = vld [vmem:[%s5839_s3 + $0x38] sm:$0xff] }
 0x256   : > { %v3321_v37 = vadd.f32 %v3320_v5, %v3292_v35 }
 0x258   : > { %v3350_v15 = vadd.f32 %v3349_v58, %v3321_v37 }
 0x25a   : > { %v3366_v14 = vpop.f32.mrf.mxu1 }
 0x25b   : > { %v5679_v41 = vadd.f32 %v3366_v14, %v3338_v45  ;;  %v5693_v31 = vpop.f32.mrf.mxu0  ;;  %v3532_v45 = vld [vmem:[%s5839_s3 + $0x48] sm:$0xff] }
 0x25c   : > { %v3294_v46 = vpop.f32.mrf.mxu2  ;;  %v3325_v10 = vpop.f32.mrf.mxu3  ;;  %3546 = vmatpush.msrb.mxu2 %v3532_v45 }
 0x25d   : > { %v3295_v51 = vadd.f32 %v3294_v46, %v5675_v59 }
 0x25e   : > { %3547 = vmatpush.msrb.mxu2 %v3531_v57 }
 0x25f   : > { %v3324_v14 = vadd.f32 %v5685_v48, %v3295_v51 }
 0x260   : > { %3548 = vmatpush.msrb.mxu2 %v3530_v17 }
 0x262   : > { %v3368_v30 = vpop.f32.mrf.mxu1 }
 0x263   : > { %v5681_v12 = vadd.f32 %v3368_v30, %v3340_v29  ;;  %v5703_v18 = vpop.f32.mrf.mxu0  ;;  %v3529_v29 = vld [vmem:[%s5839_s3 + $0x30] sm:$0xff] }
 0x264   : > { %v3296_v13 = vpop.f32.mrf.mxu2  ;;  %v3424_v8 = vpop.f32.mrf.mxu3  ;;  %3549 = vmatpush.msrb.mxu2 %v3529_v29 }
 0x265   : > { %v3297_v5 = vadd.f32 %v3296_v13, %v5677_v56 }
 0x266   : > { %3550 = vmatpush.msrb.mxu2 %v3528_v60 }
 0x268   : > { %3551 = vmatpush.msrb.mxu2 %v3527_v25 }
 0x26a   : > { %v3371_v50 = vpop.f32.mrf.mxu1 }
 0x26b   : > { %v5683_v42 = vadd.f32 %v3371_v50, %v3343_v9  ;;  %v3455_v23 = vpop.f32.mrf.mxu0  ;;  %v3326_v50 = vadd.f32 %v3325_v10, %v3297_v5 }
 0x26c   : > { %v3395_v11 = vpop.f32.mrf.mxu2  ;;  %v3426_v3 = vpop.f32.mrf.mxu3 }
 0x272   : > { %v3373_v7 = vpop.f32.mrf.mxu1 }
 0x273   : > { %v5687_v22 = vadd.f32 %v3373_v7, %v3345_v40  ;;  %v3458_v63 = vpop.f32.mrf.mxu0 }
 0x274   : > { %v3397_v49 = vpop.f32.mrf.mxu2  ;;  %v3429_v39 = vpop.f32.mrf.mxu3 }
 0x275   : > { %v3398_v35 = vadd.f32 %v3397_v49, %v5681_v12  ;;  %v3353_v12 = vadd.f32 %v5689_v27, %v3324_v14 }
 0x27a   : > { %v3376_v61 = vpop.f32.mrf.mxu1 }
 0x27b   : > { %v5691_v53 = vadd.f32 %v3376_v61, %v3348_v38  ;;  %v3460_v4 = vpop.f32.mrf.mxu0  ;;  %v3396_v38 = vadd.f32 %v3395_v11, %v5679_v41  ;;  %v3526_v41 = vld [vmem:[%s5839_s3 + $0x18] sm:$0xff] }
 0x27c   : > { %v3400_v28 = vpop.f32.mrf.mxu2  ;;  %v3431_v26 = vpop.f32.mrf.mxu3  ;;  %3552 = vmatpush.msrb.mxu2 %v3526_v41 }
 0x27d   : > { %v3401_v58 = vadd.f32 %v3400_v28, %v5683_v42  ;;  %v3425_v59 = vadd.f32 %v3424_v8, %v3396_v38  ;;  %v3525_v42 = vld [vmem:[%s5839_s3 + $0x10] sm:$0xff]  ;;  %v3523_v28 = vld [vmem:[%s5839_s3] sm:$0xff] }
 0x27e   : > { %3553 = vmatpush.msrb.mxu2 %v3525_v42 }
 0x27f   : > { %v3430_v46 = vadd.f32 %v3429_v39, %v3401_v58  ;;  %v3454_v10 = vadd.f32 %v5703_v18, %v3425_v59  ;;  %v3539_v59 = vld [vmem:[%s5840_s4] sm:$0x1] }
 0x281   : > { %v3459_v8 = vadd.f32 %v3458_v63, %v3430_v46 }
 0x282   : > { %v3378_v21 = vpop.f32.mrf.mxu1 }
 0x283   : > { %v5695_v43 = vadd.f32 %v3378_v21, %v3350_v15  ;;  %v3463_v9 = vpop.f32.mrf.mxu0  ;;  %v3427_v15 = vadd.f32 %v3426_v3, %v3398_v35 }
 0x284   : > { %v3402_v6 = vpop.f32.mrf.mxu2  ;;  %v3434_v1 = vpop.f32.mrf.mxu3 }
 0x285   : > { %v3403_v30 = vadd.f32 %v3402_v6, %v5687_v22  ;;  %v3456_v33 = vadd.f32 %v3455_v23, %v3427_v15  ;;  %v5135_v23 = vmov 64.0  }
 0x286   : > { %4952 = vrcp.f32 %v5135_v23 }
 0x287   : > { %v3432_v61 = vadd.f32 %v3431_v26, %v3403_v30 }
 0x28a   : > { %v3381_v62 = vpop.f32.mrf.mxu1 }
 0x28b   : > { %v3465_v37 = vpop.f32.mrf.mxu0  ;;  %v3382_v21 = vadd.f32 %v3381_v62, %v3353_v12 }
 0x28c   : > { %v3405_v24 = vpop.f32.mrf.mxu2  ;;  %v3436_v32 = vpop.f32.mrf.mxu3 }
 0x28d   : > { %v3406_v7 = vadd.f32 %v3405_v24, %v5691_v53  ;;  %v3355_v53 = vadd.f32 %v5693_v31, %v3326_v50  ;;  %v3461_v31 = vadd.f32 %v3460_v4, %v3432_v61  ;;  %v4953_v26 = vpop.eup %4952 }
 0x28e   : > { %vm3520_vm13 = vweird.f32 %v4953_v26 }
 0x28f   : > { %v3435_v22 = vadd.f32 %v3434_v1, %v3406_v7  ;;  %v3516_v1 = vmul.f32 64.0, %v4953_v26 }
 0x291   : > { %v3464_v44 = vadd.f32 %v3463_v9, %v3435_v22 }
 0x292   : > { %v5711_v19 = vpop.f32.mrf.mxu1 }
 0x293   : > { %v3384_v49 = vadd.f32 %v5711_v19, %v3355_v53  ;;  %v3468_v62 = vpop.f32.mrf.mxu0 }
 0x294   : > { %v3407_v20 = vpop.f32.mrf.mxu2  ;;  %v3439_v56 = vpop.f32.mrf.mxu3 }
 0x295   : > { %v3408_v48 = vadd.f32 %v3407_v20, %v5695_v43  ;;  %v3524_v43 = vld [vmem:[%s5839_s3 + $0x8] sm:$0xff] }
 0x296   : > { %3554 = vmatpush.msrb.mxu2 %v3524_v43 }
 0x297   : > { %v3437_v36 = vadd.f32 %v3436_v32, %v3408_v48 }
 0x298   : > { %3555 = vmatpush.msrb.mxu2 %v3523_v28 }
 0x299   : > { %v3466_v6 = vadd.f32 %v3465_v37, %v3437_v36 }
 0x29a   : > { %v5719_v16 = vpop.f32.mrf.mxu1 }
 0x29b   : > { %v5767_v18 = vadd.f32 %v5719_v16, %v3454_v10  ;;  %v3470_v25 = vpop.f32.mrf.mxu0 }
 0x29c   : > { %v3410_v34 = vpop.f32.mrf.mxu2 }
 0x29d   : > { %v3411_v27 = vadd.f32 %v3410_v34, %v3382_v21 }
 0x29f   : > { %v3440_v19 = vadd.f32 %v3439_v56, %v3411_v27  ;;  %v3562_v56 = vld [vmem:[%s5842_s6] sm:$0x1] }
 0x2a1   : > { %v3469_v24 = vadd.f32 %v3468_v62, %v3440_v19 }
 0x2a2   : > { %v3484_v52 = vpop.f32.mrf.mxu1 }
 0x2a3   : > { %v5757_v11 = vadd.f32 %v3484_v52, %v3456_v33  ;;  %v3441_v52 = vpop.f32.mrf.mxu3 }
 0x2a4   : > { %v3412_v55 = vpop.f32.mrf.mxu2 }
 0x2a5   : > { %v3413_v47 = vadd.f32 %v3412_v55, %v3384_v49  ;;  %v3502_v39 = vadd.f32 %v5757_v11, %v5767_v18 }
 0x2a7   : > { %v3442_v17 = vadd.f32 %v3441_v52, %v3413_v47  ;;  %v4960_v52 = vld [vmem:[%s5279_s13 + $0x10] sm:$0xff] }
 0x2a9   : > { %v3471_v20 = vadd.f32 %v3470_v25, %v3442_v17  ;;  %v4963_v17 = vld [vmem:[%s5279_s13 + $0x28] sm:$0xff] }
 0x2aa   : > { %v3487_v2 = vpop.f32.mrf.mxu1 }
 0x2ab   : > { %v5769_v3 = vadd.f32 %v3487_v2, %v3459_v8 }
 0x2ad   : > { %v3503_v16 = vadd.f32 %v3502_v39, %v5769_v3  ;;  %v4958_v39 = vld [vmem:[%s5279_s13] sm:$0xff] }
 0x2b2   : > { %v3489_v0 = vpop.f32.mrf.mxu1 }
 0x2b3   : > { %v5776_v63 = vadd.f32 %v3489_v0, %v3461_v31 }
 0x2b5   : > { %v3504_v29 = vadd.f32 %v3503_v16, %v5776_v63  ;;  %v4959_v16 = vld [vmem:[%s5279_s13 + $0x8] sm:$0xff] }
 0x2ba   : > { %v3492_v40 = vpop.f32.mrf.mxu1 }
 0x2bb   : > { %v5779_v57 = vadd.f32 %v3492_v40, %v3464_v44  ;;  %v3517_v40 = vsub.f32 1.0, %v3516_v1 }
 0x2bd   : > { %v3505_v2 = vadd.f32 %v3504_v29, %v5779_v57  ;;  %v3518_v37 = vmul.f32 %v4953_v26, %v3517_v40 }
 0x2bf   : > { %v3519_v38 = vadd.f32 %v4953_v26, %v3518_v37 }
 0x2c1   : > { %v3521_v15 = vsel %vm3520_vm13, %v4953_v26, %v3519_v38  ;;  %v4962_v26 = vld [vmem:[%s5279_s13 + $0x20] sm:$0xff] }
 0x2c2   : > { %v3494_v13 = vpop.f32.mrf.mxu1 }
 0x2c3   : > { %v3495_v4 = vadd.f32 %v3494_v13, %v3466_v6 }
 0x2c5   : > { %v3506_v9 = vadd.f32 %v3505_v2, %v3495_v4  ;;  %v4965_v2 = vld [vmem:[%s5279_s13 + $0x38] sm:$0xff] }
 0x2ca   : > { %v3497_v45 = vpop.f32.mrf.mxu1 }
 0x2cb   : > { %v3498_v60 = vadd.f32 %v3497_v45, %v3469_v24 }
 0x2cd   : > { %v3507_v32 = vadd.f32 %v3506_v9, %v3498_v60 }
 0x2d2   : > { %v3499_v0 = vpop.f32.mrf.mxu1 }
 0x2d3   : > { %v3500_v51 = vadd.f32 %v3499_v0, %v3471_v20 }
 0x2d5   : > { %v3508_v35 = vadd.f32 %v3507_v32, %v3500_v51 }
 0x2d7   : > { %v3509_v5 = vrot.slane %v3508_v35, 4 }
 0x2d9   : > { %v3510_v34 = vadd.f32 %v3509_v5, %v3508_v35 }
 0x2db   : > { %v3511_v14 = vrot.slane %v3510_v34, 2 }
 0x2dd   : > { %v3512_v58 = vadd.f32 %v3511_v14, %v3510_v34 }
 0x2df   : > { %v3513_v30 = vrot.slane %v3512_v58, 1 }
 0x2e1   : > { %v3514_v50 = vadd.f32 %v3513_v30, %v3512_v58 }
 0x2e3   : > { %v3522_v7 = vmul.f32 %v3521_v15, %v3514_v50 }
 0x2e5   : > { %3556 = vmatmul.f32.vlgmr.msrb.gmra.mxu2 %v3522_v7 }
 0x368   : > { %v3557_v46 = vpop.f32.mrf.mxu2 }
 0x369   : > { %v3558_v12 = vadd.f32 %v3557_v46, %v3539_v59 }
 0x36b   : > { %v3560_v61 = vmax.f32 %v3558_v12, 0.0 }
 0x36d   : > { %4636 = vmatmul.msk.f32.vlgmr.msrb.gmra.mxu3 %vm3563_vm14, %v3560_v61 }
 0x3f0   : > { %v3584_v13 = vpop.f32.mrf.mxu3 }
 0x3f1   : > { %v3585_v21 = vadd.f32 %v3584_v13, %v3562_v56 }
 0x3f3   : > { %v4637_v48 = vmul.f32 -1.442695, %v3585_v21 }
 0x3f5   : > { %4954 = vpow2.f32 %v4637_v48 }
 0x3fb   : > { %v4955_v33 = vpop.eup %4954 }
 0x3fc   : > { %v3590_v41 = vadd.f32 1.0, %v4955_v33 }
 0x3fe   : > { %4956 = vrcp.f32 %v3590_v41  ;;  %v3602_v27 = vand.u32 2147483648, %v3590_v41  ;;  %v3600_v8 = vand.u32 2147483647, %v3590_v41  ;;  %vm3596_vm0 = vweird.f32 %v3590_v41 }
 0x400   : > { %v3603_v54 = vor.u32 1.1754944e-38, %v3602_v27  ;;  %vm3601_vm2 = vcmp.eq.f32.partialorder %v3600_v8, 8.507059e+37 }
 0x404   : > { %v4957_v42 = vpop.eup %4956 }
 0x405   : > { %v3592_v22 = vmul.f32 %v4957_v42, %v3590_v41  ;;  %vm3597_vm15 = vweird.f32 %v4957_v42 }
 0x406   : > { %vm3598_vm1 = vmor %vm3596_vm0, %vm3597_vm15 }
 0x407   : > { %v3593_v53 = vsub.f32 1.0, %v3592_v22 }
 0x409   : > { %v3594_v10 = vmul.f32 %v4957_v42, %v3593_v53 }
 0x40b   : > { %v3595_v43 = vadd.f32 %v4957_v42, %v3594_v10 }
 0x40d   : > { %v3599_v49 = vsel %vm3598_vm1, %v4957_v42, %v3595_v43 }
 0x40e   : > { %v3604_v62 = vsel %vm3601_vm2, %v3603_v54, %v3599_v49 }
 0x40f   : > { %v3606_v55 = vperm.slane %v3604_v62, 0 }
 0x411   : > { %v3607_v31 = vmul.f32 %v3606_v55, %v5767_v18  ;;  %v3608_v36 = vmul.f32 %v3606_v55, %v5757_v11  ;;  %v3609_v23 = vmul.f32 %v3606_v55, %v5769_v3  ;;  %v3610_v28 = vmul.f32 %v3606_v55, %v5776_v63  ;;  %v4961_v3 = vld [vmem:[%s5279_s13 + $0x18] sm:$0xff] }
 0x412   : > { %v3611_v44 = vmul.f32 %v3606_v55, %v5779_v57  ;;  %v3612_v19 = vmul.f32 %v3606_v55, %v3495_v4  ;;  %v3613_v47 = vmul.f32 %v3606_v55, %v3498_v60  ;;  %v3614_v11 = vmul.f32 %v3606_v55, %v3500_v51  ;;  %v4964_v4 = vld [vmem:[%s5279_s13 + $0x30] sm:$0xff]  ;;  %s5076_s13 = scalar_lea.hbm %s5843_s7, 256 }
 0x413   : > { %v3615_v45 = vadd.f32 %v4958_v39, %v3607_v31  ;;  %v3616_v6 = vadd.f32 %v4959_v16, %v3608_v36  ;;  %v3617_v18 = vadd.f32 %v4960_v52, %v3609_v23  ;;  %v3618_v63 = vadd.f32 %v4961_v3, %v3610_v28  ;;  %p5078_p7 = scmp.lt.s32.totalorder %s5076_s13, %s5072_s11 }
 0x414   : > { %v3619_v57 = vadd.f32 %v4962_v26, %v3611_v44  ;;  %v3620_v29 = vadd.f32 %v4963_v17, %v3612_v19  ;;  %v3621_v24 = vadd.f32 %v4964_v4, %v3613_v47  ;;  %v3622_v60 = vadd.f32 %v4965_v2, %v3614_v11 }
 0x415   : > { %3623 = vst [vmem:[%s331_s23] sm:$0xff] %v3615_v45  ;;  %p5079_p9 = por %p5078_p7, %p5077_p2 }
 0x416   : > { %3624 = vst [vmem:[%s331_s23 + $0x8] sm:$0xff] %v3616_v6 }
 0x417   : > { %3625 = vst [vmem:[%s331_s23 + $0x10] sm:$0xff] %v3617_v18  ;;  %p5080_p10 = pnand %p5079_p9, %p5075_p8 }
 0x418   : > { %3626 = vst [vmem:[%s331_s23 + $0x18] sm:$0xff] %v3618_v63 }
 0x419   : > { %3627 = vst [vmem:[%s331_s23 + $0x20] sm:$0xff] %v3619_v57 }
 0x41a   : > { %3628 = vst [vmem:[%s331_s23 + $0x28] sm:$0xff] %v3620_v29 }
 0x41b   : > { %3629 = vst [vmem:[%s331_s23 + $0x30] sm:$0xff] %v3621_v24 }
 0x41c   : > { %3630 = vst [vmem:[%s331_s23 + $0x38] sm:$0xff] %v3622_v60 }
 0x41d   : > { %5083 = shalt.err (!%p5080_p10)
}
 0x41e   : > { %s5136_s14 = smov 128   ;;  %s5137_s19 = smov 8  }
 0x41f   : > { %4887 = dma.vmem_to_hbm [thread:$0]  (%p5243_p0), %s3645_s15, 1024, %s3647_s16, %s3632_s29, %s5136_s14, %s5136_s14, %s5137_s19  }
 0x420 PF: > { %p4909_p11 = scmp.ge.s32.totalorder %s5126_s27, 2  ;;  %s3661_s28 = sand.u32 1, %s5114_s24  }
 0x421   : > { %s3662_s20 = scalar_lea.sflag [#allocation6], %s3661_s28 }
 0x422   : > { %p4901_p12 = pnand %p4909_p11, %p5213_p6 }
 0x424   : > { %p4902_p13 = pneg %p4901_p12 }
 0x426   : > { %5109 = dma.done.wait (%p4902_p13), %s3662_s20, 1024  }
 0x427   : > { %5111 = vsyncadd (%p4902_p13), %s3662_s20, 4294966272  ;;  %p21_p3 = scmp.ge.s32.totalorder %s5233_s22, 6   ;;  %s5861_s24 = smov %s5118_s25 }
 0x428   : > { %s5862_s25 = smov %s5122_s26  ;;  %s5863_s26 = smov %s5249_s10 }
 0x429   : > { %s5864_s27 = smov %s5233_s22  ;;  %23 = sbr.rel (!%p21_p3) target bundleno = 8 (0x8), region = 103 }
 0x42e   :  { %3668 = vsyncpa [#allocation5], 1 }
 0x42f   :  { %3670 = vsyncpa [#allocation5 + $0x1], 1 }
 0x430   :  { %3671 = vsyncpa [#allocation8], 1 }
 0x431   :  { %3672 = vsyncpa [#allocation6], 1 }
 0x432   :  { %3674 = vsyncpa [#allocation6 + $0x1], 1 }

// kernel: tpu_custom_call.1
= control target key start
LH: loop header
LB: loop body
LE: loop exit
PB: predicated region body
PF: predicated region fallthrough
CT: control target
= control target key end

     0   :  { %s5836_s0 = inlined_call_operand.hbm [shape: f32[4,8,8,128], index: 0, kind: input, shape index: {}]   ;;  %s5837_s1 = inlined_call_operand.hbm [shape: bf16[1152,128], index: 1, kind: input, shape index: {}]   ;;  %s5838_s2 = inlined_call_operand.hbm [shape: bf16[1152,128], index: 2, kind: input, shape index: {}]   ;;  %s5839_s3 = inlined_call_operand.vmem [shape: f32[128,8], index: 3, kind: input, shape index: {}]   ;;  %s5840_s4 = inlined_call_operand.vmem [shape: f32[1,8], index: 4, kind: input, shape index: {}]   ;;  %s5841_s5 = inlined_call_operand.vmem [shape: f32[8,128], index: 5, kind: input, shape index: {}]   ;;  %s5842_s6 = inlined_call_operand.vmem [shape: f32[1,128], index: 6, kind: input, shape index: {}]   ;;  %s5843_s7 = inlined_call_operand.hbm [shape: f32[4,8,8,128], index: 7, kind: output, shape index: {}]  }
   0x1   :  { %5844 = sst [smem:[#allocation14_spill]] %s5837_s1 }
   0x2   :  { %12 = vsyncpa [#allocation5], 0 }
   0x3   :  { %14 = vsyncpa [#allocation5 + $0x1], 0 }
   0x4   :  { %15 = vsyncpa [#allocation8], 0 }
   0x5   :  { %16 = vsyncpa [#allocation6], 0 }
   0x6   :  { %18 = vsyncpa [#allocation6 + $0x1], 0  ;;  %s5178_s24 = smov 0   ;;  %s5180_s25 = smov 0  }
   0x7   :  { %s5182_s26 = smov 0   ;;  %s5184_s27 = smov 0  }
   0x8 LB: > { %s5199_s28 = sadd.s32 4294967295, %s5126_s27   ;;  %s3739_s29 = sadd.s32 4294967294, %s5126_s27   ;;  %s5126_s27 = sphi %s5184_s27, %s5864_s27   ;;  %s5122_s26 = sphi %s5182_s26, %s5863_s26   ;;  %s5118_s25 = sphi %s5180_s25, %s5862_s25   ;;  %s5114_s24 = sphi %s5178_s24, %s5861_s24  }
   0x9   : > { %p44_p0 = scmp.ne.s32.totalorder %s5118_s25, %s5114_s24  ;;  %p45_p1 = scmp.eq.s32.totalorder %s5199_s28, 0 }
   0xa   : > { %p194_p2 = scmp.eq.s32.totalorder %s5199_s28, 3  ;;  %p200_p3 = scmp.eq.s32.totalorder %s3739_s29, 3 }
   0xb   : > { %p5208_p4 = por %p45_p1, %p44_p0  ;;  %p3740_p5 = scmp.ge.s32.totalorder %s5126_s27, 1 }
   0xc   : > { %p5213_p6 = por %p200_p3, %p44_p0  ;;  %p207_p7 = scmp.lt.s32.totalorder %s5126_s27, 5 }
   0xd   : > { %s5847_s1 = sld [smem:[#allocation14_spill]]  ;;  %s5128_s13 = smov [#allocation7]  }
   0xe   : > { %p5221_p8 = pnand %p3740_p5, %p207_p7  ;;  %s220_s14 = sshll.u32 %s5128_s13, 4  ;;  %s221_s14 = int_to_ptr.vmem [resolvable:$true] %s220_s14 }
   0xf   : > { %s232_s17 = sshll.u32 %s5838_s2, 4  ;;  %s5129_s18 = smov 64   ;;  %s233_s17 = int_to_ptr.hbm [resolvable:$true] %s232_s17 }
  0x10   : > { %p4889_p9 = pneg %p5221_p8  ;;  %s5130_s19 = smov 4  }
  0x11   : > { %s5131_s20 = smov [#allocation9]   ;;  %s5233_s22 = sadd.s32 1, %s5126_s27  }
  0x12   : > { %p4890_p10 = pnand %p4889_p9, %p45_p1  ;;  %s234_s21 = sshll.u32 %s5131_s20, 4  ;;  %s235_s21 = int_to_ptr.vmem [resolvable:$true] %s234_s21 }
  0x13   : > { %s218_s11 = sshll.u32 %s5847_s1, 4  ;;  %s31_s23 = sadd.s32 1, %s5122_s26  ;;  %s219_s11 = int_to_ptr.hbm [resolvable:$true] %s218_s11 }
  0x14   : > { %4892 = dma.hbm_to_vmem [thread:$0]  (!%p4890_p10), %s219_s11, 9216, %s221_s14, [#allocation8], %s5129_s18, %s5129_s18, %s5130_s19  }
  0x15   : > { %4895 = dma.hbm_to_vmem [thread:$0]  (!%p4890_p10), %s233_s17, 9216, %s235_s21, [#allocation8], %s5129_s18, %s5129_s18, %s5130_s19  }
  0x16   : > { %s28_s29 = ssub.s32 %s5126_s27, %s5233_s22  ;;  %p38_p11 = scmp.ne.s32.totalorder %s5122_s26, %s5118_s25 }
  0x17   : > { %p29_p12 = scmp.eq.s32.totalorder %s28_s29, 0  ;;  %p39_p13 = scmp.eq.s32.totalorder %s5126_s27, 0 }
  0x18   : > { %p5243_p0 = por %p194_p2, %p38_p11  ;;  %p4906_p3 = scmp.lt.s32.totalorder %s5126_s27, 4 }
  0x19   : > { %s5249_s10 = scalar_select %p29_p12, %s5122_s26, %s31_s23  }
  0x1a   : > { %p40_p5 = por %p39_p13, %p38_p11  ;;  %s260_s11 = sand.u32 1, %s5122_s26  }
  0x1b   : > { %s3744_s13 = sshll.u32 %s260_s11, 6  ;;  %s4643_s14 = sshll.u32 %s5126_s27, 6 }
  0x1c   : > { %s269_s17 = scalar_lea.hbm %s5836_s0, %s4643_s14  ;;  %s264_s18 = scalar_lea.vmem [#allocation4], %s3744_s13 }
  0x1d   : > { %s272_s19 = sshll.u32 %s264_s18, 4  ;;  %s270_s20 = sshll.u32 %s269_s17, 4  ;;  %s273_s19 = int_to_ptr.vmem [resolvable:$true] %s272_s19  ;;  %s271_s20 = int_to_ptr.hbm [resolvable:$true] %s270_s20 }
  0x1e   : > { %p5256_p2 = pnand %p4906_p3, %p40_p5  ;;  %s261_s23 = scalar_lea.sflag [#allocation5], %s260_s11 }
  0x1f   : > { %s5026_s29 = sshra.s32 %s271_s20, 4  ;;  %s5033_s15 = scalar_lea.hbm %s5836_s0, 256  ;;  %s5027_s29 = int_to_ptr.hbm [resolvable:$true] %s5026_s29 }
  0x20   : > { %s5028_s1 = scalar_lea.hbm %s5027_s29, 64  ;;  %p5030_p9 = pneg %p5256_p2 }
  0x21   : > { %p5029_p7 = scmp.ne.s32.totalorder %s5027_s29, %s5028_s1  ;;  %p5034_p12 = scmp.lt.s32.totalorder %s5027_s29, %s5836_s0 }
  0x22   : > { %p5035_p13 = scmp.lt.s32.totalorder %s5033_s15, %s5028_s1 }
  0x23   : > { %p5031_p10 = pnand %p5030_p9, %p5029_p7 }
  0x24   : > { %p5036_p3 = por %p5035_p13, %p5034_p12 }
  0x25   : > { %p5032_p11 = pneg %p5031_p10 }
  0x27   : > { %p5037_p5 = pnand %p5036_p3, %p5032_p11 }
  0x29   : > { %5040 = shalt.err (!%p5037_p5)
}
  0x2a   : > { %s5132_s11 = smov 128   ;;  %s5133_s18 = smov 8  }
  0x2b   : > { %4899 = dma.hbm_to_vmem [thread:$0]  (!%p5256_p2), %s271_s20, 1024, %s273_s19, %s261_s23, %s5132_s11, %s5132_s11, %s5133_s18  }
  0x2c   : > { %284 = sbr.rel (%p5221_p8) target bundleno = 1056 (0x420), region = 48  ;;  %s5273_s14 = sand.u32 (!%p5221_p8), 1, %s5118_s25  }
  0x2d   : > { %s3748_s29 = sshll.u32 (!%p5221_p8), %s5273_s14, 6  ;;  %s287_s1 = scalar_lea.sflag (!%p5221_p8), [#allocation5], %s5273_s14 }
  0x2e   : > { %s5279_s13 = scalar_lea.vmem (!%p5221_p8), [#allocation4], %s3748_s29 }
  0x31   : > { %5101 = dma.done.wait (%p5208_p4), %s287_s1, 1024  }
  0x32   : > { %5103 = vsyncadd (%p5208_p4), %s287_s1, 4294966272 }
  0x33   : > { %5105 = dma.done.wait (%p45_p1), [#allocation8], 18432  }
  0x34   : > { %5107 = vsyncadd (%p45_p1), [#allocation8], 4294948864  ;;  %v5134_v0 = vmov 0   ;;  %v4687_v1 = vld [vmem:[#allocation7 + $0x38] sm:$0xff]  ;;  %vm339_vm0 = vcmask 1040384   ;;  %v4686_v3 = vld [vmem:[#allocation7 + $0x30] sm:$0xff] }
  0x35   : > { %333 = vst [vmem:[#allocation2] sm:$0xf] %v5134_v0  ;;  %v4695_v2 = vld [vmem:[#allocation7 + $0x78] sm:$0xff]  ;;  %vm340_vm1 = vsmask.f32 256  ;;  %4861 = vmatpush.bf16.msra.mxu2 %v4687_v1  ;;  %1694 = vmatpush.bf16.msra.mxu0 %v4687_v1  ;;  %v4694_v4 = vld [vmem:[#allocation7 + $0x70] sm:$0xff] }
  0x36   : > { %334 = vst [vmem:[#allocation2 + $0x4] sm:$0x1] %v5134_v0  ;;  %1723 = vmatpush.bf16.msra.mxu1 %v4695_v2  ;;  %4869 = vmatpush.bf16.msra.mxu3 %v4695_v2  ;;  %vm5290_vm2 = vmand %vm339_vm0, %vm340_vm1  ;;  %vm366_vm3 = vsmask.f32 7938  ;;  %v351_v6 = vld [vmem:[#allocation2 + $0x20] sm:$0x1] }
  0x37   : > { %336 = vst [vmem:[#allocation2 + $0x48] sm:$0xf] %v5134_v0  ;;  %v354_v7 = vld [vmem:[#allocation2 + $0x28] sm:$0x1]  ;;  %vm496_vm4 = vcmask 1043456   ;;  %v4685_v9 = vld [vmem:[#allocation7 + $0x28] sm:$0xff]  ;;  %vm5303_vm5 = vmand %vm339_vm0, %vm366_vm3 }
  0x38   : > { %337 = vst [vmem:[#allocation2 + $0x4c] sm:$0x1] %v5134_v0  ;;  %v395_v8 = vld [vmem:[%s5279_s13 + $0x18] sm:$0xff]  ;;  %v4693_v10 = vld [vmem:[#allocation7 + $0x68] sm:$0xff]  ;;  %v352_v11 = vsel %vm5290_vm2, 0, %v351_v6  ;;  %v355_v12 = vsel %vm5290_vm2, 0, %v354_v7  ;;  %vm5317_vm7 = vmand %vm496_vm4, %vm366_vm3 }
  0x39   : > { %4862 = vmatpush.bf16.msra.mxu2 %v4686_v3  ;;  %1695 = vmatpush.bf16.msra.mxu0 %v4686_v3  ;;  %v396_v13 = vld [vmem:[%s5279_s13 + $0x20] sm:$0xff]  ;;  %v403_v14 = vmax.f32 %v395_v8, 0.0  ;;  %353 = vst [vmem:[#allocation2 + $0x20] sm:$0x1] %v352_v11  ;;  %v342_v16 = vld [vmem:[#allocation2 + $0x8] sm:$0x1] }
  0x3a   : > { %1724 = vmatpush.bf16.msra.mxu1 %v4694_v4  ;;  %4870 = vmatpush.bf16.msra.mxu3 %v4694_v4  ;;  %v404_v15 = vmax.f32 %v396_v13, 0.0  ;;  %v392_v17 = vld [vmem:[%s5279_s13] sm:$0xff]  ;;  %356 = vst [vmem:[#allocation2 + $0x28] sm:$0x1] %v355_v12  ;;  %v343_v21 = vsel %vm5290_vm2, 0, %v342_v16  ;;  %v4683_v43 = vld [vmem:[#allocation7 + $0x18] sm:$0xff] }
  0x3b   : > { %v4684_v19 = vld [vmem:[#allocation7 + $0x20] sm:$0xff]  ;;  %v411_v20 = vpack.c.bf16 %v403_v14, %v403_v14  ;;  %v400_v22 = vmax.f32 %v392_v17, 0.0  ;;  %344 = vst [vmem:[#allocation2 + $0x8] sm:$0x1] %v343_v21  ;;  %v368_v25 = vld [vmem:[#allocation2 + $0xc] sm:$0x1] }
  0x3c   : > { %v546_v23 = vld [vmem:[#allocation2] sm:$0xf]  ;;  %v412_v24 = vpack.c.bf16 %v404_v15, %v404_v15  ;;  %vm600_vm6 = vsmask.f32 3328  ;;  %v4692_v26 = vld [vmem:[#allocation7 + $0x60] sm:$0xff]  ;;  %v369_v30 = vsel %vm5303_vm5, 0, %v368_v25 }
  0x3d   : > { %4863 = vmatpush.bf16.msra.mxu2 %v4685_v9  ;;  %1696 = vmatpush.bf16.msra.mxu0 %v4685_v9  ;;  %v441_v27 = vshrl.u32 %v411_v20, 16  ;;  %v444_v28 = vshll.u32 %v411_v20, 16  ;;  %v408_v29 = vpack.c.bf16 %v400_v22, %v400_v22  ;;  %556 = vst [vmem:[#allocation3] sm:$0xf] %v546_v23  ;;  %v580_v33 = vld [vmem:[#allocation2] sm:$0xf] }
  0x3e   : > { %1725 = vmatpush.bf16.msra.mxu1 %v4693_v10  ;;  %4871 = vmatpush.bf16.msra.mxu3 %v4693_v10  ;;  %v449_v31 = vshrl.u32 %v412_v24, 16  ;;  %v452_v32 = vshll.u32 %v412_v24, 16  ;;  %370 = vst [vmem:[#allocation2 + $0xc] sm:$0x1] %v369_v30  ;;  %v581_v37 = vld [vmem:[#allocation2 + $0x4] sm:$0x1] }
  0x3f   : > { %v5311_v34 = vrot.slane %v441_v27, 7  ;;  %v417_v35 = vshrl.u32 %v408_v29, 16  ;;  %v420_v36 = vshll.u32 %v408_v29, 16  ;;  %v604_v38 = vshrl.u32 %v580_v33, 16  ;;  %v4691_v44 = vld [vmem:[#allocation7 + $0x58] sm:$0xff]  ;;  %v397_v54 = vld [vmem:[%s5279_s13 + $0x28] sm:$0xff] }
  0x40   : > { %v5313_v39 = vrot.slane %v449_v31, 7  ;;  %vm601_vm8 = vsmask.f32 7440  ;;  %v607_v41 = vshll.u32 %v580_v33, 16  ;;  %v613_v42 = vshll.u32 %v581_v37, 16  ;;  %v4682_v55 = vld [vmem:[#allocation7 + $0x10] sm:$0xff] }
  0x41   : > { %4864 = vmatpush.bf16.msra.mxu2 %v4684_v19  ;;  %1697 = vmatpush.bf16.msra.mxu0 %v4684_v19  ;;  %v446_v45 = vor.u32 %v444_v28, %v5311_v34  ;;  %v516_v46 = vld [vmem:[#allocation2 + $0x20] sm:$0xf]  ;;  %v419_v47 = vrot.slane %v417_v35, 7  ;;  %v606_v48 = vrot.slane %v604_v38, 4  ;;  %v522_v50 = vld [vmem:[#allocation2 + $0x28] sm:$0xf]  ;;  %vm5334_vm9 = vmor %vm600_vm6, %vm601_vm8 }
  0x42   : > { %1726 = vmatpush.bf16.msra.mxu1 %v4692_v26  ;;  %4872 = vmatpush.bf16.msra.mxu3 %v4692_v26  ;;  %v454_v49 = vor.u32 %v452_v32, %v5313_v39  ;;  %v2099_v51 = vld [vmem:[#allocation2] sm:$0xf]  ;;  %v609_v52 = vrot.slane %v607_v41, 5  ;;  %v377_v53 = vld [vmem:[#allocation2 + $0x24] sm:$0x1]  ;;  %v615_v60 = vrot.slane %v613_v42, 5 }
  0x43   : > { %v517_v56 = vsel %vm5317_vm7, %v446_v45, %v516_v46  ;;  %v422_v57 = vor.u32 %v420_v36, %v419_v47  ;;  %v423_v58 = vrot.slane %v419_v47, 4  ;;  %v498_v59 = vld [vmem:[#allocation2 + $0x8] sm:$0xf]  ;;  %v2133_v61 = vld [vmem:[#allocation2] sm:$0xf]  ;;  %v5342_v10 = vld [vmem:[%s5279_s13 + $0x8] sm:$0xff] }
  0x44   : > { %v4690_v62 = vld [vmem:[#allocation7 + $0x50] sm:$0xff]  ;;  %518 = vst [vmem:[#allocation2 + $0x20] sm:$0xf] %v517_v56  ;;  %v523_v63 = vsel %vm5317_vm7, %v454_v49, %v522_v50  ;;  %v5328_v0 = vld [vmem:[#allocation3] sm:$0xf]  ;;  %v610_v1 = vor.u32 %v609_v52, %v606_v48  ;;  %v2154_v7 = vshrl.u32 %v2133_v61, 16 }
  0x45   : > { %v2134_v2 = vld [vmem:[#allocation2 + $0x4] sm:$0x1]  ;;  %4865 = vmatpush.bf16.msra.mxu2 %v4683_v43  ;;  %1698 = vmatpush.bf16.msra.mxu0 %v4683_v43  ;;  %524 = vst [vmem:[#allocation2 + $0x28] sm:$0xf] %v523_v63  ;;  %v499_v3 = vsel %vm5317_vm7, %v422_v57, %v498_v59  ;;  %v501_v4 = vld [vmem:[#allocation2 + $0xc] sm:$0x1] }
  0x46   : > { %v2157_v8 = vshll.u32 %v2133_v61, 16  ;;  %v5339_v9 = vld [vmem:[%s5279_s13 + $0x30] sm:$0xff]  ;;  %1727 = vmatpush.bf16.msra.mxu1 %v4691_v44  ;;  %4873 = vmatpush.bf16.msra.mxu3 %v4691_v44  ;;  %500 = vst [vmem:[#allocation2 + $0x8] sm:$0xf] %v499_v3  ;;  %v502_v11 = vsel %vm5290_vm2, %v423_v58, %v501_v4  ;;  %v611_v12 = vrot.slane %v610_v1, 4  ;;  %v2163_v13 = vshll.u32 %v2134_v2, 16 }
  0x47   : > { %v380_v14 = vld [vmem:[#allocation2 + $0x2c] sm:$0x1]  ;;  %2109 = vst [vmem:[#allocation3] sm:$0xf] %v2099_v51  ;;  %v2156_v15 = vrot.slane %v2154_v7, 4  ;;  %v378_v17 = vsel %vm5303_vm5, 0, %v377_v53 }
  0x48   : > { %v2159_v16 = vrot.slane %v2157_v8, 5  ;;  %v405_v19 = vmax.f32 %v397_v54, 0.0  ;;  %503 = vst [vmem:[#allocation2 + $0xc] sm:$0x1] %v502_v11  ;;  %v616_v20 = vsel %vm5334_vm9, %v611_v12, %v615_v60  ;;  %v381_v21 = vsel %vm5303_vm5, 0, %v380_v14  ;;  %v4681_v22 = vld [vmem:[#allocation7 + $0x8] sm:$0xff] }
  0x49   : > { %4866 = vmatpush.bf16.msra.mxu2 %v4682_v55  ;;  %1699 = vmatpush.bf16.msra.mxu0 %v4682_v55  ;;  %v4689_v23 = vld [vmem:[#allocation7 + $0x48] sm:$0xff]  ;;  %v447_v24 = vrot.slane %v5311_v34, 4  ;;  %723 = vst [vmem:[#allocation3 + $0x4] sm:$0xf] %v616_v20  ;;  %v455_v27 = vrot.slane %v5313_v39, 4  ;;  %v2165_v28 = vrot.slane %v2163_v13, 5 }
  0x4a   : > { %v2160_v25 = vor.u32 %v2159_v16, %v2156_v15  ;;  %v5353_v26 = vpack.c.bf16 %v405_v19, %v405_v19  ;;  %1728 = vmatpush.bf16.msra.mxu1 %v4690_v62  ;;  %4874 = vmatpush.bf16.msra.mxu3 %v4690_v62  ;;  %379 = vst [vmem:[#allocation2 + $0x24] sm:$0x1] %v378_v17  ;;  %v406_v29 = vmax.f32 %v5339_v9, 0.0  ;;  %v401_v30 = vmax.f32 %v5342_v10, 0.0  ;;  %v4680_v31 = vld [vmem:[#allocation7] sm:$0xff]  ;;  %v4703_v36 = vld [vmem:[#allocation7 + $0xb8] sm:$0xff] }
  0x4b   : > { %v550_v32 = vld [vmem:[#allocation2 + $0x20] sm:$0xf]  ;;  %382 = vst [vmem:[#allocation2 + $0x2c] sm:$0x1] %v381_v21  ;;  %v4688_v37 = vld [vmem:[#allocation7 + $0x40] sm:$0xff]  ;;  %v4711_v12 = vld [vmem:[#allocation7 + $0xf8] sm:$0xff] }
  0x4c   : > { %v2161_v33 = vrot.slane %v2160_v25, 4  ;;  %v457_v34 = vshrl.u32 %v5353_v26, 16  ;;  %v551_v35 = vld [vmem:[#allocation2 + $0x28] sm:$0xf]  ;;  %560 = vst [vmem:[#allocation3 + $0x90] sm:$0xf] %v550_v32  ;;  %v5367_v9 = vpack.c.bf16 %v406_v29, %v406_v29  ;;  %v409_v29 = vpack.c.bf16 %v401_v30, %v401_v30 }
  0x4d   : > { %v588_v38 = vld [vmem:[#allocation2 + $0x20] sm:$0xf]  ;;  %4867 = vmatpush.bf16.msra.mxu2 %v4681_v22  ;;  %1700 = vmatpush.bf16.msra.mxu0 %v4681_v22  ;;  %561 = vst [vmem:[#allocation3 + $0xb4] sm:$0xf] %v551_v35  ;;  %v547_v39 = vld [vmem:[#allocation2 + $0x8] sm:$0xf] }
  0x4e   : > { %v582_v41 = vld [vmem:[#allocation2 + $0x8] sm:$0xf]  ;;  %1729 = vmatpush.bf16.msra.mxu1 %v4689_v23  ;;  %4875 = vmatpush.bf16.msra.mxu3 %v4689_v23  ;;  %567 = vst [vmem:[#allocation3 + $0x78] sm:$0xf] %v550_v32  ;;  %v660_v46 = vshrl.u32 %v588_v38, 16  ;;  %v663_v47 = vshll.u32 %v588_v38, 16  ;;  %v2166_v55 = vsel %vm5334_vm9, %v2161_v33, %v2165_v28 }
  0x4f   : > { %v618_v42 = vshrl.u32 %v582_v41, 16  ;;  %v621_v43 = vshll.u32 %v582_v41, 16  ;;  %v590_v44 = vld [vmem:[#allocation2 + $0x28] sm:$0xf]  ;;  %568 = vst [vmem:[#allocation3 + $0x9c] sm:$0xf] %v551_v35 }
  0x50   : > { %v583_v45 = vld [vmem:[#allocation2 + $0xc] sm:$0x1]  ;;  %574 = vst [vmem:[#allocation3 + $0x60] sm:$0xf] %v550_v32  ;;  %v674_v51 = vshrl.u32 %v590_v44, 16  ;;  %v4702_v52 = vld [vmem:[#allocation7 + $0xb0] sm:$0xff] }
  0x51   : > { %v620_v48 = vrot.slane %v618_v42, 4  ;;  %v623_v49 = vrot.slane %v621_v43, 5  ;;  %v627_v50 = vshll.u32 %v583_v45, 16  ;;  %v357_v53 = vld [vmem:[#allocation2 + $0x30] sm:$0x1]  ;;  %4868 = vmatpush.bf16.msra.mxu2 %v4680_v31  ;;  %1701 = vmatpush.bf16.msra.mxu0 %v4680_v31  ;;  %v662_v61 = vrot.slane %v660_v46, 4 }
  0x52   : > { %575 = vst [vmem:[#allocation3 + $0x84] sm:$0xf] %v551_v35  ;;  %v5359_v54 = vld [vmem:[#allocation3 + $0x4] sm:$0xf]  ;;  %v519_v56 = vld [vmem:[#allocation2 + $0x24] sm:$0x1]  ;;  %1730 = vmatpush.bf16.msra.mxu1 %v4688_v37  ;;  %4876 = vmatpush.bf16.msra.mxu3 %v4688_v37 }
  0x53   : > { %557 = vst [vmem:[#allocation3 + $0x24] sm:$0xf] %v547_v39  ;;  %v624_v57 = vor.u32 %v623_v49, %v620_v48  ;;  %v629_v58 = vrot.slane %v627_v50, 5  ;;  %v520_v59 = vsel %vm5290_vm2, %v447_v24, %v519_v56  ;;  %v525_v60 = vld [vmem:[#allocation2 + $0x2c] sm:$0x1]  ;;  %v665_v2 = vrot.slane %v663_v47, 5 }
  0x54   : > { %v360_v62 = vld [vmem:[#allocation2 + $0x38] sm:$0x1]  ;;  %v3836_v63 = vld [vmem:[#allocation3 + $0x90] sm:$0xf]  ;;  %564 = vst [vmem:[#allocation3 + $0xc] sm:$0xf] %v547_v39  ;;  %v526_v1 = vsel %vm5290_vm2, %v455_v27, %v525_v60 }
  0x55   : > { %1752 = vmatpush.bf16.msrb.mxu2 %v4703_v36  ;;  %v676_v3 = vrot.slane %v674_v51, 4  ;;  %v4666_v4 = vld [vmem:[#allocation3 + $0xb0] sm:$0xf0]  ;;  %v625_v7 = vrot.slane %v624_v57, 4  ;;  %2273 = vst [vmem:[#allocation3 + $0x4] sm:$0xf] %v2166_v55  ;;  %v666_v17 = vor.u32 %v665_v2, %v662_v61 }
  0x56   : > { %v677_v8 = vshll.u32 %v590_v44, 16  ;;  %v3837_v11 = vor.u32 %v4666_v4, %v3836_v63  ;;  %521 = vst [vmem:[#allocation2 + $0x24] sm:$0x1] %v520_v59  ;;  %v4719_v13 = vld [vmem:[#allocation7 + $0x138] sm:$0xff]  ;;  %v358_v14 = vsel %vm5290_vm2, 0, %v357_v53  ;;  %v394_v15 = vld [vmem:[%s5279_s13 + $0x10] sm:$0xff]  ;;  %1781 = vmatpush.bf16.msrb.mxu3 %v4711_v12 }
  0x57   : > { %v630_v16 = vsel %vm5334_vm9, %v625_v7, %v629_v58  ;;  %527 = vst [vmem:[#allocation2 + $0x2c] sm:$0x1] %v526_v1  ;;  %v4701_v20 = vld [vmem:[#allocation7 + $0xa8] sm:$0xff]  ;;  %v345_v21 = vld [vmem:[#allocation2 + $0x10] sm:$0x1]  ;;  %v4710_v22 = vld [vmem:[#allocation7 + $0xf0] sm:$0xff]  ;;  %1810 = vmatpush.bf16.msrb.mxu0 %v4719_v13 }
  0x58   : > { %v679_v19 = vrot.slane %v677_v8, 5  ;;  %1712 = vmatmul.bf16.vlgmr.msra.gmra.mxu2 %v3837_v11  ;;  %724 = vst [vmem:[#allocation3 + $0x28] sm:$0xf] %v630_v16  ;;  %v361_v23 = vsel %vm5290_vm2, 0, %v360_v62  ;;  %v4718_v25 = vld [vmem:[#allocation7 + $0x130] sm:$0xff]  ;;  %v5378_v27 = vrot.slane %v457_v34, 7 }
  0x59   : > { %1753 = vmatpush.bf16.msrb.mxu2 %v4702_v52  ;;  %746 = vst [vmem:[#allocation3 + $0x10] sm:$0xf] %v630_v16  ;;  %v465_v28 = vshrl.u32 %v5367_v9, 16  ;;  %v346_v32 = vsel %vm5290_vm2, 0, %v345_v21  ;;  %v402_v33 = vmax.f32 %v394_v15, 0.0  ;;  %v667_v36 = vrot.slane %v666_v17, 4 }
  0x5a   : > { %v680_v24 = vor.u32 %v679_v19, %v676_v3  ;;  %v4648_v31 = vld [vmem:[#allocation3 + $0x20] sm:$0xf0]  ;;  %359 = vst [vmem:[#allocation2 + $0x30] sm:$0x1] %v358_v14  ;;  %v348_v34 = vld [vmem:[#allocation2 + $0x18] sm:$0x1]  ;;  %1782 = vmatpush.bf16.msrb.mxu3 %v4710_v22 }
  0x5b   : > { %v3765_v35 = vor.u32 %v4648_v31, %v5328_v0  ;;  %v4700_v37 = vld [vmem:[#allocation7 + $0xa0] sm:$0xff]  ;;  %362 = vst [vmem:[#allocation2 + $0x38] sm:$0x1] %v361_v23  ;;  %v4709_v38 = vld [vmem:[#allocation7 + $0xe8] sm:$0xff]  ;;  %v4727_v41 = vld [vmem:[#allocation7 + $0x178] sm:$0xff]  ;;  %v349_v10 = vsel %vm5290_vm2, 0, %v348_v34  ;;  %v410_v30 = vpack.c.bf16 %v402_v33, %v402_v33  ;;  %1811 = vmatpush.bf16.msrb.mxu0 %v4718_v25 }
  0x5c   : > { %v4717_v39 = vld [vmem:[#allocation7 + $0x128] sm:$0xff]  ;;  %347 = vst [vmem:[#allocation2 + $0x10] sm:$0x1] %v346_v32  ;;  %v681_v43 = vrot.slane %v680_v24, 4  ;;  %v460_v44 = vshll.u32 %v5353_v26, 16  ;;  %v468_v0 = vshll.u32 %v5367_v9, 16  ;;  %1839 = vmatpush.bf16.msrb.mxu1 %v4727_v41 }
  0x5d   : > { %1754 = vmatpush.bf16.msrb.mxu2 %v4701_v20  ;;  %1702 = vmatmul.bf16.vlgmr.msra.gmra.mxu0 %v3765_v35  ;;  %v589_v42 = vld [vmem:[#allocation2 + $0x24] sm:$0x1]  ;;  %v425_v45 = vshrl.u32 %v409_v29, 16  ;;  %v5391_v48 = vrot.slane %v465_v28, 7  ;;  %350 = vst [vmem:[#allocation2 + $0x18] sm:$0x1] %v349_v10 }
  0x5e   : > { %v591_v46 = vld [vmem:[#allocation2 + $0x2c] sm:$0x1]  ;;  %v669_v47 = vshll.u32 %v589_v42, 16  ;;  %v4726_v52 = vld [vmem:[#allocation7 + $0x170] sm:$0xff]  ;;  %v433_v53 = vshrl.u32 %v410_v30, 16  ;;  %1783 = vmatpush.bf16.msrb.mxu3 %v4709_v38  ;;  %v4708_v26 = vld [vmem:[#allocation7 + $0xe0] sm:$0xff]  ;;  %v462_v63 = vor.u32 %v460_v44, %v5378_v27 }
  0x5f   : > { %v3766_v49 = vld [vmem:[#allocation3 + $0x24] sm:$0xf0]  ;;  %v683_v50 = vshll.u32 %v591_v46, 16  ;;  %v4699_v51 = vld [vmem:[#allocation7 + $0x98] sm:$0xff]  ;;  %v5394_v57 = vrot.slane %v425_v45, 7  ;;  %v428_v58 = vshll.u32 %v409_v29, 16  ;;  %1812 = vmatpush.bf16.msrb.mxu0 %v4717_v39  ;;  %v470_v2 = vor.u32 %v468_v0, %v5391_v48 }
  0x60   : > { %v3769_v55 = vor.u32 %v5359_v54, %v3766_v49  ;;  %v671_v56 = vrot.slane %v669_v47, 5  ;;  %v5396_v60 = vrot.slane %v433_v53, 7  ;;  %v436_v61 = vshll.u32 %v410_v30, 16  ;;  %v4716_v1 = vld [vmem:[#allocation7 + $0x120] sm:$0xff]  ;;  %1840 = vmatpush.bf16.msrb.mxu1 %v4726_v52  ;;  %v374_v16 = vld [vmem:[#allocation2 + $0x1c] sm:$0x1] }
  0x61   : > { %1755 = vmatpush.bf16.msrb.mxu2 %v4700_v37  ;;  %v685_v59 = vrot.slane %v683_v50, 5  ;;  %v528_v3 = vld [vmem:[#allocation2 + $0x30] sm:$0xf]  ;;  %v430_v7 = vor.u32 %v428_v58, %v5394_v57  ;;  %v371_v13 = vld [vmem:[#allocation2 + $0x14] sm:$0x1]  ;;  %v375_v24 = vsel %vm5303_vm5, 0, %v374_v16 }
  0x62   : > { %1731 = vmatmul.bf16.vlgmr.msra.gmra.mxu1 %v3769_v55  ;;  %v672_v62 = vsel %vm5334_vm9, %v667_v36, %v671_v56  ;;  %v534_v4 = vld [vmem:[#allocation2 + $0x38] sm:$0xf]  ;;  %1784 = vmatpush.bf16.msrb.mxu3 %v4708_v26  ;;  %v438_v8 = vor.u32 %v436_v61, %v5396_v60  ;;  %v529_v11 = vsel %vm5317_vm7, %v462_v63, %v528_v3  ;;  %v372_v19 = vsel %vm5303_vm5, 0, %v371_v13  ;;  %v383_v20 = vld [vmem:[#allocation2 + $0x34] sm:$0x1]  ;;  %s4860_s19 = sshll.u32 %s5199_s28, 6 }
  0x63   : > { %v686_v54 = vsel %vm5334_vm9, %v681_v43, %v685_v59  ;;  %727 = vst [vmem:[#allocation3 + $0x94] sm:$0xf] %v672_v62  ;;  %v504_v9 = vld [vmem:[#allocation2 + $0x10] sm:$0xf]  ;;  %1813 = vmatpush.bf16.msrb.mxu0 %v4716_v1  ;;  %v535_v14 = vsel %vm5317_vm7, %v470_v2, %v534_v4  ;;  %v386_v22 = vld [vmem:[#allocation2 + $0x3c] sm:$0x1]  ;;  %s3643_s21 = scalar_lea.hbm %s5843_s7, %s4860_s19 }
  0x64   : > { %728 = vst [vmem:[#allocation3 + $0xb8] sm:$0xf] %v686_v54  ;;  %v510_v12 = vld [vmem:[#allocation2 + $0x18] sm:$0xf]  ;;  %v505_v15 = vsel %vm5317_vm7, %v430_v7, %v504_v9  ;;  %v384_v28 = vsel %vm5303_vm5, 0, %v383_v20  ;;  %v387_v29 = vsel %vm5303_vm5, 0, %v386_v22 }
  0x65   : > { %1756 = vmatpush.bf16.msrb.mxu2 %v4699_v51  ;;  %749 = vst [vmem:[#allocation3 + $0x7c] sm:$0xf] %v672_v62  ;;  %v511_v17 = vsel %vm5317_vm7, %v438_v8, %v510_v12  ;;  %v463_v32 = vrot.slane %v5378_v27, 4  ;;  %v471_v33 = vrot.slane %v5391_v48, 4  ;;  %v431_v36 = vrot.slane %v5394_v57, 4  ;;  %v4698_v57 = vld [vmem:[#allocation7 + $0x90] sm:$0xff] }
  0x66   : > { %750 = vst [vmem:[#allocation3 + $0xa0] sm:$0xf] %v686_v54  ;;  %v439_v37 = vrot.slane %v5396_v60, 4  ;;  %v4715_v2 = vld [vmem:[#allocation7 + $0x118] sm:$0xff]  ;;  %v4725_v3 = vld [vmem:[#allocation7 + $0x168] sm:$0xff]  ;;  %v4706_v8 = vld [vmem:[#allocation7 + $0xd0] sm:$0xff] }
  0x67   : > { %771 = vst [vmem:[#allocation3 + $0x64] sm:$0xf] %v672_v62  ;;  %v4707_v62 = vld [vmem:[#allocation7 + $0xd8] sm:$0xff]  ;;  %v4697_v7 = vld [vmem:[#allocation7 + $0x88] sm:$0xff]  ;;  %vm813_vm10 = vcmask 1042432   ;;  %vm814_vm11 = vcmask 1046532   ;;  %1814 = vmatpush.bf16.msrb.mxu0 %v4715_v2  ;;  %1841 = vmatpush.bf16.msrb.mxu1 %v4725_v3 }
  0x68   : > { %772 = vst [vmem:[#allocation3 + $0x88] sm:$0xf] %v686_v54  ;;  %1785 = vmatpush.bf16.msrb.mxu3 %v4707_v62  ;;  %v4724_v12 = vld [vmem:[#allocation7 + $0x160] sm:$0xff]  ;;  %v777_v22 = vld [vmem:[#allocation2] sm:$0xe]  ;;  %vm5448_vm12 = vmor %vm813_vm10, %vm814_vm11  ;;  %vm3563_vm14 = vcmask 64512  }
  0x69   : > { %530 = vst [vmem:[#allocation2 + $0x30] sm:$0xf] %v529_v11  ;;  %1757 = vmatpush.bf16.msrb.mxu2 %v4698_v57  ;;  %v4742_v3 = vld [vmem:[#allocation7 + $0x1f0] sm:$0xff]  ;;  %v4820_v5 = vld [vmem:[#allocation9 + $0x100] sm:$0xff]  ;;  %v4853_v6 = vld [vmem:[#allocation9 + $0x208] sm:$0xff]  ;;  %s331_s23 = scalar_lea.vmem [#allocation10], %s3748_s29 }
  0x6a   : > { %v4662_v21 = vld [vmem:[#allocation3 + $0x94] sm:$0xf]  ;;  %536 = vst [vmem:[#allocation2 + $0x38] sm:$0xf] %v535_v14  ;;  %s3644_s15 = sshll.u32 %s331_s23, 4  ;;  %s3646_s16 = sshll.u32 %s3643_s21, 4  ;;  %s3645_s15 = int_to_ptr.vmem [resolvable:$true] %s3644_s15  ;;  %s3647_s16 = int_to_ptr.hbm [resolvable:$true] %s3646_s16 }
  0x6b   : > { %v3838_v23 = vld [vmem:[#allocation3 + $0xb4] sm:$0xf0]  ;;  %506 = vst [vmem:[#allocation2 + $0x10] sm:$0xf] %v505_v15  ;;  %v4714_v14 = vld [vmem:[#allocation7 + $0x110] sm:$0xff]  ;;  %v4696_v15 = vld [vmem:[#allocation7 + $0x80] sm:$0xff]  ;;  %1842 = vmatpush.bf16.msrb.mxu1 %v4724_v12 }
  0x6c   : > { %v3841_v25 = vor.u32 %v4662_v21, %v3838_v23  ;;  %512 = vst [vmem:[#allocation2 + $0x18] sm:$0xf] %v511_v17  ;;  %v4705_v21 = vld [vmem:[#allocation7 + $0xc8] sm:$0xff]  ;;  %1786 = vmatpush.bf16.msrb.mxu3 %v4706_v8  ;;  %1815 = vmatpush.bf16.msrb.mxu0 %v4714_v14  ;;  %v4751_v8 = vld [vmem:[#allocation7 + $0x238] sm:$0xff]  ;;  %s3632_s29 = scalar_lea.sflag [#allocation6], %s5273_s14  ;;  %s5070_s17 = sshra.s32 %s3647_s16, 4  ;;  %s5071_s17 = int_to_ptr.hbm [resolvable:$true] %s5070_s17 }
  0x6d   : > { %373 = vst [vmem:[#allocation2 + $0x14] sm:$0x1] %v372_v19  ;;  %1758 = vmatpush.bf16.msrb.mxu2 %v4697_v7  ;;  %s5072_s11 = scalar_lea.hbm %s5071_s17, 64  ;;  %p5077_p2 = scmp.lt.s32.totalorder %s5071_s17, %s5843_s7 }
  0x6e   : > { %1741 = vmatmul.bf16.vlgmr.msra.gmra.mxu3 %v3841_v25  ;;  %376 = vst [vmem:[#allocation2 + $0x1c] sm:$0x1] %v375_v24  ;;  %v778_v24 = vld [vmem:[#allocation2 + $0x4] sm:$0x1]  ;;  %v779_v25 = vld [vmem:[#allocation2 + $0x8] sm:$0xe]  ;;  %p5073_p1 = scmp.ne.s32.totalorder %s5071_s17, %s5072_s11 }
  0x6f   : > { %385 = vst [vmem:[#allocation2 + $0x34] sm:$0x1] %v384_v28  ;;  %v780_v28 = vld [vmem:[#allocation2 + $0xc] sm:$0x1] }
  0x70   : > { %v552_v31 = vld [vmem:[#allocation2 + $0x30] sm:$0xf]  ;;  %388 = vst [vmem:[#allocation2 + $0x3c] sm:$0x1] %v387_v29  ;;  %v3752_v29 = vrot.slane %v777_v22, 9  ;;  %1787 = vmatpush.bf16.msrb.mxu3 %v4705_v21  ;;  %p5074_p4 = pnand %p5073_p1, %p5243_p0 }
  0x71   : > { %v553_v35 = vld [vmem:[#allocation2 + $0x38] sm:$0xf]  ;;  %562 = vst [vmem:[#allocation3 + $0xd8] sm:$0xf] %v552_v31  ;;  %v592_v39 = vld [vmem:[#allocation2 + $0x30] sm:$0xf]  ;;  %1759 = vmatpush.bf16.msrb.mxu2 %v4696_v15 }
  0x72   : > { %563 = vst [vmem:[#allocation3 + $0xfc] sm:$0xf] %v553_v35  ;;  %v584_v34 = vld [vmem:[#allocation2 + $0x10] sm:$0xf]  ;;  %v594_v27 = vld [vmem:[#allocation2 + $0x38] sm:$0xf]  ;;  %p5075_p8 = pneg %p5074_p4 }
  0x73   : > { %569 = vst [vmem:[#allocation3 + $0xc0] sm:$0xf] %v552_v31  ;;  %v548_v38 = vld [vmem:[#allocation2 + $0x10] sm:$0xf]  ;;  %v586_v41 = vld [vmem:[#allocation2 + $0x18] sm:$0xf] }
  0x74   : > { %570 = vst [vmem:[#allocation3 + $0xe4] sm:$0xf] %v553_v35  ;;  %v632_v10 = vshrl.u32 %v584_v34, 16  ;;  %v635_v30 = vshll.u32 %v584_v34, 16  ;;  %v549_v42 = vld [vmem:[#allocation2 + $0x18] sm:$0xf] }
  0x75   : > { %576 = vst [vmem:[#allocation3 + $0xa8] sm:$0xf] %v552_v31  ;;  %v507_v43 = vld [vmem:[#allocation2 + $0x14] sm:$0x1]  ;;  %v513_v44 = vld [vmem:[#allocation2 + $0x1c] sm:$0x1] }
  0x76   : > { %577 = vst [vmem:[#allocation3 + $0xcc] sm:$0xf] %v553_v35  ;;  %v5426_v0 = vrot.slane %v632_v10, 4  ;;  %v5428_v45 = vrot.slane %v635_v30, 5  ;;  %v646_v46 = vshrl.u32 %v586_v41, 16  ;;  %v649_v47 = vshll.u32 %v586_v41, 16 }
  0x77   : > { %558 = vst [vmem:[#allocation3 + $0x48] sm:$0xf] %v548_v38  ;;  %v688_v49 = vshrl.u32 %v592_v39, 16  ;;  %v691_v50 = vshll.u32 %v592_v39, 16  ;;  %v531_v52 = vld [vmem:[#allocation2 + $0x34] sm:$0x1]  ;;  %v508_v55 = vsel %vm5290_vm2, %v431_v36, %v507_v43  ;;  %v514_v58 = vsel %vm5290_vm2, %v439_v37, %v513_v44 }
  0x78   : > { %v3872_v48 = vld [vmem:[#allocation3 + $0xd8] sm:$0xf]  ;;  %559 = vst [vmem:[#allocation3 + $0x6c] sm:$0xf] %v549_v42  ;;  %v537_v56 = vld [vmem:[#allocation2 + $0x3c] sm:$0x1]  ;;  %v532_v63 = vsel %vm5290_vm2, %v463_v32, %v531_v52  ;;  %v638_v17 = vor.u32 %v5428_v45, %v5426_v0 }
  0x79   : > { %v4675_v51 = vld [vmem:[#allocation3 + $0xf8] sm:$0xf0]  ;;  %565 = vst [vmem:[#allocation3 + $0x30] sm:$0xf] %v548_v38  ;;  %v702_v26 = vshrl.u32 %v594_v27, 16  ;;  %v648_v59 = vrot.slane %v646_v46, 4  ;;  %v538_v4 = vsel %vm5290_vm2, %v471_v33, %v537_v56 }
  0x7a   : > { %v3873_v53 = vor.u32 %v4675_v51, %v3872_v48  ;;  %566 = vst [vmem:[#allocation3 + $0x54] sm:$0xf] %v549_v42  ;;  %v651_v60 = vrot.slane %v649_v47, 5  ;;  %v705_v61 = vshll.u32 %v594_v27, 16  ;;  %v5436_v1 = vrot.slane %v688_v49, 4  ;;  %v4723_v35 = vld [vmem:[#allocation7 + $0x158] sm:$0xff] }
  0x7b   : > { %572 = vst [vmem:[#allocation3 + $0x18] sm:$0xf] %v548_v38  ;;  %v5438_v54 = vrot.slane %v691_v50, 5  ;;  %v5442_v11 = vrot.slane %v702_v26, 4  ;;  %v818_v31 = vrot.slane %v778_v24, 5  ;;  %v3753_v32 = vrot.slane %v779_v25, 9  ;;  %1843 = vmatpush.bf16.msrb.mxu1 %v4723_v35 }
  0x7c   : > { %1717 = vmatmul.bf16.gmra.mxu2 %v3873_v53  ;;  %573 = vst [vmem:[#allocation3 + $0x3c] sm:$0xf] %v549_v42  ;;  %v652_v19 = vor.u32 %v651_v60, %v648_v59  ;;  %v707_v20 = vrot.slane %v705_v61, 5  ;;  %v822_v33 = vrot.slane %v780_v28, 5  ;;  %v4713_v36 = vld [vmem:[#allocation7 + $0x108] sm:$0xff]  ;;  %v639_v34 = vrot.slane %v638_v17, 4 }
  0x7d   : > { %509 = vst [vmem:[#allocation2 + $0x14] sm:$0x1] %v508_v55  ;;  %v819_v39 = vsel %vm5448_vm12, %v3752_v29, %v818_v31  ;;  %v4704_v10 = vld [vmem:[#allocation7 + $0xc0] sm:$0xff]  ;;  %v4735_v30 = vld [vmem:[#allocation7 + $0x1b8] sm:$0xff]  ;;  %v694_v43 = vor.u32 %v5438_v54, %v5436_v1  ;;  %v4722_v47 = vld [vmem:[#allocation7 + $0x150] sm:$0xff]  ;;  %1816 = vmatpush.bf16.msrb.mxu0 %v4713_v36 }
  0x7e   : > { %v3800_v9 = vld [vmem:[#allocation3 + $0x48] sm:$0xf]  ;;  %515 = vst [vmem:[#allocation2 + $0x1c] sm:$0x1] %v514_v58  ;;  %v653_v38 = vrot.slane %v652_v19, 4  ;;  %v823_v41 = vsel %vm5448_vm12, %v3753_v32, %v822_v33  ;;  %v4712_v44 = vld [vmem:[#allocation7 + $0x100] sm:$0xff]  ;;  %v708_v46 = vor.u32 %v707_v20, %v5442_v11  ;;  %1868 = vmatpush.bf16.msra.mxu2 %v4735_v30  ;;  %1788 = vmatpush.bf16.msrb.mxu3 %v4704_v10 }
  0x7f   : > { %v4657_v13 = vld [vmem:[#allocation3 + $0x68] sm:$0xf0]  ;;  %533 = vst [vmem:[#allocation2 + $0x34] sm:$0x1] %v532_v63  ;;  %v695_v55 = vrot.slane %v694_v43, 4  ;;  %1844 = vmatpush.bf16.msrb.mxu1 %v4722_v47  ;;  %v4743_v63 = vld [vmem:[#allocation7 + $0x1f8] sm:$0xff] }
  0x80   : > { %v3801_v16 = vor.u32 %v4657_v13, %v3800_v9  ;;  %539 = vst [vmem:[#allocation2 + $0x3c] sm:$0x1] %v538_v4  ;;  %v709_v57 = vrot.slane %v708_v46, 4  ;;  %v2327_v59 = vld [vmem:[#allocation2] sm:$0xe]  ;;  %v4721_v1 = vld [vmem:[#allocation7 + $0x148] sm:$0xff] }
  0x81   : > { %856 = vst [vmem:[#allocation3 + $0x8] sm:$0xf] %v819_v39  ;;  %v2328_v60 = vld [vmem:[#allocation2 + $0x4] sm:$0x1]  ;;  %v781_v61 = vld [vmem:[#allocation2 + $0x10] sm:$0xe]  ;;  %1817 = vmatpush.bf16.msrb.mxu0 %v4712_v44 }
  0x82   : > { %1707 = vmatmul.bf16.gmra.mxu0 %v3801_v16  ;;  %857 = vst [vmem:[#allocation3 + $0x2c] sm:$0xf] %v823_v41  ;;  %v4734_v54 = vld [vmem:[#allocation7 + $0x1b0] sm:$0xff]  ;;  %1897 = vmatpush.bf16.msra.mxu3 %v4743_v63  ;;  %v4733_v9 = vld [vmem:[#allocation7 + $0x1a8] sm:$0xff]  ;;  %v4720_v13 = vld [vmem:[#allocation7 + $0x140] sm:$0xff]  ;;  %v4194_v14 = vrot.slane %v2327_v59, 9 }
  0x83   : > { %871 = vst [vmem:[#allocation3 + $0x14] sm:$0xf] %v823_v41  ;;  %1869 = vmatpush.bf16.msra.mxu2 %v4734_v54  ;;  %1845 = vmatpush.bf16.msrb.mxu1 %v4721_v1  ;;  %v2365_v15 = vrot.slane %v2328_v60, 5  ;;  %v3754_v16 = vrot.slane %v781_v61, 9  ;;  %v783_v19 = vld [vmem:[#allocation2 + $0x18] sm:$0xe] }
  0x84   : > { %v585_v37 = vld [vmem:[#allocation2 + $0x14] sm:$0x1]  ;;  %v3780_v28 = vld [vmem:[#allocation3 + $0x10] sm:$0xf]  ;;  %v3755_v29 = vrot.slane %v783_v19, 9  ;;  %v399_v36 = vld [vmem:[%s5279_s13 + $0x38] sm:$0xff] }
  0x85   : > { %v587_v42 = vld [vmem:[#allocation2 + $0x1c] sm:$0x1]  ;;  %v641_v27 = vshll.u32 %v585_v37, 16  ;;  %v782_v62 = vld [vmem:[#allocation2 + $0x14] sm:$0x1]  ;;  %1926 = vmatpush.bf16.msra.mxu0 %v4751_v8  ;;  %v2366_v25 = vsel %vm5448_vm12, %v4194_v14, %v2365_v15 }
  0x86   : > { %v655_v0 = vshll.u32 %v587_v42, 16  ;;  %v593_v45 = vld [vmem:[#allocation2 + $0x34] sm:$0x1]  ;;  %v826_v17 = vrot.slane %v782_v62, 5  ;;  %v784_v20 = vld [vmem:[#allocation2 + $0x1c] sm:$0x1]  ;;  %1898 = vmatpush.bf16.msra.mxu3 %v4742_v3 }
  0x87   : > { %v643_v48 = vrot.slane %v641_v27, 5  ;;  %v595_v49 = vld [vmem:[#allocation2 + $0x3c] sm:$0x1]  ;;  %v697_v50 = vshll.u32 %v593_v45, 16  ;;  %1870 = vmatpush.bf16.msra.mxu2 %v4733_v9  ;;  %1846 = vmatpush.bf16.msrb.mxu1 %v4720_v13  ;;  %v830_v31 = vrot.slane %v784_v20, 5  ;;  %v407_v42 = vmax.f32 %v399_v36, 0.0 }
  0x88   : > { %v657_v51 = vrot.slane %v655_v0, 5  ;;  %v711_v52 = vshll.u32 %v595_v49, 16  ;;  %v3772_v2 = vld [vmem:[#allocation3 + $0x8] sm:$0xf]  ;;  %v827_v32 = vsel %vm5448_vm12, %v3754_v16, %v826_v17  ;;  %v786_v10 = vld [vmem:[#allocation2 + $0x24] sm:$0x1] }
  0x89   : > { %v644_v53 = vsel %vm5334_vm9, %v639_v34, %v643_v48  ;;  %v699_v56 = vrot.slane %v697_v50, 5  ;;  %v4649_v7 = vld [vmem:[#allocation3 + $0x28] sm:$0xf0]  ;;  %2403 = vst [vmem:[#allocation3 + $0x8] sm:$0xf] %v2366_v25  ;;  %v831_v34 = vsel %vm5448_vm12, %v3755_v29, %v830_v31  ;;  %v834_v43 = vrot.slane %v786_v10, 5 }
  0x8a   : > { %v658_v26 = vsel %vm5334_vm9, %v653_v38, %v657_v51  ;;  %725 = vst [vmem:[#allocation3 + $0x4c] sm:$0xf] %v644_v53  ;;  %v713_v58 = vrot.slane %v711_v52, 5  ;;  %v3773_v12 = vor.u32 %v4649_v7, %v3772_v2  ;;  %v785_v38 = vld [vmem:[#allocation2 + $0x20] sm:$0xe]  ;;  %v4741_v0 = vld [vmem:[#allocation7 + $0x1e8] sm:$0xff] }
  0x8b   : > { %726 = vst [vmem:[#allocation3 + $0x70] sm:$0xf] %v658_v26  ;;  %v700_v4 = vsel %vm5334_vm9, %v695_v55, %v699_v56  ;;  %v363_v30 = vld [vmem:[#allocation2 + $0x40] sm:$0x1]  ;;  %v3756_v27 = vrot.slane %v785_v38, 9  ;;  %v4732_v46 = vld [vmem:[#allocation7 + $0x1a0] sm:$0xff]  ;;  %1899 = vmatpush.bf16.msra.mxu3 %v4741_v0 }
  0x8c   : > { %769 = vst [vmem:[#allocation3 + $0x1c] sm:$0xf] %v644_v53  ;;  %v714_v11 = vsel %vm5334_vm9, %v709_v57, %v713_v58  ;;  %1760 = vmatmul.bf16.vlgmr.msrb.gmra.mxu2 %v3773_v12  ;;  %v787_v44 = vld [vmem:[#allocation2 + $0x28] sm:$0xe]  ;;  %v4750_v45 = vld [vmem:[#allocation7 + $0x230] sm:$0xff]  ;;  %v4740_v51 = vld [vmem:[#allocation7 + $0x1e0] sm:$0xff]  ;;  %v415_v57 = vpack.c.bf16 %v407_v42, %v407_v42 }
  0x8d   : > { %770 = vst [vmem:[#allocation3 + $0x40] sm:$0xf] %v658_v26  ;;  %v3757_v47 = vrot.slane %v787_v44, 9  ;;  %v4646_v48 = vld [vmem:[#allocation3 + $0x14] sm:$0xf]  ;;  %v835_v49 = vsel %vm5448_vm12, %v3756_v27, %v834_v43  ;;  %1927 = vmatpush.bf16.msra.mxu0 %v4750_v45  ;;  %v4749_v52 = vld [vmem:[#allocation7 + $0x228] sm:$0xff]  ;;  %1871 = vmatpush.bf16.msra.mxu2 %v4732_v46 }
  0x8e   : > { %747 = vst [vmem:[#allocation3 + $0x34] sm:$0xf] %v644_v53  ;;  %v788_v50 = vld [vmem:[#allocation2 + $0x2c] sm:$0x1]  ;;  %v389_v62 = vld [vmem:[#allocation2 + $0x44] sm:$0x1] }
  0x8f   : > { %748 = vst [vmem:[#allocation3 + $0x58] sm:$0xf] %v658_v26  ;;  %v838_v53 = vrot.slane %v788_v50, 5  ;;  %v4731_v56 = vld [vmem:[#allocation7 + $0x198] sm:$0xff]  ;;  %v364_v26 = vsel %vm5290_vm2, 0, %v363_v30  ;;  %1900 = vmatpush.bf16.msra.mxu3 %v4740_v51  ;;  %v390_v54 = vsel %vm5303_vm5, 0, %v389_v62 }
  0x90   : > { %729 = vst [vmem:[#allocation3 + $0xdc] sm:$0xf] %v700_v4  ;;  %v4659_v61 = vld [vmem:[#allocation3 + $0x78] sm:$0xf0]  ;;  %v473_v3 = vshrl.u32 %v415_v57, 16  ;;  %v4730_v29 = vld [vmem:[#allocation7 + $0x190] sm:$0xff] }
  0x91   : > { %v4653_v21 = vld [vmem:[#allocation3 + $0x4c] sm:$0xf]  ;;  %730 = vst [vmem:[#allocation3 + $0x100] sm:$0xf] %v714_v11  ;;  %v839_v60 = vsel %vm5448_vm12, %v3757_v47, %v838_v53  ;;  %1928 = vmatpush.bf16.msra.mxu0 %v4749_v52  ;;  %1872 = vmatpush.bf16.msra.mxu2 %v4731_v56  ;;  %v3774_v7 = vld [vmem:[#allocation3 + $0x2c] sm:$0xf0] }
  0x92   : > { %v3802_v22 = vld [vmem:[#allocation3 + $0x6c] sm:$0xf0]  ;;  %751 = vst [vmem:[#allocation3 + $0xc4] sm:$0xf] %v700_v4  ;;  %v475_v9 = vrot.slane %v473_v3, 7  ;;  %v4739_v25 = vld [vmem:[#allocation7 + $0x1d8] sm:$0xff] }
  0x93   : > { %v3805_v24 = vor.u32 %v4653_v21, %v3802_v22  ;;  %752 = vst [vmem:[#allocation3 + $0xe8] sm:$0xf] %v714_v11  ;;  %v789_v13 = vld [vmem:[#allocation2 + $0x30] sm:$0xe]  ;;  %v790_v14 = vld [vmem:[#allocation2 + $0x34] sm:$0x1]  ;;  %1901 = vmatpush.bf16.msra.mxu3 %v4739_v25 }
  0x94   : > { %773 = vst [vmem:[#allocation3 + $0xac] sm:$0xf] %v700_v4  ;;  %v4645_v4 = vld [vmem:[#allocation3 + $0xc] sm:$0xf]  ;;  %v3758_v15 = vrot.slane %v789_v13, 9  ;;  %v842_v18 = vrot.slane %v790_v14, 5 }
  0x95   : > { %1736 = vmatmul.bf16.gmra.mxu1 %v3805_v24  ;;  %774 = vst [vmem:[#allocation3 + $0xd0] sm:$0xf] %v714_v11  ;;  %v4650_v33 = vld [vmem:[#allocation3 + $0x30] sm:$0xf0]  ;;  %v476_v11 = vshll.u32 %v415_v57, 16  ;;  %v3777_v12 = vor.u32 %v4645_v4, %v3774_v7  ;;  %v479_v31 = vrot.slane %v475_v9, 4  ;;  %1873 = vmatpush.bf16.msra.mxu2 %v4730_v29 }
  0x96   : > { %v3781_v35 = vor.u32 %v4650_v33, %v3780_v28  ;;  %872 = vst [vmem:[#allocation3 + $0x38] sm:$0xf] %v827_v32  ;;  %v3816_v59 = vld [vmem:[#allocation3 + $0x58] sm:$0xf]  ;;  %v791_v16 = vld [vmem:[#allocation2 + $0x38] sm:$0xe]  ;;  %v843_v19 = vsel %vm5448_vm12, %v3758_v15, %v842_v18 }
  0x97   : > { %v4671_v37 = vld [vmem:[#allocation3 + $0xdc] sm:$0xf]  ;;  %858 = vst [vmem:[#allocation3 + $0x50] sm:$0xf] %v827_v32  ;;  %v3817_v8 = vor.u32 %v4659_v61, %v3816_v59  ;;  %v792_v17 = vld [vmem:[#allocation2 + $0x3c] sm:$0x1]  ;;  %v478_v22 = vor.u32 %v476_v11, %v475_v9 }
  0x98   : > { %v3874_v39 = vld [vmem:[#allocation3 + $0xfc] sm:$0xf0]  ;;  %1818 = vmatmul.bf16.vlgmr.msrb.gmra.mxu0 %v3781_v35  ;;  %886 = vst [vmem:[#allocation3 + $0x20] sm:$0xf] %v827_v32  ;;  %v3759_v20 = vrot.slane %v791_v16, 9  ;;  %v846_v21 = vrot.slane %v792_v17, 5 }
  0x99   : > { %v3877_v41 = vor.u32 %v4671_v37, %v3874_v39  ;;  %859 = vst [vmem:[#allocation3 + $0x74] sm:$0xf] %v831_v34  ;;  %v4748_v28 = vld [vmem:[#allocation7 + $0x220] sm:$0xff]  ;;  %v4747_v38 = vld [vmem:[#allocation7 + $0x218] sm:$0xff]  ;;  %v4729_v39 = vld [vmem:[#allocation7 + $0x188] sm:$0xff] }
  0x9a   : > { %887 = vst [vmem:[#allocation3 + $0x44] sm:$0xf] %v831_v34  ;;  %v847_v36 = vsel %vm5448_vm12, %v3759_v20, %v846_v21  ;;  %1929 = vmatpush.bf16.msra.mxu0 %v4748_v28  ;;  %v3852_v43 = vld [vmem:[#allocation3 + $0xa0] sm:$0xf]  ;;  %v4668_v44 = vld [vmem:[#allocation3 + $0xc0] sm:$0xf0]  ;;  %1874 = vmatpush.bf16.msra.mxu2 %v4729_v39 }
  0x9b   : > { %1746 = vmatmul.bf16.gmra.mxu3 %v3877_v41  ;;  %873 = vst [vmem:[#allocation3 + $0x5c] sm:$0xf] %v831_v34  ;;  %v4738_v34 = vld [vmem:[#allocation7 + $0x1d0] sm:$0xff]  ;;  %v3810_v45 = vld [vmem:[#allocation3 + $0x74] sm:$0xf0]  ;;  %v3853_v46 = vor.u32 %v4668_v44, %v3852_v43  ;;  %v4737_v57 = vld [vmem:[#allocation7 + $0x1c8] sm:$0xff] }
  0x9c   : > { %874 = vst [vmem:[#allocation3 + $0x80] sm:$0xf] %v835_v49  ;;  %1902 = vmatpush.bf16.msra.mxu3 %v4738_v34  ;;  %v4654_v0 = vld [vmem:[#allocation3 + $0x54] sm:$0xf]  ;;  %v4728_v59 = vld [vmem:[#allocation7 + $0x180] sm:$0xff]  ;;  %v4745_v3 = vld [vmem:[#allocation7 + $0x208] sm:$0xff] }
  0x9d   : > { %v3782_v55 = vld [vmem:[#allocation3 + $0x34] sm:$0xf0]  ;;  %860 = vst [vmem:[#allocation3 + $0x98] sm:$0xf] %v835_v49  ;;  %v3813_v47 = vor.u32 %v4654_v0, %v3810_v45  ;;  %v4744_v15 = vld [vmem:[#allocation7 + $0x200] sm:$0xff] }
  0x9e   : > { %v3808_v58 = vld [vmem:[#allocation3 + $0x50] sm:$0xf]  ;;  %888 = vst [vmem:[#allocation3 + $0x68] sm:$0xf] %v835_v49  ;;  %v3785_v63 = vor.u32 %v4646_v48, %v3782_v55  ;;  %1930 = vmatpush.bf16.msra.mxu0 %v4747_v38  ;;  %1875 = vmatpush.bf16.msra.mxu2 %v4728_v59  ;;  %v4663_v18 = vld [vmem:[#allocation3 + $0x9c] sm:$0xf] }
  0x9f   : > { %861 = vst [vmem:[#allocation3 + $0xbc] sm:$0xf] %v839_v60  ;;  %v3846_v16 = vld [vmem:[#allocation3 + $0xbc] sm:$0xf0]  ;;  %v4660_v39 = vld [vmem:[#allocation3 + $0x80] sm:$0xf0] }
  0xa0   : > { %v4658_v1 = vld [vmem:[#allocation3 + $0x70] sm:$0xf0]  ;;  %875 = vst [vmem:[#allocation3 + $0xa4] sm:$0xf] %v839_v60  ;;  %1903 = vmatpush.bf16.msra.mxu3 %v4737_v57  ;;  %v3849_v17 = vor.u32 %v4663_v18, %v3846_v16  ;;  %v3824_v38 = vld [vmem:[#allocation3 + $0x60] sm:$0xf] }
  0xa1   : > { %v3809_v2 = vor.u32 %v4658_v1, %v3808_v58  ;;  %889 = vst [vmem:[#allocation3 + $0x8c] sm:$0xf] %v839_v60  ;;  %v4746_v58 = vld [vmem:[#allocation7 + $0x210] sm:$0xff]  ;;  %v598_v44 = vld [vmem:[#allocation2 + $0x48] sm:$0xf] }
  0xa2   : > { %365 = vst [vmem:[#allocation2 + $0x40] sm:$0x1] %v364_v26  ;;  %v4655_v32 = vld [vmem:[#allocation3 + $0x5c] sm:$0xf]  ;;  %1931 = vmatpush.bf16.msra.mxu0 %v4746_v58  ;;  %v755_v45 = vshrl.u32 %v598_v44, 16 }
  0xa3   : > { %1765 = vmatmul.bf16.gmra.mxu2 %v3809_v2  ;;  %391 = vst [vmem:[#allocation2 + $0x44] sm:$0x1] %v390_v54  ;;  %v3818_v33 = vld [vmem:[#allocation3 + $0x7c] sm:$0xf0]  ;;  %v795_v57 = vld [vmem:[#allocation2 + $0x48] sm:$0xe] }
  0xa4   : > { %876 = vst [vmem:[#allocation3 + $0xc8] sm:$0xf] %v843_v19  ;;  %v3844_v35 = vld [vmem:[#allocation3 + $0x98] sm:$0xf]  ;;  %v3821_v27 = vor.u32 %v4655_v32, %v3818_v33  ;;  %v4736_v2 = vld [vmem:[#allocation7 + $0x1c0] sm:$0xff] }
  0xa5   : > { %1847 = vmatmul.bf16.vlgmr.msrb.gmra.mxu1 %v3785_v63  ;;  %862 = vst [vmem:[#allocation3 + $0xe0] sm:$0xf] %v843_v19  ;;  %1904 = vmatpush.bf16.msra.mxu3 %v4736_v2  ;;  %v4672_v32 = vld [vmem:[#allocation3 + $0xe4] sm:$0xf]  ;;  %v796_v58 = vld [vmem:[#allocation2 + $0x4c] sm:$0x1] }
  0xa6   : > { %v4667_v37 = vld [vmem:[#allocation3 + $0xb8] sm:$0xf0]  ;;  %890 = vst [vmem:[#allocation3 + $0xb0] sm:$0xf] %v843_v19  ;;  %1932 = vmatpush.bf16.msra.mxu0 %v4745_v3  ;;  %v3888_v19 = vld [vmem:[#allocation3 + $0xe8] sm:$0xf] }
  0xa7   : > { %863 = vst [vmem:[#allocation3 + $0x104] sm:$0xf] %v847_v36  ;;  %v3845_v42 = vor.u32 %v4667_v37, %v3844_v35  ;;  %v4664_v7 = vld [vmem:[#allocation3 + $0xa4] sm:$0xf]  ;;  %v3796_v35 = vld [vmem:[#allocation3 + $0x20] sm:$0xf] }
  0xa8   : > { %1823 = vmatmul.bf16.gmra.mxu0 %v3817_v8  ;;  %877 = vst [vmem:[#allocation3 + $0xec] sm:$0xf] %v847_v36  ;;  %v2151_v16 = vld [vmem:[#allocation2 + $0x48] sm:$0xf] }
  0xa9   : > { %v540_v24 = vld [vmem:[#allocation2 + $0x40] sm:$0xf]  ;;  %891 = vst [vmem:[#allocation3 + $0xd4] sm:$0xf] %v847_v36  ;;  %v4652_v36 = vld [vmem:[#allocation3 + $0x40] sm:$0xf0] }
  0xaa   : > { %v541_v41 = vsel %vm5317_vm7, %v478_v22, %v540_v24  ;;  %v543_v10 = vld [vmem:[#allocation2 + $0x44] sm:$0x1]  ;;  %1933 = vmatpush.bf16.msra.mxu0 %v4744_v15  ;;  %v3788_v22 = vld [vmem:[#allocation3 + $0x18] sm:$0xf]  ;;  %v4651_v24 = vld [vmem:[#allocation3 + $0x38] sm:$0xf0]  ;;  %v3797_v34 = vor.u32 %v4652_v36, %v3796_v35 }
  0xab   : > { %1789 = vmatmul.bf16.vlgmr.msrb.gmra.mxu3 %v3777_v12  ;;  %v544_v30 = vsel %vm5290_vm2, %v479_v31, %v543_v10  ;;  %542 = vst [vmem:[#allocation2 + $0x40] sm:$0xf] %v541_v41  ;;  %v3854_v8 = vld [vmem:[#allocation3 + $0xc4] sm:$0xf0]  ;;  %v3789_v29 = vor.u32 %v4651_v24, %v3788_v22  ;;  %v3825_v41 = vor.u32 %v4660_v39, %v3824_v38  ;;  %v4647_v10 = vld [vmem:[#allocation3 + $0x1c] sm:$0xf] }
  0xac   : > { %545 = vst [vmem:[#allocation2 + $0x44] sm:$0x1] %v544_v30  ;;  %v3880_v61 = vld [vmem:[#allocation3 + $0xe0] sm:$0xf]  ;;  %v3857_v13 = vor.u32 %v4664_v7, %v3854_v8  ;;  %v4656_v8 = vld [vmem:[#allocation3 + $0x64] sm:$0xf] }
  0xad   : > { %v3790_v30 = vld [vmem:[#allocation3 + $0x3c] sm:$0xf0]  ;;  %v2346_v24 = vld [vmem:[#allocation2 + $0x4c] sm:$0x1] }
  0xae   : > { %v4676_v63 = vld [vmem:[#allocation3 + $0x100] sm:$0xf0]  ;;  %v3793_v43 = vor.u32 %v4647_v10, %v3790_v30  ;;  %v4665_v10 = vld [vmem:[#allocation3 + $0xac] sm:$0xf]  ;;  %v3862_v30 = vld [vmem:[#allocation3 + $0xcc] sm:$0xf0] }
  0xaf   : > { %v3881_v12 = vor.u32 %v4676_v63, %v3880_v61  ;;  %v4673_v25 = vld [vmem:[#allocation3 + $0xec] sm:$0xf]  ;;  %v883_v61 = vrot.slane %v796_v58, 5 }
  0xb2   : > { %v554_v48 = vld [vmem:[#allocation2 + $0x40] sm:$0xf] }
  0xb3   : > { %1770 = vmatmul.bf16.gmra.mxu2 %v3845_v42  ;;  %v596_v49 = vld [vmem:[#allocation2 + $0x40] sm:$0xf]  ;;  %571 = vst [vmem:[#allocation3 + $0x108] sm:$0xf] %v554_v48  ;;  %v597_v50 = vld [vmem:[#allocation2 + $0x44] sm:$0x1] }
  0xb4   : > { %v732_v51 = vshrl.u32 %v596_v49, 16  ;;  %v735_v52 = vshll.u32 %v596_v49, 16  ;;  %578 = vst [vmem:[#allocation3 + $0xf0] sm:$0xf] %v554_v48  ;;  %v741_v53 = vshll.u32 %v597_v50, 16  ;;  %v757_v48 = vrot.slane %v755_v45, 4 }
  0xb5   : > { %1852 = vmatmul.bf16.gmra.mxu1 %v3821_v27  ;;  %v793_v55 = vld [vmem:[#allocation2 + $0x40] sm:$0xe]  ;;  %v794_v62 = vld [vmem:[#allocation2 + $0x44] sm:$0x1]  ;;  %v3832_v42 = vld [vmem:[#allocation3 + $0x68] sm:$0xf] }
  0xb6   : > { %v734_v56 = vrot.slane %v732_v51, 4  ;;  %v737_v26 = vrot.slane %v735_v52, 5  ;;  %v3760_v60 = vrot.slane %v793_v55, 9  ;;  %v743_v54 = vrot.slane %v741_v53, 5  ;;  %v4661_v27 = vld [vmem:[#allocation3 + $0x88] sm:$0xf0] }
  0xb7   : > { %v868_v4 = vrot.slane %v794_v62, 5  ;;  %v3833_v0 = vor.u32 %v4661_v27, %v3832_v42  ;;  %v3860_v51 = vld [vmem:[#allocation3 + $0xa8] sm:$0xf]  ;;  %v4669_v52 = vld [vmem:[#allocation3 + $0xc8] sm:$0xf0] }
  0xb8   : > { %1828 = vmatmul.bf16.gmra.mxu0 %v3853_v46  ;;  %v738_v1 = vor.u32 %v737_v26, %v734_v56  ;;  %v758_v46 = vshll.u32 %v598_v44, 16  ;;  %v599_v53 = vld [vmem:[#allocation2 + $0x4c] sm:$0x1]  ;;  %v3861_v63 = vor.u32 %v4669_v52, %v3860_v51  ;;  %v3865_v44 = vor.u32 %v4665_v10, %v3862_v30 }
  0xb9   : > { %v869_v11 = vsel %vm5448_vm12, %v3760_v60, %v868_v4  ;;  %v764_v26 = vshll.u32 %v599_v53, 16  ;;  %v3761_v60 = vrot.slane %v795_v57, 9  ;;  %v4791_v30 = vld [vmem:[#allocation9 + $0x18] sm:$0xff] }
  0xba   : > { %v739_v9 = vrot.slane %v738_v1, 4  ;;  %878 = vst [vmem:[#allocation3 + $0x110] sm:$0xf] %v869_v11  ;;  %v3882_v33 = vld [vmem:[#allocation3 + $0x104] sm:$0xf0]  ;;  %v760_v49 = vrot.slane %v758_v46, 5 }
  0xbb   : > { %1794 = vmatmul.bf16.gmra.mxu3 %v3813_v47  ;;  %892 = vst [vmem:[#allocation3 + $0xf8] sm:$0xf] %v869_v11  ;;  %v3885_v37 = vor.u32 %v4672_v32, %v3882_v33  ;;  %v555_v47 = vld [vmem:[#allocation2 + $0x48] sm:$0xf]  ;;  %v766_v62 = vrot.slane %v764_v26, 5 }
  0xbc   : > { %v744_v14 = vsel %vm5334_vm9, %v739_v9, %v743_v54  ;;  %579 = vst [vmem:[#allocation3 + $0x114] sm:$0xf] %v555_v47  ;;  %v761_v55 = vor.u32 %v760_v49, %v757_v48  ;;  %v2108_v1 = vld [vmem:[#allocation2 + $0x48] sm:$0xf]  ;;  %v884_v54 = vsel %vm5448_vm12, %v3761_v60, %v883_v61  ;;  %v3826_v9 = vld [vmem:[#allocation3 + $0x84] sm:$0xf0] }
  0xbd   : > { %753 = vst [vmem:[#allocation3 + $0x10c] sm:$0xf] %v744_v14  ;;  %v3868_v11 = vld [vmem:[#allocation3 + $0xb0] sm:$0xf] }
  0xbe   : > { %775 = vst [vmem:[#allocation3 + $0xf4] sm:$0xf] %v744_v14  ;;  %v762_v59 = vrot.slane %v761_v55, 4  ;;  %v3829_v14 = vor.u32 %v4656_v8, %v3826_v9 }
  0xbf   : > { %893 = vst [vmem:[#allocation3 + $0x11c] sm:$0xf] %v884_v54 }
  0xc0   : > { %v767_v3 = vsel %vm5334_vm9, %v762_v59, %v766_v62  ;;  %v4795_v62 = vld [vmem:[#allocation9 + $0x38] sm:$0xff] }
  0xc1   : > { %v3890_v28 = vld [vmem:[#allocation3 + $0x10c] sm:$0xf0]  ;;  %776 = vst [vmem:[#allocation3 + $0x118] sm:$0xf] %v767_v3  ;;  %3241 = vmatpush.bf16.msra.mxu1 %v4795_v62 }
  0xc2   : > { %v3893_v31 = vor.u32 %v4673_v25, %v3890_v28  ;;  %v3896_v28 = vld [vmem:[#allocation3 + $0xf0] sm:$0xf] }
  0xc3   : > { %1775 = vmatmul.bf16.gmra.mxu2 %v3881_v12  ;;  %v4678_v7 = vld [vmem:[#allocation3 + $0x110] sm:$0xf0] }
  0xc4   : > { %v4677_v20 = vld [vmem:[#allocation3 + $0x108] sm:$0xf0]  ;;  %2132 = vst [vmem:[#allocation3 + $0x114] sm:$0xf] %v2108_v1  ;;  %v4670_v12 = vld [vmem:[#allocation3 + $0xd0] sm:$0xf0] }
  0xc5   : > { %1857 = vmatmul.bf16.gmra.mxu1 %v3857_v13  ;;  %v3889_v21 = vor.u32 %v4677_v20, %v3888_v19  ;;  %v3869_v18 = vor.u32 %v4670_v12, %v3868_v11  ;;  %v2345_v19 = vld [vmem:[#allocation2 + $0x48] sm:$0xe]  ;;  %v2305_v20 = vshrl.u32 %v2151_v16, 16  ;;  %v4674_v49 = vld [vmem:[#allocation3 + $0xf4] sm:$0xf]  ;;  %v4793_v12 = vld [vmem:[#allocation9 + $0x28] sm:$0xff] }
  0xc6   : > { %v4203_v25 = vrot.slane %v2345_v19, 9  ;;  %v4679_v35 = vld [vmem:[#allocation3 + $0x118] sm:$0xf0]  ;;  %v4794_v3 = vld [vmem:[#allocation9 + $0x30] sm:$0xff]  ;;  %v4792_v19 = vld [vmem:[#allocation9 + $0x20] sm:$0xff] }
  0xc7   : > { %3242 = vmatpush.bf16.msra.mxu1 %v4794_v3  ;;  %v4790_v62 = vld [vmem:[#allocation9 + $0x10] sm:$0xff]  ;;  %v4816_v3 = vld [vmem:[#allocation9 + $0xe0] sm:$0xff] }
  0xc8   : > { %1833 = vmatmul.bf16.gmra.mxu0 %v3889_v21  ;;  %v2308_v21 = vshll.u32 %v2151_v16, 16  ;;  %v3898_v42 = vld [vmem:[#allocation3 + $0x114] sm:$0xf0] }
  0xc9   : > { %v3901_v51 = vor.u32 %v4674_v49, %v3898_v42  ;;  %v4808_v42 = vld [vmem:[#allocation9 + $0xa0] sm:$0xff] }
  0xca   : > { %v2310_v32 = vrot.slane %v2308_v21, 5 }
  0xcb   : > { %1799 = vmatmul.bf16.gmra.mxu3 %v3849_v17  ;;  %v2152_v17 = vld [vmem:[#allocation2 + $0x4c] sm:$0x1]  ;;  %3243 = vmatpush.bf16.msra.mxu1 %v4793_v12 }
  0xcc   : > { %v2314_v22 = vshll.u32 %v2152_v17, 16 }
  0xce   : > { %v2316_v38 = vrot.slane %v2314_v22, 5 }
  0xcf   : > { %3244 = vmatpush.bf16.msra.mxu1 %v4792_v19  ;;  %v4800_v19 = vld [vmem:[#allocation9 + $0x60] sm:$0xff] }
  0xd3   : > { %1876 = vmatmul.bf16.vlgmr.msra.gmra.mxu2 %v3789_v29  ;;  %v2430_v29 = vrot.slane %v2346_v24, 5  ;;  %3245 = vmatpush.bf16.msra.mxu1 %v4791_v30  ;;  %v4788_v30 = vld [vmem:[#allocation9] sm:$0xff] }
  0xd5   : > { %1862 = vmatmul.bf16.gmra.mxu1 %v3893_v31  ;;  %v2307_v31 = vrot.slane %v2305_v20, 4  ;;  %v2431_v36 = vsel %vm5448_vm12, %v4203_v25, %v2430_v29  ;;  %v4811_v25 = vld [vmem:[#allocation9 + $0xb8] sm:$0xff]  ;;  %v4810_v29 = vld [vmem:[#allocation9 + $0xb0] sm:$0xff] }
  0xd6   : > { %2440 = vst [vmem:[#allocation3 + $0x11c] sm:$0xf] %v2431_v36  ;;  %3299 = vmatpush.bf16.msrb.mxu3 %v4811_v25  ;;  %v4806_v25 = vld [vmem:[#allocation9 + $0x90] sm:$0xff] }
  0xd7   : > { %3246 = vmatpush.bf16.msra.mxu1 %v4790_v62 }
  0xd8   : > { %1934 = vmatmul.bf16.vlgmr.msra.gmra.mxu0 %v3797_v34  ;;  %v2311_v34 = vor.u32 %v2310_v32, %v2307_v31  ;;  %v4819_v32 = vld [vmem:[#allocation9 + $0xf8] sm:$0xff] }
  0xd9   : > { %3328 = vmatpush.bf16.msrb.mxu0 %v4819_v32 }
  0xda   : > { %v5494_v56 = vpop.f32.mrf.mxu0  ;;  %3300 = vmatpush.bf16.msrb.mxu3 %v4810_v29  ;;  %v4789_v29 = vld [vmem:[#allocation9 + $0x8] sm:$0xff] }
  0xdb   : > { %1804 = vmatmul.bf16.gmra.mxu3 %v3885_v37  ;;  %v1713_v50 = vpop.f32.mrf.mxu2  ;;  %v3897_v37 = vor.u32 %v4678_v7, %v3896_v28  ;;  %3247 = vmatpush.bf16.msra.mxu1 %v4789_v29  ;;  %v4812_v29 = vld [vmem:[#allocation9 + $0xc0] sm:$0xff] }
  0xdf   : > { %v1732_v1 = vpop.f32.mrf.mxu1  ;;  %3248 = vmatpush.bf16.msra.mxu1 %v4788_v30  ;;  %v2054_v30 = vld [vmem:[#allocation2 + $0xc] sm:$0x1] }
  0xe0   : > { %v1733_v10 = vadd.f32 %v1732_v1, %v5494_v56 }
  0xe2   : > { %v5504_v15 = vpop.f32.mrf.mxu0 }
  0xe3   : > { %1881 = vmatmul.bf16.gmra.mxu2 %v3825_v41  ;;  %v5502_v13 = vpop.f32.mrf.mxu2  ;;  %v2312_v41 = vrot.slane %v2311_v34, 4  ;;  %v4818_v34 = vld [vmem:[#allocation9 + $0xf0] sm:$0xff] }
  0xe4   : > { %3329 = vmatpush.bf16.msrb.mxu0 %v4818_v34 }
  0xe5   : > { %v2317_v27 = vsel %vm5334_vm9, %v2312_v41, %v2316_v38  ;;  %v4802_v38 = vld [vmem:[#allocation9 + $0x70] sm:$0xff] }
  0xe6   : > { %2326 = vst [vmem:[#allocation3 + $0x118] sm:$0xf] %v2317_v27  ;;  %v4817_v27 = vld [vmem:[#allocation9 + $0xe8] sm:$0xff] }
  0xe7   : > { %v1734_v8 = vpop.f32.mrf.mxu1 }
  0xe8   : > { %1939 = vmatmul.bf16.gmra.mxu0 %v3833_v0 }
  0xe9   : > { %3330 = vmatpush.bf16.msrb.mxu0 %v4817_v27 }
  0xeb   : > { %1905 = vmatmul.bf16.vlgmr.msra.gmra.mxu3 %v3793_v43  ;;  %v3904_v43 = vld [vmem:[#allocation3 + $0xf8] sm:$0xf] }
  0xec   : > { %v3905_v0 = vor.u32 %v4679_v35, %v3904_v43  ;;  %v4803_v35 = vld [vmem:[#allocation9 + $0x78] sm:$0xff] }
  0xed   : > { %3270 = vmatpush.bf16.msrb.mxu2 %v4803_v35  ;;  %3331 = vmatpush.bf16.msrb.mxu0 %v4816_v3  ;;  %v4799_v35 = vld [vmem:[#allocation9 + $0x58] sm:$0xff] }
  0xf1   : > { %v1742_v2 = vpop.f32.mrf.mxu3  ;;  %3271 = vmatpush.bf16.msrb.mxu2 %v4802_v38  ;;  %v4805_v38 = vld [vmem:[#allocation9 + $0x88] sm:$0xff] }
  0xf2   : > { %v5500_v4 = vadd.f32 %v1742_v2, %v1713_v50 }
  0xf3   : > { %1886 = vmatmul.bf16.gmra.mxu2 %v3861_v63 }
  0xf8   : > { %1944 = vmatmul.bf16.gmra.mxu0 %v3869_v18 }
  0xf9   : > { %v5516_v48 = vpop.f32.mrf.mxu3 }
  0xfb   : > { %1910 = vmatmul.bf16.gmra.mxu3 %v3829_v14 }
  0xff   : > { %v1718_v33 = vpop.f32.mrf.mxu2  ;;  %v5508_v39 = vpop.f32.mrf.mxu0 }
 0x103   : > { %1891 = vmatmul.bf16.gmra.mxu2 %v3897_v37  ;;  %v4809_v37 = vld [vmem:[#allocation9 + $0xa8] sm:$0xff] }
 0x104   : > { %3301 = vmatpush.bf16.msrb.mxu3 %v4809_v37 }
 0x107   : > { %v5512_v45 = vpop.f32.mrf.mxu2  ;;  %v5514_v46 = vpop.f32.mrf.mxu0 }
 0x108   : > { %1949 = vmatmul.bf16.gmra.mxu0 %v3905_v0  ;;  %3302 = vmatpush.bf16.msrb.mxu3 %v4808_v42  ;;  %v4798_v42 = vld [vmem:[#allocation9 + $0x50] sm:$0xff] }
 0x10b   : > { %1915 = vmatmul.bf16.gmra.mxu3 %v3865_v44  ;;  %v4801_v44 = vld [vmem:[#allocation9 + $0x68] sm:$0xff] }
 0x10c   : > { %3272 = vmatpush.bf16.msrb.mxu2 %v4801_v44 }
 0x10f   : > { %v1761_v47 = vpop.f32.mrf.mxu2 }
 0x110   : > { %v1762_v43 = vadd.f32 %v1761_v47, %v1733_v10  ;;  %v1735_v47 = vadd.f32 %v1734_v8, %v5504_v15  ;;  %3273 = vmatpush.bf16.msrb.mxu2 %v4800_v19  ;;  %v4814_v15 = vld [vmem:[#allocation9 + $0xd0] sm:$0xff] }
 0x112   : > { %v5550_v16 = vpop.f32.mrf.mxu1 }
 0x113   : > { %v1738_v27 = vadd.f32 %v5550_v16, %v5508_v39 }
 0x114   : > { %3274 = vmatpush.bf16.msrb.mxu2 %v4799_v35 }
 0x115   : > { %v5518_v50 = vpop.f32.mrf.mxu0 }
 0x117   : > { %v5522_v53 = vpop.f32.mrf.mxu2 }
 0x118   : > { %v1764_v32 = vadd.f32 %v5522_v53, %v1735_v47  ;;  %3275 = vmatpush.bf16.msrb.mxu2 %v4798_v42  ;;  %v4797_v47 = vld [vmem:[#allocation9 + $0x48] sm:$0xff] }
 0x11a   : > { %v5558_v22 = vpop.f32.mrf.mxu1 }
 0x11b   : > { %1920 = vmatmul.bf16.gmra.mxu3 %v3901_v51 }
 0x11c   : > { %3276 = vmatpush.bf16.msrb.mxu2 %v4797_v47  ;;  %v2060_v47 = vld [vmem:[#allocation2 + $0x14] sm:$0x1] }
 0x11d   : > { %v5520_v52 = vpop.f32.mrf.mxu0 }
 0x11e   : > { %v1747_v55 = vpop.f32.mrf.mxu3 }
 0x11f   : > { %v5524_v26 = vadd.f32 %v1747_v55, %v1718_v33  ;;  %v4807_v55 = vld [vmem:[#allocation9 + $0x98] sm:$0xff] }
 0x120   : > { %3303 = vmatpush.bf16.msrb.mxu3 %v4807_v55  ;;  %v4804_v55 = vld [vmem:[#allocation9 + $0x80] sm:$0xff] }
 0x122   : > { %v1848_v33 = vpop.f32.mrf.mxu1 }
 0x124   : > { %3304 = vmatpush.bf16.msrb.mxu3 %v4806_v25 }
 0x125   : > { %v5528_v58 = vpop.f32.mrf.mxu0 }
 0x126   : > { %v5526_v57 = vpop.f32.mrf.mxu3  ;;  %v5530_v59 = vpop.f32.mrf.mxu2 }
 0x128   : > { %3305 = vmatpush.bf16.msrb.mxu3 %v4805_v38 }
 0x12a   : > { %v1850_v51 = vpop.f32.mrf.mxu1 }
 0x12c   : > { %3306 = vmatpush.bf16.msrb.mxu3 %v4804_v55 }
 0x12d   : > { %v5534_v63 = vpop.f32.mrf.mxu0 }
 0x12e   : > { %v1790_v60 = vpop.f32.mrf.mxu3  ;;  %v5532_v61 = vpop.f32.mrf.mxu2 }
 0x12f   : > { %v1791_v49 = vadd.f32 %v1790_v60, %v1762_v43  ;;  %v4815_v60 = vld [vmem:[#allocation9 + $0xd8] sm:$0xff] }
 0x130   : > { %3332 = vmatpush.bf16.msrb.mxu0 %v4815_v60 }
 0x131   : > { %v1820_v1 = vadd.f32 %v5518_v50, %v1791_v49 }
 0x132   : > { %v1853_v8 = vpop.f32.mrf.mxu1 }
 0x133   : > { %v1849_v37 = vadd.f32 %v1848_v33, %v1820_v1 }
 0x134   : > { %3333 = vmatpush.bf16.msrb.mxu0 %v4814_v15 }
 0x135   : > { %v5540_v7 = vpop.f32.mrf.mxu0 }
 0x136   : > { %v5536_v54 = vpop.f32.mrf.mxu3  ;;  %v5538_v2 = vpop.f32.mrf.mxu2 }
 0x137   : > { %v1793_v34 = vadd.f32 %v5536_v54, %v1764_v32  ;;  %v1767_v54 = vadd.f32 %v5530_v59, %v1738_v27  ;;  %v1740_v59 = vadd.f32 %v5558_v22, %v5514_v46  ;;  %v4796_v32 = vld [vmem:[#allocation9 + $0x40] sm:$0xff] }
 0x138   : > { %3277 = vmatpush.bf16.msrb.mxu2 %v4796_v32 }
 0x139   : > { %v1822_v43 = vadd.f32 %v5520_v52, %v1793_v34 }
 0x13b   : > { %v1851_v3 = vadd.f32 %v1850_v51, %v1822_v43  ;;  %v1769_v51 = vadd.f32 %v5532_v61, %v1740_v59 }
 0x13d   : > { %v5546_v14 = vpop.f32.mrf.mxu0 }
 0x13e   : > { %v5542_v9 = vpop.f32.mrf.mxu3  ;;  %v5544_v11 = vpop.f32.mrf.mxu2 }
 0x13f   : > { %v1796_v62 = vadd.f32 %v5542_v9, %v1767_v54  ;;  %v4827_v54 = vld [vmem:[#allocation9 + $0x138] sm:$0xff] }
 0x140   : > { %3357 = vmatpush.bf16.msrb.mxu1 %v4827_v54 }
 0x141   : > { %v1825_v52 = vadd.f32 %v5528_v58, %v1796_v62  ;;  %v2051_v58 = vld [vmem:[#allocation2 + $0x8] sm:$0xf] }
 0x143   : > { %v1854_v38 = vadd.f32 %v1853_v8, %v1825_v52 }
 0x145   : > { %v5556_v21 = vpop.f32.mrf.mxu0 }
 0x146   : > { %v5548_v18 = vpop.f32.mrf.mxu3  ;;  %v5552_v17 = vpop.f32.mrf.mxu2 }
 0x147   : > { %v1798_v15 = vadd.f32 %v5548_v18, %v1769_v51  ;;  %v1772_v18 = vadd.f32 %v5538_v2, %v5500_v4  ;;  %v1777_v54 = vadd.f32 %v5552_v17, %v5524_v26 }
 0x149   : > { %v1827_v43 = vadd.f32 %v5534_v63, %v1798_v15  ;;  %v2063_v15 = vld [vmem:[#allocation2 + $0x18] sm:$0xf] }
 0x14d   : > { %v5564_v31 = vpop.f32.mrf.mxu0 }
 0x14e   : > { %v5554_v20 = vpop.f32.mrf.mxu3  ;;  %v5560_v24 = vpop.f32.mrf.mxu2 }
 0x155   : > { %v1935_v0 = vpop.f32.mrf.mxu0 }
 0x156   : > { %v5562_v28 = vpop.f32.mrf.mxu3  ;;  %v1877_v36 = vpop.f32.mrf.mxu2 }
 0x157   : > { %v1878_v50 = vadd.f32 %v1877_v36, %v1849_v37  ;;  %v4813_v36 = vld [vmem:[#allocation9 + $0xc8] sm:$0xff] }
 0x158   : > { %3334 = vmatpush.bf16.msrb.mxu0 %v4813_v36 }
 0x15c   : > { %3335 = vmatpush.bf16.msrb.mxu0 %v4812_v29 }
 0x15d   : > { %v1937_v10 = vpop.f32.mrf.mxu0 }
 0x15e   : > { %v5566_v41 = vpop.f32.mrf.mxu3  ;;  %v1879_v12 = vpop.f32.mrf.mxu2 }
 0x15f   : > { %v1880_v16 = vadd.f32 %v1879_v12, %v1851_v3 }
 0x165   : > { %v1940_v25 = vpop.f32.mrf.mxu0 }
 0x166   : > { %v5569_v56 = vpop.f32.mrf.mxu3  ;;  %v1882_v44 = vpop.f32.mrf.mxu2 }
 0x16e   : > { %v1906_v53 = vpop.f32.mrf.mxu3  ;;  %v1884_v12 = vpop.f32.mrf.mxu2 }
 0x16f   : > { %v1907_v33 = vadd.f32 %v1906_v53, %v1878_v50  ;;  %v1883_v53 = vadd.f32 %v1882_v44, %v1854_v38  ;;  %v2057_v44 = vld [vmem:[#allocation2 + $0x10] sm:$0xf] }
 0x171   : > { %v1936_v49 = vadd.f32 %v1935_v0, %v1907_v33  ;;  %v1855_v0 = vpop.f32.mrf.mxu1 }
 0x173   : > { %v1955_v19 = vmax.f32 %v1936_v49, 0.0  ;;  %v1942_v49 = vpop.f32.mrf.mxu0 }
 0x175   : > { %v1963_v39 = vpack.c.bf16 %v1955_v19, %v1955_v19  ;;  %v1801_v19 = vadd.f32 %v5554_v20, %v1772_v18  ;;  %v1745_v20 = vadd.f32 %v5516_v48, %v5502_v13  ;;  %v4206_v18 = vld [vmem:[#allocation3] sm:$0xf] }
 0x176   : > { %v1908_v1 = vpop.f32.mrf.mxu3 }
 0x177   : > { %v1972_v60 = vshrl.u32 %v1963_v39, 16  ;;  %v1909_v9 = vadd.f32 %v1908_v1, %v1880_v16  ;;  %v1975_v37 = vshll.u32 %v1963_v39, 16  ;;  %v1856_v39 = vadd.f32 %v1855_v0, %v1827_v43  ;;  %v1887_v1 = vpop.f32.mrf.mxu2 }
 0x178   : > { %v1830_v0 = vadd.f32 %v5540_v7, %v1801_v19 }
 0x179   : > { %v1974_v35 = vrot.slane %v1972_v60, 7  ;;  %v1938_v34 = vadd.f32 %v1937_v10, %v1909_v9  ;;  %v1858_v55 = vpop.f32.mrf.mxu1  ;;  %v1885_v59 = vadd.f32 %v1884_v12, %v1856_v39  ;;  %v1774_v12 = vadd.f32 %v5544_v11, %v1745_v20 }
 0x17a   : > { %v1859_v7 = vadd.f32 %v1858_v55, %v1830_v0  ;;  %v4825_v0 = vld [vmem:[#allocation9 + $0x128] sm:$0xff] }
 0x17b   : > { %v1977_v50 = vor.u32 %v1975_v37, %v1974_v35  ;;  %v1978_v42 = vrot.slane %v1974_v35, 4  ;;  %v1956_v46 = vmax.f32 %v1938_v34, 0.0 }
 0x17c   : > { %v1888_v19 = vadd.f32 %v1887_v1, %v1859_v7 }
 0x17d   : > { %v2052_v22 = vsel %vm5317_vm7, %v1977_v50, %v2051_v58  ;;  %v2055_v27 = vsel %vm5290_vm2, %v1978_v42, %v2054_v30  ;;  %v1964_v61 = vpack.c.bf16 %v1956_v46, %v1956_v46  ;;  %v4826_v30 = vld [vmem:[#allocation9 + $0x130] sm:$0xff] }
 0x17e   : > { %2053 = vst [vmem:[#allocation2 + $0x8] sm:$0xf] %v2052_v22  ;;  %v1911_v10 = vpop.f32.mrf.mxu3  ;;  %3358 = vmatpush.bf16.msrb.mxu1 %v4826_v30  ;;  %v2066_v22 = vld [vmem:[#allocation2 + $0x1c] sm:$0x1] }
 0x17f   : > { %2056 = vst [vmem:[#allocation2 + $0xc] sm:$0x1] %v2055_v27  ;;  %v1980_v8 = vshrl.u32 %v1964_v61, 16  ;;  %v1912_v33 = vadd.f32 %v1911_v10, %v1883_v53  ;;  %v1983_v36 = vshll.u32 %v1964_v61, 16  ;;  %v1945_v27 = vpop.f32.mrf.mxu0  ;;  %v1803_v10 = vadd.f32 %v5562_v28, %v1774_v12  ;;  %v1889_v28 = vpop.f32.mrf.mxu2 }
 0x181   : > { %v1982_v62 = vrot.slane %v1980_v8, 7  ;;  %v1941_v3 = vadd.f32 %v1940_v25, %v1912_v33  ;;  %v1860_v11 = vpop.f32.mrf.mxu1  ;;  %v1832_v17 = vadd.f32 %v5546_v14, %v1803_v10 }
 0x182   : > { %3359 = vmatpush.bf16.msrb.mxu1 %v4825_v0 }
 0x183   : > { %v1985_v16 = vor.u32 %v1983_v36, %v1982_v62  ;;  %v1986_v63 = vrot.slane %v1982_v62, 4  ;;  %v1957_v52 = vmax.f32 %v1941_v3, 0.0  ;;  %v1861_v30 = vadd.f32 %v1860_v11, %v1832_v17 }
 0x185   : > { %v2058_v29 = vsel %vm5317_vm7, %v1985_v16, %v2057_v44  ;;  %v2061_v4 = vsel %vm5290_vm2, %v1986_v63, %v2060_v47  ;;  %v1965_v2 = vpack.c.bf16 %v1957_v52, %v1957_v52  ;;  %v2100_v60 = vld [vmem:[#allocation2 + $0x8] sm:$0xf]  ;;  %v4214_v44 = vld [vmem:[#allocation3 + $0x8] sm:$0xf]  ;;  %v1890_v10 = vadd.f32 %v1889_v28, %v1861_v30 }
 0x186   : > { %v2329_v25 = vld [vmem:[#allocation2 + $0x8] sm:$0xe]  ;;  %2059 = vst [vmem:[#allocation2 + $0x10] sm:$0xf] %v2058_v29  ;;  %v1913_v32 = vpop.f32.mrf.mxu3  ;;  %v2330_v51 = vld [vmem:[#allocation2 + $0xc] sm:$0x1]  ;;  %v1806_v29 = vadd.f32 %v5566_v41, %v1777_v54 }
 0x187   : > { %v2135_v9 = vld [vmem:[#allocation2 + $0x8] sm:$0xf]  ;;  %v4195_v35 = vrot.slane %v2329_v25, 9  ;;  %2062 = vst [vmem:[#allocation2 + $0x14] sm:$0x1] %v2061_v4  ;;  %v1988_v34 = vshrl.u32 %v1965_v2, 16  ;;  %v1914_v38 = vadd.f32 %v1913_v32, %v1885_v59 }
 0x188   : > { %v2168_v37 = vshrl.u32 %v2135_v9, 16  ;;  %v2369_v58 = vrot.slane %v2330_v51, 5  ;;  %2110 = vst [vmem:[#allocation3 + $0x24] sm:$0xf] %v2100_v60  ;;  %v1991_v42 = vshll.u32 %v1965_v2, 16  ;;  %v2171_v53 = vshll.u32 %v2135_v9, 16 }
 0x189   : > { %v1990_v50 = vrot.slane %v1988_v34, 7  ;;  %v1943_v46 = vadd.f32 %v1942_v49, %v1914_v38  ;;  %2117 = vst [vmem:[#allocation3 + $0xc] sm:$0xf] %v2100_v60  ;;  %v2136_v48 = vld [vmem:[#allocation2 + $0xc] sm:$0x1] }
 0x18a   : > { %v2370_v13 = vsel %vm5448_vm12, %v4195_v35, %v2369_v58  ;;  %v2170_v61 = vrot.slane %v2168_v37, 4  ;;  %v2173_v49 = vrot.slane %v2171_v53, 5  ;;  %v2177_v62 = vshll.u32 %v2136_v48, 16  ;;  %v2069_v25 = vld [vmem:[#allocation2 + $0x20] sm:$0xf] }
 0x18b   : > { %2404 = vst [vmem:[#allocation3 + $0x2c] sm:$0xf] %v2370_v13  ;;  %v1993_v43 = vor.u32 %v1991_v42, %v1990_v50  ;;  %v1994_v8 = vrot.slane %v1990_v50, 4  ;;  %v1958_v33 = vmax.f32 %v1943_v46, 0.0  ;;  %v2072_v34 = vld [vmem:[#allocation2 + $0x24] sm:$0x1]  ;;  %v1835_v42 = vadd.f32 %v5556_v21, %v1806_v29  ;;  %v1947_v46 = vpop.f32.mrf.mxu0 }
 0x18c   : > { %2418 = vst [vmem:[#allocation3 + $0x14] sm:$0xf] %v2370_v13  ;;  %v2174_v63 = vor.u32 %v2173_v49, %v2170_v61  ;;  %v2179_v20 = vrot.slane %v2177_v62, 5  ;;  %v4752_v54 = vld [vmem:[#allocation3 + $0x4] sm:$0xf] }
 0x18d   : > { %v2064_v55 = vsel %vm5317_vm7, %v1993_v43, %v2063_v15  ;;  %v2067_v36 = vsel %vm5290_vm2, %v1994_v8, %v2066_v22  ;;  %v1966_v3 = vpack.c.bf16 %v1958_v33, %v1958_v33  ;;  %v2101_v47 = vld [vmem:[#allocation2 + $0x10] sm:$0xf]  ;;  %v1863_v22 = vpop.f32.mrf.mxu1  ;;  %v1750_v8 = vadd.f32 %v5526_v57, %v5512_v45 }
 0x18e   : > { %v2331_v39 = vld [vmem:[#allocation2 + $0x10] sm:$0xe]  ;;  %2065 = vst [vmem:[#allocation2 + $0x18] sm:$0xf] %v2064_v55  ;;  %v1916_v16 = vpop.f32.mrf.mxu3  ;;  %v2332_v52 = vld [vmem:[#allocation2 + $0x14] sm:$0x1]  ;;  %v1864_v45 = vadd.f32 %v1863_v22, %v1835_v42 }
 0x18f   : > { %v2137_v26 = vld [vmem:[#allocation2 + $0x10] sm:$0xf]  ;;  %2068 = vst [vmem:[#allocation2 + $0x1c] sm:$0x1] %v2067_v36  ;;  %v1996_v4 = vshrl.u32 %v1966_v3, 16  ;;  %v1917_v2 = vadd.f32 %v1916_v16, %v1888_v19  ;;  %v1999_v60 = vshll.u32 %v1966_v3, 16  ;;  %v1892_v19 = vpop.f32.mrf.mxu2  ;;  %v1779_v28 = vadd.f32 %v5560_v24, %v1750_v8 }
 0x190   : > { %v4756_v59 = vld [vmem:[#allocation3 + $0x20] sm:$0xf0]  ;;  %2118 = vst [vmem:[#allocation3 + $0x30] sm:$0xf] %v2101_v47  ;;  %v2175_v9 = vrot.slane %v2174_v63, 4  ;;  %v4196_v37 = vrot.slane %v2331_v39, 9 }
 0x191   : > { %v4207_v1 = vor.u32 %v4756_v59, %v4206_v18  ;;  %v1998_v32 = vrot.slane %v1996_v4, 7  ;;  %v1946_v51 = vadd.f32 %v1945_v27, %v1917_v2  ;;  %2111 = vst [vmem:[#allocation3 + $0x48] sm:$0xf] %v2101_v47  ;;  %v2373_v38 = vrot.slane %v2332_v52, 5  ;;  %v4753_v11 = vld [vmem:[#allocation3 + $0xc] sm:$0xf] }
 0x192   : > { %v4757_v35 = vld [vmem:[#allocation3 + $0x28] sm:$0xf0]  ;;  %2125 = vst [vmem:[#allocation3 + $0x18] sm:$0xf] %v2101_v47  ;;  %v2180_v41 = vsel %vm5334_vm9, %v2175_v9, %v2179_v20  ;;  %v2182_v58 = vshrl.u32 %v2137_v26, 16  ;;  %v2185_v7 = vshll.u32 %v2137_v26, 16  ;;  %v1808_v29 = vadd.f32 %v5569_v56, %v1779_v28 }
 0x193   : > { %3249 = vmatmul.bf16.vlgmr.msra.gmra.mxu1 %v4207_v1  ;;  %v4215_v14 = vor.u32 %v4757_v35, %v4214_v44  ;;  %v2001_v12 = vor.u32 %v1999_v60, %v1998_v32  ;;  %v2002_v15 = vrot.slane %v1998_v32, 4  ;;  %v1959_v50 = vmax.f32 %v1946_v51, 0.0  ;;  %2274 = vst [vmem:[#allocation3 + $0x28] sm:$0xf] %v2180_v41  ;;  %v2075_v44 = vld [vmem:[#allocation2 + $0x28] sm:$0xf] }
 0x194   : > { %2296 = vst [vmem:[#allocation3 + $0x10] sm:$0xf] %v2180_v41  ;;  %v2374_v13 = vsel %vm5448_vm12, %v4196_v37, %v2373_v38  ;;  %v5617_v48 = vrot.slane %v2182_v58, 4  ;;  %v2187_v62 = vrot.slane %v2185_v7, 5  ;;  %v2078_v47 = vld [vmem:[#allocation2 + $0x2c] sm:$0x1]  ;;  %v1893_v20 = vadd.f32 %v1892_v19, %v1864_v45  ;;  %v1950_v58 = vpop.f32.mrf.mxu0 }
 0x195   : > { %3307 = vmatmul.bf16.vlgmr.msrb.gmra.mxu3 %v4215_v14  ;;  %v2070_v27 = vsel %vm5317_vm7, %v2001_v12, %v2069_v25  ;;  %v2073_v61 = vsel %vm5290_vm2, %v2002_v15, %v2072_v34  ;;  %v1967_v53 = vpack.c.bf16 %v1959_v50, %v1959_v50  ;;  %v2102_v21 = vld [vmem:[#allocation2 + $0x18] sm:$0xf]  ;;  %2405 = vst [vmem:[#allocation3 + $0x50] sm:$0xf] %v2374_v13  ;;  %v4824_v63 = vld [vmem:[#allocation9 + $0x120] sm:$0xff]  ;;  %v4823_v41 = vld [vmem:[#allocation9 + $0x118] sm:$0xff]  ;;  %v1865_v42 = vpop.f32.mrf.mxu1 }
 0x196   : > { %v2333_v43 = vld [vmem:[#allocation2 + $0x18] sm:$0xe]  ;;  %2071 = vst [vmem:[#allocation2 + $0x20] sm:$0xf] %v2070_v27  ;;  %v1918_v33 = vpop.f32.mrf.mxu3  ;;  %v2334_v18 = vld [vmem:[#allocation2 + $0x1c] sm:$0x1]  ;;  %3360 = vmatpush.bf16.msrb.mxu1 %v4824_v63  ;;  %v2188_v59 = vor.u32 %v2187_v62, %v5617_v48  ;;  %v1837_v38 = vadd.f32 %v5564_v31, %v1808_v29 }
 0x197   : > { %v4197_v49 = vrot.slane %v2333_v43, 9  ;;  %2074 = vst [vmem:[#allocation2 + $0x24] sm:$0x1] %v2073_v61  ;;  %v2004_v55 = vshrl.u32 %v1967_v53, 16  ;;  %v1919_v36 = vadd.f32 %v1918_v33, %v1890_v10  ;;  %v4216_v3 = vld [vmem:[#allocation3 + $0x2c] sm:$0xf0]  ;;  %v1894_v43 = vpop.f32.mrf.mxu2 }
 0x198   : > { %v4219_v39 = vor.u32 %v4753_v11, %v4216_v3  ;;  %2112 = vst [vmem:[#allocation3 + $0x6c] sm:$0xf] %v2102_v21  ;;  %v2377_v16 = vrot.slane %v2334_v18, 5  ;;  %v2007_v52 = vshll.u32 %v1967_v53, 16  ;;  %v2138_v17 = vld [vmem:[#allocation2 + $0x14] sm:$0x1]  ;;  %v1866_v33 = vadd.f32 %v1865_v42, %v1837_v38 }
 0x199   : > { %v2006_v57 = vrot.slane %v2004_v55, 7  ;;  %v1948_v26 = vadd.f32 %v1947_v46, %v1919_v36  ;;  %2126 = vst [vmem:[#allocation3 + $0x3c] sm:$0xf] %v2102_v21  ;;  %v2139_v2 = vld [vmem:[#allocation2 + $0x18] sm:$0xf]  ;;  %v2191_v0 = vshll.u32 %v2138_v17, 16 }
 0x19a   : > { %3336 = vmatmul.bf16.vlgmr.msrb.gmra.mxu0 %v4219_v39  ;;  %v4208_v4 = vld [vmem:[#allocation3 + $0x24] sm:$0xf0]  ;;  %2119 = vst [vmem:[#allocation3 + $0x54] sm:$0xf] %v2102_v21  ;;  %v2378_v24 = vsel %vm5448_vm12, %v4197_v49, %v2377_v16  ;;  %v2196_v32 = vshrl.u32 %v2139_v2, 16  ;;  %v2199_v14 = vshll.u32 %v2139_v2, 16  ;;  %3361 = vmatpush.bf16.msrb.mxu1 %v4823_v41 }
 0x19b   : > { %v2009_v60 = vor.u32 %v2007_v52, %v2006_v57  ;;  %v2010_v25 = vrot.slane %v2006_v57, 4  ;;  %v1960_v1 = vmax.f32 %v1948_v26, 0.0  ;;  %v4211_v9 = vor.u32 %v4752_v54, %v4208_v4  ;;  %2406 = vst [vmem:[#allocation3 + $0x74] sm:$0xf] %v2378_v24  ;;  %v4242_v37 = vld [vmem:[#allocation3 + $0x48] sm:$0xf] }
 0x19c   : > { %2419 = vst [vmem:[#allocation3 + $0x38] sm:$0xf] %v2374_v13  ;;  %v2140_v34 = vld [vmem:[#allocation2 + $0x1c] sm:$0x1]  ;;  %v2189_v15 = vrot.slane %v2188_v59, 4  ;;  %v2198_v50 = vrot.slane %v2196_v32, 4 }
 0x19d   : > { %v2076_v56 = vsel %vm5317_vm7, %v2009_v60, %v2075_v44  ;;  %v2079_v51 = vsel %vm5290_vm2, %v2010_v25, %v2078_v47  ;;  %v1968_v35 = vpack.c.bf16 %v1960_v1, %v1960_v1  ;;  %3278 = vmatmul.bf16.vlgmr.msrb.gmra.mxu2 %v4211_v9  ;;  %2433 = vst [vmem:[#allocation3 + $0x20] sm:$0xf] %v2374_v13  ;;  %v2103_v12 = vld [vmem:[#allocation2 + $0x20] sm:$0xf]  ;;  %v2081_v22 = vld [vmem:[#allocation2 + $0x30] sm:$0xf] }
 0x19e   : > { %2077 = vst [vmem:[#allocation2 + $0x28] sm:$0xf] %v2076_v56  ;;  %v1921_v30 = vpop.f32.mrf.mxu3  ;;  %v2084_v27 = vld [vmem:[#allocation2 + $0x34] sm:$0x1]  ;;  %v2193_v61 = vrot.slane %v2191_v0, 5  ;;  %v2201_v53 = vrot.slane %v2199_v14, 5  ;;  %v1895_v44 = vadd.f32 %v1894_v43, %v1866_v33 }
 0x19f   : > { %2080 = vst [vmem:[#allocation2 + $0x2c] sm:$0x1] %v2079_v51  ;;  %v2012_v46 = vshrl.u32 %v1968_v35, 16  ;;  %v1922_v48 = vadd.f32 %v1921_v30, %v1893_v20  ;;  %v4765_v7 = vld [vmem:[#allocation3 + $0x68] sm:$0xf0]  ;;  %v2205_v10 = vshll.u32 %v2140_v34, 16  ;;  %v1952_v20 = vpop.f32.mrf.mxu0 }
 0x1a0   : > { %v4243_v13 = vor.u32 %v4765_v7, %v4242_v37  ;;  %2434 = vst [vmem:[#allocation3 + $0x44] sm:$0xf] %v2378_v24  ;;  %v2015_v11 = vshll.u32 %v1968_v35, 16  ;;  %v4250_v8 = vld [vmem:[#allocation3 + $0x50] sm:$0xf]  ;;  %v2194_v18 = vsel %vm5334_vm9, %v2189_v15, %v2193_v61  ;;  %v2202_v49 = vor.u32 %v2201_v53, %v2198_v50  ;;  %v4843_v62 = vld [vmem:[#allocation9 + $0x1b8] sm:$0xff] }
 0x1a1   : > { %v2014_v31 = vrot.slane %v2012_v46, 7  ;;  %v1951_v21 = vadd.f32 %v1950_v58, %v1922_v48  ;;  %2420 = vst [vmem:[#allocation3 + $0x5c] sm:$0xf] %v2378_v24  ;;  %v5637_v28 = vld [vmem:[#allocation2 + $0x20] sm:$0xf]  ;;  %v2207_v39 = vrot.slane %v2205_v10, 5  ;;  %3415 = vmatpush.bf16.msra.mxu3 %v4843_v62 }
 0x1a2   : > { %v4766_v54 = vld [vmem:[#allocation3 + $0x70] sm:$0xf0]  ;;  %2120 = vst [vmem:[#allocation3 + $0x78] sm:$0xf] %v2103_v12  ;;  %v2203_v47 = vrot.slane %v2202_v49, 4  ;;  %v2210_v25 = vshrl.u32 %v5637_v28, 16 }
 0x1a3   : > { %3254 = vmatmul.bf16.gmra.mxu1 %v4243_v13  ;;  %v2017_v55 = vor.u32 %v2015_v11, %v2014_v31  ;;  %v2018_v36 = vrot.slane %v2014_v31, 4  ;;  %v1961_v3 = vmax.f32 %v1951_v21, 0.0  ;;  %v4251_v19 = vor.u32 %v4766_v54, %v4250_v8  ;;  %2113 = vst [vmem:[#allocation3 + $0x90] sm:$0xf] %v2103_v12  ;;  %v4822_v16 = vld [vmem:[#allocation9 + $0x110] sm:$0xff]  ;;  %v4851_v50 = vld [vmem:[#allocation9 + $0x1f8] sm:$0xff] }
 0x1a4   : > { %2127 = vst [vmem:[#allocation3 + $0x60] sm:$0xf] %v2103_v12  ;;  %v4842_v63 = vld [vmem:[#allocation9 + $0x1b0] sm:$0xff]  ;;  %v2208_v17 = vsel %vm5334_vm9, %v2203_v47, %v2207_v39  ;;  %3362 = vmatpush.bf16.msrb.mxu1 %v4822_v16  ;;  %v2087_v1 = vld [vmem:[#allocation2 + $0x38] sm:$0xf]  ;;  %v2213_v38 = vshll.u32 %v5637_v28, 16  ;;  %3444 = vmatpush.bf16.msra.mxu0 %v4851_v50 }
 0x1a5   : > { %v2082_v45 = vsel %vm5317_vm7, %v2017_v55, %v2081_v22  ;;  %v2085_v57 = vsel %vm5290_vm2, %v2018_v36, %v2084_v27  ;;  %v1969_v52 = vpack.c.bf16 %v1961_v3, %v1961_v3  ;;  %3312 = vmatmul.bf16.gmra.mxu3 %v4251_v19  ;;  %2275 = vst [vmem:[#allocation3 + $0x4c] sm:$0xf] %v2194_v18  ;;  %v2335_v29 = vld [vmem:[#allocation2 + $0x20] sm:$0xe]  ;;  %v2336_v4 = vld [vmem:[#allocation2 + $0x24] sm:$0x1] }
 0x1a6   : > { %2083 = vst [vmem:[#allocation2 + $0x30] sm:$0xf] %v2082_v45  ;;  %v1923_v26 = vpop.f32.mrf.mxu3  ;;  %v4762_v59 = vld [vmem:[#allocation3 + $0x54] sm:$0xf]  ;;  %v2337_v60 = vld [vmem:[#allocation2 + $0x28] sm:$0xe]  ;;  %3416 = vmatpush.bf16.msra.mxu3 %v4842_v63 }
 0x1a7   : > { %2086 = vst [vmem:[#allocation2 + $0x34] sm:$0x1] %v2085_v57  ;;  %v2020_v24 = vshrl.u32 %v1969_v52, 16  ;;  %v1924_v2 = vadd.f32 %v1923_v26, %v1895_v44  ;;  %v2090_v9 = vld [vmem:[#allocation2 + $0x3c] sm:$0x1]  ;;  %v2023_v51 = vshll.u32 %v1969_v52, 16 }
 0x1a8   : > { %2276 = vst [vmem:[#allocation3 + $0x70] sm:$0xf] %v2208_v17  ;;  %v2338_v0 = vld [vmem:[#allocation2 + $0x2c] sm:$0x1]  ;;  %v2143_v32 = vld [vmem:[#allocation2 + $0x28] sm:$0xf] }
 0x1a9   : > { %v2022_v56 = vrot.slane %v2020_v24, 7  ;;  %v1953_v35 = vadd.f32 %v1952_v20, %v1924_v2  ;;  %v4252_v37 = vld [vmem:[#allocation3 + $0x74] sm:$0xf0]  ;;  %2319 = vst [vmem:[#allocation3 + $0x1c] sm:$0xf] %v2194_v18  ;;  %v4198_v41 = vrot.slane %v2335_v29, 9 }
 0x1aa   : > { %v4255_v34 = vor.u32 %v4762_v59, %v4252_v37  ;;  %2320 = vst [vmem:[#allocation3 + $0x40] sm:$0xf] %v2208_v17  ;;  %v2104_v14 = vld [vmem:[#allocation2 + $0x28] sm:$0xf]  ;;  %v2381_v15 = vrot.slane %v2336_v4, 5  ;;  %v4199_v42 = vrot.slane %v2337_v60, 9 }
 0x1ab   : > { %v2025_v58 = vor.u32 %v2023_v51, %v2022_v56  ;;  %v2026_v30 = vrot.slane %v2022_v56, 4  ;;  %v1962_v12 = vmax.f32 %v1953_v35, 0.0  ;;  %2297 = vst [vmem:[#allocation3 + $0x34] sm:$0xf] %v2194_v18  ;;  %v2385_v46 = vrot.slane %v2338_v0, 5  ;;  %v4835_v61 = vld [vmem:[#allocation9 + $0x178] sm:$0xff] }
 0x1ac   : > { %3341 = vmatmul.bf16.gmra.mxu0 %v4255_v34  ;;  %2298 = vst [vmem:[#allocation3 + $0x58] sm:$0xf] %v2208_v17  ;;  %v2224_v48 = vshrl.u32 %v2143_v32, 16  ;;  %v2212_v13 = vrot.slane %v2210_v25, 4  ;;  %v4841_v53 = vld [vmem:[#allocation9 + $0x1a8] sm:$0xff]  ;;  %v2215_v11 = vrot.slane %v2213_v38, 5  ;;  %v2382_v33 = vsel %vm5448_vm12, %v4198_v41, %v2381_v15  ;;  %3386 = vmatpush.bf16.msra.mxu2 %v4835_v61 }
 0x1ad   : > { %v2088_v7 = vsel %vm5317_vm7, %v2025_v58, %v2087_v1  ;;  %v2091_v22 = vsel %vm5290_vm2, %v2026_v30, %v2090_v9  ;;  %v1970_v27 = vpack.c.bf16 %v1962_v12, %v1962_v12  ;;  %2114 = vst [vmem:[#allocation3 + $0xb4] sm:$0xf] %v2104_v14  ;;  %v4761_v10 = vld [vmem:[#allocation3 + $0x4c] sm:$0xf]  ;;  %v2142_v31 = vld [vmem:[#allocation2 + $0x24] sm:$0x1]  ;;  %3417 = vmatpush.bf16.msra.mxu3 %v4841_v53 }
 0x1ae   : > { %2089 = vst [vmem:[#allocation2 + $0x38] sm:$0xf] %v2088_v7  ;;  %v2227_v21 = vshll.u32 %v2143_v32, 16  ;;  %v2144_v54 = vld [vmem:[#allocation2 + $0x2c] sm:$0x1]  ;;  %v2226_v18 = vrot.slane %v2224_v48, 4  ;;  %v2386_v3 = vsel %vm5448_vm12, %v4199_v42, %v2385_v46  ;;  %v2216_v45 = vor.u32 %v2215_v11, %v2212_v13 }
 0x1af   : > { %2092 = vst [vmem:[#allocation2 + $0x3c] sm:$0x1] %v2091_v22  ;;  %v2028_v43 = vshrl.u32 %v1970_v27, 16  ;;  %v4244_v8 = vld [vmem:[#allocation3 + $0x6c] sm:$0xf0]  ;;  %v2031_v49 = vshll.u32 %v1970_v27, 16 }
 0x1b0   : > { %v2093_v62 = vld [vmem:[#allocation2 + $0x40] sm:$0xf]  ;;  %v2096_v55 = vld [vmem:[#allocation2 + $0x44] sm:$0x1]  ;;  %v4247_v36 = vor.u32 %v4761_v10, %v4244_v8  ;;  %2121 = vst [vmem:[#allocation3 + $0x9c] sm:$0xf] %v2104_v14 }
 0x1b1   : > { %v2229_v19 = vrot.slane %v2227_v21, 5  ;;  %v4850_v28 = vld [vmem:[#allocation9 + $0x1f0] sm:$0xff]  ;;  %v2030_v44 = vrot.slane %v2028_v43, 7  ;;  %2128 = vst [vmem:[#allocation3 + $0x84] sm:$0xf] %v2104_v14  ;;  %v4821_v39 = vld [vmem:[#allocation9 + $0x108] sm:$0xff] }
 0x1b2   : > { %v4834_v47 = vld [vmem:[#allocation9 + $0x170] sm:$0xff]  ;;  %v4840_v16 = vld [vmem:[#allocation9 + $0x1a0] sm:$0xff]  ;;  %3283 = vmatmul.bf16.gmra.mxu2 %v4247_v36  ;;  %2407 = vst [vmem:[#allocation3 + $0x98] sm:$0xf] %v2382_v33  ;;  %3445 = vmatpush.bf16.msra.mxu0 %v4850_v28  ;;  %v4849_v57 = vld [vmem:[#allocation9 + $0x1e8] sm:$0xff]  ;;  %v2219_v17 = vshll.u32 %v2142_v31, 16 }
 0x1b3   : > { %v4278_v63 = vld [vmem:[#allocation3 + $0x90] sm:$0xf]  ;;  %v2033_v52 = vor.u32 %v2031_v49, %v2030_v44  ;;  %v2034_v26 = vrot.slane %v2030_v44, 4  ;;  %2408 = vst [vmem:[#allocation3 + $0xbc] sm:$0xf] %v2386_v3  ;;  %v2230_v29 = vor.u32 %v2229_v19, %v2226_v18  ;;  %3387 = vmatpush.bf16.msra.mxu2 %v4834_v47  ;;  %3363 = vmatpush.bf16.msrb.mxu1 %v4821_v39  ;;  %v4833_v4 = vld [vmem:[#allocation9 + $0x168] sm:$0xff] }
 0x1b4   : > { %v4774_v24 = vld [vmem:[#allocation3 + $0xb0] sm:$0xf0]  ;;  %2421 = vst [vmem:[#allocation3 + $0x80] sm:$0xf] %v2382_v33  ;;  %v2233_v2 = vshll.u32 %v2144_v54, 16  ;;  %3418 = vmatpush.bf16.msra.mxu3 %v4840_v16  ;;  %v2217_v9 = vrot.slane %v2216_v45, 4 }
 0x1b5   : > { %v2094_v59 = vsel %vm5317_vm7, %v2033_v52, %v2093_v62  ;;  %v2097_v60 = vsel %vm5290_vm2, %v2034_v26, %v2096_v55  ;;  %v4279_v25 = vor.u32 %v4774_v24, %v4278_v63  ;;  %2422 = vst [vmem:[#allocation3 + $0xa4] sm:$0xf] %v2386_v3  ;;  %v2105_v1 = vld [vmem:[#allocation2 + $0x30] sm:$0xf]  ;;  %v4839_v20 = vld [vmem:[#allocation9 + $0x198] sm:$0xff]  ;;  %v2221_v0 = vrot.slane %v2219_v17, 5 }
 0x1b6   : > { %2095 = vst [vmem:[#allocation2 + $0x40] sm:$0xf] %v2094_v59  ;;  %3446 = vmatpush.bf16.msra.mxu0 %v4849_v57  ;;  %v2231_v32 = vrot.slane %v2230_v29, 4  ;;  %v4848_v56 = vld [vmem:[#allocation9 + $0x1e0] sm:$0xff]  ;;  %v2235_v51 = vrot.slane %v2233_v2, 5  ;;  %v4838_v37 = vld [vmem:[#allocation9 + $0x190] sm:$0xff] }
 0x1b7   : > { %2098 = vst [vmem:[#allocation2 + $0x44] sm:$0x1] %v2097_v60  ;;  %3259 = vmatmul.bf16.gmra.mxu1 %v4279_v25  ;;  %3388 = vmatpush.bf16.msra.mxu2 %v4833_v4  ;;  %v2339_v40 = vld [vmem:[#allocation2 + $0x30] sm:$0xe]  ;;  %v2340_v34 = vld [vmem:[#allocation2 + $0x34] sm:$0x1]  ;;  %v2222_v58 = vsel %vm5334_vm9, %v2217_v9, %v2221_v0 }
 0x1b8   : > { %2435 = vst [vmem:[#allocation3 + $0x68] sm:$0xf] %v2382_v33  ;;  %3419 = vmatpush.bf16.msra.mxu3 %v4839_v20  ;;  %v4832_v35 = vld [vmem:[#allocation9 + $0x160] sm:$0xff]  ;;  %3364 = vmatpush.bf16.msrb.mxu1 %v4820_v5  ;;  %v2236_v12 = vsel %vm5334_vm9, %v2231_v32, %v2235_v51  ;;  %v2341_v15 = vld [vmem:[#allocation2 + $0x38] sm:$0xe]  ;;  %v4200_v22 = vrot.slane %v2339_v40, 9 }
 0x1b9   : > { %2436 = vst [vmem:[#allocation3 + $0x8c] sm:$0xf] %v2386_v3  ;;  %v2145_v14 = vld [vmem:[#allocation2 + $0x30] sm:$0xf]  ;;  %v4286_v41 = vld [vmem:[#allocation3 + $0x98] sm:$0xf] }
 0x1ba   : > { %v4775_v38 = vld [vmem:[#allocation3 + $0xb8] sm:$0xf0]  ;;  %2122 = vst [vmem:[#allocation3 + $0xc0] sm:$0xf] %v2105_v1  ;;  %3447 = vmatpush.bf16.msra.mxu0 %v4848_v56  ;;  %v2147_v50 = vld [vmem:[#allocation2 + $0x38] sm:$0xf] }
 0x1bb   : > { %v4287_v30 = vor.u32 %v4775_v38, %v4286_v41  ;;  %2115 = vst [vmem:[#allocation3 + $0xd8] sm:$0xf] %v2105_v1  ;;  %3389 = vmatpush.bf16.msra.mxu2 %v4832_v35  ;;  %v2238_v42 = vshrl.u32 %v2145_v14, 16  ;;  %v2241_v46 = vshll.u32 %v2145_v14, 16  ;;  %v2252_v48 = vshrl.u32 %v2147_v50, 16  ;;  %v4847_v43 = vld [vmem:[#allocation9 + $0x1d8] sm:$0xff] }
 0x1bc   : > { %2129 = vst [vmem:[#allocation3 + $0xa8] sm:$0xf] %v2105_v1  ;;  %3420 = vmatpush.bf16.msra.mxu3 %v4838_v37  ;;  %v2342_v7 = vld [vmem:[#allocation2 + $0x3c] sm:$0x1]  ;;  %v2255_v27 = vshll.u32 %v2147_v50, 16  ;;  %v2389_v61 = vrot.slane %v2340_v34, 5 }
 0x1bd   : > { %3317 = vmatmul.bf16.gmra.mxu3 %v4287_v30  ;;  %2277 = vst [vmem:[#allocation3 + $0x94] sm:$0xf] %v2222_v58  ;;  %v2106_v13 = vld [vmem:[#allocation2 + $0x38] sm:$0xf]  ;;  %v4201_v53 = vrot.slane %v2341_v15, 9  ;;  %v2240_v11 = vrot.slane %v2238_v42, 4 }
 0x1be   : > { %2278 = vst [vmem:[#allocation3 + $0xb8] sm:$0xf] %v2236_v12  ;;  %v4771_v10 = vld [vmem:[#allocation3 + $0x9c] sm:$0xf]  ;;  %v2146_v31 = vld [vmem:[#allocation2 + $0x34] sm:$0x1]  ;;  %3448 = vmatpush.bf16.msra.mxu0 %v4847_v43  ;;  %v2390_v28 = vsel %vm5448_vm12, %v4200_v22, %v2389_v61 }
 0x1bf   : > { %2299 = vst [vmem:[#allocation3 + $0x7c] sm:$0xf] %v2222_v58  ;;  %v2243_v21 = vrot.slane %v2241_v46, 5  ;;  %v4831_v8 = vld [vmem:[#allocation9 + $0x158] sm:$0xff]  ;;  %v2393_v33 = vrot.slane %v2342_v7, 5  ;;  %v2254_v54 = vrot.slane %v2252_v48, 4 }
 0x1c0   : > { %2300 = vst [vmem:[#allocation3 + $0xa0] sm:$0xf] %v2236_v12  ;;  %v2257_v18 = vrot.slane %v2255_v27, 5  ;;  %v4837_v49 = vld [vmem:[#allocation9 + $0x188] sm:$0xff]  ;;  %3390 = vmatpush.bf16.msra.mxu2 %v4831_v8  ;;  %v4846_v55 = vld [vmem:[#allocation9 + $0x1d0] sm:$0xff]  ;;  %v4836_v19 = vld [vmem:[#allocation9 + $0x180] sm:$0xff] }
 0x1c1   : > { %v4288_v62 = vld [vmem:[#allocation3 + $0xbc] sm:$0xf0]  ;;  %2321 = vst [vmem:[#allocation3 + $0x64] sm:$0xf] %v2222_v58  ;;  %v4830_v36 = vld [vmem:[#allocation9 + $0x150] sm:$0xff]  ;;  %3421 = vmatpush.bf16.msra.mxu3 %v4837_v49  ;;  %v2244_v47 = vor.u32 %v2243_v21, %v2240_v11  ;;  %v4859_v39 = vld [vmem:[#allocation9 + $0x238] sm:$0xff]  ;;  %v2394_v63 = vsel %vm5448_vm12, %v4201_v53, %v2393_v33 }
 0x1c2   : > { %v4291_v3 = vor.u32 %v4771_v10, %v4288_v62  ;;  %2322 = vst [vmem:[#allocation3 + $0x88] sm:$0xf] %v2236_v12  ;;  %v2148_v44 = vld [vmem:[#allocation2 + $0x3c] sm:$0x1]  ;;  %v2247_v45 = vshll.u32 %v2146_v31, 16  ;;  %v2258_v57 = vor.u32 %v2257_v18, %v2254_v54  ;;  %3449 = vmatpush.bf16.msra.mxu0 %v4846_v55  ;;  %3473 = vmatpush.bf16.msra.mxu1 %v4859_v39  ;;  %v4858_v60 = vld [vmem:[#allocation9 + $0x230] sm:$0xff] }
 0x1c3   : > { %2116 = vst [vmem:[#allocation3 + $0xfc] sm:$0xf] %v2106_v13  ;;  %v4845_v26 = vld [vmem:[#allocation9 + $0x1c8] sm:$0xff]  ;;  %v2261_v4 = vshll.u32 %v2148_v44, 16  ;;  %v2245_v24 = vrot.slane %v2244_v47, 4  ;;  %v4844_v9 = vld [vmem:[#allocation9 + $0x1c0] sm:$0xff] }
 0x1c4   : > { %3346 = vmatmul.bf16.gmra.mxu0 %v4291_v3  ;;  %v4770_v16 = vld [vmem:[#allocation3 + $0x94] sm:$0xf]  ;;  %2123 = vst [vmem:[#allocation3 + $0xe4] sm:$0xf] %v2106_v13  ;;  %3391 = vmatpush.bf16.msra.mxu2 %v4830_v36  ;;  %v4829_v17 = vld [vmem:[#allocation9 + $0x148] sm:$0xff]  ;;  %v2259_v59 = vrot.slane %v2258_v57, 4 }
 0x1c5   : > { %v4280_v52 = vld [vmem:[#allocation3 + $0xb4] sm:$0xf0]  ;;  %2130 = vst [vmem:[#allocation3 + $0xcc] sm:$0xf] %v2106_v13  ;;  %3422 = vmatpush.bf16.msra.mxu3 %v4836_v19  ;;  %v2107_v2 = vld [vmem:[#allocation2 + $0x40] sm:$0xf] }
 0x1c6   : > { %v4283_v29 = vor.u32 %v4770_v16, %v4280_v52  ;;  %2409 = vst [vmem:[#allocation3 + $0xe0] sm:$0xf] %v2390_v28  ;;  %v4314_v25 = vld [vmem:[#allocation3 + $0xd8] sm:$0xf]  ;;  %v2249_v1 = vrot.slane %v2247_v45, 5  ;;  %3450 = vmatpush.bf16.msra.mxu0 %v4845_v26  ;;  %v2263_v0 = vrot.slane %v2261_v4, 5  ;;  %3474 = vmatpush.bf16.msra.mxu1 %v4858_v60 }
 0x1c7   : > { %2410 = vst [vmem:[#allocation3 + $0x104] sm:$0xf] %v2394_v63  ;;  %v4828_v32 = vld [vmem:[#allocation9 + $0x140] sm:$0xff]  ;;  %v4857_v35 = vld [vmem:[#allocation9 + $0x228] sm:$0xff]  ;;  %v2149_v30 = vld [vmem:[#allocation2 + $0x40] sm:$0xf] }
 0x1c8   : > { %3288 = vmatmul.bf16.gmra.mxu2 %v4283_v29  ;;  %2423 = vst [vmem:[#allocation3 + $0xc8] sm:$0xf] %v2390_v28  ;;  %v2250_v51 = vsel %vm5334_vm9, %v2245_v24, %v2249_v1  ;;  %v2264_v40 = vsel %vm5334_vm9, %v2259_v59, %v2263_v0  ;;  %v4856_v15 = vld [vmem:[#allocation9 + $0x220] sm:$0xff]  ;;  %v2150_v50 = vld [vmem:[#allocation2 + $0x44] sm:$0x1]  ;;  %v2282_v42 = vshrl.u32 %v2149_v30, 16 }
 0x1c9   : > { %2424 = vst [vmem:[#allocation3 + $0xec] sm:$0xf] %v2394_v63  ;;  %3392 = vmatpush.bf16.msra.mxu2 %v4829_v17  ;;  %v2285_v48 = vshll.u32 %v2149_v30, 16  ;;  %v2343_v7 = vld [vmem:[#allocation2 + $0x40] sm:$0xe]  ;;  %v2291_v10 = vshll.u32 %v2150_v50, 16 }
 0x1ca   : > { %v4783_v20 = vld [vmem:[#allocation3 + $0xf8] sm:$0xf0]  ;;  %2437 = vst [vmem:[#allocation3 + $0xb0] sm:$0xf] %v2390_v28  ;;  %3451 = vmatpush.bf16.msra.mxu0 %v4844_v9  ;;  %3475 = vmatpush.bf16.msra.mxu1 %v4857_v35  ;;  %v4758_v22 = vld [vmem:[#allocation3 + $0x30] sm:$0xf0] }
 0x1cb   : > { %v4315_v56 = vor.u32 %v4783_v20, %v4314_v25  ;;  %2438 = vst [vmem:[#allocation3 + $0xd4] sm:$0xf] %v2394_v63  ;;  %v4780_v14 = vld [vmem:[#allocation3 + $0xe4] sm:$0xf]  ;;  %v2284_v27 = vrot.slane %v2282_v42, 4  ;;  %v4202_v61 = vrot.slane %v2343_v7, 9 }
 0x1cc   : > { %2124 = vst [vmem:[#allocation3 + $0x108] sm:$0xf] %v2107_v2  ;;  %v2344_v13 = vld [vmem:[#allocation2 + $0x44] sm:$0x1]  ;;  %v2287_v53 = vrot.slane %v2285_v48, 5  ;;  %v4855_v54 = vld [vmem:[#allocation9 + $0x218] sm:$0xff] }
 0x1cd   : > { %3264 = vmatmul.bf16.gmra.mxu1 %v4315_v56  ;;  %2131 = vst [vmem:[#allocation3 + $0xf0] sm:$0xf] %v2107_v2  ;;  %v4322_v5 = vld [vmem:[#allocation3 + $0xe0] sm:$0xf]  ;;  %3393 = vmatpush.bf16.msra.mxu2 %v4828_v32  ;;  %v2415_v31 = vrot.slane %v2344_v13, 5  ;;  %v2293_v49 = vrot.slane %v2291_v10, 5 }
 0x1ce   : > { %v4784_v37 = vld [vmem:[#allocation3 + $0x100] sm:$0xf0]  ;;  %2279 = vst [vmem:[#allocation3 + $0xdc] sm:$0xf] %v2250_v51  ;;  %3476 = vmatpush.bf16.msra.mxu1 %v4856_v15  ;;  %v4222_v11 = vld [vmem:[#allocation3 + $0x10] sm:$0xf]  ;;  %v2288_v43 = vor.u32 %v2287_v53, %v2284_v27 }
 0x1cf   : > { %v4323_v34 = vor.u32 %v4784_v37, %v4322_v5  ;;  %2280 = vst [vmem:[#allocation3 + $0x100] sm:$0xf] %v2264_v40  ;;  %v4223_v21 = vor.u32 %v4758_v22, %v4222_v11  ;;  %v2416_v8 = vsel %vm5448_vm12, %v4202_v61, %v2415_v31  ;;  %v4759_v33 = vld [vmem:[#allocation3 + $0x38] sm:$0xf0]  ;;  %v4230_v62 = vld [vmem:[#allocation3 + $0x18] sm:$0xf] }
 0x1d0   : > { %2301 = vst [vmem:[#allocation3 + $0xc4] sm:$0xf] %v2250_v51  ;;  %v2289_v18 = vrot.slane %v2288_v43, 4  ;;  %v4231_v55 = vor.u32 %v4759_v33, %v4230_v62  ;;  %v4232_v3 = vld [vmem:[#allocation3 + $0x3c] sm:$0xf0]  ;;  %v4854_v47 = vld [vmem:[#allocation9 + $0x210] sm:$0xff] }
 0x1d1   : > { %3322 = vmatmul.bf16.gmra.mxu3 %v4323_v34  ;;  %2302 = vst [vmem:[#allocation3 + $0xe8] sm:$0xf] %v2264_v40  ;;  %v4755_v19 = vld [vmem:[#allocation3 + $0x1c] sm:$0xf]  ;;  %v4224_v28 = vld [vmem:[#allocation3 + $0x34] sm:$0xf0] }
 0x1d2   : > { %2323 = vst [vmem:[#allocation3 + $0xac] sm:$0xf] %v2250_v51  ;;  %3477 = vmatpush.bf16.msra.mxu1 %v4855_v54  ;;  %v2294_v36 = vsel %vm5334_vm9, %v2289_v18, %v2293_v49  ;;  %v4235_v23 = vor.u32 %v4755_v19, %v4232_v3  ;;  %v4754_v44 = vld [vmem:[#allocation3 + $0x14] sm:$0xf]  ;;  %v4767_v16 = vld [vmem:[#allocation3 + $0x78] sm:$0xf0] }
 0x1d3   : > { %v4324_v41 = vld [vmem:[#allocation3 + $0x104] sm:$0xf0]  ;;  %2324 = vst [vmem:[#allocation3 + $0xd0] sm:$0xf] %v2264_v40  ;;  %v4227_v39 = vor.u32 %v4754_v44, %v4224_v28  ;;  %v4258_v63 = vld [vmem:[#allocation3 + $0x58] sm:$0xf] }
 0x1d4   : > { %v4327_v38 = vor.u32 %v4780_v14, %v4324_v41  ;;  %2425 = vst [vmem:[#allocation3 + $0x110] sm:$0xf] %v2416_v8  ;;  %v4259_v45 = vor.u32 %v4767_v16, %v4258_v63  ;;  %v4768_v57 = vld [vmem:[#allocation3 + $0x80] sm:$0xf0]  ;;  %v4266_v52 = vld [vmem:[#allocation3 + $0x60] sm:$0xf] }
 0x1d5   : > { %v4779_v58 = vld [vmem:[#allocation3 + $0xdc] sm:$0xf]  ;;  %2439 = vst [vmem:[#allocation3 + $0xf8] sm:$0xf] %v2416_v8  ;;  %v4267_v26 = vor.u32 %v4768_v57, %v4266_v52  ;;  %v4268_v17 = vld [vmem:[#allocation3 + $0x84] sm:$0xf0] }
 0x1d6   : > { %3351 = vmatmul.bf16.gmra.mxu0 %v4327_v38  ;;  %v4316_v12 = vld [vmem:[#allocation3 + $0xfc] sm:$0xf0]  ;;  %2303 = vst [vmem:[#allocation3 + $0x10c] sm:$0xf] %v2294_v36  ;;  %3478 = vmatpush.bf16.msra.mxu1 %v4854_v47  ;;  %v4764_v29 = vld [vmem:[#allocation3 + $0x64] sm:$0xf] }
 0x1d7   : > { %v4319_v46 = vor.u32 %v4779_v58, %v4316_v12  ;;  %2325 = vst [vmem:[#allocation3 + $0xf4] sm:$0xf] %v2294_v36  ;;  %v4271_v4 = vor.u32 %v4764_v29, %v4268_v17  ;;  %v4260_v24 = vld [vmem:[#allocation3 + $0x7c] sm:$0xf0]  ;;  %v4763_v2 = vld [vmem:[#allocation3 + $0x5c] sm:$0xf] }
 0x1d8   : > { %v4852_v59 = vld [vmem:[#allocation9 + $0x200] sm:$0xff]  ;;  %v4263_v60 = vor.u32 %v4763_v2, %v4260_v24  ;;  %v4777_v20 = vld [vmem:[#allocation3 + $0xc8] sm:$0xf0]  ;;  %v4302_v0 = vld [vmem:[#allocation3 + $0xa8] sm:$0xf] }
 0x1d9   : > { %3293 = vmatmul.bf16.gmra.mxu2 %v4319_v46  ;;  %v4776_v25 = vld [vmem:[#allocation3 + $0xc0] sm:$0xf0]  ;;  %v4294_v1 = vld [vmem:[#allocation3 + $0xa0] sm:$0xf]  ;;  %v4303_v32 = vor.u32 %v4777_v20, %v4302_v0  ;;  %v4773_v51 = vld [vmem:[#allocation3 + $0xac] sm:$0xf] }
 0x1da   : > { %3479 = vmatpush.bf16.msra.mxu1 %v4853_v6  ;;  %v4295_v9 = vor.u32 %v4776_v25, %v4294_v1  ;;  %v4304_v56 = vld [vmem:[#allocation3 + $0xcc] sm:$0xf0]  ;;  %v4296_v35 = vld [vmem:[#allocation3 + $0xc4] sm:$0xf0]  ;;  %v4772_v5 = vld [vmem:[#allocation3 + $0xa4] sm:$0xf] }
 0x1db   : > { %v4307_v40 = vor.u32 %v4773_v51, %v4304_v56  ;;  %v4299_v37 = vor.u32 %v4772_v5, %v4296_v35  ;;  %v4330_v14 = vld [vmem:[#allocation3 + $0xe8] sm:$0xf]  ;;  %v4338_v38 = vld [vmem:[#allocation3 + $0xf0] sm:$0xf]  ;;  %v4786_v58 = vld [vmem:[#allocation3 + $0x110] sm:$0xf0] }
 0x1dc   : > { %v4339_v30 = vor.u32 %v4786_v58, %v4338_v38  ;;  %v4340_v50 = vld [vmem:[#allocation3 + $0x114] sm:$0xf0]  ;;  %v4332_v46 = vld [vmem:[#allocation3 + $0x10c] sm:$0xf0]  ;;  %v4781_v48 = vld [vmem:[#allocation3 + $0xec] sm:$0xf] }
 0x1dd   : > { %3365 = vmatmul.bf16.vlgmr.msrb.gmra.mxu1 %v4223_v21  ;;  %v4785_v34 = vld [vmem:[#allocation3 + $0x108] sm:$0xf0]  ;;  %v4335_v7 = vor.u32 %v4781_v48, %v4332_v46  ;;  %v4760_v22 = vld [vmem:[#allocation3 + $0x40] sm:$0xf0]  ;;  %v4238_v13 = vld [vmem:[#allocation3 + $0x20] sm:$0xf] }
 0x1de   : > { %3480 = vmatpush.bf16.msra.mxu1 %v4852_v59  ;;  %v4331_v41 = vor.u32 %v4785_v34, %v4330_v14  ;;  %v4782_v15 = vld [vmem:[#allocation3 + $0xf4] sm:$0xf]  ;;  %v4239_v61 = vor.u32 %v4760_v22, %v4238_v13  ;;  %v4769_v43 = vld [vmem:[#allocation3 + $0x88] sm:$0xf0]  ;;  %v4274_v18 = vld [vmem:[#allocation3 + $0x68] sm:$0xf] }
 0x1df   : > { %v4343_v42 = vor.u32 %v4782_v15, %v4340_v50  ;;  %v4275_v49 = vor.u32 %v4769_v43, %v4274_v18  ;;  %v4778_v47 = vld [vmem:[#allocation3 + $0xd0] sm:$0xf0]  ;;  %v4310_v16 = vld [vmem:[#allocation3 + $0xb0] sm:$0xf]  ;;  %v4346_v24 = vld [vmem:[#allocation3 + $0xf8] sm:$0xf] }
 0x1e0   : > { %v4311_v63 = vor.u32 %v4778_v47, %v4310_v16  ;;  %v4787_v2 = vld [vmem:[#allocation3 + $0x118] sm:$0xf0]  ;;  %v3533_v47 = vld [vmem:[%s5839_s3 + $0x50] sm:$0xff] }
 0x1e1   : > { %3423 = vmatmul.bf16.vlgmr.msra.gmra.mxu3 %v4231_v55  ;;  %v4347_v1 = vor.u32 %v4787_v2, %v4346_v24 }
 0x1e6   : > { %3452 = vmatmul.bf16.vlgmr.msra.gmra.mxu0 %v4235_v23 }
 0x1e9   : > { %3394 = vmatmul.bf16.vlgmr.msra.gmra.mxu2 %v4227_v39 }
 0x1ed   : > { %3370 = vmatmul.bf16.gmra.mxu1 %v4259_v45 }
 0x1f1   : > { %3428 = vmatmul.bf16.gmra.mxu3 %v4267_v26 }
 0x1f6   : > { %3457 = vmatmul.bf16.gmra.mxu0 %v4271_v4 }
 0x1f9   : > { %3399 = vmatmul.bf16.gmra.mxu2 %v4263_v60 }
 0x1fd   : > { %3375 = vmatmul.bf16.gmra.mxu1 %v4295_v9 }
 0x201   : > { %3433 = vmatmul.bf16.gmra.mxu3 %v4303_v32 }
 0x206   : > { %3462 = vmatmul.bf16.gmra.mxu0 %v4307_v40 }
 0x209   : > { %3404 = vmatmul.bf16.gmra.mxu2 %v4299_v37 }
 0x20d   : > { %3380 = vmatmul.bf16.gmra.mxu1 %v4331_v41 }
 0x210   : > { %v3250_v12 = vpop.f32.mrf.mxu1 }
 0x211   : > { %3438 = vmatmul.bf16.gmra.mxu3 %v4339_v30 }
 0x216   : > { %3467 = vmatmul.bf16.gmra.mxu0 %v4343_v42 }
 0x217   : > { %v3337_v36 = vpop.f32.mrf.mxu0 }
 0x218   : > { %v3252_v27 = vpop.f32.mrf.mxu1  ;;  %v3308_v53 = vpop.f32.mrf.mxu3 }
 0x219   : > { %3409 = vmatmul.bf16.gmra.mxu2 %v4335_v7 }
 0x21d   : > { %3481 = vmatmul.bf16.vlgmr.msra.gmra.mxu1 %v4239_v61 }
 0x21f   : > { %v3339_v39 = vpop.f32.mrf.mxu0 }
 0x220   : > { %v3279_v10 = vpop.f32.mrf.mxu2  ;;  %v3255_v11 = vpop.f32.mrf.mxu1 }
 0x221   : > { %v3280_v31 = vadd.f32 %v3279_v10, %v3250_v12  ;;  %v3310_v54 = vpop.f32.mrf.mxu3 }
 0x223   : > { %v3309_v21 = vadd.f32 %v3308_v53, %v3280_v31 }
 0x225   : > { %v3338_v45 = vadd.f32 %v3337_v36, %v3309_v21  ;;  %v3535_v36 = vld [vmem:[%s5839_s3 + $0x60] sm:$0xff] }
 0x228   : > { %v3281_v8 = vpop.f32.mrf.mxu2  ;;  %v3257_v55 = vpop.f32.mrf.mxu1 }
 0x229   : > { %v3282_v33 = vadd.f32 %v3281_v8, %v3252_v27  ;;  %v3313_v3 = vpop.f32.mrf.mxu3  ;;  %v3342_v4 = vpop.f32.mrf.mxu0 }
 0x22b   : > { %v3311_v62 = vadd.f32 %v3310_v54, %v3282_v33  ;;  %v3538_v33 = vld [vmem:[%s5839_s3 + $0x78] sm:$0xff]  ;;  %v3537_v54 = vld [vmem:[%s5839_s3 + $0x70] sm:$0xff] }
 0x22c   : > { %3540 = vmatpush.msrb.mxu2 %v3538_v33 }
 0x22d   : > { %3486 = vmatmul.bf16.gmra.mxu1 %v4275_v49  ;;  %v3340_v29 = vadd.f32 %v3339_v39, %v3311_v62 }
 0x22e   : > { %3541 = vmatpush.msrb.mxu2 %v3537_v54  ;;  %v3561_v54 = vld [vmem:[%s5841_s5] sm:$0xff] }
 0x22f   : > { %3582 = vmatpush.msrb.mxu3 %v3561_v54 }
 0x231   : > { %v3315_v52 = vpop.f32.mrf.mxu3  ;;  %v3344_v0 = vpop.f32.mrf.mxu0 }
 0x234   : > { %v3260_v28 = vpop.f32.mrf.mxu1 }
 0x235   : > { %v3284_v19 = vpop.f32.mrf.mxu2 }
 0x236   : > { %v3285_v23 = vadd.f32 %v3284_v19, %v3255_v11 }
 0x238   : > { %v3314_v44 = vadd.f32 %v3313_v3, %v3285_v23 }
 0x23a   : > { %v3343_v9 = vadd.f32 %v3342_v4, %v3314_v44  ;;  %v3534_v44 = vld [vmem:[%s5839_s3 + $0x58] sm:$0xff] }
 0x23c   : > { %v3262_v17 = vpop.f32.mrf.mxu1 }
 0x23d   : > { %3491 = vmatmul.bf16.gmra.mxu1 %v4311_v63  ;;  %v3286_v57 = vpop.f32.mrf.mxu2 }
 0x23e   : > { %v3287_v6 = vadd.f32 %v3286_v57, %v3257_v55  ;;  %v3536_v55 = vld [vmem:[%s5839_s3 + $0x68] sm:$0xff]  ;;  %v3531_v57 = vld [vmem:[%s5839_s3 + $0x40] sm:$0xff] }
 0x23f   : > { %3542 = vmatpush.msrb.mxu2 %v3536_v55 }
 0x240   : > { %v3316_v26 = vadd.f32 %v3315_v52, %v3287_v6  ;;  %v3318_v60 = vpop.f32.mrf.mxu3 }
 0x241   : > { %v3347_v34 = vpop.f32.mrf.mxu0  ;;  %3543 = vmatpush.msrb.mxu2 %v3535_v36 }
 0x242   : > { %v3345_v40 = vadd.f32 %v3344_v0, %v3316_v26 }
 0x243   : > { %3544 = vmatpush.msrb.mxu2 %v3534_v44 }
 0x245   : > { %3545 = vmatpush.msrb.mxu2 %v3533_v47 }
 0x248   : > { %v3320_v5 = vpop.f32.mrf.mxu3 }
 0x249   : > { %v3349_v58 = vpop.f32.mrf.mxu0 }
 0x24a   : > { %v5675_v59 = vpop.f32.mrf.mxu1 }
 0x24b   : > { %v3289_v25 = vpop.f32.mrf.mxu2 }
 0x24c   : > { %v3290_v20 = vadd.f32 %v3289_v25, %v3260_v28  ;;  %v3527_v25 = vld [vmem:[%s5839_s3 + $0x20] sm:$0xff] }
 0x24d   : > { %3496 = vmatmul.bf16.gmra.mxu1 %v4347_v1 }
 0x24e   : > { %v3319_v32 = vadd.f32 %v3318_v60, %v3290_v20  ;;  %v3528_v60 = vld [vmem:[%s5839_s3 + $0x28] sm:$0xff] }
 0x250   : > { %v3348_v38 = vadd.f32 %v3347_v34, %v3319_v32 }
 0x252   : > { %v5677_v56 = vpop.f32.mrf.mxu1 }
 0x253   : > { %v3291_v51 = vpop.f32.mrf.mxu2  ;;  %v5689_v27 = vpop.f32.mrf.mxu0 }
 0x254   : > { %v3292_v35 = vadd.f32 %v3291_v51, %v3262_v17  ;;  %v5685_v48 = vpop.f32.mrf.mxu3  ;;  %v3530_v17 = vld [vmem:[%s5839_s3 + $0x38] sm:$0xff] }
 0x256   : > { %v3321_v37 = vadd.f32 %v3320_v5, %v3292_v35 }
 0x258   : > { %v3350_v15 = vadd.f32 %v3349_v58, %v3321_v37 }
 0x25a   : > { %v3366_v14 = vpop.f32.mrf.mxu1 }
 0x25b   : > { %v5679_v41 = vadd.f32 %v3366_v14, %v3338_v45  ;;  %v5693_v31 = vpop.f32.mrf.mxu0  ;;  %v3532_v45 = vld [vmem:[%s5839_s3 + $0x48] sm:$0xff] }
 0x25c   : > { %v3294_v46 = vpop.f32.mrf.mxu2  ;;  %v3325_v10 = vpop.f32.mrf.mxu3  ;;  %3546 = vmatpush.msrb.mxu2 %v3532_v45 }
 0x25d   : > { %v3295_v51 = vadd.f32 %v3294_v46, %v5675_v59 }
 0x25e   : > { %3547 = vmatpush.msrb.mxu2 %v3531_v57 }
 0x25f   : > { %v3324_v14 = vadd.f32 %v5685_v48, %v3295_v51 }
 0x260   : > { %3548 = vmatpush.msrb.mxu2 %v3530_v17 }
 0x262   : > { %v3368_v30 = vpop.f32.mrf.mxu1 }
 0x263   : > { %v5681_v12 = vadd.f32 %v3368_v30, %v3340_v29  ;;  %v5703_v18 = vpop.f32.mrf.mxu0  ;;  %v3529_v29 = vld [vmem:[%s5839_s3 + $0x30] sm:$0xff] }
 0x264   : > { %v3296_v13 = vpop.f32.mrf.mxu2  ;;  %v3424_v8 = vpop.f32.mrf.mxu3  ;;  %3549 = vmatpush.msrb.mxu2 %v3529_v29 }
 0x265   : > { %v3297_v5 = vadd.f32 %v3296_v13, %v5677_v56 }
 0x266   : > { %3550 = vmatpush.msrb.mxu2 %v3528_v60 }
 0x268   : > { %3551 = vmatpush.msrb.mxu2 %v3527_v25 }
 0x26a   : > { %v3371_v50 = vpop.f32.mrf.mxu1 }
 0x26b   : > { %v5683_v42 = vadd.f32 %v3371_v50, %v3343_v9  ;;  %v3455_v23 = vpop.f32.mrf.mxu0  ;;  %v3326_v50 = vadd.f32 %v3325_v10, %v3297_v5 }
 0x26c   : > { %v3395_v11 = vpop.f32.mrf.mxu2  ;;  %v3426_v3 = vpop.f32.mrf.mxu3 }
 0x272   : > { %v3373_v7 = vpop.f32.mrf.mxu1 }
 0x273   : > { %v5687_v22 = vadd.f32 %v3373_v7, %v3345_v40  ;;  %v3458_v63 = vpop.f32.mrf.mxu0 }
 0x274   : > { %v3397_v49 = vpop.f32.mrf.mxu2  ;;  %v3429_v39 = vpop.f32.mrf.mxu3 }
 0x275   : > { %v3398_v35 = vadd.f32 %v3397_v49, %v5681_v12  ;;  %v3353_v12 = vadd.f32 %v5689_v27, %v3324_v14 }
 0x27a   : > { %v3376_v61 = vpop.f32.mrf.mxu1 }
 0x27b   : > { %v5691_v53 = vadd.f32 %v3376_v61, %v3348_v38  ;;  %v3460_v4 = vpop.f32.mrf.mxu0  ;;  %v3396_v38 = vadd.f32 %v3395_v11, %v5679_v41  ;;  %v3526_v41 = vld [vmem:[%s5839_s3 + $0x18] sm:$0xff] }
 0x27c   : > { %v3400_v28 = vpop.f32.mrf.mxu2  ;;  %v3431_v26 = vpop.f32.mrf.mxu3  ;;  %3552 = vmatpush.msrb.mxu2 %v3526_v41 }
 0x27d   : > { %v3401_v58 = vadd.f32 %v3400_v28, %v5683_v42  ;;  %v3425_v59 = vadd.f32 %v3424_v8, %v3396_v38  ;;  %v3525_v42 = vld [vmem:[%s5839_s3 + $0x10] sm:$0xff]  ;;  %v3523_v28 = vld [vmem:[%s5839_s3] sm:$0xff] }
 0x27e   : > { %3553 = vmatpush.msrb.mxu2 %v3525_v42 }
 0x27f   : > { %v3430_v46 = vadd.f32 %v3429_v39, %v3401_v58  ;;  %v3454_v10 = vadd.f32 %v5703_v18, %v3425_v59  ;;  %v3539_v59 = vld [vmem:[%s5840_s4] sm:$0x1] }
 0x281   : > { %v3459_v8 = vadd.f32 %v3458_v63, %v3430_v46 }
 0x282   : > { %v3378_v21 = vpop.f32.mrf.mxu1 }
 0x283   : > { %v5695_v43 = vadd.f32 %v3378_v21, %v3350_v15  ;;  %v3463_v9 = vpop.f32.mrf.mxu0  ;;  %v3427_v15 = vadd.f32 %v3426_v3, %v3398_v35 }
 0x284   : > { %v3402_v6 = vpop.f32.mrf.mxu2  ;;  %v3434_v1 = vpop.f32.mrf.mxu3 }
 0x285   : > { %v3403_v30 = vadd.f32 %v3402_v6, %v5687_v22  ;;  %v3456_v33 = vadd.f32 %v3455_v23, %v3427_v15  ;;  %v5135_v23 = vmov 64.0  }
 0x286   : > { %4952 = vrcp.f32 %v5135_v23 }
 0x287   : > { %v3432_v61 = vadd.f32 %v3431_v26, %v3403_v30 }
 0x28a   : > { %v3381_v62 = vpop.f32.mrf.mxu1 }
 0x28b   : > { %v3465_v37 = vpop.f32.mrf.mxu0  ;;  %v3382_v21 = vadd.f32 %v3381_v62, %v3353_v12 }
 0x28c   : > { %v3405_v24 = vpop.f32.mrf.mxu2  ;;  %v3436_v32 = vpop.f32.mrf.mxu3 }
 0x28d   : > { %v3406_v7 = vadd.f32 %v3405_v24, %v5691_v53  ;;  %v3355_v53 = vadd.f32 %v5693_v31, %v3326_v50  ;;  %v3461_v31 = vadd.f32 %v3460_v4, %v3432_v61  ;;  %v4953_v26 = vpop.eup %4952 }
 0x28e   : > { %vm3520_vm13 = vweird.f32 %v4953_v26 }
 0x28f   : > { %v3435_v22 = vadd.f32 %v3434_v1, %v3406_v7  ;;  %v3516_v1 = vmul.f32 64.0, %v4953_v26 }
 0x291   : > { %v3464_v44 = vadd.f32 %v3463_v9, %v3435_v22 }
 0x292   : > { %v5711_v19 = vpop.f32.mrf.mxu1 }
 0x293   : > { %v3384_v49 = vadd.f32 %v5711_v19, %v3355_v53  ;;  %v3468_v62 = vpop.f32.mrf.mxu0 }
 0x294   : > { %v3407_v20 = vpop.f32.mrf.mxu2  ;;  %v3439_v56 = vpop.f32.mrf.mxu3 }
 0x295   : > { %v3408_v48 = vadd.f32 %v3407_v20, %v5695_v43  ;;  %v3524_v43 = vld [vmem:[%s5839_s3 + $0x8] sm:$0xff] }
 0x296   : > { %3554 = vmatpush.msrb.mxu2 %v3524_v43 }
 0x297   : > { %v3437_v36 = vadd.f32 %v3436_v32, %v3408_v48 }
 0x298   : > { %3555 = vmatpush.msrb.mxu2 %v3523_v28 }
 0x299   : > { %v3466_v6 = vadd.f32 %v3465_v37, %v3437_v36 }
 0x29a   : > { %v5719_v16 = vpop.f32.mrf.mxu1 }
 0x29b   : > { %v5767_v18 = vadd.f32 %v5719_v16, %v3454_v10  ;;  %v3470_v25 = vpop.f32.mrf.mxu0 }
 0x29c   : > { %v3410_v34 = vpop.f32.mrf.mxu2 }
 0x29d   : > { %v3411_v27 = vadd.f32 %v3410_v34, %v3382_v21 }
 0x29f   : > { %v3440_v19 = vadd.f32 %v3439_v56, %v3411_v27  ;;  %v3562_v56 = vld [vmem:[%s5842_s6] sm:$0x1] }
 0x2a1   : > { %v3469_v24 = vadd.f32 %v3468_v62, %v3440_v19 }
 0x2a2   : > { %v3484_v52 = vpop.f32.mrf.mxu1 }
 0x2a3   : > { %v5757_v11 = vadd.f32 %v3484_v52, %v3456_v33  ;;  %v3441_v52 = vpop.f32.mrf.mxu3 }
 0x2a4   : > { %v3412_v55 = vpop.f32.mrf.mxu2 }
 0x2a5   : > { %v3413_v47 = vadd.f32 %v3412_v55, %v3384_v49  ;;  %v3502_v39 = vadd.f32 %v5757_v11, %v5767_v18 }
 0x2a7   : > { %v3442_v17 = vadd.f32 %v3441_v52, %v3413_v47  ;;  %v4960_v52 = vld [vmem:[%s5279_s13 + $0x10] sm:$0xff] }
 0x2a9   : > { %v3471_v20 = vadd.f32 %v3470_v25, %v3442_v17  ;;  %v4963_v17 = vld [vmem:[%s5279_s13 + $0x28] sm:$0xff] }
 0x2aa   : > { %v3487_v2 = vpop.f32.mrf.mxu1 }
 0x2ab   : > { %v5769_v3 = vadd.f32 %v3487_v2, %v3459_v8 }
 0x2ad   : > { %v3503_v16 = vadd.f32 %v3502_v39, %v5769_v3  ;;  %v4958_v39 = vld [vmem:[%s5279_s13] sm:$0xff] }
 0x2b2   : > { %v3489_v0 = vpop.f32.mrf.mxu1 }
 0x2b3   : > { %v5776_v63 = vadd.f32 %v3489_v0, %v3461_v31 }
 0x2b5   : > { %v3504_v29 = vadd.f32 %v3503_v16, %v5776_v63  ;;  %v4959_v16 = vld [vmem:[%s5279_s13 + $0x8] sm:$0xff] }
 0x2ba   : > { %v3492_v40 = vpop.f32.mrf.mxu1 }
 0x2bb   : > { %v5779_v57 = vadd.f32 %v3492_v40, %v3464_v44  ;;  %v3517_v40 = vsub.f32 1.0, %v3516_v1 }
 0x2bd   : > { %v3505_v2 = vadd.f32 %v3504_v29, %v5779_v57  ;;  %v3518_v37 = vmul.f32 %v4953_v26, %v3517_v40 }
 0x2bf   : > { %v3519_v38 = vadd.f32 %v4953_v26, %v3518_v37 }
 0x2c1   : > { %v3521_v15 = vsel %vm3520_vm13, %v4953_v26, %v3519_v38  ;;  %v4962_v26 = vld [vmem:[%s5279_s13 + $0x20] sm:$0xff] }
 0x2c2   : > { %v3494_v13 = vpop.f32.mrf.mxu1 }
 0x2c3   : > { %v3495_v4 = vadd.f32 %v3494_v13, %v3466_v6 }
 0x2c5   : > { %v3506_v9 = vadd.f32 %v3505_v2, %v3495_v4  ;;  %v4965_v2 = vld [vmem:[%s5279_s13 + $0x38] sm:$0xff] }
 0x2ca   : > { %v3497_v45 = vpop.f32.mrf.mxu1 }
 0x2cb   : > { %v3498_v60 = vadd.f32 %v3497_v45, %v3469_v24 }
 0x2cd   : > { %v3507_v32 = vadd.f32 %v3506_v9, %v3498_v60 }
 0x2d2   : > { %v3499_v0 = vpop.f32.mrf.mxu1 }
 0x2d3   : > { %v3500_v51 = vadd.f32 %v3499_v0, %v3471_v20 }
 0x2d5   : > { %v3508_v35 = vadd.f32 %v3507_v32, %v3500_v51 }
 0x2d7   : > { %v3509_v5 = vrot.slane %v3508_v35, 4 }
 0x2d9   : > { %v3510_v34 = vadd.f32 %v3509_v5, %v3508_v35 }
 0x2db   : > { %v3511_v14 = vrot.slane %v3510_v34, 2 }
 0x2dd   : > { %v3512_v58 = vadd.f32 %v3511_v14, %v3510_v34 }
 0x2df   : > { %v3513_v30 = vrot.slane %v3512_v58, 1 }
 0x2e1   : > { %v3514_v50 = vadd.f32 %v3513_v30, %v3512_v58 }
 0x2e3   : > { %v3522_v7 = vmul.f32 %v3521_v15, %v3514_v50 }
 0x2e5   : > { %3556 = vmatmul.f32.vlgmr.msrb.gmra.mxu2 %v3522_v7 }
 0x368   : > { %v3557_v46 = vpop.f32.mrf.mxu2 }
 0x369   : > { %v3558_v12 = vadd.f32 %v3557_v46, %v3539_v59 }
 0x36b   : > { %v3560_v61 = vmax.f32 %v3558_v12, 0.0 }
 0x36d   : > { %4636 = vmatmul.msk.f32.vlgmr.msrb.gmra.mxu3 %vm3563_vm14, %v3560_v61 }
 0x3f0   : > { %v3584_v13 = vpop.f32.mrf.mxu3 }
 0x3f1   : > { %v3585_v21 = vadd.f32 %v3584_v13, %v3562_v56 }
 0x3f3   : > { %v4637_v48 = vmul.f32 -1.442695, %v3585_v21 }
 0x3f5   : > { %4954 = vpow2.f32 %v4637_v48 }
 0x3fb   : > { %v4955_v33 = vpop.eup %4954 }
 0x3fc   : > { %v3590_v41 = vadd.f32 1.0, %v4955_v33 }
 0x3fe   : > { %4956 = vrcp.f32 %v3590_v41  ;;  %v3602_v27 = vand.u32 2147483648, %v3590_v41  ;;  %v3600_v8 = vand.u32 2147483647, %v3590_v41  ;;  %vm3596_vm0 = vweird.f32 %v3590_v41 }
 0x400   : > { %v3603_v54 = vor.u32 1.1754944e-38, %v3602_v27  ;;  %vm3601_vm2 = vcmp.eq.f32.partialorder %v3600_v8, 8.507059e+37 }
 0x404   : > { %v4957_v42 = vpop.eup %4956 }
 0x405   : > { %v3592_v22 = vmul.f32 %v4957_v42, %v3590_v41  ;;  %vm3597_vm15 = vweird.f32 %v4957_v42 }
 0x406   : > { %vm3598_vm1 = vmor %vm3596_vm0, %vm3597_vm15 }
 0x407   : > { %v3593_v53 = vsub.f32 1.0, %v3592_v22 }
 0x409   : > { %v3594_v10 = vmul.f32 %v4957_v42, %v3593_v53 }
 0x40b   : > { %v3595_v43 = vadd.f32 %v4957_v42, %v3594_v10 }
 0x40d   : > { %v3599_v49 = vsel %vm3598_vm1, %v4957_v42, %v3595_v43 }
 0x40e   : > { %v3604_v62 = vsel %vm3601_vm2, %v3603_v54, %v3599_v49 }
 0x40f   : > { %v3606_v55 = vperm.slane %v3604_v62, 0 }
 0x411   : > { %v3607_v31 = vmul.f32 %v3606_v55, %v5767_v18  ;;  %v3608_v36 = vmul.f32 %v3606_v55, %v5757_v11  ;;  %v3609_v23 = vmul.f32 %v3606_v55, %v5769_v3  ;;  %v3610_v28 = vmul.f32 %v3606_v55, %v5776_v63  ;;  %v4961_v3 = vld [vmem:[%s5279_s13 + $0x18] sm:$0xff] }
 0x412   : > { %v3611_v44 = vmul.f32 %v3606_v55, %v5779_v57  ;;  %v3612_v19 = vmul.f32 %v3606_v55, %v3495_v4  ;;  %v3613_v47 = vmul.f32 %v3606_v55, %v3498_v60  ;;  %v3614_v11 = vmul.f32 %v3606_v55, %v3500_v51  ;;  %v4964_v4 = vld [vmem:[%s5279_s13 + $0x30] sm:$0xff]  ;;  %s5076_s13 = scalar_lea.hbm %s5843_s7, 256 }
 0x413   : > { %v3615_v45 = vadd.f32 %v4958_v39, %v3607_v31  ;;  %v3616_v6 = vadd.f32 %v4959_v16, %v3608_v36  ;;  %v3617_v18 = vadd.f32 %v4960_v52, %v3609_v23  ;;  %v3618_v63 = vadd.f32 %v4961_v3, %v3610_v28  ;;  %p5078_p7 = scmp.lt.s32.totalorder %s5076_s13, %s5072_s11 }
 0x414   : > { %v3619_v57 = vadd.f32 %v4962_v26, %v3611_v44  ;;  %v3620_v29 = vadd.f32 %v4963_v17, %v3612_v19  ;;  %v3621_v24 = vadd.f32 %v4964_v4, %v3613_v47  ;;  %v3622_v60 = vadd.f32 %v4965_v2, %v3614_v11 }
 0x415   : > { %3623 = vst [vmem:[%s331_s23] sm:$0xff] %v3615_v45  ;;  %p5079_p9 = por %p5078_p7, %p5077_p2 }
 0x416   : > { %3624 = vst [vmem:[%s331_s23 + $0x8] sm:$0xff] %v3616_v6 }
 0x417   : > { %3625 = vst [vmem:[%s331_s23 + $0x10] sm:$0xff] %v3617_v18  ;;  %p5080_p10 = pnand %p5079_p9, %p5075_p8 }
 0x418   : > { %3626 = vst [vmem:[%s331_s23 + $0x18] sm:$0xff] %v3618_v63 }
 0x419   : > { %3627 = vst [vmem:[%s331_s23 + $0x20] sm:$0xff] %v3619_v57 }
 0x41a   : > { %3628 = vst [vmem:[%s331_s23 + $0x28] sm:$0xff] %v3620_v29 }
 0x41b   : > { %3629 = vst [vmem:[%s331_s23 + $0x30] sm:$0xff] %v3621_v24 }
 0x41c   : > { %3630 = vst [vmem:[%s331_s23 + $0x38] sm:$0xff] %v3622_v60 }
 0x41d   : > { %5083 = shalt.err (!%p5080_p10)
}
 0x41e   : > { %s5136_s14 = smov 128   ;;  %s5137_s19 = smov 8  }
 0x41f   : > { %4887 = dma.vmem_to_hbm [thread:$0]  (%p5243_p0), %s3645_s15, 1024, %s3647_s16, %s3632_s29, %s5136_s14, %s5136_s14, %s5137_s19  }
 0x420 PF: > { %p4909_p11 = scmp.ge.s32.totalorder %s5126_s27, 2  ;;  %s3661_s28 = sand.u32 1, %s5114_s24  }
 0x421   : > { %s3662_s20 = scalar_lea.sflag [#allocation6], %s3661_s28 }
 0x422   : > { %p4901_p12 = pnand %p4909_p11, %p5213_p6 }
 0x424   : > { %p4902_p13 = pneg %p4901_p12 }
 0x426   : > { %5109 = dma.done.wait (%p4902_p13), %s3662_s20, 1024  }
 0x427   : > { %5111 = vsyncadd (%p4902_p13), %s3662_s20, 4294966272  ;;  %p21_p3 = scmp.ge.s32.totalorder %s5233_s22, 6   ;;  %s5861_s24 = smov %s5118_s25 }
 0x428   : > { %s5862_s25 = smov %s5122_s26  ;;  %s5863_s26 = smov %s5249_s10 }
 0x429   : > { %s5864_s27 = smov %s5233_s22  ;;  %23 = sbr.rel (!%p21_p3) target bundleno = 8 (0x8), region = 103 }
 0x42e   :  { %3668 = vsyncpa [#allocation5], 1 }
 0x42f   :  { %3670 = vsyncpa [#allocation5 + $0x1], 1 }
 0x430   :  { %3671 = vsyncpa [#allocation8], 1 }
 0x431   :  { %3672 = vsyncpa [#allocation6], 1 }
 0x432   :  { %3674 = vsyncpa [#allocation6 + $0x1], 1 }

</bundles_post_ra>
